<compile_context>
chip_gen: v5e
topology: v5e:2x2
jax: 0.10.0
libtpu: 0.0.40
codegen_flags: <defaults>
</compile_context>

<pallas_src>
import functools

import jax
import jax.numpy as jnp
from jax import lax
from jax.experimental import pallas as pl
from jax.experimental.pallas import tpu as pltpu

EPS = 1e-5
LANES = 128
# Matmul operand dtype. Keep float32 for accuracy headroom; on TPU v5e set this
# to jnp.bfloat16 (f32 MXU throughput is halved there) -- accumulation stays
# float32 either way via preferred_element_type.
MM_DTYPE = jnp.float32


def _round_up(x, m):
    return (x + m - 1) // m * m


def _residual_block_kernel(x_ref, w1_ref, g1_ref, be1_ref, a_ref,
                           w2_ref, g2_ref, be2_ref,
                           o_ref, xp_ref, col_ref,
                           *, N, H, W, Cp, K):
    """Fully fused ResidualBlock forward.

    x_ref  : (N, H, W, Cp)          channel-padded NHWC input (residual source)
    w*_ref : (K*K*Cp, Cp)           im2col-flattened HWIO conv weights
    g*/be* : (1, Cp)                BN gamma / beta (zero in padded channels)
    a_ref  : (1,)  SMEM             PReLU shared slope
    o_ref  : (N*H*W, Cp)            lane-dense 2-D output
    xp_ref : (N, H+K-1, W+K-1, Cp)  VMEM scratch: zero-padded stage input
    col_ref: (N*H*W, K*K*Cp)        VMEM scratch: im2col operand (reused)
    """
    M = N * H * W
    p = K // 2
    inv_m = 1.0 / M

    # 'same' padding done in VMEM: zero once, the border stays zero for both
    # conv stages (only the interior is ever overwritten).
    xp_ref[...] = jnp.zeros_like(xp_ref)
    xp_ref[:, p:p + H, p:p + W, :] = x_ref[...]

    def conv_bn(w_ref, g_ref, be_ref):
        # Build the im2col operand once: the K*K taps sit side-by-side along
        # lanes; each block is Cp (=128k) wide so every store is lane-aligned.
        for kh in range(K):
            for kw in range(K):
                j = (kh * K + kw) * Cp
                col_ref[:, j:j + Cp] = (
                    xp_ref[:, kh:kh + H, kw:kw + W, :]
                    .reshape(M, Cp).astype(col_ref.dtype))
        # Single MXU pass, f32 accumulation.
        acc = jnp.dot(col_ref[...], w_ref[...],
                      preferred_element_type=jnp.float32)
        # Conv bias omitted: BatchNorm's mean subtraction cancels it exactly.
        # Fused BN epilogue (training-mode batch stats, biased variance):
        mean = jnp.sum(acc, axis=0, keepdims=True) * inv_m
        ex2 = jnp.sum(acc * acc, axis=0, keepdims=True) * inv_m
        var = jnp.maximum(ex2 - mean * mean, 0.0)
        scale = g_ref[...] * lax.rsqrt(var + EPS)
        shift = be_ref[...] - mean * scale
        return acc * scale + shift

    # Stage 1: Conv3x3 -> BN -> PReLU.
    y = conv_bn(w1_ref, g1_ref, be1_ref)
    a = a_ref[0]
    y = jnp.where(y > 0, y, a * y)

    # Stage 2: intermediate stays in VMEM; zero border from stage 1 is reused.
    xp_ref[:, p:p + H, p:p + W, :] = y.reshape(N, H, W, Cp)
    y = conv_bn(w2_ref, g2_ref, be2_ref)

    # Residual add + lane-dense store.
    o_ref[...] = y + x_ref[...].reshape(M, Cp)


def _pack_conv_weights(w_hwio, Cp, dtype):
    """(K,K,C,C) HWIO -> (K*K*Cp, Cp), zero-padded, im2col-compatible row order."""
    K = w_hwio.shape[0]
    C = w_hwio.shape[2]
    wp = jnp.zeros((K, K, Cp, Cp), jnp.float32).at[:, :, :C, :C].set(
        w_hwio.astype(jnp.float32))
    return wp.reshape(K * K * Cp, Cp).astype(dtype)


def _pad_vec(v, Cp):
    """(1, C) -> (1, Cp) zero-padded (keeps padded channels inert through BN)."""
    C = v.shape[-1]
    return jnp.pad(v.astype(jnp.float32), ((0, 0), (0, Cp - C)))


def residual_block(x_nchw, params):
    """Forward pass matching the PyTorch ResidualBlock (NCHW in / NCHW out)."""
    N, C, H, W = x_nchw.shape
    K = params["w1"].shape[0]
    Cp = _round_up(C, LANES)
    M = N * H * W

    # NCHW -> NHWC + lane-dense channel padding (layout plumbing only; the
    # spatial 'same' padding happens inside the kernel).
    x = jnp.transpose(x_nchw, (0, 2, 3, 1)).astype(jnp.float32)
    x_p = jnp.pad(x, ((0, 0), (0, 0), (0, 0), (0, Cp - C)))

    w1 = _pack_conv_weights(params["w1"], Cp, MM_DTYPE)
    w2 = _pack_conv_weights(params["w2"], Cp, MM_DTYPE)
    g1, be1 = _pad_vec(params["g1"], Cp), _pad_vec(params["be1"], Cp)
    g2, be2 = _pad_vec(params["g2"], Cp), _pad_vec(params["be2"], Cp)
    alpha = params["alpha"].astype(jnp.float32)            # (1,) PReLU slope

    def vspec(shape):
        return pl.BlockSpec(shape, lambda: (0,) * len(shape))

    kernel = functools.partial(_residual_block_kernel,
                               N=N, H=H, W=W, Cp=Cp, K=K)
    out2d = pl.pallas_call(
        kernel,
        out_shape=jax.ShapeDtypeStruct((M, Cp), jnp.float32),
        in_specs=[
            vspec(x_p.shape),
            vspec(w1.shape), vspec(g1.shape), vspec(be1.shape),
            pl.BlockSpec(memory_space=pltpu.MemorySpace.SMEM),   # PReLU slope
            vspec(w2.shape), vspec(g2.shape), vspec(be2.shape),
        ],
        out_specs=vspec((M, Cp)),
        scratch_shapes=[
            pltpu.VMEM((N, H + K - 1, W + K - 1, Cp), jnp.float32),  # padded buf
            pltpu.VMEM((M, K * K * Cp), MM_DTYPE),                   # im2col
        ],
        compiler_params=pltpu.CompilerParams(
            vmem_limit_bytes=32 * 1024 * 1024),
    )(x_p, w1, g1, be1, alpha, w2, g2, be2)

    out = out2d.reshape(N, H, W, Cp)[..., :C]
    return jnp.transpose(out, (0, 3, 1, 2))                  # NHWC -> NCHW


# ----------------------------- pure-JAX reference -----------------------------
def _ref_forward(x_nchw, params):
    x = jnp.transpose(x_nchw, (0, 2, 3, 1)).astype(jnp.float32)

    def conv(z, w, b):
        y = lax.conv_general_dilated(z, w, (1, 1), "SAME",
                                     dimension_numbers=("NHWC", "HWIO", "NHWC"))
        return y + b.reshape(1, 1, 1, -1)

    def bn(y, g, be):
        m = jnp.mean(y, axis=(0, 1, 2), keepdims=True)
        v = jnp.mean((y - m) ** 2, axis=(0, 1, 2), keepdims=True)
        return (y - m) * lax.rsqrt(v + EPS) * g.reshape(1, 1, 1, -1) + be.reshape(1, 1, 1, -1)

    y = bn(conv(x, params["w1"], params["b1"]), params["g1"], params["be1"])
    a = params["alpha"][0]
    y = jnp.where(y > 0, y, a * y)
    y = bn(conv(y, params["w2"], params["b2"]), params["g2"], params["be2"])
    return jnp.transpose(x + y, (0, 3, 1, 2))


# ----------------------------------- main -------------------------------------
if __name__ == "__main__":
    N, C, H, W = 2, 8, 16, 16
    K = 3

    key = jax.random.PRNGKey(0)
    k = jax.random.split(key, 10)
    bound = 1.0 / (C * K * K) ** 0.5  # kaiming-uniform-ish, deterministic

    params = {
        "w1": jax.random.uniform(k[0], (K, K, C, C), jnp.float32, -bound, bound),
        "b1": jax.random.uniform(k[1], (1, C), jnp.float32, -bound, bound),
        "g1": jax.random.uniform(k[5], (1, C), jnp.float32, 0.5, 1.5),
        "be1": 0.1 * jax.random.normal(k[6], (1, C), jnp.float32),
        "alpha": jnp.full((1,), 0.25, jnp.float32),  # PReLU default init
        "w2": jax.random.uniform(k[2], (K, K, C, C), jnp.float32, -bound, bound),
        "b2": jax.random.uniform(k[3], (1, C), jnp.float32, -bound, bound),
        "g2": jax.random.uniform(k[7], (1, C), jnp.float32, 0.5, 1.5),
        "be2": 0.1 * jax.random.normal(k[8], (1, C), jnp.float32),
    }

    x = jax.random.normal(k[4], (N, C, H, W), jnp.float32)

    out = jax.block_until_ready(residual_block(x, params))
    ref = jax.block_until_ready(_ref_forward(x, params))

    assert out.shape == (N, C, H, W)
    err = jnp.max(jnp.abs(out - ref))
    assert jnp.allclose(out, ref, rtol=5e-3, atol=5e-3), f"max abs err = {err}"
    print("KERNEL_OK")
</pallas_src>

<mosaic_0001>
module attributes {stable_mosaic.version = 11 : i64} {
  func.func @_residual_block_kernel(%arg0: memref<2x16x16x128xf32, #tpu.memory_space<vmem>>, %arg1: memref<1152x128xf32, #tpu.memory_space<vmem>>, %arg2: memref<1x128xf32, #tpu.memory_space<vmem>>, %arg3: memref<1x128xf32, #tpu.memory_space<vmem>>, %arg4: memref<1xf32, #tpu.memory_space<smem>>, %arg5: memref<1152x128xf32, #tpu.memory_space<vmem>>, %arg6: memref<1x128xf32, #tpu.memory_space<vmem>>, %arg7: memref<1x128xf32, #tpu.memory_space<vmem>>, %arg8: memref<512x128xf32, #tpu.memory_space<vmem>>, %arg9: memref<2x18x18x128xf32, #tpu.memory_space<vmem>>, %arg10: memref<512x1152xf32, #tpu.memory_space<vmem>>) attributes {dimension_semantics = [], scalar_prefetch = 0 : i64, scratch_operands = 2 : i64, tpu.core_type = #tpu.core_type<tc>} {
    %cst = arith.constant 0.000000e+00 : f32
    %0 = vector.broadcast %cst : f32 to vector<2x18x18x128xf32>
    %c0 = arith.constant 0 : index
    %c0_0 = arith.constant 0 : index
    %c0_1 = arith.constant 0 : index
    %c0_2 = arith.constant 0 : index
    %1 = vector.load %arg9[%c0, %c0_0, %c0_1, %c0_2] : memref<2x18x18x128xf32, #tpu.memory_space<vmem>>, vector<2x18x18x128xf32>
    tpu.vector_store %arg9[%c0, %c0_0, %c0_1, %c0_2], %0 {strides = array<i32>} : memref<2x18x18x128xf32, #tpu.memory_space<vmem>>, vector<2x18x18x128xf32>,
    %c0_3 = arith.constant 0 : index
    %c0_4 = arith.constant 0 : index
    %c0_5 = arith.constant 0 : index
    %c0_6 = arith.constant 0 : index
    %2 = vector.load %arg0[%c0_3, %c0_4, %c0_5, %c0_6] : memref<2x16x16x128xf32, #tpu.memory_space<vmem>>, vector<2x16x16x128xf32>
    %c0_7 = arith.constant 0 : index
    %c1 = arith.constant 1 : index
    %c1_8 = arith.constant 1 : index
    %c0_9 = arith.constant 0 : index
    %3 = vector.load %arg9[%c0_7, %c1, %c1_8, %c0_9] : memref<2x18x18x128xf32, #tpu.memory_space<vmem>>, vector<2x16x16x128xf32>
    tpu.vector_store %arg9[%c0_7, %c1, %c1_8, %c0_9], %2 {strides = array<i32>} : memref<2x18x18x128xf32, #tpu.memory_space<vmem>>, vector<2x16x16x128xf32>,
    %c0_10 = arith.constant 0 : index
    %c0_11 = arith.constant 0 : index
    %c0_12 = arith.constant 0 : index
    %c0_13 = arith.constant 0 : index
    %4 = vector.load %arg9[%c0_10, %c0_11, %c0_12, %c0_13] : memref<2x18x18x128xf32, #tpu.memory_space<vmem>>, vector<2x16x16x128xf32>
    %5 = vector.shape_cast %4 : vector<2x16x16x128xf32> to vector<512x128xf32>
    %c0_14 = arith.constant 0 : index
    %c0_15 = arith.constant 0 : index
    %6 = vector.load %arg10[%c0_14, %c0_15] : memref<512x1152xf32, #tpu.memory_space<vmem>>, vector<512x128xf32>
    tpu.vector_store %arg10[%c0_14, %c0_15], %5 {strides = array<i32>} : memref<512x1152xf32, #tpu.memory_space<vmem>>, vector<512x128xf32>,
    %c0_16 = arith.constant 0 : index
    %c0_17 = arith.constant 0 : index
    %c1_18 = arith.constant 1 : index
    %c0_19 = arith.constant 0 : index
    %7 = vector.load %arg9[%c0_16, %c0_17, %c1_18, %c0_19] : memref<2x18x18x128xf32, #tpu.memory_space<vmem>>, vector<2x16x16x128xf32>
    %8 = vector.shape_cast %7 : vector<2x16x16x128xf32> to vector<512x128xf32>
    %c0_20 = arith.constant 0 : index
    %c128 = arith.constant 128 : index
    %9 = vector.load %arg10[%c0_20, %c128] : memref<512x1152xf32, #tpu.memory_space<vmem>>, vector<512x128xf32>
    tpu.vector_store %arg10[%c0_20, %c128], %8 {strides = array<i32>} : memref<512x1152xf32, #tpu.memory_space<vmem>>, vector<512x128xf32>,
    %c0_21 = arith.constant 0 : index
    %c0_22 = arith.constant 0 : index
    %c2 = arith.constant 2 : index
    %c0_23 = arith.constant 0 : index
    %10 = vector.load %arg9[%c0_21, %c0_22, %c2, %c0_23] : memref<2x18x18x128xf32, #tpu.memory_space<vmem>>, vector<2x16x16x128xf32>
    %11 = vector.shape_cast %10 : vector<2x16x16x128xf32> to vector<512x128xf32>
    %c0_24 = arith.constant 0 : index
    %c256 = arith.constant 256 : index
    %12 = vector.load %arg10[%c0_24, %c256] : memref<512x1152xf32, #tpu.memory_space<vmem>>, vector<512x128xf32>
    tpu.vector_store %arg10[%c0_24, %c256], %11 {strides = array<i32>} : memref<512x1152xf32, #tpu.memory_space<vmem>>, vector<512x128xf32>,
    %c0_25 = arith.constant 0 : index
    %c1_26 = arith.constant 1 : index
    %c0_27 = arith.constant 0 : index
    %c0_28 = arith.constant 0 : index
    %13 = vector.load %arg9[%c0_25, %c1_26, %c0_27, %c0_28] : memref<2x18x18x128xf32, #tpu.memory_space<vmem>>, vector<2x16x16x128xf32>
    %14 = vector.shape_cast %13 : vector<2x16x16x128xf32> to vector<512x128xf32>
    %c0_29 = arith.constant 0 : index
    %c384 = arith.constant 384 : index
    %15 = vector.load %arg10[%c0_29, %c384] : memref<512x1152xf32, #tpu.memory_space<vmem>>, vector<512x128xf32>
    tpu.vector_store %arg10[%c0_29, %c384], %14 {strides = array<i32>} : memref<512x1152xf32, #tpu.memory_space<vmem>>, vector<512x128xf32>,
    %c0_30 = arith.constant 0 : index
    %c1_31 = arith.constant 1 : index
    %c1_32 = arith.constant 1 : index
    %c0_33 = arith.constant 0 : index
    %16 = vector.load %arg9[%c0_30, %c1_31, %c1_32, %c0_33] : memref<2x18x18x128xf32, #tpu.memory_space<vmem>>, vector<2x16x16x128xf32>
    %17 = vector.shape_cast %16 : vector<2x16x16x128xf32> to vector<512x128xf32>
    %c0_34 = arith.constant 0 : index
    %c512 = arith.constant 512 : index
    %18 = vector.load %arg10[%c0_34, %c512] : memref<512x1152xf32, #tpu.memory_space<vmem>>, vector<512x128xf32>
    tpu.vector_store %arg10[%c0_34, %c512], %17 {strides = array<i32>} : memref<512x1152xf32, #tpu.memory_space<vmem>>, vector<512x128xf32>,
    %c0_35 = arith.constant 0 : index
    %c1_36 = arith.constant 1 : index
    %c2_37 = arith.constant 2 : index
    %c0_38 = arith.constant 0 : index
    %19 = vector.load %arg9[%c0_35, %c1_36, %c2_37, %c0_38] : memref<2x18x18x128xf32, #tpu.memory_space<vmem>>, vector<2x16x16x128xf32>
    %20 = vector.shape_cast %19 : vector<2x16x16x128xf32> to vector<512x128xf32>
    %c0_39 = arith.constant 0 : index
    %c640 = arith.constant 640 : index
    %21 = vector.load %arg10[%c0_39, %c640] : memref<512x1152xf32, #tpu.memory_space<vmem>>, vector<512x128xf32>
    tpu.vector_store %arg10[%c0_39, %c640], %20 {strides = array<i32>} : memref<512x1152xf32, #tpu.memory_space<vmem>>, vector<512x128xf32>,
    %c0_40 = arith.constant 0 : index
    %c2_41 = arith.constant 2 : index
    %c0_42 = arith.constant 0 : index
    %c0_43 = arith.constant 0 : index
    %22 = vector.load %arg9[%c0_40, %c2_41, %c0_42, %c0_43] : memref<2x18x18x128xf32, #tpu.memory_space<vmem>>, vector<2x16x16x128xf32>
    %23 = vector.shape_cast %22 : vector<2x16x16x128xf32> to vector<512x128xf32>
    %c0_44 = arith.constant 0 : index
    %c768 = arith.constant 768 : index
    %24 = vector.load %arg10[%c0_44, %c768] : memref<512x1152xf32, #tpu.memory_space<vmem>>, vector<512x128xf32>
    tpu.vector_store %arg10[%c0_44, %c768], %23 {strides = array<i32>} : memref<512x1152xf32, #tpu.memory_space<vmem>>, vector<512x128xf32>,
    %c0_45 = arith.constant 0 : index
    %c2_46 = arith.constant 2 : index
    %c1_47 = arith.constant 1 : index
    %c0_48 = arith.constant 0 : index
    %25 = vector.load %arg9[%c0_45, %c2_46, %c1_47, %c0_48] : memref<2x18x18x128xf32, #tpu.memory_space<vmem>>, vector<2x16x16x128xf32>
    %26 = vector.shape_cast %25 : vector<2x16x16x128xf32> to vector<512x128xf32>
    %c0_49 = arith.constant 0 : index
    %c896 = arith.constant 896 : index
    %27 = vector.load %arg10[%c0_49, %c896] : memref<512x1152xf32, #tpu.memory_space<vmem>>, vector<512x128xf32>
    tpu.vector_store %arg10[%c0_49, %c896], %26 {strides = array<i32>} : memref<512x1152xf32, #tpu.memory_space<vmem>>, vector<512x128xf32>,
    %c0_50 = arith.constant 0 : index
    %c2_51 = arith.constant 2 : index
    %c2_52 = arith.constant 2 : index
    %c0_53 = arith.constant 0 : index
    %28 = vector.load %arg9[%c0_50, %c2_51, %c2_52, %c0_53] : memref<2x18x18x128xf32, #tpu.memory_space<vmem>>, vector<2x16x16x128xf32>
    %29 = vector.shape_cast %28 : vector<2x16x16x128xf32> to vector<512x128xf32>
    %c0_54 = arith.constant 0 : index
    %c1024 = arith.constant 1024 : index
    %30 = vector.load %arg10[%c0_54, %c1024] : memref<512x1152xf32, #tpu.memory_space<vmem>>, vector<512x128xf32>
    tpu.vector_store %arg10[%c0_54, %c1024], %29 {strides = array<i32>} : memref<512x1152xf32, #tpu.memory_space<vmem>>, vector<512x128xf32>,
    %c0_55 = arith.constant 0 : index
    %c0_56 = arith.constant 0 : index
    %31 = vector.load %arg10[%c0_55, %c0_56] : memref<512x1152xf32, #tpu.memory_space<vmem>>, vector<512x1152xf32>
    %c0_57 = arith.constant 0 : index
    %c0_58 = arith.constant 0 : index
    %32 = vector.load %arg1[%c0_57, %c0_58] : memref<1152x128xf32, #tpu.memory_space<vmem>>, vector<1152x128xf32>
    %cst_59 = arith.constant dense<0.000000e+00> : vector<512x128xf32>
    %33 = tpu.matmul %31, %32, %cst_59 {dimension_numbers = #tpu.dot_dimension_numbers<[1], [0], [0], [1], [0, 0, 1, 1], [], []>} : vector<512x1152xf32>, vector<1152x128xf32>, vector<512x128xf32> -> vector<512x128xf32>
    %cst_60 = arith.constant dense<0.000000e+00> : vector<128xf32>
    %34 = vector.multi_reduction <add>, %33, %cst_60 [0] : vector<512x128xf32> to vector<128xf32>
    %35 = vector.shape_cast %34 : vector<128xf32> to vector<1x128xf32>
    %cst_61 = arith.constant 0.001953125 : f32
    %36 = vector.broadcast %cst_61 : f32 to vector<1x128xf32>
    %37 = arith.mulf %35, %36 : vector<1x128xf32>
    %38 = arith.mulf %33, %33 : vector<512x128xf32>
    %cst_62 = arith.constant dense<0.000000e+00> : vector<128xf32>
    %39 = vector.multi_reduction <add>, %38, %cst_62 [0] : vector<512x128xf32> to vector<128xf32>
    %40 = vector.shape_cast %39 : vector<128xf32> to vector<1x128xf32>
    %cst_63 = arith.constant 0.001953125 : f32
    %41 = vector.broadcast %cst_63 : f32 to vector<1x128xf32>
    %42 = arith.mulf %40, %41 : vector<1x128xf32>
    %43 = arith.mulf %37, %37 : vector<1x128xf32>
    %44 = arith.subf %42, %43 : vector<1x128xf32>
    %cst_64 = arith.constant 0.000000e+00 : f32
    %45 = vector.broadcast %cst_64 : f32 to vector<1x128xf32>
    %46 = arith.maximumf %44, %45 : vector<1x128xf32>
    %c0_65 = arith.constant 0 : index
    %c0_66 = arith.constant 0 : index
    %47 = vector.load %arg2[%c0_65, %c0_66] : memref<1x128xf32, #tpu.memory_space<vmem>>, vector<1x128xf32>
    %cst_67 = arith.constant 9.99999974E-6 : f32
    %48 = vector.broadcast %cst_67 : f32 to vector<1x128xf32>
    %49 = arith.addf %46, %48 : vector<1x128xf32>
    %50 = math.rsqrt %49 : vector<1x128xf32>
    %51 = arith.mulf %47, %50 : vector<1x128xf32>
    %c0_68 = arith.constant 0 : index
    %c0_69 = arith.constant 0 : index
    %52 = vector.load %arg3[%c0_68, %c0_69] : memref<1x128xf32, #tpu.memory_space<vmem>>, vector<1x128xf32>
    %53 = arith.mulf %37, %51 : vector<1x128xf32>
    %54 = arith.subf %52, %53 : vector<1x128xf32>
    %55 = vector.broadcast %51 : vector<1x128xf32> to vector<512x128xf32>
    %56 = arith.mulf %33, %55 : vector<512x128xf32>
    %57 = vector.broadcast %54 : vector<1x128xf32> to vector<512x128xf32>
    %58 = arith.addf %56, %57 : vector<512x128xf32>
    %c0_70 = arith.constant 0 : index
    %59 = memref.load %arg4[%c0_70] : memref<1xf32, #tpu.memory_space<smem>>
    %cst_71 = arith.constant 0.000000e+00 : f32
    %60 = vector.broadcast %cst_71 : f32 to vector<512x128xf32>
    %61 = arith.cmpf ogt, %58, %60 : vector<512x128xf32>
    %62 = vector.broadcast %59 : f32 to vector<512x128xf32>
    %63 = arith.mulf %62, %58 : vector<512x128xf32>
    %64 = arith.select %61, %58, %63 : vector<512x128xi1>, vector<512x128xf32>
    %65 = vector.shape_cast %64 : vector<512x128xf32> to vector<2x16x16x128xf32>
    %c0_72 = arith.constant 0 : index
    %c1_73 = arith.constant 1 : index
    %c1_74 = arith.constant 1 : index
    %c0_75 = arith.constant 0 : index
    %66 = vector.load %arg9[%c0_72, %c1_73, %c1_74, %c0_75] : memref<2x18x18x128xf32, #tpu.memory_space<vmem>>, vector<2x16x16x128xf32>
    tpu.vector_store %arg9[%c0_72, %c1_73, %c1_74, %c0_75], %65 {strides = array<i32>} : memref<2x18x18x128xf32, #tpu.memory_space<vmem>>, vector<2x16x16x128xf32>,
    %c0_76 = arith.constant 0 : index
    %c0_77 = arith.constant 0 : index
    %c0_78 = arith.constant 0 : index
    %c0_79 = arith.constant 0 : index
    %67 = vector.load %arg9[%c0_76, %c0_77, %c0_78, %c0_79] : memref<2x18x18x128xf32, #tpu.memory_space<vmem>>, vector<2x16x16x128xf32>
    %68 = vector.shape_cast %67 : vector<2x16x16x128xf32> to vector<512x128xf32>
    %c0_80 = arith.constant 0 : index
    %c0_81 = arith.constant 0 : index
    %69 = vector.load %arg10[%c0_80, %c0_81] : memref<512x1152xf32, #tpu.memory_space<vmem>>, vector<512x128xf32>
    tpu.vector_store %arg10[%c0_80, %c0_81], %68 {strides = array<i32>} : memref<512x1152xf32, #tpu.memory_space<vmem>>, vector<512x128xf32>,
    %c0_82 = arith.constant 0 : index
    %c0_83 = arith.constant 0 : index
    %c1_84 = arith.constant 1 : index
    %c0_85 = arith.constant 0 : index
    %70 = vector.load %arg9[%c0_82, %c0_83, %c1_84, %c0_85] : memref<2x18x18x128xf32, #tpu.memory_space<vmem>>, vector<2x16x16x128xf32>
    %71 = vector.shape_cast %70 : vector<2x16x16x128xf32> to vector<512x128xf32>
    %c0_86 = arith.constant 0 : index
    %c128_87 = arith.constant 128 : index
    %72 = vector.load %arg10[%c0_86, %c128_87] : memref<512x1152xf32, #tpu.memory_space<vmem>>, vector<512x128xf32>
    tpu.vector_store %arg10[%c0_86, %c128_87], %71 {strides = array<i32>} : memref<512x1152xf32, #tpu.memory_space<vmem>>, vector<512x128xf32>,
    %c0_88 = arith.constant 0 : index
    %c0_89 = arith.constant 0 : index
    %c2_90 = arith.constant 2 : index
    %c0_91 = arith.constant 0 : index
    %73 = vector.load %arg9[%c0_88, %c0_89, %c2_90, %c0_91] : memref<2x18x18x128xf32, #tpu.memory_space<vmem>>, vector<2x16x16x128xf32>
    %74 = vector.shape_cast %73 : vector<2x16x16x128xf32> to vector<512x128xf32>
    %c0_92 = arith.constant 0 : index
    %c256_93 = arith.constant 256 : index
    %75 = vector.load %arg10[%c0_92, %c256_93] : memref<512x1152xf32, #tpu.memory_space<vmem>>, vector<512x128xf32>
    tpu.vector_store %arg10[%c0_92, %c256_93], %74 {strides = array<i32>} : memref<512x1152xf32, #tpu.memory_space<vmem>>, vector<512x128xf32>,
    %c0_94 = arith.constant 0 : index
    %c1_95 = arith.constant 1 : index
    %c0_96 = arith.constant 0 : index
    %c0_97 = arith.constant 0 : index
    %76 = vector.load %arg9[%c0_94, %c1_95, %c0_96, %c0_97] : memref<2x18x18x128xf32, #tpu.memory_space<vmem>>, vector<2x16x16x128xf32>
    %77 = vector.shape_cast %76 : vector<2x16x16x128xf32> to vector<512x128xf32>
    %c0_98 = arith.constant 0 : index
    %c384_99 = arith.constant 384 : index
    %78 = vector.load %arg10[%c0_98, %c384_99] : memref<512x1152xf32, #tpu.memory_space<vmem>>, vector<512x128xf32>
    tpu.vector_store %arg10[%c0_98, %c384_99], %77 {strides = array<i32>} : memref<512x1152xf32, #tpu.memory_space<vmem>>, vector<512x128xf32>,
    %c0_100 = arith.constant 0 : index
    %c1_101 = arith.constant 1 : index
    %c1_102 = arith.constant 1 : index
    %c0_103 = arith.constant 0 : index
    %79 = vector.load %arg9[%c0_100, %c1_101, %c1_102, %c0_103] : memref<2x18x18x128xf32, #tpu.memory_space<vmem>>, vector<2x16x16x128xf32>
    %80 = vector.shape_cast %79 : vector<2x16x16x128xf32> to vector<512x128xf32>
    %c0_104 = arith.constant 0 : index
    %c512_105 = arith.constant 512 : index
    %81 = vector.load %arg10[%c0_104, %c512_105] : memref<512x1152xf32, #tpu.memory_space<vmem>>, vector<512x128xf32>
    tpu.vector_store %arg10[%c0_104, %c512_105], %80 {strides = array<i32>} : memref<512x1152xf32, #tpu.memory_space<vmem>>, vector<512x128xf32>,
    %c0_106 = arith.constant 0 : index
    %c1_107 = arith.constant 1 : index
    %c2_108 = arith.constant 2 : index
    %c0_109 = arith.constant 0 : index
    %82 = vector.load %arg9[%c0_106, %c1_107, %c2_108, %c0_109] : memref<2x18x18x128xf32, #tpu.memory_space<vmem>>, vector<2x16x16x128xf32>
    %83 = vector.shape_cast %82 : vector<2x16x16x128xf32> to vector<512x128xf32>
    %c0_110 = arith.constant 0 : index
    %c640_111 = arith.constant 640 : index
    %84 = vector.load %arg10[%c0_110, %c640_111] : memref<512x1152xf32, #tpu.memory_space<vmem>>, vector<512x128xf32>
    tpu.vector_store %arg10[%c0_110, %c640_111], %83 {strides = array<i32>} : memref<512x1152xf32, #tpu.memory_space<vmem>>, vector<512x128xf32>,
    %c0_112 = arith.constant 0 : index
    %c2_113 = arith.constant 2 : index
    %c0_114 = arith.constant 0 : index
    %c0_115 = arith.constant 0 : index
    %85 = vector.load %arg9[%c0_112, %c2_113, %c0_114, %c0_115] : memref<2x18x18x128xf32, #tpu.memory_space<vmem>>, vector<2x16x16x128xf32>
    %86 = vector.shape_cast %85 : vector<2x16x16x128xf32> to vector<512x128xf32>
    %c0_116 = arith.constant 0 : index
    %c768_117 = arith.constant 768 : index
    %87 = vector.load %arg10[%c0_116, %c768_117] : memref<512x1152xf32, #tpu.memory_space<vmem>>, vector<512x128xf32>
    tpu.vector_store %arg10[%c0_116, %c768_117], %86 {strides = array<i32>} : memref<512x1152xf32, #tpu.memory_space<vmem>>, vector<512x128xf32>,
    %c0_118 = arith.constant 0 : index
    %c2_119 = arith.constant 2 : index
    %c1_120 = arith.constant 1 : index
    %c0_121 = arith.constant 0 : index
    %88 = vector.load %arg9[%c0_118, %c2_119, %c1_120, %c0_121] : memref<2x18x18x128xf32, #tpu.memory_space<vmem>>, vector<2x16x16x128xf32>
    %89 = vector.shape_cast %88 : vector<2x16x16x128xf32> to vector<512x128xf32>
    %c0_122 = arith.constant 0 : index
    %c896_123 = arith.constant 896 : index
    %90 = vector.load %arg10[%c0_122, %c896_123] : memref<512x1152xf32, #tpu.memory_space<vmem>>, vector<512x128xf32>
    tpu.vector_store %arg10[%c0_122, %c896_123], %89 {strides = array<i32>} : memref<512x1152xf32, #tpu.memory_space<vmem>>, vector<512x128xf32>,
    %c0_124 = arith.constant 0 : index
    %c2_125 = arith.constant 2 : index
    %c2_126 = arith.constant 2 : index
    %c0_127 = arith.constant 0 : index
    %91 = vector.load %arg9[%c0_124, %c2_125, %c2_126, %c0_127] : memref<2x18x18x128xf32, #tpu.memory_space<vmem>>, vector<2x16x16x128xf32>
    %92 = vector.shape_cast %91 : vector<2x16x16x128xf32> to vector<512x128xf32>
    %c0_128 = arith.constant 0 : index
    %c1024_129 = arith.constant 1024 : index
    %93 = vector.load %arg10[%c0_128, %c1024_129] : memref<512x1152xf32, #tpu.memory_space<vmem>>, vector<512x128xf32>
    tpu.vector_store %arg10[%c0_128, %c1024_129], %92 {strides = array<i32>} : memref<512x1152xf32, #tpu.memory_space<vmem>>, vector<512x128xf32>,
    %c0_130 = arith.constant 0 : index
    %c0_131 = arith.constant 0 : index
    %94 = vector.load %arg10[%c0_130, %c0_131] : memref<512x1152xf32, #tpu.memory_space<vmem>>, vector<512x1152xf32>
    %c0_132 = arith.constant 0 : index
    %c0_133 = arith.constant 0 : index
    %95 = vector.load %arg5[%c0_132, %c0_133] : memref<1152x128xf32, #tpu.memory_space<vmem>>, vector<1152x128xf32>
    %cst_134 = arith.constant dense<0.000000e+00> : vector<512x128xf32>
    %96 = tpu.matmul %94, %95, %cst_134 {dimension_numbers = #tpu.dot_dimension_numbers<[1], [0], [0], [1], [0, 0, 1, 1], [], []>} : vector<512x1152xf32>, vector<1152x128xf32>, vector<512x128xf32> -> vector<512x128xf32>
    %cst_135 = arith.constant dense<0.000000e+00> : vector<128xf32>
    %97 = vector.multi_reduction <add>, %96, %cst_135 [0] : vector<512x128xf32> to vector<128xf32>
    %98 = vector.shape_cast %97 : vector<128xf32> to vector<1x128xf32>
    %cst_136 = arith.constant 0.001953125 : f32
    %99 = vector.broadcast %cst_136 : f32 to vector<1x128xf32>
    %100 = arith.mulf %98, %99 : vector<1x128xf32>
    %101 = arith.mulf %96, %96 : vector<512x128xf32>
    %cst_137 = arith.constant dense<0.000000e+00> : vector<128xf32>
    %102 = vector.multi_reduction <add>, %101, %cst_137 [0] : vector<512x128xf32> to vector<128xf32>
    %103 = vector.shape_cast %102 : vector<128xf32> to vector<1x128xf32>
    %cst_138 = arith.constant 0.001953125 : f32
    %104 = vector.broadcast %cst_138 : f32 to vector<1x128xf32>
    %105 = arith.mulf %103, %104 : vector<1x128xf32>
    %106 = arith.mulf %100, %100 : vector<1x128xf32>
    %107 = arith.subf %105, %106 : vector<1x128xf32>
    %cst_139 = arith.constant 0.000000e+00 : f32
    %108 = vector.broadcast %cst_139 : f32 to vector<1x128xf32>
    %109 = arith.maximumf %107, %108 : vector<1x128xf32>
    %c0_140 = arith.constant 0 : index
    %c0_141 = arith.constant 0 : index
    %110 = vector.load %arg6[%c0_140, %c0_141] : memref<1x128xf32, #tpu.memory_space<vmem>>, vector<1x128xf32>
    %cst_142 = arith.constant 9.99999974E-6 : f32
    %111 = vector.broadcast %cst_142 : f32 to vector<1x128xf32>
    %112 = arith.addf %109, %111 : vector<1x128xf32>
    %113 = math.rsqrt %112 : vector<1x128xf32>
    %114 = arith.mulf %110, %113 : vector<1x128xf32>
    %c0_143 = arith.constant 0 : index
    %c0_144 = arith.constant 0 : index
    %115 = vector.load %arg7[%c0_143, %c0_144] : memref<1x128xf32, #tpu.memory_space<vmem>>, vector<1x128xf32>
    %116 = arith.mulf %100, %114 : vector<1x128xf32>
    %117 = arith.subf %115, %116 : vector<1x128xf32>
    %118 = vector.broadcast %114 : vector<1x128xf32> to vector<512x128xf32>
    %119 = arith.mulf %96, %118 : vector<512x128xf32>
    %120 = vector.broadcast %117 : vector<1x128xf32> to vector<512x128xf32>
    %121 = arith.addf %119, %120 : vector<512x128xf32>
    %c0_145 = arith.constant 0 : index
    %c0_146 = arith.constant 0 : index
    %c0_147 = arith.constant 0 : index
    %c0_148 = arith.constant 0 : index
    %122 = vector.load %arg0[%c0_145, %c0_146, %c0_147, %c0_148] : memref<2x16x16x128xf32, #tpu.memory_space<vmem>>, vector<2x16x16x128xf32>
    %123 = vector.shape_cast %122 : vector<2x16x16x128xf32> to vector<512x128xf32>
    %124 = arith.addf %121, %123 : vector<512x128xf32>
    %c0_149 = arith.constant 0 : index
    %c0_150 = arith.constant 0 : index
    %125 = vector.load %arg8[%c0_149, %c0_150] : memref<512x128xf32, #tpu.memory_space<vmem>>, vector<512x128xf32>
    tpu.vector_store %arg8[%c0_149, %c0_150], %124 {strides = array<i32>} : memref<512x128xf32, #tpu.memory_space<vmem>>, vector<512x128xf32>,
    return
  }
}

</mosaic_0001>

<bundles_post_ra>
// kernel: tpu_custom_call.1
= control target key start
LH: loop header
LB: loop body
LE: loop exit
PB: predicated region body
PF: predicated region fallthrough
CT: control target
= control target key end

     0   :  { %14 = vsyncpa [#allocation6], 0  ;;  %s13488_s0 = inlined_call_operand.hbm [shape: f32[2,16,16,128], index: 0, kind: input, shape index: {}]   ;;  %s13489_s1 = inlined_call_operand.hbm [shape: f32[1152,128], index: 1, kind: input, shape index: {}]   ;;  %s13490_s2 = inlined_call_operand.vmem [shape: f32[1,128], index: 2, kind: input, shape index: {}]   ;;  %s13491_s3 = inlined_call_operand.vmem [shape: f32[1,128], index: 3, kind: input, shape index: {}]   ;;  %s13492_s4 = inlined_call_operand.<no memory space> [shape: f32[1], index: 4, kind: input, shape index: {}]   ;;  %s13493_s5 = inlined_call_operand.hbm [shape: f32[1152,128], index: 5, kind: input, shape index: {}]   ;;  %s13494_s6 = inlined_call_operand.vmem [shape: f32[1,128], index: 6, kind: input, shape index: {}]   ;;  %s13495_s7 = inlined_call_operand.vmem [shape: f32[1,128], index: 7, kind: input, shape index: {}]   ;;  %s13496_s8 = inlined_call_operand.hbm [shape: f32[512,128], index: 8, kind: output, shape index: {}]  }
   0x1   :  { %15 = vsyncpa [#allocation9], 0 }
   0x2   :  { %16 = vsyncpa [#allocation7], 0  ;;  %s34_s29 = sshll.u32 %s13489_s1, 4  ;;  %s9156_s30 = smov [#allocation8]   ;;  %s35_s29 = int_to_ptr.hbm [resolvable:$true] %s34_s29 }
   0x3   :  { %s36_s9 = sshll.u32 %s9156_s30, 4  ;;  %s21_s12 = sshll.u32 %s13488_s0, 4  ;;  %s37_s9 = int_to_ptr.vmem [resolvable:$true] %s36_s9  ;;  %s22_s12 = int_to_ptr.hbm [resolvable:$true] %s21_s12 }
   0x4   :  { %s9157_s13 = smov 128   ;;  %s9158_s14 = smov 8  }
   0x5   :  { %42 = dma.hbm_to_vmem [thread:$0]  %s35_s29, 18432, %s37_s9, [#allocation9], %s9157_s13, %s9157_s13, %s9158_s14  }
   0x6   :  { %s9159_s15 = smov [#allocation5]   ;;  %s53_s1 = sshll.u32 %s13493_s5, 4  ;;  %s54_s1 = int_to_ptr.hbm [resolvable:$true] %s53_s1 }
   0x7   :  { %s23_s16 = sshll.u32 %s9159_s15, 4  ;;  %s9160_s0 = smov [#allocation10]   ;;  %s24_s16 = int_to_ptr.vmem [resolvable:$true] %s23_s16 }
   0x8   :  { %29 = dma.hbm_to_vmem [thread:$0]  %s22_s12, 8192, %s24_s16, [#allocation6], %s9157_s13, %s9157_s13, %s9158_s14  }
   0x9   :  { %s55_s19 = sshll.u32 %s9160_s0, 4  ;;  %s56_s19 = int_to_ptr.vmem [resolvable:$true] %s55_s19 }
   0xa   :  { %61 = dma.hbm_to_vmem [thread:$0]  %s54_s1, 18432, %s56_s19, [#allocation9], %s9157_s13, %s9157_s13, %s9158_s14  }
   0xb   :  { %9150 = dma.done.wait [#allocation6], 8192  }
   0xc   :  { %9151 = vsyncadd [#allocation6], 4294959104 }
   0xd   :  { %9152 = dma.done.wait [#allocation9], 36864  }
   0xe   :  { %9153 = vsyncadd [#allocation9], 4294930432  ;;  %v9161_v0 = vmov 0.0   ;;  %v2059_v1 = vld [vmem:[#allocation8 + $0x78] sm:$0xff]  ;;  %v2058_v3 = vld [vmem:[#allocation8 + $0x70] sm:$0xff]  ;;  %s8992_s28 = sshll.u32 %s13496_s8, 4  ;;  %s8993_s28 = int_to_ptr.hbm [resolvable:$true] %s8992_s28 }
   0xf   :  { %132 = vst [vmem:[#allocation2 + $0x1b0] sm:$0xff] %v9161_v0  ;;  %v2075_v2 = vld [vmem:[#allocation8 + $0xf8] sm:$0xff]  ;;  %9006 = vmatpush.msra.mxu2 %v2059_v1  ;;  %v2074_v4 = vld [vmem:[#allocation8 + $0xf0] sm:$0xff]  ;;  %v2057_v5 = vld [vmem:[#allocation8 + $0x68] sm:$0xff]  ;;  %2188 = vmatpush.msra.mxu0 %v2059_v1 }
  0x10   :  { %78 = vst [vmem:[#allocation2] sm:$0xff] %v9161_v0  ;;  %9022 = vmatpush.msra.mxu3 %v2075_v2  ;;  %v2073_v6 = vld [vmem:[#allocation8 + $0xe8] sm:$0xff]  ;;  %2397 = vmatpush.msra.mxu1 %v2075_v2  ;;  %v2056_v7 = vld [vmem:[#allocation8 + $0x60] sm:$0xff]  ;;  %v2055_v9 = vld [vmem:[#allocation8 + $0x58] sm:$0xff] }
  0x11   :  { %79 = vst [vmem:[#allocation2 + $0x8] sm:$0xff] %v9161_v0  ;;  %9007 = vmatpush.msra.mxu2 %v2058_v3  ;;  %v2072_v8 = vld [vmem:[#allocation8 + $0xe0] sm:$0xff]  ;;  %2189 = vmatpush.msra.mxu0 %v2058_v3  ;;  %v2071_v10 = vld [vmem:[#allocation8 + $0xd8] sm:$0xff]  ;;  %v2054_v11 = vld [vmem:[#allocation8 + $0x50] sm:$0xff] }
  0x12   :  { %80 = vst [vmem:[#allocation2 + $0x10] sm:$0x3] %v9161_v0  ;;  %9023 = vmatpush.msra.mxu3 %v2074_v4  ;;  %2398 = vmatpush.msra.mxu1 %v2074_v4  ;;  %v2070_v12 = vld [vmem:[#allocation8 + $0xd0] sm:$0xff]  ;;  %v2053_v13 = vld [vmem:[#allocation8 + $0x48] sm:$0xff]  ;;  %v2052_v15 = vld [vmem:[#allocation8 + $0x40] sm:$0xff] }
  0x13   :  { %81 = vst [vmem:[#allocation2 + $0x18] sm:$0xff] %v9161_v0  ;;  %9008 = vmatpush.msra.mxu2 %v2057_v5  ;;  %2190 = vmatpush.msra.mxu0 %v2057_v5  ;;  %v2069_v14 = vld [vmem:[#allocation8 + $0xc8] sm:$0xff]  ;;  %v2068_v16 = vld [vmem:[#allocation8 + $0xc0] sm:$0xff]  ;;  %v2051_v17 = vld [vmem:[#allocation8 + $0x38] sm:$0xff] }
  0x14   :  { %82 = vst [vmem:[#allocation2 + $0x20] sm:$0xff] %v9161_v0  ;;  %9024 = vmatpush.msra.mxu3 %v2073_v6  ;;  %2399 = vmatpush.msra.mxu1 %v2073_v6  ;;  %v2067_v18 = vld [vmem:[#allocation8 + $0xb8] sm:$0xff]  ;;  %v2050_v19 = vld [vmem:[#allocation8 + $0x30] sm:$0xff]  ;;  %v2049_v21 = vld [vmem:[#allocation8 + $0x28] sm:$0xff] }
  0x15   :  { %83 = vst [vmem:[#allocation2 + $0x28] sm:$0x3] %v9161_v0  ;;  %9009 = vmatpush.msra.mxu2 %v2056_v7  ;;  %2191 = vmatpush.msra.mxu0 %v2056_v7  ;;  %v2066_v20 = vld [vmem:[#allocation8 + $0xb0] sm:$0xff]  ;;  %v2065_v22 = vld [vmem:[#allocation8 + $0xa8] sm:$0xff]  ;;  %v2048_v23 = vld [vmem:[#allocation8 + $0x20] sm:$0xff] }
  0x16   :  { %84 = vst [vmem:[#allocation2 + $0x30] sm:$0xff] %v9161_v0  ;;  %9025 = vmatpush.msra.mxu3 %v2072_v8  ;;  %2400 = vmatpush.msra.mxu1 %v2072_v8  ;;  %v2064_v24 = vld [vmem:[#allocation8 + $0xa0] sm:$0xff]  ;;  %v2047_v25 = vld [vmem:[#allocation8 + $0x18] sm:$0xff]  ;;  %v2046_v27 = vld [vmem:[#allocation8 + $0x10] sm:$0xff] }
  0x17   :  { %85 = vst [vmem:[#allocation2 + $0x38] sm:$0xff] %v9161_v0  ;;  %9010 = vmatpush.msra.mxu2 %v2055_v9  ;;  %2192 = vmatpush.msra.mxu0 %v2055_v9  ;;  %v2063_v26 = vld [vmem:[#allocation8 + $0x98] sm:$0xff]  ;;  %v2062_v28 = vld [vmem:[#allocation8 + $0x90] sm:$0xff]  ;;  %v2045_v29 = vld [vmem:[#allocation8 + $0x8] sm:$0xff] }
  0x18   :  { %86 = vst [vmem:[#allocation2 + $0x40] sm:$0x3] %v9161_v0  ;;  %9026 = vmatpush.msra.mxu3 %v2071_v10  ;;  %2401 = vmatpush.msra.mxu1 %v2071_v10  ;;  %v2061_v30 = vld [vmem:[#allocation8 + $0x88] sm:$0xff]  ;;  %v2044_v31 = vld [vmem:[#allocation8] sm:$0xff]  ;;  %v2091_v36 = vld [vmem:[#allocation8 + $0x178] sm:$0xff] }
  0x19   :  { %87 = vst [vmem:[#allocation2 + $0x48] sm:$0xff] %v9161_v0  ;;  %9011 = vmatpush.msra.mxu2 %v2054_v11  ;;  %2193 = vmatpush.msra.mxu0 %v2054_v11  ;;  %v2060_v32 = vld [vmem:[#allocation8 + $0x80] sm:$0xff]  ;;  %v2107_v37 = vld [vmem:[#allocation8 + $0x1f8] sm:$0xff]  ;;  %v2090_v40 = vld [vmem:[#allocation8 + $0x170] sm:$0xff] }
  0x1a   :  { %88 = vst [vmem:[#allocation2 + $0x50] sm:$0xff] %v9161_v0  ;;  %9027 = vmatpush.msra.mxu3 %v2070_v12  ;;  %2402 = vmatpush.msra.mxu1 %v2070_v12  ;;  %v443_v33 = vld [vmem:[#allocation2 + $0x1] sm:$0xff]  ;;  %v2123_v38 = vld [vmem:[#allocation8 + $0x278] sm:$0xff]  ;;  %v444_v41 = vld [vmem:[#allocation2 + $0x9] sm:$0xff] }
  0x1b   :  { %89 = vst [vmem:[#allocation2 + $0x58] sm:$0x3] %v9161_v0  ;;  %9012 = vmatpush.msra.mxu2 %v2053_v13  ;;  %2194 = vmatpush.msra.mxu0 %v2053_v13  ;;  %v218_v39 = vld [vmem:[#allocation5 + $0x100] sm:$0xff]  ;;  %v2106_v42 = vld [vmem:[#allocation8 + $0x1f0] sm:$0xff]  ;;  %v219_v43 = vld [vmem:[#allocation5 + $0x108] sm:$0xff] }
  0x1c   :  { %90 = vst [vmem:[#allocation2 + $0x60] sm:$0xff] %v9161_v0  ;;  %9028 = vmatpush.msra.mxu3 %v2069_v14  ;;  %2403 = vmatpush.msra.mxu1 %v2069_v14  ;;  %v186_v44 = vld [vmem:[#allocation5] sm:$0xff]  ;;  %v2122_v45 = vld [vmem:[#allocation8 + $0x270] sm:$0xff]  ;;  %v2089_v47 = vld [vmem:[#allocation8 + $0x168] sm:$0xff] }
  0x1d   :  { %91 = vst [vmem:[#allocation2 + $0x68] sm:$0xff] %v9161_v0  ;;  %9013 = vmatpush.msra.mxu2 %v2052_v15  ;;  %2195 = vmatpush.msra.mxu0 %v2052_v15  ;;  %v220_v46 = vld [vmem:[#allocation5 + $0x110] sm:$0xff]  ;;  %v187_v48 = vld [vmem:[#allocation5 + $0x8] sm:$0xff]  ;;  %v221_v50 = vld [vmem:[#allocation5 + $0x118] sm:$0xff] }
  0x1e   :  { %92 = vst [vmem:[#allocation2 + $0x70] sm:$0x3] %v9161_v0  ;;  %9029 = vmatpush.msra.mxu3 %v2068_v16  ;;  %2404 = vmatpush.msra.mxu1 %v2068_v16  ;;  %v2105_v49 = vld [vmem:[#allocation8 + $0x1e8] sm:$0xff]  ;;  %v188_v51 = vld [vmem:[#allocation5 + $0x10] sm:$0xff]  ;;  %v222_v53 = vld [vmem:[#allocation5 + $0x120] sm:$0xff] }
  0x1f   :  { %93 = vst [vmem:[#allocation2 + $0x78] sm:$0xff] %v9161_v0  ;;  %9014 = vmatpush.msra.mxu2 %v2051_v17  ;;  %2196 = vmatpush.msra.mxu0 %v2051_v17  ;;  %v2121_v52 = vld [vmem:[#allocation8 + $0x268] sm:$0xff]  ;;  %v189_v54 = vld [vmem:[#allocation5 + $0x18] sm:$0xff]  ;;  %v2088_v57 = vld [vmem:[#allocation8 + $0x160] sm:$0xff] }
  0x20   :  { %94 = vst [vmem:[#allocation2 + $0x80] sm:$0xff] %v9161_v0  ;;  %9030 = vmatpush.msra.mxu3 %v2067_v18  ;;  %2405 = vmatpush.msra.mxu1 %v2067_v18  ;;  %v223_v56 = vld [vmem:[#allocation5 + $0x128] sm:$0xff]  ;;  %v2104_v58 = vld [vmem:[#allocation8 + $0x1e0] sm:$0xff]  ;;  %v224_v63 = vld [vmem:[#allocation5 + $0x130] sm:$0xff] }
  0x21   :  { %95 = vst [vmem:[#allocation2 + $0x88] sm:$0x3] %v9161_v0  ;;  %9015 = vmatpush.msra.mxu2 %v2050_v19  ;;  %2197 = vmatpush.msra.mxu0 %v2050_v19  ;;  %v190_v60 = vld [vmem:[#allocation5 + $0x20] sm:$0xff]  ;;  %v191_v1 = vld [vmem:[#allocation5 + $0x28] sm:$0xff]  ;;  %v225_v4 = vld [vmem:[#allocation5 + $0x138] sm:$0xff] }
  0x22   :  { %96 = vst [vmem:[#allocation2 + $0x90] sm:$0xff] %v9161_v0  ;;  %9031 = vmatpush.msra.mxu3 %v2066_v20  ;;  %2406 = vmatpush.msra.mxu1 %v2066_v20  ;;  %v2087_v5 = vld [vmem:[#allocation8 + $0x158] sm:$0xff]  ;;  %v192_v7 = vld [vmem:[#allocation5 + $0x30] sm:$0xff]  ;;  %v226_v10 = vld [vmem:[#allocation5 + $0x140] sm:$0xff] }
  0x23   :  { %97 = vst [vmem:[#allocation2 + $0x98] sm:$0xff] %v9161_v0  ;;  %9016 = vmatpush.msra.mxu2 %v2049_v21  ;;  %2198 = vmatpush.msra.mxu0 %v2049_v21  ;;  %v2103_v6 = vld [vmem:[#allocation8 + $0x1d8] sm:$0xff]  ;;  %v227_v15 = vld [vmem:[#allocation5 + $0x148] sm:$0xff]  ;;  %v2086_v16 = vld [vmem:[#allocation8 + $0x150] sm:$0xff] }
  0x24   :  { %98 = vst [vmem:[#allocation2 + $0xa0] sm:$0x3] %v9161_v0  ;;  %9032 = vmatpush.msra.mxu3 %v2065_v22  ;;  %2407 = vmatpush.msra.mxu1 %v2065_v22  ;;  %v2119_v11 = vld [vmem:[#allocation8 + $0x258] sm:$0xff]  ;;  %v2102_v17 = vld [vmem:[#allocation8 + $0x1d0] sm:$0xff]  ;;  %v194_v18 = vld [vmem:[#allocation5 + $0x40] sm:$0xff] }
  0x25   :  { %99 = vst [vmem:[#allocation2 + $0xa8] sm:$0xff] %v9161_v0  ;;  %9017 = vmatpush.msra.mxu2 %v2048_v23  ;;  %2199 = vmatpush.msra.mxu0 %v2048_v23  ;;  %v193_v12 = vld [vmem:[#allocation5 + $0x38] sm:$0xff]  ;;  %v228_v21 = vld [vmem:[#allocation5 + $0x150] sm:$0xff]  ;;  %v195_v23 = vld [vmem:[#allocation5 + $0x48] sm:$0xff] }
  0x26   :  { %100 = vst [vmem:[#allocation2 + $0xb0] sm:$0xff] %v9161_v0  ;;  %9033 = vmatpush.msra.mxu3 %v2064_v24  ;;  %2408 = vmatpush.msra.mxu1 %v2064_v24  ;;  %v2118_v22 = vld [vmem:[#allocation8 + $0x250] sm:$0xff] }
  0x27   :  { %101 = vst [vmem:[#allocation2 + $0xb8] sm:$0x3] %v9161_v0  ;;  %9018 = vmatpush.msra.mxu2 %v2047_v25  ;;  %2200 = vmatpush.msra.mxu0 %v2047_v25 }
  0x28   :  { %102 = vst [vmem:[#allocation2 + $0xc0] sm:$0xff] %v9161_v0  ;;  %9034 = vmatpush.msra.mxu3 %v2063_v26  ;;  %2409 = vmatpush.msra.mxu1 %v2063_v26  ;;  %v229_v26 = vld [vmem:[#allocation5 + $0x158] sm:$0xff] }
  0x29   :  { %103 = vst [vmem:[#allocation2 + $0xc8] sm:$0xff] %v9161_v0  ;;  %9019 = vmatpush.msra.mxu2 %v2046_v27  ;;  %2201 = vmatpush.msra.mxu0 %v2046_v27  ;;  %v2085_v27 = vld [vmem:[#allocation8 + $0x148] sm:$0xff] }
  0x2a   :  { %104 = vst [vmem:[#allocation2 + $0xd0] sm:$0x3] %v9161_v0  ;;  %9035 = vmatpush.msra.mxu3 %v2062_v28  ;;  %2410 = vmatpush.msra.mxu1 %v2062_v28  ;;  %v2101_v28 = vld [vmem:[#allocation8 + $0x1c8] sm:$0xff] }
  0x2b   :  { %105 = vst [vmem:[#allocation2 + $0xd8] sm:$0xff] %v9161_v0  ;;  %9020 = vmatpush.msra.mxu2 %v2045_v29  ;;  %2202 = vmatpush.msra.mxu0 %v2045_v29  ;;  %v196_v29 = vld [vmem:[#allocation5 + $0x50] sm:$0xff] }
  0x2c   :  { %106 = vst [vmem:[#allocation2 + $0xe0] sm:$0xff] %v9161_v0  ;;  %9036 = vmatpush.msra.mxu3 %v2061_v30  ;;  %2411 = vmatpush.msra.mxu1 %v2061_v30 }
  0x2d   :  { %107 = vst [vmem:[#allocation2 + $0xe8] sm:$0x3] %v9161_v0  ;;  %9021 = vmatpush.msra.mxu2 %v2044_v31  ;;  %2203 = vmatpush.msra.mxu0 %v2044_v31 }
  0x2e   :  { %108 = vst [vmem:[#allocation2 + $0xf0] sm:$0xff] %v9161_v0  ;;  %9037 = vmatpush.msra.mxu3 %v2060_v32  ;;  %2300 = vmatmul.f32.vlgmr.msra.gmra.mxu2 %v9161_v0 }
  0x2f   :  { %109 = vst [vmem:[#allocation2 + $0xf8] sm:$0xff] %v9161_v0  ;;  %2412 = vmatpush.msra.mxu1 %v2060_v32  ;;  %2204 = vmatmul.f32.vlgmr.msra.gmra.mxu0 %v9161_v0  ;;  %v230_v32 = vld [vmem:[#allocation5 + $0x160] sm:$0xff] }
  0x30   :  { %110 = vst [vmem:[#allocation2 + $0x100] sm:$0x3] %v9161_v0  ;;  %2413 = vmatmul.f32.vlgmr.msra.gmra.mxu1 %v443_v33  ;;  %2606 = vmatpush.msrb.mxu2 %v2091_v36  ;;  %v2117_v33 = vld [vmem:[#allocation8 + $0x248] sm:$0xff] }
  0x31   :  { %111 = vst [vmem:[#allocation2 + $0x108] sm:$0xff] %v9161_v0  ;;  %2815 = vmatpush.msrb.mxu3 %v2107_v37  ;;  %3024 = vmatpush.msrb.mxu0 %v2123_v38  ;;  %v231_v37 = vld [vmem:[#allocation5 + $0x168] sm:$0xff]  ;;  %v2084_v38 = vld [vmem:[#allocation8 + $0x140] sm:$0xff] }
  0x32   :  { %112 = vst [vmem:[#allocation2 + $0x110] sm:$0xff] %v9161_v0  ;;  %2607 = vmatpush.msrb.mxu2 %v2090_v40  ;;  %v198_v40 = vld [vmem:[#allocation5 + $0x60] sm:$0xff] }
  0x33   :  { %113 = vst [vmem:[#allocation2 + $0x118] sm:$0x3] %v9161_v0  ;;  %2816 = vmatpush.msrb.mxu3 %v2106_v42  ;;  %3025 = vmatpush.msrb.mxu0 %v2122_v45  ;;  %v199_v45 = vld [vmem:[#allocation5 + $0x68] sm:$0xff] }
  0x34   :  { %114 = vst [vmem:[#allocation2 + $0x120] sm:$0xff] %v9161_v0  ;;  %2608 = vmatpush.msrb.mxu2 %v2089_v47 }
  0x35   :  { %115 = vst [vmem:[#allocation2 + $0x128] sm:$0xff] %v9161_v0  ;;  %2817 = vmatpush.msrb.mxu3 %v2105_v49  ;;  %3026 = vmatpush.msrb.mxu0 %v2121_v52  ;;  %v2083_v49 = vld [vmem:[#allocation8 + $0x138] sm:$0xff]  ;;  %v200_v52 = vld [vmem:[#allocation5 + $0x70] sm:$0xff] }
  0x36   :  { %116 = vst [vmem:[#allocation2 + $0x130] sm:$0x3] %v9161_v0  ;;  %2303 = vmatmul.f32.gmra.mxu2 %v9161_v0 }
  0x37   :  { %117 = vst [vmem:[#allocation2 + $0x138] sm:$0xff] %v9161_v0  ;;  %2207 = vmatmul.f32.gmra.mxu0 %v9161_v0  ;;  %2609 = vmatpush.msrb.mxu2 %v2088_v57  ;;  %v2115_v57 = vld [vmem:[#allocation8 + $0x238] sm:$0xff] }
  0x38   :  { %118 = vst [vmem:[#allocation2 + $0x140] sm:$0xff] %v9161_v0  ;;  %2416 = vmatmul.f32.gmra.mxu1 %v444_v41  ;;  %2818 = vmatpush.msrb.mxu3 %v2104_v58 }
  0x39   :  { %119 = vst [vmem:[#allocation2 + $0x148] sm:$0x3] %v9161_v0  ;;  %2610 = vmatpush.msrb.mxu2 %v2087_v5 }
  0x3a   :  { %120 = vst [vmem:[#allocation2 + $0x150] sm:$0xff] %v9161_v0  ;;  %2819 = vmatpush.msrb.mxu3 %v2103_v6 }
  0x3b   :  { %121 = vst [vmem:[#allocation2 + $0x158] sm:$0xff] %v9161_v0  ;;  %2611 = vmatpush.msrb.mxu2 %v2086_v16  ;;  %v237_v16 = vld [vmem:[#allocation5 + $0x198] sm:$0xff] }
  0x3c   :  { %122 = vst [vmem:[#allocation2 + $0x160] sm:$0x3] %v9161_v0  ;;  %2820 = vmatpush.msrb.mxu3 %v2102_v17  ;;  %v2081_v17 = vld [vmem:[#allocation8 + $0x128] sm:$0xff] }
  0x3d   :  { %123 = vst [vmem:[#allocation2 + $0x168] sm:$0xff] %v9161_v0  ;;  %2612 = vmatpush.msrb.mxu2 %v2085_v27 }
  0x3e   :  { %124 = vst [vmem:[#allocation2 + $0x170] sm:$0xff] %v9161_v0  ;;  %2821 = vmatpush.msrb.mxu3 %v2101_v28  ;;  %v205_v28 = vld [vmem:[#allocation5 + $0x98] sm:$0xff] }
  0x3f   :  { %125 = vst [vmem:[#allocation2 + $0x178] sm:$0x3] %v9161_v0  ;;  %2613 = vmatpush.msrb.mxu2 %v2084_v38 }
  0x40   :  { %126 = vst [vmem:[#allocation2 + $0x180] sm:$0xff] %v9161_v0  ;;  %2419 = vmatmul.f32.gmra.mxu1 %v186_v44 }
  0x41   :  { %127 = vst [vmem:[#allocation2 + $0x188] sm:$0xff] %v9161_v0  ;;  %2614 = vmatpush.msrb.mxu2 %v2083_v49 }
  0x42   :  { %128 = vst [vmem:[#allocation2 + $0x190] sm:$0x3] %v9161_v0 }
  0x43   :  { %129 = vst [vmem:[#allocation2 + $0x198] sm:$0xff] %v9161_v0 }
  0x44   :  { %130 = vst [vmem:[#allocation2 + $0x1a0] sm:$0xff] %v9161_v0 }
  0x45   :  { %131 = vst [vmem:[#allocation2 + $0x1a8] sm:$0x3] %v9161_v0 }
  0x46   :  { %133 = vst [vmem:[#allocation2 + $0x1b8] sm:$0xff] %v9161_v0 }
  0x47   :  { %134 = vst [vmem:[#allocation2 + $0x1c0] sm:$0x3] %v9161_v0 }
  0x48   :  { %135 = vst [vmem:[#allocation2 + $0x1c8] sm:$0xff] %v9161_v0  ;;  %2422 = vmatmul.f32.gmra.mxu1 %v187_v48 }
  0x49   :  { %136 = vst [vmem:[#allocation2 + $0x1d0] sm:$0xff] %v9161_v0 }
  0x4a   :  { %137 = vst [vmem:[#allocation2 + $0x1d8] sm:$0x3] %v9161_v0 }
  0x4b   :  { %138 = vst [vmem:[#allocation2 + $0x1e0] sm:$0xff] %v9161_v0 }
  0x4c   :  { %139 = vst [vmem:[#allocation2 + $0x1e8] sm:$0xff] %v9161_v0 }
  0x4d   :  { %140 = vst [vmem:[#allocation2 + $0x1f0] sm:$0x3] %v9161_v0  ;;  %v475_v34 = vld [vmem:[#allocation2 + $0x1b1] sm:$0xff] }
  0x4e   :  { %141 = vst [vmem:[#allocation2 + $0x1f8] sm:$0xff] %v9161_v0  ;;  %2509 = vmatmul.f32.vlgmr.msra.gmra.mxu3 %v475_v34  ;;  %v476_v35 = vld [vmem:[#allocation2 + $0x1b9] sm:$0xff] }
  0x4f   :  { %142 = vst [vmem:[#allocation2 + $0x200] sm:$0xff] %v9161_v0  ;;  %v197_v34 = vld [vmem:[#allocation5 + $0x58] sm:$0xff] }
  0x50   :  { %143 = vst [vmem:[#allocation2 + $0x208] sm:$0x3] %v9161_v0  ;;  %2425 = vmatmul.f32.gmra.mxu1 %v188_v51 }
  0x51   :  { %144 = vst [vmem:[#allocation2 + $0x210] sm:$0xff] %v9161_v0 }
  0x52   :  { %145 = vst [vmem:[#allocation2 + $0x218] sm:$0xff] %v9161_v0 }
  0x53   :  { %146 = vst [vmem:[#allocation2 + $0x220] sm:$0x3] %v9161_v0 }
  0x54   :  { %147 = vst [vmem:[#allocation2 + $0x228] sm:$0xff] %v9161_v0 }
  0x55   :  { %148 = vst [vmem:[#allocation2 + $0x230] sm:$0xff] %v9161_v0 }
  0x56   :  { %149 = vst [vmem:[#allocation2 + $0x238] sm:$0x3] %v9161_v0  ;;  %2512 = vmatmul.f32.gmra.mxu3 %v476_v35 }
  0x57   :  { %150 = vst [vmem:[#allocation2 + $0x240] sm:$0xff] %v9161_v0 }
  0x58   :  { %151 = vst [vmem:[#allocation2 + $0x248] sm:$0xff] %v9161_v0  ;;  %2428 = vmatmul.f32.gmra.mxu1 %v189_v54 }
  0x59   :  { %152 = vst [vmem:[#allocation2 + $0x250] sm:$0x3] %v9161_v0 }
  0x5a   :  { %153 = vst [vmem:[#allocation2 + $0x258] sm:$0xff] %v9161_v0 }
  0x5b   :  { %154 = vst [vmem:[#allocation2 + $0x260] sm:$0xff] %v9161_v0 }
  0x5c   :  { %155 = vst [vmem:[#allocation2 + $0x268] sm:$0x3] %v9161_v0 }
  0x5d   :  { %156 = vst [vmem:[#allocation2 + $0x270] sm:$0xff] %v9161_v0 }
  0x5e   :  { %157 = vst [vmem:[#allocation2 + $0x278] sm:$0xff] %v9161_v0  ;;  %2515 = vmatmul.f32.gmra.mxu3 %v218_v39 }
  0x5f   :  { %158 = vst [vmem:[#allocation2 + $0x280] sm:$0x3] %v9161_v0 }
  0x60   :  { %159 = vst [vmem:[#allocation2 + $0x288] sm:$0xff] %v9161_v0  ;;  %2431 = vmatmul.f32.gmra.mxu1 %v190_v60 }
  0x61   :  { %160 = vst [vmem:[#allocation2 + $0x290] sm:$0xff] %v9161_v0 }
  0x62   :  { %161 = vst [vmem:[#allocation2 + $0x298] sm:$0x3] %v9161_v0 }
  0x63   :  { %162 = vst [vmem:[#allocation2 + $0x2a0] sm:$0xff] %v9161_v0 }
  0x64   :  { %163 = vst [vmem:[#allocation2 + $0x2a8] sm:$0xff] %v9161_v0 }
  0x65   :  { %164 = vst [vmem:[#allocation2 + $0x2b0] sm:$0x3] %v9161_v0 }
  0x66   :  { %165 = vst [vmem:[#allocation2 + $0x2b8] sm:$0xff] %v9161_v0  ;;  %2518 = vmatmul.f32.gmra.mxu3 %v219_v43 }
  0x67   :  { %166 = vst [vmem:[#allocation2 + $0x2c0] sm:$0xff] %v9161_v0 }
  0x68   :  { %167 = vst [vmem:[#allocation2 + $0x2c8] sm:$0x3] %v9161_v0  ;;  %2434 = vmatmul.f32.gmra.mxu1 %v191_v1 }
  0x69   :  { %168 = vst [vmem:[#allocation2 + $0x2d0] sm:$0xff] %v9161_v0 }
  0x6a   :  { %169 = vst [vmem:[#allocation2 + $0x2d8] sm:$0xff] %v9161_v0 }
  0x6b   :  { %170 = vst [vmem:[#allocation2 + $0x2e0] sm:$0x3] %v9161_v0 }
  0x6c   :  { %171 = vst [vmem:[#allocation2 + $0x2e8] sm:$0xff] %v9161_v0 }
  0x6d   :  { %172 = vst [vmem:[#allocation2 + $0x2f0] sm:$0xff] %v9161_v0 }
  0x6e   :  { %173 = vst [vmem:[#allocation2 + $0x2f8] sm:$0x3] %v9161_v0  ;;  %2521 = vmatmul.f32.gmra.mxu3 %v220_v46 }
  0x6f   :  { %174 = vst [vmem:[#allocation2 + $0x300] sm:$0xff] %v9161_v0 }
  0x70   :  { %175 = vst [vmem:[#allocation2 + $0x308] sm:$0xff] %v9161_v0  ;;  %2437 = vmatmul.f32.gmra.mxu1 %v192_v7 }
  0x71   :  { %176 = vst [vmem:[#allocation2 + $0x310] sm:$0x3] %v9161_v0 }
  0x72   :  { %177 = vst [vmem:[#allocation2 + $0x318] sm:$0xff] %v9161_v0 }
  0x73   :  { %178 = vst [vmem:[#allocation2 + $0x320] sm:$0xff] %v9161_v0 }
  0x74   :  { %179 = vst [vmem:[#allocation2 + $0x328] sm:$0x3] %v9161_v0 }
  0x75   :  { %180 = vst [vmem:[#allocation2 + $0x330] sm:$0xff] %v9161_v0 }
  0x76   :  { %181 = vst [vmem:[#allocation2 + $0x338] sm:$0xff] %v9161_v0  ;;  %2524 = vmatmul.f32.gmra.mxu3 %v221_v50 }
  0x77   :  { %182 = vst [vmem:[#allocation2 + $0x340] sm:$0x3] %v9161_v0 }
  0x78   :  { %183 = vst [vmem:[#allocation2 + $0x348] sm:$0xff] %v9161_v0  ;;  %2440 = vmatmul.f32.gmra.mxu1 %v193_v12 }
  0x79   :  { %184 = vst [vmem:[#allocation2 + $0x350] sm:$0xff] %v9161_v0 }
  0x7a   :  { %185 = vst [vmem:[#allocation2 + $0x358] sm:$0x3] %v9161_v0  ;;  %v2120_v0 = vld [vmem:[#allocation8 + $0x260] sm:$0xff] }
  0x7b   :  { %283 = vst [vmem:[#allocation2 + $0x1c9] sm:$0xff] %v218_v39  ;;  %3027 = vmatpush.msrb.mxu0 %v2120_v0  ;;  %v2100_v39 = vld [vmem:[#allocation8 + $0x1c0] sm:$0xff]  ;;  %v2082_v0 = vld [vmem:[#allocation8 + $0x130] sm:$0xff] }
  0x7c   :  { %284 = vst [vmem:[#allocation2 + $0x1d1] sm:$0xff] %v219_v43  ;;  %2822 = vmatpush.msrb.mxu3 %v2100_v39  ;;  %v232_v43 = vld [vmem:[#allocation5 + $0x170] sm:$0xff]  ;;  %2615 = vmatpush.msrb.mxu2 %v2082_v0 }
  0x7d   :  { %251 = vst [vmem:[#allocation2 + $0x19] sm:$0xff] %v186_v44  ;;  %3028 = vmatpush.msrb.mxu0 %v2119_v11  ;;  %v2116_v44 = vld [vmem:[#allocation8 + $0x240] sm:$0xff] }
  0x7e   :  { %285 = vst [vmem:[#allocation2 + $0x1e1] sm:$0xff] %v220_v46  ;;  %2527 = vmatmul.f32.gmra.mxu3 %v222_v53  ;;  %2616 = vmatpush.msrb.mxu2 %v2081_v17 }
  0x7f   :  { %252 = vst [vmem:[#allocation2 + $0x21] sm:$0xff] %v187_v48  ;;  %3029 = vmatpush.msrb.mxu0 %v2118_v22  ;;  %v233_v48 = vld [vmem:[#allocation5 + $0x178] sm:$0xff] }
  0x80   :  { %286 = vst [vmem:[#allocation2 + $0x1e9] sm:$0xff] %v221_v50  ;;  %2443 = vmatmul.f32.gmra.mxu1 %v194_v18  ;;  %v2099_v50 = vld [vmem:[#allocation8 + $0x1b8] sm:$0xff] }
  0x81   :  { %253 = vst [vmem:[#allocation2 + $0x31] sm:$0xff] %v188_v51  ;;  %3030 = vmatpush.msrb.mxu0 %v2117_v33  ;;  %2823 = vmatpush.msrb.mxu3 %v2099_v50 }
  0x82   :  { %v349_v55 = vld [vmem:[#allocation2 + $0x1c8] sm:$0xff]  ;;  %287 = vst [vmem:[#allocation2 + $0x1f9] sm:$0xff] %v222_v53 }
  0x83   :  { %2306 = vmatmul.f32.gmra.mxu2 %v349_v55  ;;  %254 = vst [vmem:[#allocation2 + $0x39] sm:$0xff] %v189_v54  ;;  %v350_v61 = vld [vmem:[#allocation2 + $0x1d0] sm:$0xff]  ;;  %3031 = vmatpush.msrb.mxu0 %v2116_v44 }
  0x84   :  { %v317_v59 = vld [vmem:[#allocation2 + $0x18] sm:$0xff]  ;;  %288 = vst [vmem:[#allocation2 + $0x201] sm:$0xff] %v223_v56 }
  0x85   :  { %2210 = vmatmul.f32.gmra.mxu0 %v317_v59  ;;  %255 = vst [vmem:[#allocation2 + $0x49] sm:$0xff] %v190_v60  ;;  %v351_v2 = vld [vmem:[#allocation2 + $0x1e0] sm:$0xff]  ;;  %v201_v59 = vld [vmem:[#allocation5 + $0x78] sm:$0xff] }
  0x86   :  { %2530 = vmatmul.f32.gmra.mxu3 %v223_v56  ;;  %v318_v62 = vld [vmem:[#allocation2 + $0x20] sm:$0xff]  ;;  %289 = vst [vmem:[#allocation2 + $0x211] sm:$0xff] %v224_v63  ;;  %3032 = vmatpush.msrb.mxu0 %v2115_v57  ;;  %v241_v57 = vld [vmem:[#allocation5 + $0x1b8] sm:$0xff] }
  0x87   :  { %256 = vst [vmem:[#allocation2 + $0x51] sm:$0xff] %v191_v1  ;;  %v352_v8 = vld [vmem:[#allocation2 + $0x1e8] sm:$0xff]  ;;  %v234_v56 = vld [vmem:[#allocation5 + $0x180] sm:$0xff]  ;;  %v2098_v1 = vld [vmem:[#allocation8 + $0x1b0] sm:$0xff] }
  0x88   :  { %v319_v3 = vld [vmem:[#allocation2 + $0x30] sm:$0xff]  ;;  %290 = vst [vmem:[#allocation2 + $0x219] sm:$0xff] %v225_v4  ;;  %2446 = vmatmul.f32.gmra.mxu1 %v195_v23  ;;  %2824 = vmatpush.msrb.mxu3 %v2098_v1 }
  0x89   :  { %257 = vst [vmem:[#allocation2 + $0x61] sm:$0xff] %v192_v7  ;;  %v353_v13 = vld [vmem:[#allocation2 + $0x1f8] sm:$0xff]  ;;  %v236_v7 = vld [vmem:[#allocation5 + $0x190] sm:$0xff] }
  0x8a   :  { %v320_v9 = vld [vmem:[#allocation2 + $0x38] sm:$0xff]  ;;  %291 = vst [vmem:[#allocation2 + $0x229] sm:$0xff] %v226_v10 }
  0x8b   :  { %2309 = vmatmul.f32.gmra.mxu2 %v350_v61  ;;  %258 = vst [vmem:[#allocation2 + $0x69] sm:$0xff] %v193_v12  ;;  %v354_v19 = vld [vmem:[#allocation2 + $0x200] sm:$0xff] }
  0x8c   :  { %v321_v14 = vld [vmem:[#allocation2 + $0x48] sm:$0xff]  ;;  %292 = vst [vmem:[#allocation2 + $0x231] sm:$0xff] %v227_v15 }
  0x8d   :  { %2213 = vmatmul.f32.gmra.mxu0 %v318_v62  ;;  %259 = vst [vmem:[#allocation2 + $0x79] sm:$0xff] %v194_v18  ;;  %v355_v24 = vld [vmem:[#allocation2 + $0x210] sm:$0xff]  ;;  %v2097_v18 = vld [vmem:[#allocation8 + $0x1a8] sm:$0xff] }
  0x8e   :  { %2533 = vmatmul.f32.gmra.mxu3 %v224_v63  ;;  %v322_v20 = vld [vmem:[#allocation2 + $0x50] sm:$0xff]  ;;  %293 = vst [vmem:[#allocation2 + $0x241] sm:$0xff] %v228_v21  ;;  %v235_v63 = vld [vmem:[#allocation5 + $0x188] sm:$0xff] }
  0x8f   :  { %260 = vst [vmem:[#allocation2 + $0x81] sm:$0xff] %v195_v23  ;;  %v356_v30 = vld [vmem:[#allocation2 + $0x218] sm:$0xff]  ;;  %2825 = vmatpush.msrb.mxu3 %v2097_v18 }
  0x90   :  { %v323_v25 = vld [vmem:[#allocation2 + $0x60] sm:$0xff]  ;;  %294 = vst [vmem:[#allocation2 + $0x249] sm:$0xff] %v229_v26  ;;  %2449 = vmatmul.f32.gmra.mxu1 %v196_v29 }
  0x91   :  { %261 = vst [vmem:[#allocation2 + $0x91] sm:$0xff] %v196_v29  ;;  %v357_v35 = vld [vmem:[#allocation2 + $0x228] sm:$0xff] }
  0x92   :  { %v324_v31 = vld [vmem:[#allocation2 + $0x68] sm:$0xff]  ;;  %295 = vst [vmem:[#allocation2 + $0x259] sm:$0xff] %v230_v32 }
  0x93   :  { %2312 = vmatmul.f32.gmra.mxu2 %v351_v2  ;;  %262 = vst [vmem:[#allocation2 + $0x99] sm:$0xff] %v197_v34  ;;  %v358_v41 = vld [vmem:[#allocation2 + $0x230] sm:$0xff]  ;;  %v202_v2 = vld [vmem:[#allocation5 + $0x80] sm:$0xff] }
  0x94   :  { %v325_v36 = vld [vmem:[#allocation2 + $0x78] sm:$0xff]  ;;  %296 = vst [vmem:[#allocation2 + $0x261] sm:$0xff] %v231_v37 }
  0x95   :  { %2216 = vmatmul.f32.gmra.mxu0 %v319_v3  ;;  %263 = vst [vmem:[#allocation2 + $0xa9] sm:$0xff] %v198_v40  ;;  %v359_v46 = vld [vmem:[#allocation2 + $0x240] sm:$0xff] }
  0x96   :  { %2536 = vmatmul.f32.gmra.mxu3 %v225_v4  ;;  %v326_v42 = vld [vmem:[#allocation2 + $0x80] sm:$0xff]  ;;  %297 = vst [vmem:[#allocation2 + $0x271] sm:$0xff] %v232_v43 }
  0x97   :  { %264 = vst [vmem:[#allocation2 + $0xb1] sm:$0xff] %v199_v45  ;;  %v360_v54 = vld [vmem:[#allocation2 + $0x248] sm:$0xff] }
  0x98   :  { %2452 = vmatmul.f32.gmra.mxu1 %v197_v34  ;;  %v327_v47 = vld [vmem:[#allocation2 + $0x90] sm:$0xff]  ;;  %298 = vst [vmem:[#allocation2 + $0x279] sm:$0xff] %v233_v48  ;;  %v239_v34 = vld [vmem:[#allocation5 + $0x1a8] sm:$0xff] }
  0x99   :  { %265 = vst [vmem:[#allocation2 + $0xc1] sm:$0xff] %v200_v52  ;;  %v361_v60 = vld [vmem:[#allocation2 + $0x258] sm:$0xff] }
  0x9a   :  { %v328_v55 = vld [vmem:[#allocation2 + $0x98] sm:$0xff]  ;;  %299 = vst [vmem:[#allocation2 + $0x289] sm:$0xff] %v234_v56 }
  0x9b   :  { %2315 = vmatmul.f32.gmra.mxu2 %v352_v8  ;;  %266 = vst [vmem:[#allocation2 + $0xc9] sm:$0xff] %v201_v59  ;;  %v362_v4 = vld [vmem:[#allocation2 + $0x260] sm:$0xff]  ;;  %v2114_v8 = vld [vmem:[#allocation8 + $0x230] sm:$0xff] }
  0x9c   :  { %v329_v62 = vld [vmem:[#allocation2 + $0xa8] sm:$0xff]  ;;  %300 = vst [vmem:[#allocation2 + $0x291] sm:$0xff] %v235_v63  ;;  %3033 = vmatpush.msrb.mxu0 %v2114_v8  ;;  %v2111_v8 = vld [vmem:[#allocation8 + $0x218] sm:$0xff] }
  0x9d   :  { %2219 = vmatmul.f32.gmra.mxu0 %v320_v9  ;;  %267 = vst [vmem:[#allocation2 + $0xd9] sm:$0xff] %v202_v2  ;;  %v203_v9 = vld [vmem:[#allocation5 + $0x88] sm:$0xff]  ;;  %v363_v12 = vld [vmem:[#allocation2 + $0x270] sm:$0xff] }
  0x9e   :  { %2539 = vmatmul.f32.gmra.mxu3 %v226_v10  ;;  %v330_v6 = vld [vmem:[#allocation2 + $0xb0] sm:$0xff]  ;;  %301 = vst [vmem:[#allocation2 + $0x2a1] sm:$0xff] %v236_v7 }
  0x9f   :  { %268 = vst [vmem:[#allocation2 + $0xe1] sm:$0xff] %v203_v9 }
  0xa0   :  { %2455 = vmatmul.f32.gmra.mxu1 %v198_v40  ;;  %302 = vst [vmem:[#allocation2 + $0x2a9] sm:$0xff] %v237_v16 }
  0xa1   :  { %270 = vst [vmem:[#allocation2 + $0xf9] sm:$0xff] %v205_v28 }
  0xa2   :  { %304 = vst [vmem:[#allocation2 + $0x2c1] sm:$0xff] %v239_v34 }
  0xa3   :  { %2318 = vmatmul.f32.gmra.mxu2 %v353_v13  ;;  %306 = vst [vmem:[#allocation2 + $0x2d9] sm:$0xff] %v241_v57 }
  0xa4   :  { %v333_v33 = vld [vmem:[#allocation2 + $0xd8] sm:$0xff] }
  0xa5   :  { %2222 = vmatmul.f32.gmra.mxu0 %v321_v14 }
  0xa6   :  { %2542 = vmatmul.f32.gmra.mxu3 %v227_v15  ;;  %v331_v15 = vld [vmem:[#allocation2 + $0xc0] sm:$0xff] }
  0xa7   :  { %v334_v44 = vld [vmem:[#allocation2 + $0xe0] sm:$0xff] }
  0xa8   :  { %2458 = vmatmul.f32.gmra.mxu1 %v199_v45  ;;  %v240_v45 = vld [vmem:[#allocation5 + $0x1b0] sm:$0xff] }
  0xa9   :  { %305 = vst [vmem:[#allocation2 + $0x2d1] sm:$0xff] %v240_v45 }
  0xab   :  { %2321 = vmatmul.f32.gmra.mxu2 %v354_v19  ;;  %v204_v19 = vld [vmem:[#allocation5 + $0x90] sm:$0xff] }
  0xac   :  { %v9350_v10 = vpop.f32.mrf.mxu0  ;;  %269 = vst [vmem:[#allocation2 + $0xf1] sm:$0xff] %v204_v19 }
  0xad   :  { %2225 = vmatmul.f32.gmra.mxu0 %v322_v20  ;;  %v9340_v53 = vpop.f32.mrf.mxu1 }
  0xae   :  { %2545 = vmatmul.f32.gmra.mxu3 %v228_v21  ;;  %v364_v21 = vld [vmem:[#allocation2 + $0x278] sm:$0xff] }
  0xb0   :  { %2461 = vmatmul.f32.gmra.mxu1 %v200_v52  ;;  %v367_v52 = vld [vmem:[#allocation2 + $0x2a0] sm:$0xff] }
  0xb1   :  { %v9356_v14 = vpop.f32.mrf.mxu2 }
  0xb2   :  { %13629 = vst [vmem:[#allocation17_spill] sm:$0xff] %v9356_v14 }
  0xb3   :  { %2324 = vmatmul.f32.gmra.mxu2 %v355_v24  ;;  %v332_v24 = vld [vmem:[#allocation2 + $0xc8] sm:$0xff] }
  0xb4   :  { %v9360_v22 = vpop.f32.mrf.mxu0 }
  0xb5   :  { %2228 = vmatmul.f32.gmra.mxu0 %v323_v25  ;;  %v9344_v61 = vpop.f32.mrf.mxu1  ;;  %v238_v25 = vld [vmem:[#allocation5 + $0x1a0] sm:$0xff] }
  0xb6   :  { %2548 = vmatmul.f32.gmra.mxu3 %v229_v26  ;;  %v2113_v26 = vld [vmem:[#allocation8 + $0x228] sm:$0xff]  ;;  %303 = vst [vmem:[#allocation2 + $0x2b9] sm:$0xff] %v238_v25 }
  0xb7   :  { %3034 = vmatpush.msrb.mxu0 %v2113_v26 }
  0xb8   :  { %2464 = vmatmul.f32.gmra.mxu1 %v201_v59  ;;  %v2079_v59 = vld [vmem:[#allocation8 + $0x118] sm:$0xff] }
  0xb9   :  { %v9364_v27 = vpop.f32.mrf.mxu2 }
  0xba   :  { %13630 = vst [vmem:[#allocation18_spill] sm:$0xff] %v9364_v27  ;;  %v705_v27 = vld [vmem:[#allocation2 + $0x60] sm:$0xff] }
  0xbb   :  { %2327 = vmatmul.f32.gmra.mxu2 %v356_v30  ;;  %v365_v30 = vld [vmem:[#allocation2 + $0x288] sm:$0xff] }
  0xbd   :  { %2231 = vmatmul.f32.gmra.mxu0 %v324_v31  ;;  %v9348_v5 = vpop.f32.mrf.mxu1 }
  0xbe   :  { %2551 = vmatmul.f32.gmra.mxu3 %v230_v32 }
  0xc0   :  { %2467 = vmatmul.f32.gmra.mxu1 %v202_v2  ;;  %v368_v2 = vld [vmem:[#allocation2 + $0x2a8] sm:$0xff] }
  0xc3   :  { %2330 = vmatmul.f32.gmra.mxu2 %v357_v35  ;;  %v2080_v35 = vld [vmem:[#allocation8 + $0x120] sm:$0xff] }
  0xc4   :  { %2617 = vmatpush.msrb.mxu2 %v2080_v35 }
  0xc5   :  { %2234 = vmatmul.f32.gmra.mxu0 %v325_v36  ;;  %v9354_v13 = vpop.f32.mrf.mxu1  ;;  %v2096_v36 = vld [vmem:[#allocation8 + $0x1a0] sm:$0xff] }
  0xc6   :  { %2554 = vmatmul.f32.gmra.mxu3 %v231_v37  ;;  %v206_v37 = vld [vmem:[#allocation5 + $0xa0] sm:$0xff]  ;;  %2618 = vmatpush.msrb.mxu2 %v2079_v59  ;;  %v212_v59 = vld [vmem:[#allocation5 + $0xd0] sm:$0xff] }
  0xc7   :  { %2826 = vmatpush.msrb.mxu3 %v2096_v36  ;;  %271 = vst [vmem:[#allocation2 + $0x109] sm:$0xff] %v206_v37  ;;  %v244_v36 = vld [vmem:[#allocation5 + $0x1d0] sm:$0xff] }
  0xc8   :  { %2470 = vmatmul.f32.gmra.mxu1 %v203_v9  ;;  %v209_v9 = vld [vmem:[#allocation5 + $0xb8] sm:$0xff]  ;;  %309 = vst [vmem:[#allocation2 + $0x301] sm:$0xff] %v244_v36 }
  0xc9   :  { %274 = vst [vmem:[#allocation2 + $0x129] sm:$0xff] %v209_v9 }
  0xca   :  { %277 = vst [vmem:[#allocation2 + $0x151] sm:$0xff] %v212_v59 }
  0xcb   :  { %2333 = vmatmul.f32.gmra.mxu2 %v358_v41  ;;  %v366_v41 = vld [vmem:[#allocation2 + $0x290] sm:$0xff] }
  0xcd   :  { %2237 = vmatmul.f32.gmra.mxu0 %v326_v42  ;;  %v9362_v23 = vpop.f32.mrf.mxu1 }
  0xce   :  { %2557 = vmatmul.f32.gmra.mxu3 %v232_v43 }
  0xd0   :  { %2473 = vmatmul.f32.gmra.mxu1 %v204_v19  ;;  %v337_v19 = vld [vmem:[#allocation2 + $0x108] sm:$0xff] }
  0xd1   :  { %v9338_v51 = vpop.f32.mrf.mxu3 }
  0xd2   :  { %13627 = vst [vmem:[#allocation15_spill] sm:$0xff] %v9338_v51 }
  0xd3   :  { %2336 = vmatmul.f32.gmra.mxu2 %v359_v46  ;;  %v2112_v46 = vld [vmem:[#allocation8 + $0x220] sm:$0xff] }
  0xd4   :  { %3035 = vmatpush.msrb.mxu0 %v2112_v46 }
  0xd5   :  { %2240 = vmatmul.f32.gmra.mxu0 %v327_v47  ;;  %v9368_v31 = vpop.f32.mrf.mxu1  ;;  %v207_v47 = vld [vmem:[#allocation5 + $0xa8] sm:$0xff] }
  0xd6   :  { %2560 = vmatmul.f32.gmra.mxu3 %v233_v48  ;;  %272 = vst [vmem:[#allocation2 + $0x111] sm:$0xff] %v207_v47  ;;  %3036 = vmatpush.msrb.mxu0 %v2111_v8  ;;  %v246_v8 = vld [vmem:[#allocation5 + $0x1e0] sm:$0xff] }
  0xd7   :  { %311 = vst [vmem:[#allocation2 + $0x319] sm:$0xff] %v246_v8 }
  0xd8   :  { %2476 = vmatmul.f32.gmra.mxu1 %v205_v28 }
  0xd9   :  { %v9342_v58 = vpop.f32.mrf.mxu3 }
  0xda   :  { %13628 = vst [vmem:[#allocation16_spill] sm:$0xff] %v9342_v58 }
  0xdb   :  { %2339 = vmatmul.f32.gmra.mxu2 %v360_v54 }
  0xdd   :  { %2243 = vmatmul.f32.gmra.mxu0 %v328_v55  ;;  %v9377_v42 = vpop.f32.mrf.mxu1  ;;  %v338_v35 = vld [vmem:[#allocation2 + $0x110] sm:$0xff] }
  0xde   :  { %2563 = vmatmul.f32.gmra.mxu3 %v234_v56  ;;  %v335_v56 = vld [vmem:[#allocation2 + $0xf0] sm:$0xff] }
  0xe0   :  { %2479 = vmatmul.f32.gmra.mxu1 %v206_v37  ;;  %v2110_v37 = vld [vmem:[#allocation8 + $0x210] sm:$0xff] }
  0xe1   :  { %v9346_v3 = vpop.f32.mrf.mxu3  ;;  %3037 = vmatpush.msrb.mxu0 %v2110_v37  ;;  %v2137_v37 = vld [vmem:[#allocation8 + $0x2e8] sm:$0xff] }
  0xe3   :  { %2342 = vmatmul.f32.gmra.mxu2 %v361_v60  ;;  %v2095_v60 = vld [vmem:[#allocation8 + $0x198] sm:$0xff] }
  0xe4   :  { %2827 = vmatpush.msrb.mxu3 %v2095_v60 }
  0xe5   :  { %2246 = vmatmul.f32.gmra.mxu0 %v329_v62  ;;  %v9386_v54 = vpop.f32.mrf.mxu1  ;;  %v208_v62 = vld [vmem:[#allocation5 + $0xb0] sm:$0xff] }
  0xe6   :  { %2566 = vmatmul.f32.gmra.mxu3 %v235_v63  ;;  %273 = vst [vmem:[#allocation2 + $0x121] sm:$0xff] %v208_v62 }
  0xe8   :  { %2482 = vmatmul.f32.gmra.mxu1 %v207_v47 }
  0xe9   :  { %v9352_v11 = vpop.f32.mrf.mxu3 }
  0xeb   :  { %2345 = vmatmul.f32.gmra.mxu2 %v362_v4 }
  0xed   :  { %2249 = vmatmul.f32.gmra.mxu0 %v330_v6  ;;  %v336_v6 = vld [vmem:[#allocation2 + $0xf8] sm:$0xff] }
  0xee   :  { %2569 = vmatmul.f32.gmra.mxu3 %v236_v7  ;;  %v242_v7 = vld [vmem:[#allocation5 + $0x1c0] sm:$0xff] }
  0xef   :  { %307 = vst [vmem:[#allocation2 + $0x2e9] sm:$0xff] %v242_v7 }
  0xf0   :  { %2485 = vmatmul.f32.gmra.mxu1 %v208_v62 }
  0xf1   :  { %v9358_v20 = vpop.f32.mrf.mxu3 }
  0xf3   :  { %2348 = vmatmul.f32.gmra.mxu2 %v363_v12 }
  0xf5   :  { %2252 = vmatmul.f32.gmra.mxu0 %v331_v15 }
  0xf6   :  { %2572 = vmatmul.f32.gmra.mxu3 %v237_v16  ;;  %v369_v16 = vld [vmem:[#allocation2 + $0x2b8] sm:$0xff] }
  0xf8   :  { %2488 = vmatmul.f32.gmra.mxu1 %v209_v9  ;;  %v2109_v9 = vld [vmem:[#allocation8 + $0x208] sm:$0xff] }
  0xf9   :  { %v9366_v29 = vpop.f32.mrf.mxu3  ;;  %3038 = vmatpush.msrb.mxu0 %v2109_v9  ;;  %v2108_v9 = vld [vmem:[#allocation8 + $0x200] sm:$0xff] }
  0xfb   :  { %2351 = vmatmul.f32.gmra.mxu2 %v364_v21  ;;  %v2078_v21 = vld [vmem:[#allocation8 + $0x110] sm:$0xff]  ;;  %3039 = vmatpush.msrb.mxu0 %v2108_v9 }
  0xfc   :  { %2619 = vmatpush.msrb.mxu2 %v2078_v21  ;;  %v2138_v21 = vld [vmem:[#allocation8 + $0x2f0] sm:$0xff] }
  0xfd   :  { %2255 = vmatmul.f32.gmra.mxu0 %v332_v24  ;;  %v2094_v24 = vld [vmem:[#allocation8 + $0x190] sm:$0xff] }
  0xfe   :  { %2575 = vmatmul.f32.gmra.mxu3 %v238_v25  ;;  %v210_v25 = vld [vmem:[#allocation5 + $0xc0] sm:$0xff]  ;;  %v2126_v9 = vld [vmem:[#allocation8 + $0x290] sm:$0xff] }
  0xff   :  { %2828 = vmatpush.msrb.mxu3 %v2094_v24  ;;  %275 = vst [vmem:[#allocation2 + $0x139] sm:$0xff] %v210_v25  ;;  %v373_v24 = vld [vmem:[#allocation2 + $0x2e8] sm:$0xff] }
 0x100   :  { %2491 = vmatmul.f32.gmra.mxu1 %v210_v25 }
 0x101   :  { %v9372_v39 = vpop.f32.mrf.mxu3 }
 0x102   :  { %v9370_v32 = vpop.f32.mrf.mxu0 }
 0x103   :  { %2354 = vmatmul.f32.gmra.mxu2 %v365_v30  ;;  %v370_v30 = vld [vmem:[#allocation2 + $0x2c0] sm:$0xff] }
 0x105   :  { %2258 = vmatmul.f32.gmra.mxu0 %v333_v33 }
 0x106   :  { %v2307_v38 = vpop.f32.mrf.mxu2  ;;  %2578 = vmatmul.f32.gmra.mxu3 %v239_v34 }
 0x107   :  { %v9375_v40 = vadd.f32 %v9346_v3, %v2307_v38  ;;  %v9395_v3 = vpop.f32.mrf.mxu1  ;;  %v211_v38 = vld [vmem:[#allocation5 + $0xc8] sm:$0xff] }
 0x108   :  { %276 = vst [vmem:[#allocation2 + $0x141] sm:$0xff] %v211_v38  ;;  %2494 = vmatmul.f32.gmra.mxu1 %v211_v38  ;;  %v2092_v38 = vld [vmem:[#allocation8 + $0x180] sm:$0xff] }
 0x109   :  { %13631 = vst [vmem:[#allocation19_spill] sm:$0xff] %v9375_v40  ;;  %v9381_v49 = vpop.f32.mrf.mxu3  ;;  %v704_v40 = vld [vmem:[#allocation2 + $0x50] sm:$0xff] }
 0x10a   :  { %v9379_v43 = vpop.f32.mrf.mxu0 }
 0x10b   :  { %2357 = vmatmul.f32.gmra.mxu2 %v366_v41 }
 0x10d   :  { %2261 = vmatmul.f32.gmra.mxu0 %v334_v44 }
 0x10e   :  { %v2310_v48 = vpop.f32.mrf.mxu2  ;;  %2581 = vmatmul.f32.gmra.mxu3 %v240_v45  ;;  %v371_v45 = vld [vmem:[#allocation2 + $0x2d0] sm:$0xff] }
 0x10f   :  { %v9384_v50 = vadd.f32 %v9352_v11, %v2310_v48  ;;  %v9404_v17 = vpop.f32.mrf.mxu1  ;;  %v339_v48 = vld [vmem:[#allocation2 + $0x120] sm:$0xff] }
 0x110   :  { %2497 = vmatmul.f32.gmra.mxu1 %v212_v59 }
 0x111   :  { %13632 = vst [vmem:[#allocation20_spill] sm:$0xff] %v9384_v50  ;;  %v9390_v0 = vpop.f32.mrf.mxu3 }
 0x112   :  { %v9388_v55 = vpop.f32.mrf.mxu0 }
 0x113   :  { %2360 = vmatmul.f32.gmra.mxu2 %v367_v52  ;;  %v245_v52 = vld [vmem:[#allocation5 + $0x1d8] sm:$0xff] }
 0x114   :  { %310 = vst [vmem:[#allocation2 + $0x309] sm:$0xff] %v245_v52 }
 0x115   :  { %2264 = vmatmul.f32.gmra.mxu0 %v335_v56  ;;  %v2077_v56 = vld [vmem:[#allocation8 + $0x108] sm:$0xff] }
 0x116   :  { %v2313_v63 = vpop.f32.mrf.mxu2  ;;  %2584 = vmatmul.f32.gmra.mxu3 %v241_v57  ;;  %v2093_v57 = vld [vmem:[#allocation8 + $0x188] sm:$0xff]  ;;  %2620 = vmatpush.msrb.mxu2 %v2077_v56  ;;  %v2135_v56 = vld [vmem:[#allocation8 + $0x2d8] sm:$0xff] }
 0x117   :  { %v9393_v1 = vadd.f32 %v9358_v20, %v2313_v63  ;;  %v243_v20 = vld [vmem:[#allocation5 + $0x1c8] sm:$0xff]  ;;  %v9413_v33 = vpop.f32.mrf.mxu1  ;;  %2829 = vmatpush.msrb.mxu3 %v2093_v57  ;;  %v372_v63 = vld [vmem:[#allocation2 + $0x2d8] sm:$0xff]  ;;  %v2134_v57 = vld [vmem:[#allocation8 + $0x2d0] sm:$0xff] }
 0x118   :  { %308 = vst [vmem:[#allocation2 + $0x2f1] sm:$0xff] %v243_v20 }
 0x119   :  { %13633 = vst [vmem:[#allocation21_spill] sm:$0xff] %v9393_v1  ;;  %v9399_v12 = vpop.f32.mrf.mxu3  ;;  %2830 = vmatpush.msrb.mxu3 %v2092_v38  ;;  %v343_v38 = vld [vmem:[#allocation2 + $0x150] sm:$0xff]  ;;  %v958_v1 = vld [vmem:[#allocation2 + $0x3a] sm:$0xff] }
 0x11a   :  { %v9397_v4 = vpop.f32.mrf.mxu0 }
 0x11b   :  { %2363 = vmatmul.f32.gmra.mxu2 %v368_v2 }
 0x11d   :  { %2267 = vmatmul.f32.gmra.mxu0 %v336_v6 }
 0x11e   :  { %v2316_v11 = vpop.f32.mrf.mxu2  ;;  %2587 = vmatmul.f32.gmra.mxu3 %v242_v7  ;;  %v340_v7 = vld [vmem:[#allocation2 + $0x128] sm:$0xff] }
 0x11f   :  { %v9402_v15 = vadd.f32 %v9366_v29, %v2316_v11  ;;  %v9422_v46 = vpop.f32.mrf.mxu1  ;;  %v213_v11 = vld [vmem:[#allocation5 + $0xd8] sm:$0xff]  ;;  %v374_v59 = vld [vmem:[#allocation2 + $0x2f0] sm:$0xff] }
 0x120   :  { %278 = vst [vmem:[#allocation2 + $0x159] sm:$0xff] %v213_v11  ;;  %2500 = vmatmul.f32.gmra.mxu1 %v213_v11  ;;  %v215_v11 = vld [vmem:[#allocation5 + $0xe8] sm:$0xff] }
 0x121   :  { %13634 = vst [vmem:[#allocation22_spill] sm:$0xff] %v9402_v15  ;;  %v9408_v28 = vpop.f32.mrf.mxu3 }
 0x122   :  { %v9406_v18 = vpop.f32.mrf.mxu0  ;;  %280 = vst [vmem:[#allocation2 + $0x171] sm:$0xff] %v215_v11 }
 0x123   :  { %2366 = vmatmul.f32.gmra.mxu2 %v369_v16 }
 0x125   :  { %2270 = vmatmul.f32.gmra.mxu0 %v337_v19 }
 0x126   :  { %v2319_v26 = vpop.f32.mrf.mxu2  ;;  %2590 = vmatmul.f32.gmra.mxu3 %v243_v20  ;;  %v2139_v20 = vld [vmem:[#allocation8 + $0x2f8] sm:$0xff] }
 0x127   :  { %v9411_v29 = vadd.f32 %v9372_v39, %v2319_v26  ;;  %v9431_v2 = vpop.f32.mrf.mxu1  ;;  %3233 = vmatpush.msrb.mxu1 %v2139_v20 }
 0x129   :  { %13635 = vst [vmem:[#allocation23_spill] sm:$0xff] %v9411_v29  ;;  %v9417_v44 = vpop.f32.mrf.mxu3  ;;  %3234 = vmatpush.msrb.mxu1 %v2138_v21  ;;  %v2170_v29 = vld [vmem:[#allocation8 + $0x3f0] sm:$0xff] }
 0x12a   :  { %v9415_v34 = vpop.f32.mrf.mxu0 }
 0x12b   :  { %2369 = vmatmul.f32.gmra.mxu2 %v370_v30  ;;  %v341_v30 = vld [vmem:[#allocation2 + $0x138] sm:$0xff]  ;;  %3235 = vmatpush.msrb.mxu1 %v2137_v37 }
 0x12d   :  { %2273 = vmatmul.f32.gmra.mxu0 %v338_v35  ;;  %v247_v35 = vld [vmem:[#allocation5 + $0x1e8] sm:$0xff] }
 0x12e   :  { %v2322_v41 = vpop.f32.mrf.mxu2  ;;  %2593 = vmatmul.f32.gmra.mxu3 %v244_v36  ;;  %v2076_v36 = vld [vmem:[#allocation8 + $0x100] sm:$0xff]  ;;  %312 = vst [vmem:[#allocation2 + $0x321] sm:$0xff] %v247_v35 }
 0x12f   :  { %v9420_v39 = vadd.f32 %v9381_v49, %v2322_v41  ;;  %v9440_v25 = vpop.f32.mrf.mxu1  ;;  %2621 = vmatpush.msrb.mxu2 %v2076_v36  ;;  %v2136_v41 = vld [vmem:[#allocation8 + $0x2e0] sm:$0xff] }
 0x130   :  { %3236 = vmatpush.msrb.mxu1 %v2136_v41  ;;  %v2129_v41 = vld [vmem:[#allocation8 + $0x2a8] sm:$0xff] }
 0x131   :  { %13636 = vst [vmem:[#allocation24_spill] sm:$0xff] %v9420_v39  ;;  %v9426_v49 = vpop.f32.mrf.mxu3  ;;  %v2154_v39 = vld [vmem:[#allocation8 + $0x370] sm:$0xff] }
 0x132   :  { %v9424_v47 = vpop.f32.mrf.mxu0  ;;  %3237 = vmatpush.msrb.mxu1 %v2135_v56  ;;  %v2171_v56 = vld [vmem:[#allocation8 + $0x3f8] sm:$0xff] }
 0x133   :  { %2372 = vmatmul.f32.gmra.mxu2 %v371_v45  ;;  %3651 = vmatpush.msra.mxu3 %v2171_v56 }
 0x134   :  { %3238 = vmatpush.msrb.mxu1 %v2134_v57 }
 0x135   :  { %2276 = vmatmul.f32.gmra.mxu0 %v339_v48  ;;  %3652 = vmatpush.msra.mxu3 %v2170_v29 }
 0x136   :  { %v2325_v60 = vpop.f32.mrf.mxu2  ;;  %2596 = vmatmul.f32.gmra.mxu3 %v245_v52 }
 0x137   :  { %v9429_v62 = vadd.f32 %v9390_v0, %v2325_v60  ;;  %v9449_v60 = vpop.f32.mrf.mxu1 }
 0x139   :  { %13637 = vst [vmem:[#allocation25_spill] sm:$0xff] %v9429_v62  ;;  %v9435_v19 = vpop.f32.mrf.mxu3  ;;  %v827_v62 = vld [vmem:[#allocation2 + $0x19] sm:$0xff] }
 0x13a   :  { %v9433_v6 = vpop.f32.mrf.mxu0 }
 0x13b   :  { %2375 = vmatmul.f32.gmra.mxu2 %v372_v63 }
 0x13d   :  { %2279 = vmatmul.f32.gmra.mxu0 %v340_v7  ;;  %v342_v7 = vld [vmem:[#allocation2 + $0x140] sm:$0xff] }
 0x13e   :  { %v2328_v16 = vpop.f32.mrf.mxu2  ;;  %2599 = vmatmul.f32.gmra.mxu3 %v246_v8  ;;  %v2133_v8 = vld [vmem:[#allocation8 + $0x2c8] sm:$0xff] }
 0x13f   :  { %v9438_v0 = vadd.f32 %v9399_v12, %v2328_v16  ;;  %v214_v12 = vld [vmem:[#allocation5 + $0xe0] sm:$0xff]  ;;  %3239 = vmatpush.msrb.mxu1 %v2133_v8  ;;  %v9458_v36 = vpop.f32.mrf.mxu1  ;;  %v2127_v8 = vld [vmem:[#allocation8 + $0x298] sm:$0xff] }
 0x140   :  { %279 = vst [vmem:[#allocation2 + $0x169] sm:$0xff] %v214_v12  ;;  %2503 = vmatmul.f32.gmra.mxu1 %v214_v12  ;;  %v2155_v12 = vld [vmem:[#allocation8 + $0x378] sm:$0xff] }
 0x141   :  { %13638 = vst [vmem:[#allocation26_spill] sm:$0xff] %v9438_v0  ;;  %v9444_v48 = vpop.f32.mrf.mxu3  ;;  %3442 = vmatpush.msra.mxu2 %v2155_v12 }
 0x142   :  { %v9442_v26 = vpop.f32.mrf.mxu0 }
 0x143   :  { %2378 = vmatmul.f32.gmra.mxu2 %v373_v24  ;;  %v2131_v24 = vld [vmem:[#allocation8 + $0x2b8] sm:$0xff] }
 0x144   :  { %3443 = vmatpush.msra.mxu2 %v2154_v39  ;;  %v2186_v39 = vld [vmem:[#allocation8 + $0x470] sm:$0xff] }
 0x145   :  { %2282 = vmatmul.f32.gmra.mxu0 %v341_v30  ;;  %v2130_v30 = vld [vmem:[#allocation8 + $0x2b0] sm:$0xff] }
 0x146   :  { %v2331_v45 = vpop.f32.mrf.mxu2  ;;  %2602 = vmatmul.f32.gmra.mxu3 %v247_v35  ;;  %v375_v35 = vld [vmem:[#allocation2 + $0x300] sm:$0xff] }
 0x147   :  { %v9447_v52 = vadd.f32 %v9408_v28, %v2331_v45  ;;  %v2132_v28 = vld [vmem:[#allocation8 + $0x2c0] sm:$0xff]  ;;  %v699_v45 = vld [vmem:[#allocation2 + $0x18] sm:$0xff] }
 0x148   :  { %3240 = vmatpush.msrb.mxu1 %v2132_v28  ;;  %v376_v28 = vld [vmem:[#allocation2 + $0x308] sm:$0xff] }
 0x149   :  { %13639 = vst [vmem:[#allocation27_spill] sm:$0xff] %v9447_v52  ;;  %v9453_v20 = vpop.f32.mrf.mxu3  ;;  %2506 = vmatmul.f32.gmra.mxu1 %v215_v11  ;;  %v2125_v11 = vld [vmem:[#allocation8 + $0x288] sm:$0xff]  ;;  %v957_v52 = vld [vmem:[#allocation2 + $0x32] sm:$0xff] }
 0x14a   :  { %v9451_v63 = vpop.f32.mrf.mxu0  ;;  %3241 = vmatpush.msrb.mxu1 %v2131_v24 }
 0x14b   :  { %2381 = vmatmul.f32.gmra.mxu2 %v374_v59 }
 0x14c   :  { %3242 = vmatpush.msrb.mxu1 %v2130_v30  ;;  %v9471_v30 = vld [vmem:[#allocation2 + $0x158] sm:$0xff] }
 0x14d   :  { %2285 = vmatmul.f32.gmra.mxu0 %v342_v7 }
 0x14e   :  { %v2334_v16 = vpop.f32.mrf.mxu2  ;;  %3243 = vmatpush.msrb.mxu1 %v2129_v41  ;;  %2831 = vmatmul.f32.vlgmr.msrb.gmra.mxu3 %v699_v45  ;;  %v9474_v45 = vld [vmem:[#allocation2 + $0x1a] sm:$0xff] }
 0x14f   :  { %v9456_v21 = vadd.f32 %v9417_v44, %v2334_v16  ;;  %v2128_v44 = vld [vmem:[#allocation8 + $0x2a0] sm:$0xff]  ;;  %v9467_v16 = vpop.f32.mrf.mxu1 }
 0x150   :  { %3244 = vmatpush.msrb.mxu1 %v2128_v44  ;;  %v377_v44 = vld [vmem:[#allocation2 + $0x318] sm:$0xff] }
 0x151   :  { %13640 = vst [vmem:[#allocation28_spill] sm:$0xff] %v9456_v21  ;;  %v9462_v59 = vpop.f32.mrf.mxu3 }
 0x152   :  { %v9460_v37 = vpop.f32.mrf.mxu0  ;;  %3245 = vmatpush.msrb.mxu1 %v2127_v8 }
 0x153   :  { %2384 = vmatmul.f32.gmra.mxu2 %v375_v35  ;;  %v700_v35 = vld [vmem:[#allocation2 + $0x20] sm:$0xff] }
 0x154   :  { %3246 = vmatpush.msrb.mxu1 %v2126_v9  ;;  %v9484_v9 = vld [vmem:[#allocation2 + $0x168] sm:$0xff] }
 0x155   :  { %2288 = vmatmul.f32.gmra.mxu0 %v343_v38  ;;  %v2187_v38 = vld [vmem:[#allocation8 + $0x478] sm:$0xff] }
 0x156   :  { %v2337_v57 = vpop.f32.mrf.mxu2  ;;  %3247 = vmatpush.msrb.mxu1 %v2125_v11  ;;  %2834 = vmatmul.f32.gmra.mxu3 %v700_v35 }
 0x157   :  { %v9465_v7 = vadd.f32 %v9426_v49, %v2337_v57  ;;  %v2124_v49 = vld [vmem:[#allocation8 + $0x280] sm:$0xff]  ;;  %3860 = vmatpush.msra.mxu0 %v2187_v38  ;;  %v9480_v57 = vpop.f32.mrf.mxu1 }
 0x158   :  { %3248 = vmatpush.msrb.mxu1 %v2124_v49  ;;  %v956_v38 = vld [vmem:[#allocation2 + $0x22] sm:$0xff] }
 0x159   :  { %13641 = vst [vmem:[#allocation29_spill] sm:$0xff] %v9465_v7  ;;  %v2561_v41 = vpop.f32.mrf.mxu3  ;;  %3249 = vmatmul.f32.vlgmr.msrb.gmra.mxu1 %v9474_v45  ;;  %v378_v49 = vld [vmem:[#allocation2 + $0x320] sm:$0xff]  ;;  %v9494_v7 = vld [vmem:[#allocation2 + $0x170] sm:$0xff]  ;;  %3861 = vmatpush.msra.mxu0 %v2186_v39 }
 0x15a   :  { %v9469_v24 = vpop.f32.mrf.mxu0 }
 0x15b   :  { %2387 = vmatmul.f32.gmra.mxu2 %v376_v28  ;;  %v701_v28 = vld [vmem:[#allocation2 + $0x30] sm:$0xff] }
 0x15d   :  { %2291 = vmatmul.f32.gmra.mxu0 %v9471_v30 }
 0x15e   :  { %v2340_v12 = vpop.f32.mrf.mxu2  ;;  %2837 = vmatmul.f32.gmra.mxu3 %v701_v28 }
 0x15f   :  { %v9477_v56 = vadd.f32 %v9435_v19, %v2340_v12  ;;  %v9490_v12 = vpop.f32.mrf.mxu1 }
 0x160   :  { %13644 = vst [vmem:[#allocation32_spill] sm:$0xff] %v9490_v12  ;;  %v844_v12 = vld [vmem:[#allocation2 + $0xe1] sm:$0xff] }
 0x161   :  { %13642 = vst [vmem:[#allocation30_spill] sm:$0xff] %v9477_v56  ;;  %v2564_v35 = vpop.f32.mrf.mxu3  ;;  %3252 = vmatmul.f32.gmra.mxu1 %v956_v38 }
 0x162   :  { %v9482_v8 = vpop.f32.mrf.mxu0 }
 0x163   :  { %2390 = vmatmul.f32.gmra.mxu2 %v377_v44  ;;  %v702_v44 = vld [vmem:[#allocation2 + $0x38] sm:$0xff] }
 0x165   :  { %2294 = vmatmul.f32.gmra.mxu0 %v9484_v9 }
 0x166   :  { %v2343_v11 = vpop.f32.mrf.mxu2  ;;  %2840 = vmatmul.f32.gmra.mxu3 %v702_v44 }
 0x167   :  { %v9488_v19 = vadd.f32 %v9444_v48, %v2343_v11  ;;  %v571_v48 = vld [vmem:[#allocation2 + $0x2] sm:$0xff]  ;;  %v9500_v11 = vpop.f32.mrf.mxu1 }
 0x168   :  { %13646 = vst [vmem:[#allocation34_spill] sm:$0xff] %v9500_v11 }
 0x169   :  { %13643 = vst [vmem:[#allocation31_spill] sm:$0xff] %v9488_v19  ;;  %v2567_v28 = vpop.f32.mrf.mxu3  ;;  %3255 = vmatmul.f32.gmra.mxu1 %v957_v52 }
 0x16a   :  { %v9492_v56 = vpop.f32.mrf.mxu0 }
 0x16b   :  { %2393 = vmatmul.f32.gmra.mxu2 %v378_v49  ;;  %v703_v49 = vld [vmem:[#allocation2 + $0x48] sm:$0xff] }
 0x16d   :  { %2297 = vmatmul.f32.gmra.mxu0 %v9494_v7 }
 0x16e   :  { %v2346_v21 = vpop.f32.mrf.mxu2  ;;  %2843 = vmatmul.f32.gmra.mxu3 %v703_v49  ;;  %v959_v49 = vld [vmem:[#allocation2 + $0x4a] sm:$0xff] }
 0x16f   :  { %v9498_v0 = vadd.f32 %v9453_v20, %v2346_v21  ;;  %v572_v21 = vld [vmem:[#allocation2 + $0xa] sm:$0xff] }
 0x171   :  { %13645 = vst [vmem:[#allocation33_spill] sm:$0xff] %v9498_v0  ;;  %v2570_v15 = vpop.f32.mrf.mxu3  ;;  %3258 = vmatmul.f32.gmra.mxu1 %v958_v1  ;;  %v9507_v0 = vpop.f32.mrf.mxu1 }
 0x172   :  { %v9502_v19 = vpop.f32.mrf.mxu0  ;;  %13648 = vst [vmem:[#allocation36_spill] sm:$0xff] %v9507_v0  ;;  %v2169_v0 = vld [vmem:[#allocation8 + $0x3e8] sm:$0xff] }
 0x173   :  { %2622 = vmatmul.f32.vlgmr.msrb.gmra.mxu2 %v571_v48  ;;  %v828_v48 = vld [vmem:[#allocation2 + $0x21] sm:$0xff]  ;;  %3653 = vmatpush.msra.mxu3 %v2169_v0 }
 0x175   :  { %3040 = vmatmul.f32.vlgmr.msrb.gmra.mxu0 %v827_v62 }
 0x176   :  { %v2349_v44 = vpop.f32.mrf.mxu2  ;;  %2846 = vmatmul.f32.gmra.mxu3 %v704_v40 }
 0x177   :  { %v9505_v20 = vadd.f32 %v9462_v59, %v2349_v44 }
 0x179   :  { %13647 = vst [vmem:[#allocation35_spill] sm:$0xff] %v9505_v20  ;;  %v2573_v62 = vpop.f32.mrf.mxu3  ;;  %3261 = vmatmul.f32.gmra.mxu1 %v959_v49  ;;  %v9513_v59 = vpop.f32.mrf.mxu1  ;;  %v829_v20 = vld [vmem:[#allocation2 + $0x31] sm:$0xff] }
 0x17a   :  { %v9509_v50 = vpop.f32.mrf.mxu0  ;;  %13650 = vst [vmem:[#allocation38_spill] sm:$0xff] %v9513_v59  ;;  %v961_v59 = vld [vmem:[#allocation2 + $0x62] sm:$0xff] }
 0x17b   :  { %2625 = vmatmul.f32.gmra.mxu2 %v572_v21 }
 0x17d   :  { %3043 = vmatmul.f32.gmra.mxu0 %v828_v48  ;;  %v960_v48 = vld [vmem:[#allocation2 + $0x52] sm:$0xff] }
 0x17e   :  { %v2352_v29 = vpop.f32.mrf.mxu2  ;;  %2849 = vmatmul.f32.gmra.mxu3 %v705_v27 }
 0x17f   :  { %v9511_v58 = vadd.f32 %v2561_v41, %v2352_v29  ;;  %v830_v29 = vld [vmem:[#allocation2 + $0x39] sm:$0xff] }
 0x181   :  { %13649 = vst [vmem:[#allocation37_spill] sm:$0xff] %v9511_v58  ;;  %v2576_v39 = vpop.f32.mrf.mxu3  ;;  %3264 = vmatmul.f32.gmra.mxu1 %v960_v48  ;;  %v9520_v40 = vpop.f32.mrf.mxu1  ;;  %v706_v58 = vld [vmem:[#allocation2 + $0x68] sm:$0xff] }
 0x182   :  { %v9515_v44 = vpop.f32.mrf.mxu0  ;;  %13653 = vst [vmem:[#allocation41_spill] sm:$0xff] %v9520_v40  ;;  %v707_v40 = vld [vmem:[#allocation2 + $0x78] sm:$0xff] }
 0x183   :  { %13651 = vst [vmem:[#allocation39_spill] sm:$0xff] %v9515_v44  ;;  %2628 = vmatmul.f32.gmra.mxu2 %v9474_v45 }
 0x185   :  { %3046 = vmatmul.f32.gmra.mxu0 %v829_v20 }
 0x186   :  { %v2355_v21 = vpop.f32.mrf.mxu2  ;;  %2852 = vmatmul.f32.gmra.mxu3 %v706_v58 }
 0x187   :  { %v9518_v51 = vadd.f32 %v2564_v35, %v2355_v21  ;;  %v831_v21 = vld [vmem:[#allocation2 + $0x49] sm:$0xff] }
 0x189   :  { %13652 = vst [vmem:[#allocation40_spill] sm:$0xff] %v9518_v51  ;;  %v2579_v45 = vpop.f32.mrf.mxu3  ;;  %3267 = vmatmul.f32.gmra.mxu1 %v961_v59  ;;  %v9526_v27 = vpop.f32.mrf.mxu1  ;;  %v2153_v51 = vld [vmem:[#allocation8 + $0x368] sm:$0xff] }
 0x18a   :  { %v9522_v41 = vpop.f32.mrf.mxu0  ;;  %13656 = vst [vmem:[#allocation44_spill] sm:$0xff] %v9526_v27  ;;  %3444 = vmatpush.msra.mxu2 %v2153_v51  ;;  %v2185_v27 = vld [vmem:[#allocation8 + $0x468] sm:$0xff] }
 0x18b   :  { %13654 = vst [vmem:[#allocation42_spill] sm:$0xff] %v9522_v41  ;;  %2631 = vmatmul.f32.gmra.mxu2 %v956_v38  ;;  %3862 = vmatpush.msra.mxu0 %v2185_v27  ;;  %v964_v27 = vld [vmem:[#allocation2 + $0x82] sm:$0xff] }
 0x18d   :  { %3049 = vmatmul.f32.gmra.mxu0 %v830_v29  ;;  %v962_v29 = vld [vmem:[#allocation2 + $0x6a] sm:$0xff] }
 0x18e   :  { %v2358_v14 = vpop.f32.mrf.mxu2  ;;  %2855 = vmatmul.f32.gmra.mxu3 %v707_v40 }
 0x18f   :  { %v9524_v20 = vadd.f32 %v2567_v28, %v2358_v14 }
 0x191   :  { %13655 = vst [vmem:[#allocation43_spill] sm:$0xff] %v9524_v20  ;;  %v2582_v58 = vpop.f32.mrf.mxu3  ;;  %3270 = vmatmul.f32.gmra.mxu1 %v962_v29  ;;  %v9532_v14 = vpop.f32.mrf.mxu1  ;;  %v832_v20 = vld [vmem:[#allocation2 + $0x51] sm:$0xff] }
 0x192   :  { %v9528_v35 = vpop.f32.mrf.mxu0  ;;  %13659 = vst [vmem:[#allocation47_spill] sm:$0xff] %v9532_v14  ;;  %v709_v14 = vld [vmem:[#allocation2 + $0x90] sm:$0xff] }
 0x193   :  { %13657 = vst [vmem:[#allocation45_spill] sm:$0xff] %v9528_v35  ;;  %2634 = vmatmul.f32.gmra.mxu2 %v957_v52  ;;  %v708_v52 = vld [vmem:[#allocation2 + $0x80] sm:$0xff] }
 0x195   :  { %3052 = vmatmul.f32.gmra.mxu0 %v831_v21  ;;  %v963_v21 = vld [vmem:[#allocation2 + $0x7a] sm:$0xff] }
 0x196   :  { %v2361_v38 = vpop.f32.mrf.mxu2  ;;  %2858 = vmatmul.f32.gmra.mxu3 %v708_v52 }
 0x197   :  { %v9530_v11 = vadd.f32 %v2570_v15, %v2361_v38 }
 0x199   :  { %13658 = vst [vmem:[#allocation46_spill] sm:$0xff] %v9530_v11  ;;  %v2585_v0 = vpop.f32.mrf.mxu3  ;;  %3273 = vmatmul.f32.gmra.mxu1 %v963_v21  ;;  %v9538_v15 = vpop.f32.mrf.mxu1  ;;  %v833_v11 = vld [vmem:[#allocation2 + $0x61] sm:$0xff] }
 0x19a   :  { %v9534_v28 = vpop.f32.mrf.mxu0  ;;  %13662 = vst [vmem:[#allocation50_spill] sm:$0xff] %v9538_v15 }
 0x19b   :  { %13660 = vst [vmem:[#allocation48_spill] sm:$0xff] %v9534_v28  ;;  %2637 = vmatmul.f32.gmra.mxu2 %v958_v1 }
 0x19d   :  { %3055 = vmatmul.f32.gmra.mxu0 %v832_v20 }
 0x19e   :  { %v2364_v51 = vpop.f32.mrf.mxu2  ;;  %2861 = vmatmul.f32.gmra.mxu3 %v709_v14 }
 0x19f   :  { %v9536_v40 = vadd.f32 %v2573_v62, %v2364_v51  ;;  %v834_v51 = vld [vmem:[#allocation2 + $0x69] sm:$0xff] }
 0x1a1   :  { %13661 = vst [vmem:[#allocation49_spill] sm:$0xff] %v9536_v40  ;;  %v2588_v28 = vpop.f32.mrf.mxu3  ;;  %3276 = vmatmul.f32.gmra.mxu1 %v964_v27  ;;  %v9544_v52 = vpop.f32.mrf.mxu1  ;;  %v710_v40 = vld [vmem:[#allocation2 + $0x98] sm:$0xff] }
 0x1a2   :  { %v9540_v38 = vpop.f32.mrf.mxu0  ;;  %13665 = vst [vmem:[#allocation53_spill] sm:$0xff] %v9544_v52  ;;  %v711_v52 = vld [vmem:[#allocation2 + $0xa8] sm:$0xff] }
 0x1a3   :  { %13663 = vst [vmem:[#allocation51_spill] sm:$0xff] %v9540_v38  ;;  %2640 = vmatmul.f32.gmra.mxu2 %v959_v49  ;;  %v965_v38 = vld [vmem:[#allocation2 + $0x92] sm:$0xff] }
 0x1a5   :  { %3058 = vmatmul.f32.gmra.mxu0 %v833_v11 }
 0x1a6   :  { %v2367_v1 = vpop.f32.mrf.mxu2  ;;  %2864 = vmatmul.f32.gmra.mxu3 %v710_v40 }
 0x1a7   :  { %v9542_v20 = vadd.f32 %v2576_v39, %v2367_v1  ;;  %v835_v1 = vld [vmem:[#allocation2 + $0x79] sm:$0xff] }
 0x1a9   :  { %13664 = vst [vmem:[#allocation52_spill] sm:$0xff] %v9542_v20  ;;  %v2591_v49 = vpop.f32.mrf.mxu3  ;;  %3279 = vmatmul.f32.gmra.mxu1 %v965_v38  ;;  %v9550_v14 = vpop.f32.mrf.mxu1  ;;  %v2152_v20 = vld [vmem:[#allocation8 + $0x360] sm:$0xff] }
 0x1aa   :  { %v9546_v62 = vpop.f32.mrf.mxu0  ;;  %13668 = vst [vmem:[#allocation56_spill] sm:$0xff] %v9550_v14  ;;  %3445 = vmatpush.msra.mxu2 %v2152_v20  ;;  %v2184_v14 = vld [vmem:[#allocation8 + $0x460] sm:$0xff] }
 0x1ab   :  { %13666 = vst [vmem:[#allocation54_spill] sm:$0xff] %v9546_v62  ;;  %2643 = vmatmul.f32.gmra.mxu2 %v960_v48  ;;  %v2168_v62 = vld [vmem:[#allocation8 + $0x3e0] sm:$0xff]  ;;  %3863 = vmatpush.msra.mxu0 %v2184_v14 }
 0x1ac   :  { %3654 = vmatpush.msra.mxu3 %v2168_v62 }
 0x1ad   :  { %3061 = vmatmul.f32.gmra.mxu0 %v834_v51  ;;  %v966_v51 = vld [vmem:[#allocation2 + $0x9a] sm:$0xff] }
 0x1ae   :  { %v2370_v15 = vpop.f32.mrf.mxu2  ;;  %2867 = vmatmul.f32.gmra.mxu3 %v711_v52 }
 0x1af   :  { %v9548_v11 = vadd.f32 %v2579_v45, %v2370_v15 }
 0x1b1   :  { %13667 = vst [vmem:[#allocation55_spill] sm:$0xff] %v9548_v11  ;;  %v2594_v40 = vpop.f32.mrf.mxu3  ;;  %3282 = vmatmul.f32.gmra.mxu1 %v966_v51  ;;  %v9556_v45 = vpop.f32.mrf.mxu1  ;;  %v836_v11 = vld [vmem:[#allocation2 + $0x81] sm:$0xff] }
 0x1b2   :  { %v9552_v39 = vpop.f32.mrf.mxu0  ;;  %13671 = vst [vmem:[#allocation59_spill] sm:$0xff] %v9556_v45  ;;  %v713_v45 = vld [vmem:[#allocation2 + $0xc0] sm:$0xff] }
 0x1b3   :  { %13669 = vst [vmem:[#allocation57_spill] sm:$0xff] %v9552_v39  ;;  %2646 = vmatmul.f32.gmra.mxu2 %v961_v59  ;;  %v712_v59 = vld [vmem:[#allocation2 + $0xb0] sm:$0xff] }
 0x1b5   :  { %3064 = vmatmul.f32.gmra.mxu0 %v835_v1  ;;  %v967_v1 = vld [vmem:[#allocation2 + $0xaa] sm:$0xff] }
 0x1b6   :  { %v2373_v48 = vpop.f32.mrf.mxu2  ;;  %2870 = vmatmul.f32.gmra.mxu3 %v712_v59 }
 0x1b7   :  { %v9554_v35 = vadd.f32 %v2582_v58, %v2373_v48  ;;  %v837_v48 = vld [vmem:[#allocation2 + $0x91] sm:$0xff] }
 0x1b9   :  { %13670 = vst [vmem:[#allocation58_spill] sm:$0xff] %v9554_v35  ;;  %v2597_v62 = vpop.f32.mrf.mxu3  ;;  %3285 = vmatmul.f32.gmra.mxu1 %v967_v1  ;;  %v9564_v35 = vpop.f32.mrf.mxu1 }
 0x1ba   :  { %v9558_v15 = vpop.f32.mrf.mxu0  ;;  %13675 = vst [vmem:[#allocation63_spill] sm:$0xff] %v9564_v35 }
 0x1bb   :  { %13672 = vst [vmem:[#allocation60_spill] sm:$0xff] %v9558_v15  ;;  %2649 = vmatmul.f32.gmra.mxu2 %v962_v29  ;;  %v968_v15 = vld [vmem:[#allocation2 + $0xb2] sm:$0xff] }
 0x1bd   :  { %3067 = vmatmul.f32.gmra.mxu0 %v836_v11 }
 0x1be   :  { %v2376_v20 = vpop.f32.mrf.mxu2  ;;  %2873 = vmatmul.f32.gmra.mxu3 %v713_v45 }
 0x1bf   :  { %v9560_v52 = vadd.f32 %v2585_v0, %v2376_v20  ;;  %v838_v0 = vld [vmem:[#allocation2 + $0x99] sm:$0xff] }
 0x1c1   :  { %13673 = vst [vmem:[#allocation61_spill] sm:$0xff] %v9560_v52  ;;  %v2600_v11 = vpop.f32.mrf.mxu3  ;;  %3288 = vmatmul.f32.gmra.mxu1 %v968_v15  ;;  %v9570_v20 = vpop.f32.mrf.mxu1  ;;  %v714_v52 = vld [vmem:[#allocation2 + $0xc8] sm:$0xff] }
 0x1c2   :  { %v9562_v58 = vpop.f32.mrf.mxu0  ;;  %13678 = vst [vmem:[#allocation66_spill] sm:$0xff] %v9570_v20  ;;  %v716_v20 = vld [vmem:[#allocation2 + $0xe0] sm:$0xff] }
 0x1c3   :  { %13674 = vst [vmem:[#allocation62_spill] sm:$0xff] %v9562_v58  ;;  %2652 = vmatmul.f32.gmra.mxu2 %v963_v21  ;;  %v969_v21 = vld [vmem:[#allocation2 + $0xc2] sm:$0xff] }
 0x1c5   :  { %3070 = vmatmul.f32.gmra.mxu0 %v837_v48 }
 0x1c6   :  { %v2379_v29 = vpop.f32.mrf.mxu2  ;;  %2876 = vmatmul.f32.gmra.mxu3 %v714_v52  ;;  %v9578_v52 = vld [vmem:[#allocation2 + $0xca] sm:$0xff] }
 0x1c7   :  { %v9566_v14 = vadd.f32 %v2588_v28, %v2379_v29  ;;  %v839_v28 = vld [vmem:[#allocation2 + $0xa9] sm:$0xff]  ;;  %v2151_v29 = vld [vmem:[#allocation8 + $0x358] sm:$0xff] }
 0x1c8   :  { %3446 = vmatpush.msra.mxu2 %v2151_v29 }
 0x1c9   :  { %13676 = vst [vmem:[#allocation64_spill] sm:$0xff] %v9566_v14  ;;  %3291 = vmatmul.f32.gmra.mxu1 %v969_v21  ;;  %v2603_v45 = vpop.f32.mrf.mxu3  ;;  %v715_v14 = vld [vmem:[#allocation2 + $0xd8] sm:$0xff] }
 0x1ca   :  { %v9568_v59 = vpop.f32.mrf.mxu0 }
 0x1cb   :  { %13677 = vst [vmem:[#allocation65_spill] sm:$0xff] %v9568_v59  ;;  %2655 = vmatmul.f32.gmra.mxu2 %v964_v27  ;;  %v2167_v59 = vld [vmem:[#allocation8 + $0x3d8] sm:$0xff]  ;;  %v9576_v27 = vpop.f32.mrf.mxu1 }
 0x1cc   :  { %13681 = vst [vmem:[#allocation69_spill] sm:$0xff] %v9576_v27  ;;  %3655 = vmatpush.msra.mxu3 %v2167_v59  ;;  %v9585_v59 = vld [vmem:[#allocation2 + $0xda] sm:$0xff]  ;;  %v717_v27 = vld [vmem:[#allocation2 + $0xf0] sm:$0xff] }
 0x1cd   :  { %3073 = vmatmul.f32.gmra.mxu0 %v838_v0 }
 0x1ce   :  { %v2382_v58 = vpop.f32.mrf.mxu2  ;;  %2879 = vmatmul.f32.gmra.mxu3 %v715_v14 }
 0x1cf   :  { %v9572_v35 = vadd.f32 %v2591_v49, %v2382_v58 }
 0x1d1   :  { %13679 = vst [vmem:[#allocation67_spill] sm:$0xff] %v9572_v35  ;;  %3294 = vmatmul.f32.gmra.mxu1 %v9578_v52  ;;  %v2832_v58 = vpop.f32.mrf.mxu3 }
 0x1d2   :  { %v9574_v48 = vpop.f32.mrf.mxu0 }
 0x1d3   :  { %13680 = vst [vmem:[#allocation68_spill] sm:$0xff] %v9574_v48  ;;  %2658 = vmatmul.f32.gmra.mxu2 %v965_v38  ;;  %v840_v38 = vld [vmem:[#allocation2 + $0xb1] sm:$0xff] }
 0x1d5   :  { %3076 = vmatmul.f32.gmra.mxu0 %v839_v28  ;;  %v2183_v28 = vld [vmem:[#allocation8 + $0x458] sm:$0xff] }
 0x1d6   :  { %v2385_v0 = vpop.f32.mrf.mxu2  ;;  %v3250_v29 = vpop.f32.mrf.mxu1  ;;  %2882 = vmatmul.f32.gmra.mxu3 %v716_v20  ;;  %3864 = vmatpush.msra.mxu0 %v2183_v28  ;;  %v842_v28 = vld [vmem:[#allocation2 + $0xc9] sm:$0xff] }
 0x1d7   :  { %v9580_v49 = vadd.f32 %v2594_v40, %v2385_v0 }
 0x1d9   :  { %13682 = vst [vmem:[#allocation70_spill] sm:$0xff] %v9580_v49  ;;  %3297 = vmatmul.f32.gmra.mxu1 %v9585_v59  ;;  %v2835_v40 = vpop.f32.mrf.mxu3  ;;  %v841_v49 = vld [vmem:[#allocation2 + $0xc1] sm:$0xff] }
 0x1da   :  { %v9583_v35 = vpop.f32.mrf.mxu0 }
 0x1db   :  { %13683 = vst [vmem:[#allocation71_spill] sm:$0xff] %v9583_v35  ;;  %2661 = vmatmul.f32.gmra.mxu2 %v966_v51  ;;  %v9592_v35 = vld [vmem:[#allocation2 + $0xe2] sm:$0xff] }
 0x1dd   :  { %3079 = vmatmul.f32.gmra.mxu0 %v840_v38 }
 0x1de   :  { %v2388_v48 = vpop.f32.mrf.mxu2  ;;  %v3253_v51 = vpop.f32.mrf.mxu1  ;;  %2885 = vmatmul.f32.gmra.mxu3 %v717_v27 }
 0x1df   :  { %v9587_v14 = vadd.f32 %v2597_v62, %v2388_v48 }
 0x1e1   :  { %13684 = vst [vmem:[#allocation72_spill] sm:$0xff] %v9587_v14  ;;  %3300 = vmatmul.f32.gmra.mxu1 %v9592_v35  ;;  %v9597_v62 = vpop.f32.mrf.mxu3  ;;  %v718_v14 = vld [vmem:[#allocation2 + $0xf8] sm:$0xff] }
 0x1e2   :  { %v9590_v0 = vpop.f32.mrf.mxu0 }
 0x1e3   :  { %13685 = vst [vmem:[#allocation73_spill] sm:$0xff] %v9590_v0  ;;  %2664 = vmatmul.f32.gmra.mxu2 %v967_v1  ;;  %v9603_v0 = vld [vmem:[#allocation2 + $0xf2] sm:$0xff] }
 0x1e5   :  { %3082 = vmatmul.f32.gmra.mxu0 %v841_v49 }
 0x1e6   :  { %v2391_v38 = vpop.f32.mrf.mxu2  ;;  %v9601_v1 = vpop.f32.mrf.mxu1  ;;  %2888 = vmatmul.f32.gmra.mxu3 %v718_v14  ;;  %v2166_v14 = vld [vmem:[#allocation8 + $0x3d0] sm:$0xff] }
 0x1e7   :  { %v9594_v20 = vadd.f32 %v2600_v11, %v2391_v38  ;;  %3656 = vmatpush.msra.mxu3 %v2166_v14 }
 0x1e9   :  { %13686 = vst [vmem:[#allocation74_spill] sm:$0xff] %v9594_v20  ;;  %3303 = vmatmul.f32.gmra.mxu1 %v9603_v0  ;;  %v9608_v11 = vpop.f32.mrf.mxu3  ;;  %v843_v20 = vld [vmem:[#allocation2 + $0xd9] sm:$0xff] }
 0x1ea   :  { %v9599_v48 = vpop.f32.mrf.mxu0 }
 0x1eb   :  { %13687 = vst [vmem:[#allocation75_spill] sm:$0xff] %v9599_v48  ;;  %2667 = vmatmul.f32.gmra.mxu2 %v968_v15  ;;  %v2150_v48 = vld [vmem:[#allocation8 + $0x350] sm:$0xff]  ;;  %v719_v15 = vld [vmem:[#allocation2 + $0x108] sm:$0xff] }
 0x1ec   :  { %3447 = vmatpush.msra.mxu2 %v2150_v48 }
 0x1ed   :  { %3085 = vmatmul.f32.gmra.mxu0 %v842_v28  ;;  %v2415_v28 = vadd.f32 %v9340_v53, %v9350_v10  ;;  %v720_v53 = vld [vmem:[#allocation2 + $0x110] sm:$0xff]  ;;  %v2418_v10 = vadd.f32 %v9344_v61, %v9360_v22  ;;  %v721_v22 = vld [vmem:[#allocation2 + $0x120] sm:$0xff] }
 0x1ee   :  { %v2394_v49 = vpop.f32.mrf.mxu2  ;;  %v9612_v39 = vpop.f32.mrf.mxu1  ;;  %2891 = vmatmul.f32.gmra.mxu3 %v719_v15 }
 0x1ef   :  { %v9605_v27 = vadd.f32 %v2603_v45, %v2394_v49  ;;  %v9614_v45 = vld [vmem:[#allocation2 + $0xfa] sm:$0xff] }
 0x1f1   :  { %13688 = vst [vmem:[#allocation76_spill] sm:$0xff] %v9605_v27  ;;  %3306 = vmatmul.f32.gmra.mxu1 %v9614_v45 }
 0x1f2   :  { %v3041_v38 = vpop.f32.mrf.mxu0 }
 0x1f3   :  { %2670 = vmatmul.f32.gmra.mxu2 %v969_v21  ;;  %v9617_v21 = vpop.f32.mrf.mxu3 }
 0x1f5   :  { %3088 = vmatmul.f32.gmra.mxu0 %v843_v20 }
 0x1f6   :  { %v2623_v41 = vpop.f32.mrf.mxu2  ;;  %v9624_v15 = vpop.f32.mrf.mxu1  ;;  %2894 = vmatmul.f32.gmra.mxu3 %v720_v53 }
 0x1f7   :  { %v2624_v49 = vadd.f32 %v2623_v41, %v2415_v28  ;;  %v2182_v41 = vld [vmem:[#allocation8 + $0x450] sm:$0xff] }
 0x1f8   :  { %3865 = vmatpush.msra.mxu0 %v2182_v41 }
 0x1f9   :  { %v2833_v27 = vadd.f32 %v2832_v58, %v2624_v49  ;;  %v9626_v58 = vld [vmem:[#allocation2 + $0x10a] sm:$0xff] }
 0x1fa   :  { %v3044_v48 = vpop.f32.mrf.mxu0  ;;  %3309 = vmatmul.f32.gmra.mxu1 %v9626_v58  ;;  %v845_v49 = vld [vmem:[#allocation2 + $0xf1] sm:$0xff] }
 0x1fb   :  { %v3042_v44 = vadd.f32 %v3041_v38, %v2833_v27  ;;  %2673 = vmatmul.f32.gmra.mxu2 %v9578_v52  ;;  %v9629_v52 = vpop.f32.mrf.mxu3 }
 0x1fd   :  { %v9622_v20 = vadd.f32 %v3250_v29, %v3042_v44  ;;  %3091 = vmatmul.f32.gmra.mxu0 %v844_v12  ;;  %v2421_v12 = vadd.f32 %v9348_v5, %v9370_v32  ;;  %v722_v5 = vld [vmem:[#allocation2 + $0x128] sm:$0xff]  ;;  %v2424_v32 = vadd.f32 %v9354_v13, %v9379_v43 }
 0x1fe   :  { %v2626_v28 = vpop.f32.mrf.mxu2  ;;  %v9636_v29 = vpop.f32.mrf.mxu1  ;;  %2897 = vmatmul.f32.gmra.mxu3 %v721_v22  ;;  %v2149_v43 = vld [vmem:[#allocation8 + $0x348] sm:$0xff] }
 0x1ff   :  { %v2627_v14 = vadd.f32 %v2626_v28, %v2418_v10  ;;  %v9638_v10 = vld [vmem:[#allocation2 + $0x112] sm:$0xff]  ;;  %3448 = vmatpush.msra.mxu2 %v2149_v43 }
 0x200   :  { %v846_v28 = vld [vmem:[#allocation2 + $0xf9] sm:$0xff] }
 0x201   :  { %v2836_v27 = vadd.f32 %v2835_v40, %v2627_v14 }
 0x202   :  { %v3047_v38 = vpop.f32.mrf.mxu0  ;;  %3312 = vmatmul.f32.gmra.mxu1 %v9638_v10 }
 0x203   :  { %v3045_v61 = vadd.f32 %v3044_v48, %v2836_v27  ;;  %2676 = vmatmul.f32.gmra.mxu2 %v9585_v59  ;;  %v9642_v41 = vpop.f32.mrf.mxu3 }
 0x205   :  { %v9634_v44 = vadd.f32 %v3253_v51, %v3045_v61  ;;  %3094 = vmatmul.f32.gmra.mxu0 %v845_v49 }
 0x206   :  { %v2629_v53 = vpop.f32.mrf.mxu2  ;;  %v9650_v27 = vpop.f32.mrf.mxu1  ;;  %2900 = vmatmul.f32.gmra.mxu3 %v722_v5 }
 0x207   :  { %v2630_v40 = vadd.f32 %v2629_v53, %v2421_v12  ;;  %v847_v12 = vld [vmem:[#allocation2 + $0x109] sm:$0xff]  ;;  %v2427_v53 = vadd.f32 %v9362_v23, %v9388_v55  ;;  %v848_v55 = vld [vmem:[#allocation2 + $0x111] sm:$0xff] }
 0x209   :  { %v2839_v48 = vadd.f32 %v9597_v62, %v2630_v40  ;;  %v9652_v62 = vld [vmem:[#allocation2 + $0x122] sm:$0xff] }
 0x20a   :  { %v3050_v59 = vpop.f32.mrf.mxu0  ;;  %3315 = vmatmul.f32.gmra.mxu1 %v9652_v62 }
 0x20b   :  { %v3048_v14 = vadd.f32 %v3047_v38, %v2839_v48  ;;  %2679 = vmatmul.f32.gmra.mxu2 %v9592_v35  ;;  %v9656_v35 = vpop.f32.mrf.mxu3 }
 0x20d   :  { %v9648_v51 = vadd.f32 %v9601_v1, %v3048_v14  ;;  %3097 = vmatmul.f32.gmra.mxu0 %v846_v28  ;;  %v723_v1 = vld [vmem:[#allocation2 + $0x138] sm:$0xff]  ;;  %v9666_v14 = vld [vmem:[#allocation2 + $0x12a] sm:$0xff] }
 0x20e   :  { %v2632_v49 = vpop.f32.mrf.mxu2  ;;  %v9664_v48 = vpop.f32.mrf.mxu1  ;;  %2903 = vmatmul.f32.gmra.mxu3 %v723_v1  ;;  %v725_v1 = vld [vmem:[#allocation2 + $0x150] sm:$0xff] }
 0x20f   :  { %v2633_v61 = vadd.f32 %v2632_v49, %v2424_v32  ;;  %v724_v32 = vld [vmem:[#allocation2 + $0x140] sm:$0xff]  ;;  %v2430_v49 = vadd.f32 %v9368_v31, %v9397_v4 }
 0x210   :  { %v849_v4 = vld [vmem:[#allocation2 + $0x121] sm:$0xff] }
 0x211   :  { %v2842_v38 = vadd.f32 %v9608_v11, %v2633_v61  ;;  %v2165_v11 = vld [vmem:[#allocation8 + $0x3c8] sm:$0xff] }
 0x212   :  { %v3053_v22 = vpop.f32.mrf.mxu0  ;;  %3657 = vmatpush.msra.mxu3 %v2165_v11  ;;  %3318 = vmatmul.f32.gmra.mxu1 %v9666_v14 }
 0x213   :  { %v3051_v13 = vadd.f32 %v3050_v59, %v2842_v38  ;;  %2682 = vmatmul.f32.gmra.mxu2 %v9603_v0  ;;  %v9670_v5 = vpop.f32.mrf.mxu3 }
 0x215   :  { %v9662_v40 = vadd.f32 %v9612_v39, %v3051_v13  ;;  %3100 = vmatmul.f32.gmra.mxu0 %v847_v12  ;;  %v2181_v12 = vld [vmem:[#allocation8 + $0x448] sm:$0xff] }
 0x216   :  { %v2635_v28 = vpop.f32.mrf.mxu2  ;;  %v9678_v38 = vpop.f32.mrf.mxu1  ;;  %2906 = vmatmul.f32.gmra.mxu3 %v724_v32  ;;  %3866 = vmatpush.msra.mxu0 %v2181_v12 }
 0x217   :  { %v2636_v59 = vadd.f32 %v2635_v28, %v2427_v53  ;;  %v2433_v53 = vadd.f32 %v9377_v42, %v9406_v18  ;;  %v2436_v18 = vadd.f32 %v9386_v54, %v9415_v34  ;;  %v851_v54 = vld [vmem:[#allocation2 + $0x139] sm:$0xff] }
 0x219   :  { %v2845_v0 = vadd.f32 %v9617_v21, %v2636_v59  ;;  %v9680_v21 = vld [vmem:[#allocation2 + $0x13a] sm:$0xff] }
 0x21a   :  { %v3056_v23 = vpop.f32.mrf.mxu0  ;;  %3321 = vmatmul.f32.gmra.mxu1 %v9680_v21 }
 0x21b   :  { %v3054_v39 = vadd.f32 %v3053_v22, %v2845_v0  ;;  %2685 = vmatmul.f32.gmra.mxu2 %v9614_v45  ;;  %v9684_v22 = vpop.f32.mrf.mxu3 }
 0x21d   :  { %v9676_v61 = vadd.f32 %v9624_v15, %v3054_v39  ;;  %3103 = vmatmul.f32.gmra.mxu0 %v848_v55  ;;  %v850_v39 = vld [vmem:[#allocation2 + $0x129] sm:$0xff] }
 0x21e   :  { %v2638_v13 = vpop.f32.mrf.mxu2  ;;  %v9692_v28 = vpop.f32.mrf.mxu1  ;;  %2909 = vmatmul.f32.gmra.mxu3 %v725_v1 }
 0x21f   :  { %v2639_v43 = vadd.f32 %v2638_v13, %v2430_v49 }
 0x221   :  { %v2848_v45 = vadd.f32 %v9629_v52, %v2639_v43  ;;  %v9694_v52 = vld [vmem:[#allocation2 + $0x142] sm:$0xff] }
 0x222   :  { %v3059_v31 = vpop.f32.mrf.mxu0  ;;  %3324 = vmatmul.f32.gmra.mxu1 %v9694_v52 }
 0x223   :  { %v3057_v15 = vadd.f32 %v3056_v23, %v2848_v45  ;;  %2688 = vmatmul.f32.gmra.mxu2 %v9626_v58  ;;  %v9698_v58 = vpop.f32.mrf.mxu3  ;;  %v2439_v45 = vadd.f32 %v9395_v3, %v9424_v47  ;;  %v852_v47 = vld [vmem:[#allocation2 + $0x141] sm:$0xff] }
 0x225   :  { %v9690_v11 = vadd.f32 %v9636_v29, %v3057_v15  ;;  %3106 = vmatmul.f32.gmra.mxu0 %v849_v4  ;;  %v2164_v4 = vld [vmem:[#allocation8 + $0x3c0] sm:$0xff] }
 0x226   :  { %v2641_v59 = vpop.f32.mrf.mxu2  ;;  %v9706_v32 = vpop.f32.mrf.mxu1  ;;  %2912 = vmatmul.f32.gmra.mxu3 %v9471_v30  ;;  %v9724_v15 = vld [vmem:[#allocation2 + $0x15a] sm:$0xff] }
 0x227   :  { %v2642_v0 = vadd.f32 %v2641_v59, %v2433_v53  ;;  %3658 = vmatpush.msra.mxu3 %v2164_v4  ;;  %v9731_v59 = vld [vmem:[#allocation5 + $0xf0] sm:$0xff]  ;;  %v2448_v4 = vadd.f32 %v9422_v46, %v9451_v63  ;;  %v2147_v46 = vld [vmem:[#allocation8 + $0x338] sm:$0xff]  ;;  %v731_v63 = vld [vmem:[#allocation2 + $0x1c8] sm:$0xff] }
 0x228   :  { %281 = vst [vmem:[#allocation2 + $0x181] sm:$0xff] %v9731_v59 }
 0x229   :  { %v2851_v23 = vadd.f32 %v9642_v41, %v2642_v0  ;;  %v9709_v41 = vld [vmem:[#allocation2 + $0x152] sm:$0xff] }
 0x22a   :  { %v3062_v55 = vpop.f32.mrf.mxu0  ;;  %3327 = vmatmul.f32.gmra.mxu1 %v9709_v41 }
 0x22b   :  { %v3060_v42 = vadd.f32 %v3059_v31, %v2851_v23  ;;  %2691 = vmatmul.f32.gmra.mxu2 %v9638_v10  ;;  %v9713_v10 = vpop.f32.mrf.mxu3 }
 0x22d   :  { %v9704_v29 = vadd.f32 %v9650_v27, %v3060_v42  ;;  %3109 = vmatmul.f32.gmra.mxu0 %v850_v39  ;;  %v2148_v27 = vld [vmem:[#allocation8 + $0x340] sm:$0xff]  ;;  %v9742_v39 = vld [vmem:[#allocation2 + $0x16a] sm:$0xff] }
 0x22e   :  { %v2644_v49 = vpop.f32.mrf.mxu2  ;;  %3449 = vmatpush.msra.mxu2 %v2148_v27  ;;  %v9721_v31 = vpop.f32.mrf.mxu1  ;;  %2915 = vmatmul.f32.gmra.mxu3 %v9484_v9  ;;  %v2442_v9 = vadd.f32 %v9404_v17, %v9433_v6  ;;  %v853_v42 = vld [vmem:[#allocation2 + $0x151] sm:$0xff] }
 0x22f   :  { %v2645_v12 = vadd.f32 %v2644_v49, %v2436_v18  ;;  %v729_v49 = vld [vmem:[#allocation2 + $0x180] sm:$0xff] }
 0x230   :  { %3450 = vmatpush.msra.mxu2 %v2147_v46 }
 0x231   :  { %v2854_v13 = vadd.f32 %v9656_v35, %v2645_v12  ;;  %v9749_v12 = vld [vmem:[#allocation5 + $0xf8] sm:$0xff] }
 0x232   :  { %v3065_v43 = vpop.f32.mrf.mxu0  ;;  %3330 = vmatmul.f32.gmra.mxu1 %v9724_v15  ;;  %282 = vst [vmem:[#allocation2 + $0x189] sm:$0xff] %v9749_v12 }
 0x233   :  { %v3063_v34 = vadd.f32 %v3062_v55, %v2854_v13  ;;  %2694 = vmatmul.f32.gmra.mxu2 %v9652_v62  ;;  %v9728_v53 = vpop.f32.mrf.mxu3  ;;  %v2180_v55 = vld [vmem:[#allocation8 + $0x440] sm:$0xff] }
 0x234   :  { %3867 = vmatpush.msra.mxu0 %v2180_v55 }
 0x235   :  { %v9719_v30 = vadd.f32 %v9664_v48, %v3063_v34  ;;  %3112 = vmatmul.f32.gmra.mxu0 %v851_v54  ;;  %v9759_v54 = vld [vmem:[#allocation2 + $0x172] sm:$0xff] }
 0x236   :  { %v2647_v35 = vpop.f32.mrf.mxu2  ;;  %v9738_v23 = vpop.f32.mrf.mxu1  ;;  %2918 = vmatmul.f32.gmra.mxu3 %v9494_v7  ;;  %v2445_v7 = vadd.f32 %v9413_v33, %v9442_v26  ;;  %v854_v26 = vld [vmem:[#allocation2 + $0x159] sm:$0xff] }
 0x237   :  { %v2648_v1 = vadd.f32 %v2647_v35, %v2439_v45 }
 0x239   :  { %v2857_v62 = vadd.f32 %v9670_v5, %v2648_v1  ;;  %v730_v45 = vld [vmem:[#allocation2 + $0x188] sm:$0xff] }
 0x23a   :  { %v3068_v3 = vpop.f32.mrf.mxu0  ;;  %3333 = vmatmul.f32.gmra.mxu1 %v9742_v39 }
 0x23b   :  { %v3066_v48 = vadd.f32 %v3065_v43, %v2857_v62  ;;  %2697 = vmatmul.f32.gmra.mxu2 %v9666_v14  ;;  %v9746_v6 = vpop.f32.mrf.mxu3 }
 0x23d   :  { %v9736_v0 = vadd.f32 %v9678_v38, %v3066_v48  ;;  %3115 = vmatmul.f32.gmra.mxu0 %v852_v47 }
 0x23e   :  { %v2650_v5 = vpop.f32.mrf.mxu2  ;;  %v9756_v43 = vpop.f32.mrf.mxu1  ;;  %2921 = vmatmul.f32.gmra.mxu3 %v729_v49 }
 0x23f   :  { %v2651_v14 = vadd.f32 %v2650_v5, %v2442_v9  ;;  %v855_v9 = vld [vmem:[#allocation2 + $0x169] sm:$0xff] }
 0x241   :  { %v2860_v17 = vadd.f32 %v9684_v22, %v2651_v14 }
 0x242   :  { %v3071_v38 = vpop.f32.mrf.mxu0  ;;  %3336 = vmatmul.f32.gmra.mxu1 %v9759_v54 }
 0x243   :  { %v3069_v18 = vadd.f32 %v3068_v3, %v2860_v17  ;;  %2700 = vmatmul.f32.gmra.mxu2 %v9680_v21  ;;  %v9763_v27 = vpop.f32.mrf.mxu3 }
 0x245   :  { %v9754_v13 = vadd.f32 %v9692_v28, %v3069_v18  ;;  %3118 = vmatmul.f32.gmra.mxu0 %v853_v42 }
 0x246   :  { %v2653_v22 = vpop.f32.mrf.mxu2  ;;  %v9771_v1 = vpop.f32.mrf.mxu1  ;;  %2924 = vmatmul.f32.gmra.mxu3 %v730_v45  ;;  %v2457_v45 = vadd.f32 %v9449_v60, %v9482_v8  ;;  %v734_v8 = vld [vmem:[#allocation2 + $0x1e8] sm:$0xff] }
 0x247   :  { %v2654_v34 = vadd.f32 %v2653_v22, %v2445_v7  ;;  %v9049_v22 = vld [vmem:[#allocation2 + $0x171] sm:$0xff] }
 0x249   :  { %v2863_v21 = vadd.f32 %v9698_v58, %v2654_v34  ;;  %v985_v58 = vld [vmem:[#allocation2 + $0x182] sm:$0xff] }
 0x24a   :  { %v3074_v33 = vpop.f32.mrf.mxu0  ;;  %3339 = vmatmul.f32.gmra.mxu1 %v985_v58 }
 0x24b   :  { %v3072_v28 = vadd.f32 %v3071_v38, %v2863_v21  ;;  %2703 = vmatmul.f32.gmra.mxu2 %v9694_v52  ;;  %v9774_v48 = vpop.f32.mrf.mxu3  ;;  %v986_v38 = vld [vmem:[#allocation2 + $0x18a] sm:$0xff]  ;;  %v2179_v21 = vld [vmem:[#allocation8 + $0x438] sm:$0xff] }
 0x24c   :  { %3868 = vmatpush.msra.mxu0 %v2179_v21  ;;  %v736_v21 = vld [vmem:[#allocation2 + $0x200] sm:$0xff] }
 0x24d   :  { %v9769_v35 = vadd.f32 %v9706_v32, %v3072_v28  ;;  %3121 = vmatmul.f32.gmra.mxu0 %v854_v26  ;;  %v2451_v32 = vadd.f32 %v9431_v2, %v9460_v37  ;;  %v732_v2 = vld [vmem:[#allocation2 + $0x1d0] sm:$0xff]  ;;  %v2454_v37 = vadd.f32 %v9440_v25, %v9469_v24 }
 0x24e   :  { %v2656_v62 = vpop.f32.mrf.mxu2  ;;  %v9782_v14 = vpop.f32.mrf.mxu1  ;;  %2927 = vmatmul.f32.gmra.mxu3 %v731_v63  ;;  %v603_v63 = vld [vmem:[#allocation2 + $0x1b2] sm:$0xff] }
 0x24f   :  { %v2657_v3 = vadd.f32 %v2656_v62, %v2448_v4 }
 0x251   :  { %v2866_v47 = vadd.f32 %v9713_v10, %v2657_v3  ;;  %v2163_v10 = vld [vmem:[#allocation8 + $0x3b8] sm:$0xff] }
 0x252   :  { %v3077_v52 = vpop.f32.mrf.mxu0  ;;  %3659 = vmatpush.msra.mxu3 %v2163_v10  ;;  %3342 = vmatmul.f32.gmra.mxu1 %v986_v38  ;;  %v2146_v10 = vld [vmem:[#allocation8 + $0x330] sm:$0xff] }
 0x253   :  { %v3075_v55 = vadd.f32 %v3074_v33, %v2866_v47  ;;  %2706 = vmatmul.f32.gmra.mxu2 %v9709_v41  ;;  %v9785_v18 = vpop.f32.mrf.mxu3 }
 0x254   :  { %3451 = vmatpush.msra.mxu2 %v2146_v10  ;;  %v13692_v10 = vld [vmem:[#allocation34_spill] sm:$0xff] }
 0x255   :  { %v9780_v5 = vadd.f32 %v9721_v31, %v3075_v55  ;;  %3124 = vmatmul.f32.gmra.mxu0 %v855_v9 }
 0x256   :  { %v2659_v17 = vpop.f32.mrf.mxu2  ;;  %v9793_v34 = vpop.f32.mrf.mxu1  ;;  %2930 = vmatmul.f32.gmra.mxu3 %v732_v2  ;;  %v604_v2 = vld [vmem:[#allocation2 + $0x1ba] sm:$0xff] }
 0x257   :  { %v2660_v42 = vadd.f32 %v2659_v17, %v2451_v32  ;;  %v2463_v17 = vadd.f32 %v9467_v16, %v9502_v19  ;;  %v860_v19 = vld [vmem:[#allocation2 + $0x1d1] sm:$0xff] }
 0x259   :  { %v2869_v41 = vadd.f32 %v9728_v53, %v2660_v42  ;;  %v9795_v53 = vld [vmem:[#allocation2 + $0x1ca] sm:$0xff] }
 0x25a   :  { %v3080_v49 = vpop.f32.mrf.mxu0  ;;  %3345 = vmatmul.f32.gmra.mxu1 %v9795_v53 }
 0x25b   :  { %v3078_v7 = vadd.f32 %v3077_v52, %v2869_v41  ;;  %2709 = vmatmul.f32.gmra.mxu2 %v9724_v15  ;;  %v9799_v28 = vpop.f32.mrf.mxu3  ;;  %v2162_v41 = vld [vmem:[#allocation8 + $0x3b0] sm:$0xff] }
 0x25c   :  { %3660 = vmatpush.msra.mxu3 %v2162_v41 }
 0x25d   :  { %v9791_v31 = vadd.f32 %v9738_v23, %v3078_v7  ;;  %3127 = vmatmul.f32.gmra.mxu0 %v9049_v22  ;;  %v733_v23 = vld [vmem:[#allocation2 + $0x1e0] sm:$0xff] }
 0x25e   :  { %v2662_v33 = vpop.f32.mrf.mxu2  ;;  %v9808_v62 = vpop.f32.mrf.mxu1  ;;  %2933 = vmatmul.f32.gmra.mxu3 %v733_v23 }
 0x25f   :  { %v2663_v26 = vadd.f32 %v2662_v33, %v2454_v37  ;;  %v2466_v33 = vadd.f32 %v9480_v57, %v9509_v50  ;;  %v861_v57 = vld [vmem:[#allocation2 + $0x1e1] sm:$0xff] }
 0x261   :  { %v2872_v15 = vadd.f32 %v9746_v6, %v2663_v26  ;;  %v9810_v6 = vld [vmem:[#allocation2 + $0x1d2] sm:$0xff] }
 0x262   :  { %v3083_v25 = vpop.f32.mrf.mxu0  ;;  %3348 = vmatmul.f32.gmra.mxu1 %v9810_v6 }
 0x263   :  { %v3081_v24 = vadd.f32 %v3080_v49, %v2872_v15  ;;  %2712 = vmatmul.f32.gmra.mxu2 %v9742_v39  ;;  %v9814_v47 = vpop.f32.mrf.mxu3  ;;  %v9838_v49 = vld [vmem:[#allocation2 + $0x1ea] sm:$0xff] }
 0x265   :  { %v9805_v4 = vadd.f32 %v9756_v43, %v3081_v24  ;;  %3130 = vmatmul.f32.gmra.mxu0 %v9731_v59  ;;  %v2460_v59 = vadd.f32 %v9458_v36, %v9492_v56  ;;  %v859_v56 = vld [vmem:[#allocation2 + $0x1c9] sm:$0xff] }
 0x266   :  { %v2665_v58 = vpop.f32.mrf.mxu2  ;;  %v9823_v9 = vpop.f32.mrf.mxu1  ;;  %2936 = vmatmul.f32.gmra.mxu3 %v734_v8 }
 0x267   :  { %v2666_v3 = vadd.f32 %v2665_v58, %v2457_v45 }
 0x269   :  { %v2875_v39 = vadd.f32 %v9763_v27, %v2666_v3  ;;  %v9825_v27 = vld [vmem:[#allocation2 + $0x1e2] sm:$0xff]  ;;  %v737_v3 = vld [vmem:[#allocation2 + $0x210] sm:$0xff] }
 0x26a   :  { %v3086_v52 = vpop.f32.mrf.mxu0  ;;  %3351 = vmatmul.f32.gmra.mxu1 %v9825_v27 }
 0x26b   :  { %v3084_v60 = vadd.f32 %v3083_v25, %v2875_v39  ;;  %2715 = vmatmul.f32.gmra.mxu2 %v9759_v54  ;;  %v9829_v32 = vpop.f32.mrf.mxu3  ;;  %v2178_v25 = vld [vmem:[#allocation8 + $0x430] sm:$0xff]  ;;  %v13689_v39 = vld [vmem:[#allocation39_spill] sm:$0xff] }
 0x26c   :  { %3869 = vmatpush.msra.mxu0 %v2178_v25 }
 0x26d   :  { %v9820_v43 = vadd.f32 %v9771_v1, %v3084_v60  ;;  %3133 = vmatmul.f32.gmra.mxu0 %v9749_v12  ;;  %v735_v12 = vld [vmem:[#allocation2 + $0x1f8] sm:$0xff] }
 0x26e   :  { %v2668_v55 = vpop.f32.mrf.mxu2  ;;  %v9836_v42 = vpop.f32.mrf.mxu1  ;;  %2939 = vmatmul.f32.gmra.mxu3 %v735_v12 }
 0x26f   :  { %v2669_v46 = vadd.f32 %v2668_v55, %v2460_v59 }
 0x271   :  { %v2878_v54 = vadd.f32 %v9774_v48, %v2669_v46 }
 0x272   :  { %v3089_v36 = vpop.f32.mrf.mxu0  ;;  %3354 = vmatmul.f32.gmra.mxu1 %v9838_v49 }
 0x273   :  { %v3087_v1 = vadd.f32 %v3086_v52, %v2878_v54  ;;  %2718 = vmatmul.f32.gmra.mxu2 %v603_v63  ;;  %v9842_v22 = vpop.f32.mrf.mxu3  ;;  %v13690_v52 = vld [vmem:[#allocation32_spill] sm:$0xff] }
 0x274   :  { %v2469_v60 = vadd.f32 %v13690_v52, %v13689_v39  ;;  %v864_v39 = vld [vmem:[#allocation2 + $0x201] sm:$0xff]  ;;  %v740_v52 = vld [vmem:[#allocation2 + $0x230] sm:$0xff] }
 0x275   :  { %v9834_v38 = vadd.f32 %v9782_v14, %v3087_v1  ;;  %3136 = vmatmul.f32.gmra.mxu0 %v859_v56  ;;  %v13691_v1 = vld [vmem:[#allocation42_spill] sm:$0xff] }
 0x276   :  { %v2671_v48 = vpop.f32.mrf.mxu2  ;;  %2942 = vmatmul.f32.gmra.mxu3 %v736_v21  ;;  %v2472_v12 = vadd.f32 %v13692_v10, %v13691_v1  ;;  %v13693_v21 = vld [vmem:[#allocation45_spill] sm:$0xff] }
 0x277   :  { %v2672_v7 = vadd.f32 %v2671_v48, %v2463_v17  ;;  %v9849_v15 = vpop.f32.mrf.mxu1 }
 0x279   :  { %v2881_v37 = vadd.f32 %v9785_v18, %v2672_v7  ;;  %v9851_v18 = vld [vmem:[#allocation2 + $0x1fa] sm:$0xff] }
 0x27a   :  { %v3092_v16 = vpop.f32.mrf.mxu0  ;;  %3357 = vmatmul.f32.gmra.mxu1 %v9851_v18 }
 0x27b   :  { %v3090_v14 = vadd.f32 %v3089_v36, %v2881_v37  ;;  %2721 = vmatmul.f32.gmra.mxu2 %v604_v2  ;;  %v9855_v58 = vpop.f32.mrf.mxu3  ;;  %v862_v36 = vld [vmem:[#allocation2 + $0x1e9] sm:$0xff] }
 0x27d   :  { %v9847_v26 = vadd.f32 %v9793_v34, %v3090_v14  ;;  %3139 = vmatmul.f32.gmra.mxu0 %v860_v19  ;;  %v739_v14 = vld [vmem:[#allocation2 + $0x228] sm:$0xff] }
 0x27e   :  { %v2674_v24 = vpop.f32.mrf.mxu2  ;;  %2945 = vmatmul.f32.gmra.mxu3 %v737_v3 }
 0x27f   :  { %v2675_v23 = vadd.f32 %v2674_v24, %v2466_v33  ;;  %v9863_v59 = vpop.f32.mrf.mxu1  ;;  %v13694_v33 = vld [vmem:[#allocation36_spill] sm:$0xff] }
 0x280   :  { %v2475_v25 = vadd.f32 %v13694_v33, %v13693_v21 }
 0x281   :  { %v2884_v45 = vadd.f32 %v9799_v28, %v2675_v23  ;;  %v9865_v28 = vld [vmem:[#allocation2 + $0x202] sm:$0xff] }
 0x282   :  { %v3095_v50 = vpop.f32.mrf.mxu0  ;;  %3360 = vmatmul.f32.gmra.mxu1 %v9865_v28 }
 0x283   :  { %v3093_v34 = vadd.f32 %v3092_v16, %v2884_v45  ;;  %2724 = vmatmul.f32.gmra.mxu2 %v9795_v53  ;;  %v9869_v53 = vpop.f32.mrf.mxu3  ;;  %v863_v16 = vld [vmem:[#allocation2 + $0x1f9] sm:$0xff] }
 0x285   :  { %v9861_v8 = vadd.f32 %v9808_v62, %v3093_v34  ;;  %3142 = vmatmul.f32.gmra.mxu0 %v861_v57  ;;  %v738_v62 = vld [vmem:[#allocation2 + $0x218] sm:$0xff] }
 0x286   :  { %v2677_v55 = vpop.f32.mrf.mxu2  ;;  %2948 = vmatmul.f32.gmra.mxu3 %v738_v62 }
 0x287   :  { %v2678_v46 = vadd.f32 %v2677_v55, %v2469_v60  ;;  %v9877_v41 = vpop.f32.mrf.mxu1  ;;  %v13695_v60 = vld [vmem:[#allocation48_spill] sm:$0xff]  ;;  %v13696_v55 = vld [vmem:[#allocation38_spill] sm:$0xff] }
 0x289   :  { %v2887_v63 = vadd.f32 %v9814_v47, %v2678_v46  ;;  %v9879_v47 = vld [vmem:[#allocation2 + $0x212] sm:$0xff]  ;;  %v2478_v46 = vadd.f32 %v13696_v55, %v13695_v60 }
 0x28a   :  { %v3098_v54 = vpop.f32.mrf.mxu0  ;;  %3363 = vmatmul.f32.gmra.mxu1 %v9879_v47 }
 0x28b   :  { %v3096_v56 = vadd.f32 %v3095_v50, %v2887_v63  ;;  %2727 = vmatmul.f32.gmra.mxu2 %v9810_v6  ;;  %v9883_v6 = vpop.f32.mrf.mxu3  ;;  %v9893_v50 = vld [vmem:[#allocation2 + $0x21a] sm:$0xff] }
 0x28d   :  { %v9875_v17 = vadd.f32 %v9823_v9, %v3096_v56  ;;  %3145 = vmatmul.f32.gmra.mxu0 %v862_v36  ;;  %v2145_v9 = vld [vmem:[#allocation8 + $0x328] sm:$0xff] }
 0x28e   :  { %v2680_v48 = vpop.f32.mrf.mxu2  ;;  %3452 = vmatpush.msra.mxu2 %v2145_v9  ;;  %2951 = vmatmul.f32.gmra.mxu3 %v739_v14  ;;  %v2177_v36 = vld [vmem:[#allocation8 + $0x428] sm:$0xff] }
 0x28f   :  { %v2681_v7 = vadd.f32 %v2680_v48, %v2472_v12  ;;  %v9891_v23 = vpop.f32.mrf.mxu1  ;;  %3870 = vmatpush.msra.mxu0 %v2177_v36  ;;  %v865_v12 = vld [vmem:[#allocation2 + $0x211] sm:$0xff]  ;;  %v741_v48 = vld [vmem:[#allocation2 + $0x240] sm:$0xff] }
 0x291   :  { %v2890_v2 = vadd.f32 %v9829_v32, %v2681_v7  ;;  %v2161_v32 = vld [vmem:[#allocation8 + $0x3a8] sm:$0xff]  ;;  %v13697_v7 = vld [vmem:[#allocation51_spill] sm:$0xff] }
 0x292   :  { %v3101_v37 = vpop.f32.mrf.mxu0  ;;  %3661 = vmatpush.msra.mxu3 %v2161_v32  ;;  %3366 = vmatmul.f32.gmra.mxu1 %v9893_v50 }
 0x293   :  { %v3099_v19 = vadd.f32 %v3098_v54, %v2890_v2  ;;  %2730 = vmatmul.f32.gmra.mxu2 %v9825_v27  ;;  %v9897_v34 = vpop.f32.mrf.mxu3  ;;  %v13698_v2 = vld [vmem:[#allocation41_spill] sm:$0xff] }
 0x295   :  { %v9889_v24 = vadd.f32 %v9836_v42, %v3099_v19  ;;  %3148 = vmatmul.f32.gmra.mxu0 %v863_v16 }
 0x296   :  { %v2683_v45 = vpop.f32.mrf.mxu2  ;;  %2954 = vmatmul.f32.gmra.mxu3 %v740_v52 }
 0x297   :  { %v2684_v57 = vadd.f32 %v2683_v45, %v2475_v25  ;;  %v9905_v54 = vpop.f32.mrf.mxu1  ;;  %v866_v25 = vld [vmem:[#allocation2 + $0x219] sm:$0xff] }
 0x298   :  { %v13699_v45 = vld [vmem:[#allocation54_spill] sm:$0xff] }
 0x299   :  { %v2893_v27 = vadd.f32 %v9842_v22, %v2684_v57  ;;  %v9907_v22 = vld [vmem:[#allocation2 + $0x22a] sm:$0xff] }
 0x29a   :  { %v3104_v3 = vpop.f32.mrf.mxu0  ;;  %3369 = vmatmul.f32.gmra.mxu1 %v9907_v22  ;;  %v13700_v57 = vld [vmem:[#allocation44_spill] sm:$0xff] }
 0x29b   :  { %v3102_v42 = vadd.f32 %v3101_v37, %v2893_v27  ;;  %2733 = vmatmul.f32.gmra.mxu2 %v9838_v49  ;;  %v9911_v1 = vpop.f32.mrf.mxu3  ;;  %v2481_v37 = vadd.f32 %v13698_v2, %v13697_v7  ;;  %v2484_v27 = vadd.f32 %v13700_v57, %v13699_v45  ;;  %v2176_v45 = vld [vmem:[#allocation8 + $0x420] sm:$0xff] }
 0x29c   :  { %3871 = vmatpush.msra.mxu0 %v2176_v45 }
 0x29d   :  { %v9903_v63 = vadd.f32 %v9849_v15, %v3102_v42  ;;  %3151 = vmatmul.f32.gmra.mxu0 %v864_v39  ;;  %v9933_v42 = vld [vmem:[#allocation2 + $0x242] sm:$0xff] }
 0x29e   :  { %v2686_v56 = vpop.f32.mrf.mxu2  ;;  %2957 = vmatmul.f32.gmra.mxu3 %v741_v48 }
 0x29f   :  { %v2687_v62 = vadd.f32 %v2686_v56, %v2478_v46  ;;  %v9919_v9 = vpop.f32.mrf.mxu1  ;;  %v867_v46 = vld [vmem:[#allocation2 + $0x229] sm:$0xff]  ;;  %v743_v56 = vld [vmem:[#allocation2 + $0x258] sm:$0xff] }
 0x2a1   :  { %v2896_v49 = vadd.f32 %v9855_v58, %v2687_v62  ;;  %v9921_v58 = vld [vmem:[#allocation2 + $0x232] sm:$0xff] }
 0x2a2   :  { %v3107_v10 = vpop.f32.mrf.mxu0  ;;  %3372 = vmatmul.f32.gmra.mxu1 %v9921_v58  ;;  %v13701_v62 = vld [vmem:[#allocation57_spill] sm:$0xff] }
 0x2a3   :  { %v3105_v15 = vadd.f32 %v3104_v3, %v2896_v49  ;;  %2736 = vmatmul.f32.gmra.mxu2 %v9851_v18  ;;  %v9925_v18 = vpop.f32.mrf.mxu3  ;;  %v13702_v49 = vld [vmem:[#allocation47_spill] sm:$0xff] }
 0x2a5   :  { %v9917_v16 = vadd.f32 %v9863_v59, %v3105_v15  ;;  %3154 = vmatmul.f32.gmra.mxu0 %v865_v12  ;;  %v742_v59 = vld [vmem:[#allocation2 + $0x248] sm:$0xff]  ;;  %v2160_v15 = vld [vmem:[#allocation8 + $0x3a0] sm:$0xff] }
 0x2a6   :  { %v2689_v19 = vpop.f32.mrf.mxu2  ;;  %2960 = vmatmul.f32.gmra.mxu3 %v742_v59 }
 0x2a7   :  { %v2690_v14 = vadd.f32 %v2689_v19, %v2481_v37  ;;  %v9935_v52 = vpop.f32.mrf.mxu1  ;;  %3662 = vmatpush.msra.mxu3 %v2160_v15  ;;  %v868_v19 = vld [vmem:[#allocation2 + $0x231] sm:$0xff] }
 0x2a9   :  { %v2899_v21 = vadd.f32 %v9869_v53, %v2690_v14 }
 0x2aa   :  { %v3110_v33 = vpop.f32.mrf.mxu0  ;;  %3375 = vmatmul.f32.gmra.mxu1 %v9933_v42 }
 0x2ab   :  { %v3108_v32 = vadd.f32 %v3107_v10, %v2899_v21  ;;  %2739 = vmatmul.f32.gmra.mxu2 %v9865_v28  ;;  %v9939_v28 = vpop.f32.mrf.mxu3  ;;  %v2487_v10 = vadd.f32 %v13702_v49, %v13701_v62 }
 0x2ad   :  { %v9931_v3 = vadd.f32 %v9877_v41, %v3108_v32  ;;  %3157 = vmatmul.f32.gmra.mxu0 %v866_v25  ;;  %v2144_v41 = vld [vmem:[#allocation8 + $0x320] sm:$0xff]  ;;  %v13704_v25 = vld [vmem:[#allocation50_spill] sm:$0xff] }
 0x2ae   :  { %v2692_v39 = vpop.f32.mrf.mxu2  ;;  %3453 = vmatpush.msra.mxu2 %v2144_v41  ;;  %2963 = vmatmul.f32.gmra.mxu3 %v743_v56  ;;  %v13706_v41 = vld [vmem:[#allocation53_spill] sm:$0xff] }
 0x2af   :  { %v2693_v53 = vadd.f32 %v2692_v39, %v2484_v27  ;;  %v3331_v14 = vpop.f32.mrf.mxu1 }
 0x2b1   :  { %v2902_v60 = vadd.f32 %v9883_v6, %v2693_v53  ;;  %v9947_v6 = vld [vmem:[#allocation2 + $0x24a] sm:$0xff] }
 0x2b2   :  { %v3113_v55 = vpop.f32.mrf.mxu0  ;;  %3378 = vmatmul.f32.gmra.mxu1 %v9947_v6 }
 0x2b3   :  { %v3111_v36 = vadd.f32 %v3110_v33, %v2902_v60  ;;  %2742 = vmatmul.f32.gmra.mxu2 %v9879_v47  ;;  %v9951_v2 = vpop.f32.mrf.mxu3  ;;  %v13703_v33 = vld [vmem:[#allocation60_spill] sm:$0xff] }
 0x2b4   :  { %v2490_v32 = vadd.f32 %v13704_v25, %v13703_v33  ;;  %v869_v60 = vld [vmem:[#allocation2 + $0x241] sm:$0xff] }
 0x2b5   :  { %v9945_v12 = vadd.f32 %v9891_v23, %v3111_v36  ;;  %3160 = vmatmul.f32.gmra.mxu0 %v867_v46  ;;  %v744_v23 = vld [vmem:[#allocation2 + $0x260] sm:$0xff]  ;;  %v745_v46 = vld [vmem:[#allocation2 + $0x270] sm:$0xff]  ;;  %v13705_v36 = vld [vmem:[#allocation62_spill] sm:$0xff] }
 0x2b6   :  { %v2695_v48 = vpop.f32.mrf.mxu2  ;;  %2966 = vmatmul.f32.gmra.mxu3 %v744_v23  ;;  %v2493_v56 = vadd.f32 %v13706_v41, %v13705_v36  ;;  %v2159_v41 = vld [vmem:[#allocation8 + $0x398] sm:$0xff] }
 0x2b7   :  { %v2696_v7 = vadd.f32 %v2695_v48, %v2487_v10  ;;  %v9971_v10 = vld [vmem:[#allocation2 + $0x262] sm:$0xff]  ;;  %3663 = vmatpush.msra.mxu3 %v2159_v41 }
 0x2b9   :  { %v2905_v47 = vadd.f32 %v9897_v34, %v2696_v7  ;;  %v9959_v34 = vld [vmem:[#allocation2 + $0x25a] sm:$0xff]  ;;  %v870_v7 = vld [vmem:[#allocation2 + $0x249] sm:$0xff] }
 0x2ba   :  { %v3116_v37 = vpop.f32.mrf.mxu0  ;;  %3381 = vmatmul.f32.gmra.mxu1 %v9959_v34 }
 0x2bb   :  { %v3114_v21 = vadd.f32 %v3113_v55, %v2905_v47  ;;  %2745 = vmatmul.f32.gmra.mxu2 %v9893_v50  ;;  %v9963_v50 = vpop.f32.mrf.mxu3 }
 0x2bd   :  { %v9957_v59 = vadd.f32 %v9905_v54, %v3114_v21  ;;  %3163 = vmatmul.f32.gmra.mxu0 %v868_v19  ;;  %v3334_v54 = vpop.f32.mrf.mxu1  ;;  %v13708_v19 = vld [vmem:[#allocation56_spill] sm:$0xff] }
 0x2be   :  { %v2698_v57 = vpop.f32.mrf.mxu2  ;;  %2969 = vmatmul.f32.gmra.mxu3 %v745_v46 }
 0x2bf   :  { %v2699_v27 = vadd.f32 %v2698_v57, %v2490_v32  ;;  %v9983_v32 = vld [vmem:[#allocation2 + $0x272] sm:$0xff] }
 0x2c1   :  { %v2908_v39 = vadd.f32 %v9911_v1, %v2699_v27  ;;  %v871_v27 = vld [vmem:[#allocation2 + $0x259] sm:$0xff] }
 0x2c2   :  { %v3119_v53 = vpop.f32.mrf.mxu0  ;;  %3384 = vmatmul.f32.gmra.mxu1 %v9971_v10 }
 0x2c3   :  { %v3117_v55 = vadd.f32 %v3116_v37, %v2908_v39  ;;  %2748 = vmatmul.f32.gmra.mxu2 %v9907_v22  ;;  %v9975_v48 = vpop.f32.mrf.mxu3  ;;  %v746_v37 = vld [vmem:[#allocation2 + $0x278] sm:$0xff] }
 0x2c5   :  { %v9969_v62 = vadd.f32 %v9919_v9, %v3117_v55  ;;  %3166 = vmatmul.f32.gmra.mxu0 %v869_v60  ;;  %v13707_v9 = vld [vmem:[#allocation65_spill] sm:$0xff]  ;;  %v3337_v25 = vpop.f32.mrf.mxu1  ;;  %v13709_v60 = vld [vmem:[#allocation68_spill] sm:$0xff]  ;;  %v13710_v55 = vld [vmem:[#allocation59_spill] sm:$0xff] }
 0x2c6   :  { %v2701_v49 = vpop.f32.mrf.mxu2  ;;  %v2496_v21 = vadd.f32 %v13708_v19, %v13707_v9  ;;  %2972 = vmatmul.f32.gmra.mxu3 %v746_v37  ;;  %v2499_v46 = vadd.f32 %v13710_v55, %v13709_v60  ;;  %v13711_v37 = vld [vmem:[#allocation71_spill] sm:$0xff]  ;;  %v13713_v60 = vld [vmem:[#allocation73_spill] sm:$0xff]  ;;  %v13714_v55 = vld [vmem:[#allocation66_spill] sm:$0xff] }
 0x2c7   :  { %v2702_v1 = vadd.f32 %v2701_v49, %v2493_v56  ;;  %v13712_v9 = vld [vmem:[#allocation63_spill] sm:$0xff] }
 0x2c8   :  { %v2502_v19 = vadd.f32 %v13712_v9, %v13711_v37  ;;  %v13715_v37 = vld [vmem:[#allocation75_spill] sm:$0xff]  ;;  %v13716_v9 = vld [vmem:[#allocation69_spill] sm:$0xff] }
 0x2c9   :  { %v2911_v15 = vadd.f32 %v9925_v18, %v2702_v1 }
 0x2ca   :  { %v3122_v22 = vpop.f32.mrf.mxu0  ;;  %3387 = vmatmul.f32.gmra.mxu1 %v9983_v32 }
 0x2cb   :  { %v3120_v47 = vadd.f32 %v3119_v53, %v2911_v15  ;;  %2751 = vmatmul.f32.gmra.mxu2 %v9921_v58  ;;  %v9987_v57 = vpop.f32.mrf.mxu3  ;;  %v747_v53 = vld [vmem:[#allocation2 + $0x288] sm:$0xff] }
 0x2cd   :  { %v9981_v23 = vadd.f32 %v9935_v52, %v3120_v47  ;;  %3169 = vmatmul.f32.gmra.mxu0 %v870_v7  ;;  %v2143_v52 = vld [vmem:[#allocation8 + $0x318] sm:$0xff]  ;;  %v3340_v1 = vpop.f32.mrf.mxu1  ;;  %v872_v7 = vld [vmem:[#allocation2 + $0x261] sm:$0xff] }
 0x2ce   :  { %v2704_v33 = vpop.f32.mrf.mxu2  ;;  %3454 = vmatpush.msra.mxu2 %v2143_v52  ;;  %2975 = vmatmul.f32.gmra.mxu3 %v747_v53 }
 0x2cf   :  { %v2705_v18 = vadd.f32 %v2704_v33, %v2496_v21  ;;  %v2175_v33 = vld [vmem:[#allocation8 + $0x418] sm:$0xff] }
 0x2d0   :  { %3872 = vmatpush.msra.mxu0 %v2175_v33 }
 0x2d1   :  { %v2914_v45 = vadd.f32 %v9939_v28, %v2705_v18  ;;  %v9994_v28 = vld [vmem:[#allocation2 + $0x27a] sm:$0xff] }
 0x2d2   :  { %v3125_v58 = vpop.f32.mrf.mxu0  ;;  %3390 = vmatmul.f32.gmra.mxu1 %v9994_v28 }
 0x2d3   :  { %v3123_v39 = vadd.f32 %v3122_v22, %v2914_v45  ;;  %2754 = vmatmul.f32.gmra.mxu2 %v9933_v42  ;;  %v9998_v15 = vpop.f32.mrf.mxu3  ;;  %v10005_v45 = vld [vmem:[#allocation2 + $0x28a] sm:$0xff] }
 0x2d5   :  { %v9992_v36 = vadd.f32 %v3331_v14, %v3123_v39  ;;  %3172 = vmatmul.f32.gmra.mxu0 %v871_v27  ;;  %v748_v14 = vld [vmem:[#allocation2 + $0x290] sm:$0xff]  ;;  %v3343_v52 = vpop.f32.mrf.mxu1 }
 0x2d6   :  { %v2707_v56 = vpop.f32.mrf.mxu2  ;;  %2978 = vmatmul.f32.gmra.mxu3 %v748_v14  ;;  %v873_v39 = vld [vmem:[#allocation2 + $0x271] sm:$0xff] }
 0x2d7   :  { %v2708_v49 = vadd.f32 %v2707_v56, %v2499_v46  ;;  %v2505_v46 = vadd.f32 %v13714_v55, %v13713_v60  ;;  %v13717_v60 = vld [vmem:[#allocation17_spill] sm:$0xff]  ;;  %v13718_v55 = vld [vmem:[#allocation15_spill] sm:$0xff] }
 0x2d9   :  { %v2917_v42 = vadd.f32 %v9951_v2, %v2708_v49  ;;  %v10016_v49 = vld [vmem:[#allocation2 + $0x292] sm:$0xff] }
 0x2da   :  { %v3128_v22 = vpop.f32.mrf.mxu0  ;;  %3393 = vmatmul.f32.gmra.mxu1 %v10005_v45 }
 0x2db   :  { %v3126_v47 = vadd.f32 %v3125_v58, %v2917_v42  ;;  %2757 = vmatmul.f32.gmra.mxu2 %v9947_v6  ;;  %v10009_v27 = vpop.f32.mrf.mxu3 }
 0x2dd   :  { %v10003_v21 = vadd.f32 %v3334_v54, %v3126_v47  ;;  %3175 = vmatmul.f32.gmra.mxu0 %v872_v7  ;;  %v749_v54 = vld [vmem:[#allocation2 + $0x2a0] sm:$0xff]  ;;  %v3346_v14 = vpop.f32.mrf.mxu1 }
 0x2de   :  { %v2710_v18 = vpop.f32.mrf.mxu2  ;;  %2981 = vmatmul.f32.gmra.mxu3 %v749_v54  ;;  %v2142_v54 = vld [vmem:[#allocation8 + $0x310] sm:$0xff] }
 0x2df   :  { %v2711_v2 = vadd.f32 %v2710_v18, %v2502_v19  ;;  %v2508_v19 = vadd.f32 %v13716_v9, %v13715_v37  ;;  %3455 = vmatpush.msra.mxu2 %v2142_v54  ;;  %v876_v37 = vld [vmem:[#allocation2 + $0x291] sm:$0xff]  ;;  %v10049_v54 = vld [vmem:[#allocation2 + $0x2ba] sm:$0xff] }
 0x2e1   :  { %v2920_v58 = vadd.f32 %v9963_v50, %v2711_v2  ;;  %v10027_v2 = vld [vmem:[#allocation2 + $0x2a2] sm:$0xff] }
 0x2e2   :  { %v3131_v6 = vpop.f32.mrf.mxu0  ;;  %3396 = vmatmul.f32.gmra.mxu1 %v10016_v49 }
 0x2e3   :  { %v3129_v53 = vadd.f32 %v3128_v22, %v2920_v58  ;;  %2760 = vmatmul.f32.gmra.mxu2 %v9959_v34  ;;  %v10020_v7 = vpop.f32.mrf.mxu3  ;;  %v874_v34 = vld [vmem:[#allocation2 + $0x279] sm:$0xff] }
 0x2e5   :  { %v10014_v41 = vadd.f32 %v3337_v25, %v3129_v53  ;;  %3178 = vmatmul.f32.gmra.mxu0 %v873_v39  ;;  %v750_v25 = vld [vmem:[#allocation2 + $0x2a8] sm:$0xff] }
 0x2e6   :  { %v2713_v56 = vpop.f32.mrf.mxu2  ;;  %2984 = vmatmul.f32.gmra.mxu3 %v750_v25  ;;  %v875_v39 = vld [vmem:[#allocation2 + $0x289] sm:$0xff] }
 0x2e7   :  { %v2714_v50 = vadd.f32 %v2713_v56, %v2505_v46  ;;  %v2511_v46 = vadd.f32 %v13718_v55, %v13717_v60  ;;  %v877_v55 = vld [vmem:[#allocation2 + $0x2a1] sm:$0xff] }
 0x2e9   :  { %v2923_v42 = vadd.f32 %v9975_v48, %v2714_v50  ;;  %v2158_v50 = vld [vmem:[#allocation8 + $0x390] sm:$0xff] }
 0x2ea   :  { %v3134_v22 = vpop.f32.mrf.mxu0  ;;  %3399 = vmatmul.f32.gmra.mxu1 %v10027_v2  ;;  %3664 = vmatpush.msra.mxu3 %v2158_v50 }
 0x2eb   :  { %v3132_v47 = vadd.f32 %v3131_v6, %v2923_v42  ;;  %2763 = vmatmul.f32.gmra.mxu2 %v9971_v10  ;;  %v10031_v6 = vpop.f32.mrf.mxu3 }
 0x2ed   :  { %v10025_v33 = vadd.f32 %v3340_v1, %v3132_v47  ;;  %3181 = vmatmul.f32.gmra.mxu0 %v874_v34  ;;  %v751_v1 = vld [vmem:[#allocation2 + $0x2b8] sm:$0xff]  ;;  %v3349_v34 = vpop.f32.mrf.mxu1 }
 0x2ee   :  { %v2716_v18 = vpop.f32.mrf.mxu2  ;;  %2987 = vmatmul.f32.gmra.mxu3 %v751_v1 }
 0x2ef   :  { %v2717_v48 = vadd.f32 %v2716_v18, %v2508_v19  ;;  %v13719_v19 = vld [vmem:[#allocation18_spill] sm:$0xff]  ;;  %v13720_v18 = vld [vmem:[#allocation16_spill] sm:$0xff] }
 0x2f1   :  { %v2926_v58 = vadd.f32 %v9987_v57, %v2717_v48  ;;  %v10038_v57 = vld [vmem:[#allocation2 + $0x2aa] sm:$0xff]  ;;  %v2514_v48 = vadd.f32 %v13720_v18, %v13719_v19 }
 0x2f2   :  { %v3137_v10 = vpop.f32.mrf.mxu0  ;;  %3402 = vmatmul.f32.gmra.mxu1 %v10038_v57  ;;  %v878_v19 = vld [vmem:[#allocation2 + $0x2a9] sm:$0xff] }
 0x2f3   :  { %v3135_v53 = vadd.f32 %v3134_v22, %v2926_v58  ;;  %2766 = vmatmul.f32.gmra.mxu2 %v9983_v32  ;;  %v10042_v22 = vpop.f32.mrf.mxu3 }
 0x2f5   :  { %v10036_v56 = vadd.f32 %v3343_v52, %v3135_v53  ;;  %3184 = vmatmul.f32.gmra.mxu0 %v875_v39  ;;  %v752_v52 = vld [vmem:[#allocation2 + $0x2c0] sm:$0xff]  ;;  %v2174_v39 = vld [vmem:[#allocation8 + $0x410] sm:$0xff]  ;;  %v3352_v1 = vpop.f32.mrf.mxu1 }
 0x2f6   :  { %v2719_v42 = vpop.f32.mrf.mxu2  ;;  %2990 = vmatmul.f32.gmra.mxu3 %v752_v52  ;;  %3873 = vmatpush.msra.mxu0 %v2174_v39  ;;  %v10068_v39 = vld [vmem:[#allocation2 + $0x2d2] sm:$0xff] }
 0x2f7   :  { %v2720_v47 = vadd.f32 %v2719_v42, %v2511_v46 }
 0x2f9   :  { %v2929_v32 = vadd.f32 %v9998_v15, %v2720_v47  ;;  %v10058_v47 = vld [vmem:[#allocation2 + $0x2c2] sm:$0xff] }
 0x2fa   :  { %v3140_v25 = vpop.f32.mrf.mxu0  ;;  %3405 = vmatmul.f32.gmra.mxu1 %v10049_v54 }
 0x2fb   :  { %v3138_v9 = vadd.f32 %v3137_v10, %v2929_v32  ;;  %2769 = vmatmul.f32.gmra.mxu2 %v9994_v28  ;;  %v10053_v28 = vpop.f32.mrf.mxu3  ;;  %v13721_v32 = vld [vmem:[#allocation19_spill] sm:$0xff] }
 0x2fd   :  { %v10047_v58 = vadd.f32 %v3346_v14, %v3138_v9  ;;  %3187 = vmatmul.f32.gmra.mxu0 %v876_v37  ;;  %v753_v14 = vld [vmem:[#allocation2 + $0x2d0] sm:$0xff] }
 0x2fe   :  { %v2722_v53 = vpop.f32.mrf.mxu2  ;;  %2993 = vmatmul.f32.gmra.mxu3 %v753_v14  ;;  %v755_v14 = vld [vmem:[#allocation2 + $0x2e8] sm:$0xff] }
 0x2ff   :  { %v2723_v15 = vadd.f32 %v2722_v53, %v2514_v48  ;;  %v13722_v53 = vld [vmem:[#allocation20_spill] sm:$0xff] }
 0x301   :  { %v2932_v10 = vadd.f32 %v10009_v27, %v2723_v15 }
 0x302   :  { %v3143_v60 = vpop.f32.mrf.mxu0  ;;  %3408 = vmatmul.f32.gmra.mxu1 %v10058_v47 }
 0x303   :  { %v3141_v46 = vadd.f32 %v3140_v25, %v2932_v10  ;;  %2772 = vmatmul.f32.gmra.mxu2 %v10005_v45  ;;  %v10063_v9 = vpop.f32.mrf.mxu3  ;;  %v3355_v25 = vpop.f32.mrf.mxu1 }
 0x305   :  { %v10056_v50 = vadd.f32 %v3349_v34, %v3141_v46  ;;  %3190 = vmatmul.f32.gmra.mxu0 %v877_v55  ;;  %v754_v34 = vld [vmem:[#allocation2 + $0x2d8] sm:$0xff] }
 0x306   :  { %v2725_v42 = vpop.f32.mrf.mxu2  ;;  %2996 = vmatmul.f32.gmra.mxu3 %v754_v34  ;;  %v880_v34 = vld [vmem:[#allocation2 + $0x2c1] sm:$0xff] }
 0x307   :  { %v2726_v37 = vadd.f32 %v2725_v42, %v13721_v32  ;;  %v2157_v32 = vld [vmem:[#allocation8 + $0x388] sm:$0xff] }
 0x308   :  { %3665 = vmatpush.msra.mxu3 %v2157_v32  ;;  %v881_v32 = vld [vmem:[#allocation2 + $0x2d1] sm:$0xff] }
 0x309   :  { %v2935_v27 = vadd.f32 %v10020_v7, %v2726_v37 }
 0x30a   :  { %v3146_v52 = vpop.f32.mrf.mxu0  ;;  %3411 = vmatmul.f32.gmra.mxu1 %v10068_v39 }
 0x30b   :  { %v3144_v45 = vadd.f32 %v3143_v60, %v2935_v27  ;;  %2775 = vmatmul.f32.gmra.mxu2 %v10016_v49  ;;  %v10073_v10 = vpop.f32.mrf.mxu3  ;;  %v879_v60 = vld [vmem:[#allocation2 + $0x2b9] sm:$0xff]  ;;  %v2141_v49 = vld [vmem:[#allocation8 + $0x308] sm:$0xff] }
 0x30c   :  { %3456 = vmatpush.msra.mxu2 %v2141_v49  ;;  %v10078_v27 = vld [vmem:[#allocation2 + $0x2da] sm:$0xff] }
 0x30d   :  { %v10066_v18 = vadd.f32 %v3352_v1, %v3144_v45  ;;  %3193 = vmatmul.f32.gmra.mxu0 %v878_v19  ;;  %v3358_v1 = vpop.f32.mrf.mxu1  ;;  %v13724_v49 = vld [vmem:[#allocation22_spill] sm:$0xff] }
 0x30e   :  { %v2728_v48 = vpop.f32.mrf.mxu2  ;;  %2999 = vmatmul.f32.gmra.mxu3 %v755_v14 }
 0x30f   :  { %v2729_v15 = vadd.f32 %v2728_v48, %v13722_v53 }
 0x311   :  { %v2938_v7 = vadd.f32 %v10031_v6, %v2729_v15  ;;  %v13723_v6 = vld [vmem:[#allocation21_spill] sm:$0xff]  ;;  %v2173_v15 = vld [vmem:[#allocation8 + $0x408] sm:$0xff] }
 0x312   :  { %v3149_v55 = vpop.f32.mrf.mxu0  ;;  %3414 = vmatmul.f32.gmra.mxu1 %v10078_v27  ;;  %3874 = vmatpush.msra.mxu0 %v2173_v15 }
 0x313   :  { %v3147_v46 = vadd.f32 %v3146_v52, %v2938_v7  ;;  %2778 = vmatmul.f32.gmra.mxu2 %v10027_v2  ;;  %v10083_v2 = vpop.f32.mrf.mxu3 }
 0x315   :  { %v10076_v42 = vadd.f32 %v3355_v25, %v3147_v46  ;;  %3196 = vmatmul.f32.gmra.mxu0 %v879_v60  ;;  %v756_v25 = vld [vmem:[#allocation2 + $0x2f0] sm:$0xff]  ;;  %v3361_v60 = vpop.f32.mrf.mxu1 }
 0x316   :  { %v2731_v37 = vpop.f32.mrf.mxu2  ;;  %3002 = vmatmul.f32.gmra.mxu3 %v756_v25  ;;  %v10088_v46 = vld [vmem:[#allocation2 + $0x2ea] sm:$0xff] }
 0x317   :  { %v2732_v19 = vadd.f32 %v2731_v37, %v13723_v6  ;;  %v757_v37 = vld [vmem:[#allocation2 + $0x300] sm:$0xff] }
 0x319   :  { %v2941_v52 = vadd.f32 %v10042_v22, %v2732_v19 }
 0x31a   :  { %v3152_v45 = vpop.f32.mrf.mxu0  ;;  %3417 = vmatmul.f32.gmra.mxu1 %v10088_v46 }
 0x31b   :  { %v3150_v48 = vadd.f32 %v3149_v55, %v2941_v52  ;;  %2781 = vmatmul.f32.gmra.mxu2 %v10038_v57  ;;  %v10093_v55 = vpop.f32.mrf.mxu3  ;;  %v10098_v52 = vld [vmem:[#allocation2 + $0x2f2] sm:$0xff] }
 0x31d   :  { %v10086_v53 = vadd.f32 %v3358_v1, %v3150_v48  ;;  %3199 = vmatmul.f32.gmra.mxu0 %v880_v34  ;;  %v13726_v34 = vld [vmem:[#allocation23_spill] sm:$0xff]  ;;  %v3364_v25 = vpop.f32.mrf.mxu1 }
 0x31e   :  { %v2734_v7 = vpop.f32.mrf.mxu2  ;;  %3005 = vmatmul.f32.gmra.mxu3 %v757_v37 }
 0x31f   :  { %v2735_v22 = vadd.f32 %v2734_v7, %v13724_v49  ;;  %v882_v7 = vld [vmem:[#allocation2 + $0x2d9] sm:$0xff] }
 0x321   :  { %v2944_v14 = vadd.f32 %v10053_v28, %v2735_v22 }
 0x322   :  { %v3155_v57 = vpop.f32.mrf.mxu0  ;;  %3420 = vmatmul.f32.gmra.mxu1 %v10098_v52 }
 0x323   :  { %v3153_v1 = vadd.f32 %v3152_v45, %v2944_v14  ;;  %2784 = vmatmul.f32.gmra.mxu2 %v10049_v54  ;;  %v10103_v15 = vpop.f32.mrf.mxu3  ;;  %v10108_v14 = vld [vmem:[#allocation2 + $0x302] sm:$0xff] }
 0x325   :  { %v10096_v6 = vadd.f32 %v3361_v60, %v3153_v1  ;;  %3202 = vmatmul.f32.gmra.mxu0 %v881_v32  ;;  %v758_v60 = vld [vmem:[#allocation2 + $0x308] sm:$0xff] }
 0x326   :  { %v2737_v19 = vpop.f32.mrf.mxu2  ;;  %3008 = vmatmul.f32.gmra.mxu3 %v758_v60  ;;  %v13728_v32 = vld [vmem:[#allocation24_spill] sm:$0xff] }
 0x327   :  { %13725 = vst [vmem:[#allocation39_spill] sm:$0xff] %v10096_v6  ;;  %v2738_v48 = vadd.f32 %v2737_v19, %v13726_v34  ;;  %v3367_v19 = vpop.f32.mrf.mxu1  ;;  %v883_v34 = vld [vmem:[#allocation2 + $0x2e9] sm:$0xff] }
 0x328   :  { %v10118_v60 = vld [vmem:[#allocation2 + $0x30a] sm:$0xff] }
 0x329   :  { %v2947_v28 = vadd.f32 %v10063_v9, %v2738_v48  ;;  %v2140_v48 = vld [vmem:[#allocation8 + $0x300] sm:$0xff] }
 0x32a   :  { %v3158_v45 = vpop.f32.mrf.mxu0  ;;  %3423 = vmatmul.f32.gmra.mxu1 %v10108_v14  ;;  %3457 = vmatpush.msra.mxu2 %v2140_v48 }
 0x32b   :  { %v3156_v54 = vadd.f32 %v3155_v57, %v2947_v28  ;;  %2787 = vmatmul.f32.gmra.mxu2 %v10058_v47  ;;  %v10113_v37 = vpop.f32.mrf.mxu3 }
 0x32d   :  { %v10106_v49 = vadd.f32 %v3364_v25, %v3156_v54  ;;  %3205 = vmatmul.f32.gmra.mxu0 %v882_v7  ;;  %v759_v25 = vld [vmem:[#allocation2 + $0x318] sm:$0xff]  ;;  %v2156_v7 = vld [vmem:[#allocation8 + $0x380] sm:$0xff] }
 0x32e   :  { %v2740_v22 = vpop.f32.mrf.mxu2  ;;  %3011 = vmatmul.f32.gmra.mxu3 %v759_v25  ;;  %v1015_v25 = vld [vmem:[#allocation2 + $0x31a] sm:$0xff] }
 0x32f   :  { %13727 = vst [vmem:[#allocation32_spill] sm:$0xff] %v10106_v49  ;;  %v2741_v1 = vadd.f32 %v2740_v22, %v13728_v32  ;;  %3666 = vmatpush.msra.mxu3 %v2156_v7  ;;  %v13732_v7 = vld [vmem:[#allocation26_spill] sm:$0xff] }
 0x331   :  { %v2950_v9 = vadd.f32 %v10073_v10, %v2741_v1  ;;  %v13730_v10 = vld [vmem:[#allocation25_spill] sm:$0xff] }
 0x332   :  { %v3161_v57 = vpop.f32.mrf.mxu0  ;;  %3426 = vmatmul.f32.gmra.mxu1 %v10118_v60  ;;  %v884_v1 = vld [vmem:[#allocation2 + $0x2f1] sm:$0xff] }
 0x333   :  { %v3159_v47 = vadd.f32 %v3158_v45, %v2950_v9  ;;  %2790 = vmatmul.f32.gmra.mxu2 %v10068_v39  ;;  %v2964_v32 = vpop.f32.mrf.mxu3 }
 0x335   :  { %v10116_v28 = vadd.f32 %v3367_v19, %v3159_v47  ;;  %3208 = vmatmul.f32.gmra.mxu0 %v883_v34  ;;  %v760_v19 = vld [vmem:[#allocation2 + $0x320] sm:$0xff]  ;;  %v10126_v34 = vld [vmem:[#allocation5 + $0x1f0] sm:$0xff] }
 0x336   :  { %v2743_v54 = vpop.f32.mrf.mxu2  ;;  %v2172_v47 = vld [vmem:[#allocation8 + $0x400] sm:$0xff]  ;;  %313 = vst [vmem:[#allocation2 + $0x331] sm:$0xff] %v10126_v34  ;;  %3014 = vmatmul.f32.gmra.mxu3 %v760_v19 }
 0x337   :  { %13729 = vst [vmem:[#allocation42_spill] sm:$0xff] %v10116_v28  ;;  %v2744_v22 = vadd.f32 %v2743_v54, %v13730_v10  ;;  %3875 = vmatpush.msra.mxu0 %v2172_v47  ;;  %v1016_v19 = vld [vmem:[#allocation2 + $0x322] sm:$0xff] }
 0x338   :  { %v13734_v47 = vld [vmem:[#allocation27_spill] sm:$0xff] }
 0x339   :  { %v2953_v45 = vadd.f32 %v10083_v2, %v2744_v22  ;;  %v885_v22 = vld [vmem:[#allocation2 + $0x301] sm:$0xff] }
 0x33a   :  { %v3164_v39 = vpop.f32.mrf.mxu0  ;;  %3429 = vmatmul.f32.gmra.mxu1 %v1015_v25 }
 0x33b   :  { %v10123_v9 = vadd.f32 %v3161_v57, %v2953_v45  ;;  %2793 = vmatmul.f32.gmra.mxu2 %v10078_v27  ;;  %v2967_v57 = vpop.f32.mrf.mxu3 }
 0x33d   :  { %13731 = vst [vmem:[#allocation34_spill] sm:$0xff] %v10123_v9  ;;  %3211 = vmatmul.f32.gmra.mxu0 %v884_v1  ;;  %v761_v45 = vld [vmem:[#allocation2 + $0x330] sm:$0xff]  ;;  %v249_v1 = vld [vmem:[#allocation5 + $0x1f8] sm:$0xff] }
 0x33e   :  { %v2746_v48 = vpop.f32.mrf.mxu2  ;;  %314 = vst [vmem:[#allocation2 + $0x339] sm:$0xff] %v249_v1  ;;  %3017 = vmatmul.f32.gmra.mxu3 %v761_v45 }
 0x33f   :  { %v2747_v2 = vadd.f32 %v2746_v48, %v13732_v7 }
 0x341   :  { %v2956_v54 = vadd.f32 %v10093_v55, %v2747_v2  ;;  %v886_v2 = vld [vmem:[#allocation2 + $0x309] sm:$0xff] }
 0x342   :  { %v3167_v10 = vpop.f32.mrf.mxu0  ;;  %3432 = vmatmul.f32.gmra.mxu1 %v1016_v19 }
 0x343   :  { %v10131_v27 = vadd.f32 %v3164_v39, %v2956_v54  ;;  %2796 = vmatmul.f32.gmra.mxu2 %v10088_v46  ;;  %v2970_v55 = vpop.f32.mrf.mxu3 }
 0x345   :  { %13733 = vst [vmem:[#allocation45_spill] sm:$0xff] %v10131_v27  ;;  %3214 = vmatmul.f32.gmra.mxu0 %v885_v22  ;;  %v762_v46 = vld [vmem:[#allocation2 + $0x338] sm:$0xff]  ;;  %v13736_v22 = vld [vmem:[#allocation28_spill] sm:$0xff] }
 0x346   :  { %v2749_v9 = vpop.f32.mrf.mxu2  ;;  %3020 = vmatmul.f32.gmra.mxu3 %v762_v46  ;;  %v1017_v54 = vld [vmem:[#allocation2 + $0x332] sm:$0xff] }
 0x347   :  { %v2750_v28 = vadd.f32 %v2749_v9, %v13734_v47 }
 0x349   :  { %v2959_v48 = vadd.f32 %v10103_v15, %v2750_v28  ;;  %v887_v15 = vld [vmem:[#allocation2 + $0x319] sm:$0xff] }
 0x34a   :  { %v3170_v7 = vpop.f32.mrf.mxu0  ;;  %3435 = vmatmul.f32.gmra.mxu1 %v1017_v54 }
 0x34b   :  { %v10136_v49 = vadd.f32 %v3167_v10, %v2959_v48  ;;  %2799 = vmatmul.f32.gmra.mxu2 %v10098_v52  ;;  %v2973_v47 = vpop.f32.mrf.mxu3  ;;  %v1212_v10 = vld [vmem:[#allocation2 + $0x31] sm:$0xff]  ;;  %v1018_v48 = vld [vmem:[#allocation2 + $0x33a] sm:$0xff] }
 0x34d   :  { %13735 = vst [vmem:[#allocation36_spill] sm:$0xff] %v10136_v49  ;;  %3217 = vmatmul.f32.gmra.mxu0 %v886_v2  ;;  %v13738_v2 = vld [vmem:[#allocation29_spill] sm:$0xff] }
 0x34e   :  { %v2752_v39 = vpop.f32.mrf.mxu2  ;;  %3667 = vmatmul.f32.vlgmr.msra.gmra.mxu3 %v1212_v10 }
 0x34f   :  { %v2753_v45 = vadd.f32 %v2752_v39, %v13736_v22  ;;  %v888_v22 = vld [vmem:[#allocation2 + $0x321] sm:$0xff] }
 0x351   :  { %v2962_v9 = vadd.f32 %v10113_v37, %v2753_v45 }
 0x352   :  { %v3173_v27 = vpop.f32.mrf.mxu0  ;;  %3438 = vmatmul.f32.gmra.mxu1 %v1018_v48 }
 0x353   :  { %v10141_v28 = vadd.f32 %v3170_v7, %v2962_v9  ;;  %2802 = vmatmul.f32.gmra.mxu2 %v10108_v14  ;;  %v2976_v39 = vpop.f32.mrf.mxu3  ;;  %v1213_v7 = vld [vmem:[#allocation2 + $0x39] sm:$0xff] }
 0x354   :  { %v13740_v14 = vld [vmem:[#allocation30_spill] sm:$0xff] }
 0x355   :  { %13737 = vst [vmem:[#allocation48_spill] sm:$0xff] %v10141_v28  ;;  %3220 = vmatmul.f32.gmra.mxu0 %v887_v15 }
 0x356   :  { %v2755_v52 = vpop.f32.mrf.mxu2  ;;  %3670 = vmatmul.f32.gmra.mxu3 %v1213_v7 }
 0x357   :  { %v2756_v46 = vadd.f32 %v2755_v52, %v13738_v2 }
 0x359   :  { %v2965_v49 = vadd.f32 %v2964_v32, %v2756_v46  ;;  %v1214_v32 = vld [vmem:[#allocation2 + $0x49] sm:$0xff] }
 0x35a   :  { %v3176_v54 = vpop.f32.mrf.mxu0 }
 0x35b   :  { %v10145_v37 = vadd.f32 %v3173_v27, %v2965_v49  ;;  %2805 = vmatmul.f32.gmra.mxu2 %v10118_v60  ;;  %v2979_v10 = vpop.f32.mrf.mxu3  ;;  %v13742_v49 = vld [vmem:[#allocation31_spill] sm:$0xff] }
 0x35d   :  { %13739 = vst [vmem:[#allocation38_spill] sm:$0xff] %v10145_v37  ;;  %3223 = vmatmul.f32.gmra.mxu0 %v888_v22  ;;  %v1215_v22 = vld [vmem:[#allocation2 + $0x51] sm:$0xff] }
 0x35e   :  { %v2758_v45 = vpop.f32.mrf.mxu2  ;;  %3673 = vmatmul.f32.gmra.mxu3 %v1214_v32 }
 0x35f   :  { %v2759_v9 = vadd.f32 %v2758_v45, %v13740_v14 }
 0x361   :  { %v2968_v15 = vadd.f32 %v2967_v57, %v2759_v9  ;;  %v1340_v9 = vld [vmem:[#allocation2 + $0x32] sm:$0xff] }
 0x362   :  { %v3179_v28 = vpop.f32.mrf.mxu0 }
 0x363   :  { %v10149_v6 = vadd.f32 %v3176_v54, %v2968_v15  ;;  %2808 = vmatmul.f32.gmra.mxu2 %v1015_v25  ;;  %v2982_v48 = vpop.f32.mrf.mxu3  ;;  %v13744_v54 = vld [vmem:[#allocation33_spill] sm:$0xff] }
 0x364   :  { %v1084_v25 = vld [vmem:[#allocation2 + $0x30] sm:$0xff] }
 0x365   :  { %13741 = vst [vmem:[#allocation51_spill] sm:$0xff] %v10149_v6  ;;  %3226 = vmatmul.f32.gmra.mxu0 %v10126_v34 }
 0x366   :  { %v2761_v52 = vpop.f32.mrf.mxu2  ;;  %3676 = vmatmul.f32.gmra.mxu3 %v1215_v22 }
 0x367   :  { %v2762_v27 = vadd.f32 %v2761_v52, %v13742_v49  ;;  %v1085_v52 = vld [vmem:[#allocation2 + $0x38] sm:$0xff] }
 0x369   :  { %v2971_v60 = vadd.f32 %v2970_v55, %v2762_v27  ;;  %v1216_v55 = vld [vmem:[#allocation2 + $0x61] sm:$0xff] }
 0x36a   :  { %v3182_v2 = vpop.f32.mrf.mxu0 }
 0x36b   :  { %v10153_v46 = vadd.f32 %v3179_v28, %v2971_v60  ;;  %2811 = vmatmul.f32.gmra.mxu2 %v1016_v19  ;;  %v2985_v14 = vpop.f32.mrf.mxu3  ;;  %v13746_v28 = vld [vmem:[#allocation35_spill] sm:$0xff] }
 0x36c   :  { %v1341_v60 = vld [vmem:[#allocation2 + $0x3a] sm:$0xff] }
 0x36d   :  { %13743 = vst [vmem:[#allocation41_spill] sm:$0xff] %v10153_v46  ;;  %3229 = vmatmul.f32.gmra.mxu0 %v249_v1  ;;  %v1139_v46 = vld [vmem:[#allocation2 + $0x2f0] sm:$0xff] }
 0x36e   :  { %v2764_v57 = vpop.f32.mrf.mxu2  ;;  %3679 = vmatmul.f32.gmra.mxu3 %v1216_v55  ;;  %v1342_v55 = vld [vmem:[#allocation2 + $0x4a] sm:$0xff] }
 0x36f   :  { %v2765_v7 = vadd.f32 %v2764_v57, %v13744_v54 }
 0x371   :  { %v2974_v45 = vadd.f32 %v2973_v47, %v2765_v7  ;;  %v1217_v47 = vld [vmem:[#allocation2 + $0x69] sm:$0xff] }
 0x372   :  { %v3185_v34 = vpop.f32.mrf.mxu0  ;;  %v1086_v7 = vld [vmem:[#allocation2 + $0x48] sm:$0xff] }
 0x373   :  { %v10156_v15 = vadd.f32 %v3182_v2, %v2974_v45  ;;  %3458 = vmatmul.f32.vlgmr.msra.gmra.mxu2 %v1084_v25  ;;  %v2988_v49 = vpop.f32.mrf.mxu3  ;;  %v13748_v2 = vld [vmem:[#allocation37_spill] sm:$0xff] }
 0x375   :  { %13745 = vst [vmem:[#allocation54_spill] sm:$0xff] %v10156_v15  ;;  %3876 = vmatmul.f32.vlgmr.msra.gmra.mxu0 %v1340_v9 }
 0x376   :  { %v2767_v32 = vpop.f32.mrf.mxu2  ;;  %3682 = vmatmul.f32.gmra.mxu3 %v1217_v47 }
 0x377   :  { %v2768_v19 = vadd.f32 %v2767_v32, %v13746_v28 }
 0x379   :  { %v2977_v1 = vadd.f32 %v2976_v39, %v2768_v19  ;;  %v1218_v39 = vld [vmem:[#allocation2 + $0x79] sm:$0xff] }
 0x37a   :  { %v3188_v27 = vpop.f32.mrf.mxu0 }
 0x37b   :  { %v10159_v22 = vadd.f32 %v3185_v34, %v2977_v1  ;;  %3461 = vmatmul.f32.gmra.mxu2 %v1085_v52  ;;  %v2991_v45 = vpop.f32.mrf.mxu3  ;;  %v13750_v34 = vld [vmem:[#allocation40_spill] sm:$0xff]  ;;  %v1087_v52 = vld [vmem:[#allocation2 + $0x50] sm:$0xff] }
 0x37d   :  { %13747 = vst [vmem:[#allocation44_spill] sm:$0xff] %v10159_v22  ;;  %3879 = vmatmul.f32.gmra.mxu0 %v1341_v60  ;;  %v1343_v22 = vld [vmem:[#allocation2 + $0x52] sm:$0xff] }
 0x37e   :  { %v2770_v57 = vpop.f32.mrf.mxu2  ;;  %3685 = vmatmul.f32.gmra.mxu3 %v1218_v39 }
 0x37f   :  { %v2771_v54 = vadd.f32 %v2770_v57, %v13748_v2 }
 0x381   :  { %v2980_v25 = vadd.f32 %v2979_v10, %v2771_v54  ;;  %v1219_v10 = vld [vmem:[#allocation2 + $0x81] sm:$0xff] }
 0x382   :  { %v3191_v9 = vpop.f32.mrf.mxu0 }
 0x383   :  { %v10162_v32 = vadd.f32 %v3188_v27, %v2980_v25  ;;  %3464 = vmatmul.f32.gmra.mxu2 %v1086_v7  ;;  %v2994_v60 = vpop.f32.mrf.mxu3  ;;  %v13752_v27 = vld [vmem:[#allocation43_spill] sm:$0xff] }
 0x384   :  { %v1088_v7 = vld [vmem:[#allocation2 + $0x60] sm:$0xff] }
 0x385   :  { %13749 = vst [vmem:[#allocation57_spill] sm:$0xff] %v10162_v32  ;;  %3882 = vmatmul.f32.gmra.mxu0 %v1342_v55  ;;  %v1344_v32 = vld [vmem:[#allocation2 + $0x62] sm:$0xff] }
 0x386   :  { %v2773_v28 = vpop.f32.mrf.mxu2  ;;  %3688 = vmatmul.f32.gmra.mxu3 %v1219_v10 }
 0x387   :  { %v2774_v19 = vadd.f32 %v2773_v28, %v13750_v34 }
 0x389   :  { %v2983_v1 = vadd.f32 %v2982_v48, %v2774_v19  ;;  %v1220_v48 = vld [vmem:[#allocation2 + $0x91] sm:$0xff] }
 0x38a   :  { %v3194_v47 = vpop.f32.mrf.mxu0 }
 0x38b   :  { %v10165_v57 = vadd.f32 %v3191_v9, %v2983_v1  ;;  %3467 = vmatmul.f32.gmra.mxu2 %v1087_v52  ;;  %v2997_v55 = vpop.f32.mrf.mxu3  ;;  %v13754_v9 = vld [vmem:[#allocation46_spill] sm:$0xff]  ;;  %v1089_v52 = vld [vmem:[#allocation2 + $0x68] sm:$0xff] }
 0x38d   :  { %13751 = vst [vmem:[#allocation47_spill] sm:$0xff] %v10165_v57  ;;  %3885 = vmatmul.f32.gmra.mxu0 %v1343_v22  ;;  %v1345_v57 = vld [vmem:[#allocation2 + $0x6a] sm:$0xff] }
 0x38e   :  { %v2776_v2 = vpop.f32.mrf.mxu2  ;;  %3691 = vmatmul.f32.gmra.mxu3 %v1220_v48 }
 0x38f   :  { %v2777_v54 = vadd.f32 %v2776_v2, %v13752_v27 }
 0x391   :  { %v2986_v25 = vadd.f32 %v2985_v14, %v2777_v54  ;;  %v1221_v14 = vld [vmem:[#allocation2 + $0x99] sm:$0xff] }
 0x392   :  { %v3197_v39 = vpop.f32.mrf.mxu0 }
 0x393   :  { %v10168_v28 = vadd.f32 %v3194_v47, %v2986_v25  ;;  %3470 = vmatmul.f32.gmra.mxu2 %v1088_v7  ;;  %v3000_v1 = vpop.f32.mrf.mxu3  ;;  %v13756_v47 = vld [vmem:[#allocation49_spill] sm:$0xff]  ;;  %v1090_v7 = vld [vmem:[#allocation2 + $0x78] sm:$0xff] }
 0x395   :  { %13753 = vst [vmem:[#allocation60_spill] sm:$0xff] %v10168_v28  ;;  %3888 = vmatmul.f32.gmra.mxu0 %v1344_v32  ;;  %v1346_v28 = vld [vmem:[#allocation2 + $0x7a] sm:$0xff] }
 0x396   :  { %v2779_v34 = vpop.f32.mrf.mxu2  ;;  %3694 = vmatmul.f32.gmra.mxu3 %v1221_v14 }
 0x397   :  { %v2780_v19 = vadd.f32 %v2779_v34, %v13754_v9 }
 0x399   :  { %v2989_v22 = vadd.f32 %v2988_v49, %v2780_v19  ;;  %v1222_v49 = vld [vmem:[#allocation2 + $0xa9] sm:$0xff] }
 0x39a   :  { %v3200_v10 = vpop.f32.mrf.mxu0 }
 0x39b   :  { %v10171_v2 = vadd.f32 %v3197_v39, %v2989_v22  ;;  %3473 = vmatmul.f32.gmra.mxu2 %v1089_v52  ;;  %v3003_v25 = vpop.f32.mrf.mxu3  ;;  %v13758_v39 = vld [vmem:[#allocation52_spill] sm:$0xff]  ;;  %v1091_v52 = vld [vmem:[#allocation2 + $0x80] sm:$0xff] }
 0x39d   :  { %13755 = vst [vmem:[#allocation50_spill] sm:$0xff] %v10171_v2  ;;  %3891 = vmatmul.f32.gmra.mxu0 %v1345_v57  ;;  %v1347_v2 = vld [vmem:[#allocation2 + $0x82] sm:$0xff] }
 0x39e   :  { %v2782_v27 = vpop.f32.mrf.mxu2  ;;  %3697 = vmatmul.f32.gmra.mxu3 %v1222_v49 }
 0x39f   :  { %v2783_v54 = vadd.f32 %v2782_v27, %v13756_v47 }
 0x3a1   :  { %v2992_v32 = vadd.f32 %v2991_v45, %v2783_v54  ;;  %v1223_v45 = vld [vmem:[#allocation2 + $0xb1] sm:$0xff] }
 0x3a2   :  { %v3203_v48 = vpop.f32.mrf.mxu0 }
 0x3a3   :  { %v10174_v34 = vadd.f32 %v3200_v10, %v2992_v32  ;;  %3476 = vmatmul.f32.gmra.mxu2 %v1090_v7  ;;  %v3006_v22 = vpop.f32.mrf.mxu3  ;;  %v13760_v10 = vld [vmem:[#allocation55_spill] sm:$0xff]  ;;  %v1092_v7 = vld [vmem:[#allocation2 + $0x90] sm:$0xff] }
 0x3a5   :  { %13757 = vst [vmem:[#allocation62_spill] sm:$0xff] %v10174_v34  ;;  %3894 = vmatmul.f32.gmra.mxu0 %v1346_v28  ;;  %v1348_v34 = vld [vmem:[#allocation2 + $0x92] sm:$0xff] }
 0x3a6   :  { %v2785_v9 = vpop.f32.mrf.mxu2  ;;  %3700 = vmatmul.f32.gmra.mxu3 %v1223_v45 }
 0x3a7   :  { %v2786_v19 = vadd.f32 %v2785_v9, %v13758_v39 }
 0x3a9   :  { %v2995_v57 = vadd.f32 %v2994_v60, %v2786_v19  ;;  %v1224_v60 = vld [vmem:[#allocation2 + $0xc1] sm:$0xff] }
 0x3aa   :  { %v3206_v14 = vpop.f32.mrf.mxu0 }
 0x3ab   :  { %v10177_v27 = vadd.f32 %v3203_v48, %v2995_v57  ;;  %3479 = vmatmul.f32.gmra.mxu2 %v1091_v52  ;;  %v3009_v32 = vpop.f32.mrf.mxu3  ;;  %v13762_v48 = vld [vmem:[#allocation58_spill] sm:$0xff] }
 0x3ac   :  { %v1093_v52 = vld [vmem:[#allocation2 + $0x98] sm:$0xff] }
 0x3ad   :  { %13759 = vst [vmem:[#allocation53_spill] sm:$0xff] %v10177_v27  ;;  %3897 = vmatmul.f32.gmra.mxu0 %v1347_v2  ;;  %v1349_v27 = vld [vmem:[#allocation2 + $0x9a] sm:$0xff] }
 0x3ae   :  { %v2788_v47 = vpop.f32.mrf.mxu2  ;;  %3703 = vmatmul.f32.gmra.mxu3 %v1224_v60 }
 0x3af   :  { %v2789_v54 = vadd.f32 %v2788_v47, %v13760_v10 }
 0x3b1   :  { %v2998_v28 = vadd.f32 %v2997_v55, %v2789_v54  ;;  %v1225_v55 = vld [vmem:[#allocation2 + $0xc9] sm:$0xff] }
 0x3b2   :  { %v3209_v49 = vpop.f32.mrf.mxu0 }
 0x3b3   :  { %v10180_v9 = vadd.f32 %v3206_v14, %v2998_v28  ;;  %3482 = vmatmul.f32.gmra.mxu2 %v1092_v7  ;;  %v3012_v57 = vpop.f32.mrf.mxu3  ;;  %v13764_v14 = vld [vmem:[#allocation61_spill] sm:$0xff]  ;;  %v1094_v7 = vld [vmem:[#allocation2 + $0xa8] sm:$0xff] }
 0x3b5   :  { %13761 = vst [vmem:[#allocation65_spill] sm:$0xff] %v10180_v9  ;;  %3900 = vmatmul.f32.gmra.mxu0 %v1348_v34  ;;  %v1350_v9 = vld [vmem:[#allocation2 + $0xaa] sm:$0xff] }
 0x3b6   :  { %v2791_v39 = vpop.f32.mrf.mxu2  ;;  %3706 = vmatmul.f32.gmra.mxu3 %v1225_v55 }
 0x3b7   :  { %v2792_v19 = vadd.f32 %v2791_v39, %v13762_v48 }
 0x3b9   :  { %v3001_v2 = vadd.f32 %v3000_v1, %v2792_v19  ;;  %v1226_v1 = vld [vmem:[#allocation2 + $0xd9] sm:$0xff] }
 0x3ba   :  { %v3212_v45 = vpop.f32.mrf.mxu0 }
 0x3bb   :  { %v10183_v47 = vadd.f32 %v3209_v49, %v3001_v2  ;;  %3485 = vmatmul.f32.gmra.mxu2 %v1093_v52  ;;  %v3015_v28 = vpop.f32.mrf.mxu3  ;;  %v13766_v49 = vld [vmem:[#allocation64_spill] sm:$0xff]  ;;  %v1095_v52 = vld [vmem:[#allocation2 + $0xb0] sm:$0xff] }
 0x3bd   :  { %13763 = vst [vmem:[#allocation56_spill] sm:$0xff] %v10183_v47  ;;  %3903 = vmatmul.f32.gmra.mxu0 %v1349_v27  ;;  %v1351_v47 = vld [vmem:[#allocation2 + $0xb2] sm:$0xff] }
 0x3be   :  { %v2794_v10 = vpop.f32.mrf.mxu2  ;;  %3709 = vmatmul.f32.gmra.mxu3 %v1226_v1 }
 0x3bf   :  { %v2795_v54 = vadd.f32 %v2794_v10, %v13764_v14 }
 0x3c1   :  { %v3004_v34 = vadd.f32 %v3003_v25, %v2795_v54  ;;  %v1227_v25 = vld [vmem:[#allocation2 + $0xe1] sm:$0xff] }
 0x3c2   :  { %v3215_v60 = vpop.f32.mrf.mxu0 }
 0x3c3   :  { %v10186_v39 = vadd.f32 %v3212_v45, %v3004_v34  ;;  %3488 = vmatmul.f32.gmra.mxu2 %v1094_v7  ;;  %v3018_v2 = vpop.f32.mrf.mxu3  ;;  %v13768_v45 = vld [vmem:[#allocation67_spill] sm:$0xff] }
 0x3c4   :  { %v1096_v7 = vld [vmem:[#allocation2 + $0xc0] sm:$0xff] }
 0x3c5   :  { %13765 = vst [vmem:[#allocation68_spill] sm:$0xff] %v10186_v39  ;;  %3906 = vmatmul.f32.gmra.mxu0 %v1350_v9  ;;  %v1352_v39 = vld [vmem:[#allocation2 + $0xc2] sm:$0xff] }
 0x3c6   :  { %v2797_v48 = vpop.f32.mrf.mxu2  ;;  %3712 = vmatmul.f32.gmra.mxu3 %v1227_v25 }
 0x3c7   :  { %v2798_v19 = vadd.f32 %v2797_v48, %v13766_v49 }
 0x3c9   :  { %v3007_v27 = vadd.f32 %v3006_v22, %v2798_v19  ;;  %v1228_v22 = vld [vmem:[#allocation2 + $0xf1] sm:$0xff] }
 0x3ca   :  { %v3218_v55 = vpop.f32.mrf.mxu0 }
 0x3cb   :  { %v10189_v10 = vadd.f32 %v3215_v60, %v3007_v27  ;;  %3491 = vmatmul.f32.gmra.mxu2 %v1095_v52  ;;  %v3021_v34 = vpop.f32.mrf.mxu3  ;;  %v13770_v60 = vld [vmem:[#allocation70_spill] sm:$0xff]  ;;  %v1097_v52 = vld [vmem:[#allocation2 + $0xc8] sm:$0xff] }
 0x3cd   :  { %13767 = vst [vmem:[#allocation59_spill] sm:$0xff] %v10189_v10  ;;  %3909 = vmatmul.f32.gmra.mxu0 %v1351_v47  ;;  %v1353_v10 = vld [vmem:[#allocation2 + $0xca] sm:$0xff] }
 0x3ce   :  { %v2800_v14 = vpop.f32.mrf.mxu2  ;;  %3715 = vmatmul.f32.gmra.mxu3 %v1228_v22 }
 0x3cf   :  { %v2801_v54 = vadd.f32 %v2800_v14, %v13768_v45 }
 0x3d1   :  { %v3010_v9 = vadd.f32 %v3009_v32, %v2801_v54  ;;  %v1229_v32 = vld [vmem:[#allocation2 + $0xf9] sm:$0xff] }
 0x3d2   :  { %v3221_v1 = vpop.f32.mrf.mxu0 }
 0x3d3   :  { %v10192_v48 = vadd.f32 %v3218_v55, %v3010_v9  ;;  %3494 = vmatmul.f32.gmra.mxu2 %v1096_v7  ;;  %v3668_v27 = vpop.f32.mrf.mxu3  ;;  %v13772_v55 = vld [vmem:[#allocation72_spill] sm:$0xff]  ;;  %v1098_v7 = vld [vmem:[#allocation2 + $0xd8] sm:$0xff] }
 0x3d5   :  { %13769 = vst [vmem:[#allocation71_spill] sm:$0xff] %v10192_v48  ;;  %3912 = vmatmul.f32.gmra.mxu0 %v1352_v39  ;;  %v1354_v48 = vld [vmem:[#allocation2 + $0xda] sm:$0xff] }
 0x3d6   :  { %v2803_v49 = vpop.f32.mrf.mxu2  ;;  %3718 = vmatmul.f32.gmra.mxu3 %v1229_v32 }
 0x3d7   :  { %v2804_v19 = vadd.f32 %v2803_v49, %v13770_v60 }
 0x3d9   :  { %v3013_v47 = vadd.f32 %v3012_v57, %v2804_v19  ;;  %v1230_v57 = vld [vmem:[#allocation2 + $0x109] sm:$0xff] }
 0x3da   :  { %v3224_v25 = vpop.f32.mrf.mxu0 }
 0x3db   :  { %v10195_v14 = vadd.f32 %v3221_v1, %v3013_v47  ;;  %3497 = vmatmul.f32.gmra.mxu2 %v1097_v52  ;;  %v3671_v9 = vpop.f32.mrf.mxu3  ;;  %v13774_v1 = vld [vmem:[#allocation74_spill] sm:$0xff]  ;;  %v1099_v52 = vld [vmem:[#allocation2 + $0xe0] sm:$0xff] }
 0x3dd   :  { %13771 = vst [vmem:[#allocation63_spill] sm:$0xff] %v10195_v14  ;;  %3915 = vmatmul.f32.gmra.mxu0 %v1353_v10  ;;  %v1355_v14 = vld [vmem:[#allocation2 + $0xe2] sm:$0xff] }
 0x3de   :  { %v2806_v45 = vpop.f32.mrf.mxu2  ;;  %3721 = vmatmul.f32.gmra.mxu3 %v1230_v57 }
 0x3df   :  { %v2807_v54 = vadd.f32 %v2806_v45, %v13772_v55 }
 0x3e1   :  { %v3016_v39 = vadd.f32 %v3015_v28, %v2807_v54  ;;  %v1231_v28 = vld [vmem:[#allocation2 + $0x111] sm:$0xff] }
 0x3e2   :  { %v3227_v22 = vpop.f32.mrf.mxu0 }
 0x3e3   :  { %v10198_v49 = vadd.f32 %v3224_v25, %v3016_v39  ;;  %3500 = vmatmul.f32.gmra.mxu2 %v1098_v7  ;;  %v3674_v47 = vpop.f32.mrf.mxu3  ;;  %v13776_v25 = vld [vmem:[#allocation76_spill] sm:$0xff]  ;;  %v1100_v7 = vld [vmem:[#allocation2 + $0xf0] sm:$0xff] }
 0x3e5   :  { %13773 = vst [vmem:[#allocation73_spill] sm:$0xff] %v10198_v49  ;;  %3918 = vmatmul.f32.gmra.mxu0 %v1354_v48  ;;  %v1356_v49 = vld [vmem:[#allocation2 + $0xf2] sm:$0xff] }
 0x3e6   :  { %v2809_v60 = vpop.f32.mrf.mxu2  ;;  %3724 = vmatmul.f32.gmra.mxu3 %v1231_v28  ;;  %v1357_v28 = vld [vmem:[#allocation2 + $0xfa] sm:$0xff] }
 0x3e7   :  { %v2810_v19 = vadd.f32 %v2809_v60, %v13774_v1 }
 0x3e9   :  { %v3019_v10 = vadd.f32 %v3018_v2, %v2810_v19  ;;  %v1232_v2 = vld [vmem:[#allocation2 + $0x121] sm:$0xff]  ;;  %v1101_v19 = vld [vmem:[#allocation2 + $0xf8] sm:$0xff] }
 0x3ea   :  { %v3230_v32 = vpop.f32.mrf.mxu0 }
 0x3eb   :  { %v10201_v45 = vadd.f32 %v3227_v22, %v3019_v10  ;;  %3503 = vmatmul.f32.gmra.mxu2 %v1099_v52  ;;  %v3677_v39 = vpop.f32.mrf.mxu3 }
 0x3ed   :  { %13775 = vst [vmem:[#allocation66_spill] sm:$0xff] %v10201_v45  ;;  %3921 = vmatmul.f32.gmra.mxu0 %v1355_v14 }
 0x3ee   :  { %v2812_v55 = vpop.f32.mrf.mxu2  ;;  %3727 = vmatmul.f32.gmra.mxu3 %v1232_v2  ;;  %v1358_v2 = vld [vmem:[#allocation2 + $0x10a] sm:$0xff] }
 0x3ef   :  { %v2813_v54 = vadd.f32 %v2812_v55, %v13776_v25 }
 0x3f1   :  { %v3022_v48 = vadd.f32 %v3021_v34, %v2813_v54  ;;  %v1233_v34 = vld [vmem:[#allocation2 + $0x129] sm:$0xff] }
 0x3f2   :  { %v3877_v57 = vpop.f32.mrf.mxu0  ;;  %v1102_v54 = vld [vmem:[#allocation2 + $0x108] sm:$0xff] }
 0x3f3   :  { %v10204_v60 = vadd.f32 %v3230_v32, %v3022_v48  ;;  %3506 = vmatmul.f32.gmra.mxu2 %v1100_v7  ;;  %v3680_v52 = vpop.f32.mrf.mxu3 }
 0x3f5   :  { %13777 = vst [vmem:[#allocation75_spill] sm:$0xff] %v10204_v60  ;;  %3924 = vmatmul.f32.gmra.mxu0 %v1356_v49  ;;  %v1373_v60 = vld [vmem:[#allocation2 + $0x1ea] sm:$0xff] }
 0x3f6   :  { %v3459_v1 = vpop.f32.mrf.mxu2  ;;  %3730 = vmatmul.f32.gmra.mxu3 %v1233_v34  ;;  %v1359_v34 = vld [vmem:[#allocation2 + $0x112] sm:$0xff] }
 0x3f7   :  { %v3460_v22 = vadd.f32 %v3459_v1, %v9622_v20 }
 0x3f9   :  { %v3669_v14 = vadd.f32 %v3668_v27, %v3460_v22  ;;  %v1234_v27 = vld [vmem:[#allocation2 + $0x139] sm:$0xff] }
 0x3fa   :  { %v3880_v10 = vpop.f32.mrf.mxu0  ;;  %v6427_v22 = vld [vmem:[#allocation10 + $0x78] sm:$0xff] }
 0x3fb   :  { %v10207_v55 = vadd.f32 %v3877_v57, %v3669_v14  ;;  %3509 = vmatmul.f32.gmra.mxu2 %v1101_v19  ;;  %v3683_v7 = vpop.f32.mrf.mxu3  ;;  %v1103_v19 = vld [vmem:[#allocation2 + $0x110] sm:$0xff]  ;;  %6556 = vmatpush.msra.mxu1 %v6427_v22  ;;  %v1105_v22 = vld [vmem:[#allocation2 + $0x128] sm:$0xff] }
 0x3fd   :  { %13778 = vst [vmem:[#allocation69_spill] sm:$0xff] %v10207_v55  ;;  %3927 = vmatmul.f32.gmra.mxu0 %v1357_v28 }
 0x3fe   :  { %v3462_v25 = vpop.f32.mrf.mxu2  ;;  %3733 = vmatmul.f32.gmra.mxu3 %v1234_v27  ;;  %v1360_v27 = vld [vmem:[#allocation2 + $0x122] sm:$0xff] }
 0x3ff   :  { %v3463_v32 = vadd.f32 %v3462_v25, %v9634_v44  ;;  %v1235_v25 = vld [vmem:[#allocation2 + $0x141] sm:$0xff] }
 0x401   :  { %v3672_v49 = vadd.f32 %v3671_v9, %v3463_v32 }
 0x402   :  { %v3883_v48 = vpop.f32.mrf.mxu0 }
 0x403   :  { %v10210_v20 = vadd.f32 %v3880_v10, %v3672_v49  ;;  %3512 = vmatmul.f32.gmra.mxu2 %v1102_v54  ;;  %v3686_v28 = vpop.f32.mrf.mxu3  ;;  %v1104_v54 = vld [vmem:[#allocation2 + $0x120] sm:$0xff] }
 0x405   :  { %13779 = vst [vmem:[#allocation17_spill] sm:$0xff] %v10210_v20  ;;  %3930 = vmatmul.f32.gmra.mxu0 %v1358_v2 }
 0x406   :  { %v3465_v1 = vpop.f32.mrf.mxu2  ;;  %3736 = vmatmul.f32.gmra.mxu3 %v1235_v25  ;;  %v1361_v25 = vld [vmem:[#allocation2 + $0x12a] sm:$0xff] }
 0x407   :  { %v3466_v57 = vadd.f32 %v3465_v1, %v9648_v51 }
 0x409   :  { %v3675_v14 = vadd.f32 %v3674_v47, %v3466_v57  ;;  %v1236_v47 = vld [vmem:[#allocation2 + $0x151] sm:$0xff] }
 0x40a   :  { %v3886_v44 = vpop.f32.mrf.mxu0 }
 0x40b   :  { %v10213_v9 = vadd.f32 %v3883_v48, %v3675_v14  ;;  %3515 = vmatmul.f32.gmra.mxu2 %v1103_v19  ;;  %v3689_v2 = vpop.f32.mrf.mxu3 }
 0x40d   :  { %13780 = vst [vmem:[#allocation15_spill] sm:$0xff] %v10213_v9  ;;  %3933 = vmatmul.f32.gmra.mxu0 %v1359_v34 }
 0x40e   :  { %v3468_v10 = vpop.f32.mrf.mxu2  ;;  %3739 = vmatmul.f32.gmra.mxu3 %v1236_v47  ;;  %v1362_v47 = vld [vmem:[#allocation2 + $0x13a] sm:$0xff] }
 0x40f   :  { %v3469_v32 = vadd.f32 %v3468_v10, %v9662_v40 }
 0x411   :  { %v3678_v49 = vadd.f32 %v3677_v39, %v3469_v32  ;;  %v1237_v39 = vld [vmem:[#allocation2 + $0x159] sm:$0xff] }
 0x412   :  { %v3889_v51 = vpop.f32.mrf.mxu0  ;;  %v1106_v32 = vld [vmem:[#allocation2 + $0x138] sm:$0xff] }
 0x413   :  { %v10216_v1 = vadd.f32 %v3886_v44, %v3678_v49  ;;  %3518 = vmatmul.f32.gmra.mxu2 %v1104_v54  ;;  %v3692_v14 = vpop.f32.mrf.mxu3 }
 0x415   :  { %13781 = vst [vmem:[#allocation18_spill] sm:$0xff] %v10216_v1  ;;  %3936 = vmatmul.f32.gmra.mxu0 %v1360_v27 }
 0x416   :  { %v3471_v57 = vpop.f32.mrf.mxu2  ;;  %3742 = vmatmul.f32.gmra.mxu3 %v1237_v39  ;;  %v1363_v39 = vld [vmem:[#allocation2 + $0x142] sm:$0xff] }
 0x417   :  { %v3472_v48 = vadd.f32 %v3471_v57, %v9676_v61 }
 0x419   :  { %v3681_v19 = vadd.f32 %v3680_v52, %v3472_v48  ;;  %v1238_v52 = vld [vmem:[#allocation2 + $0x169] sm:$0xff] }
 0x41a   :  { %v3892_v34 = vpop.f32.mrf.mxu0  ;;  %v6426_v48 = vld [vmem:[#allocation10 + $0x70] sm:$0xff] }
 0x41b   :  { %v10219_v40 = vadd.f32 %v3889_v51, %v3681_v19  ;;  %3521 = vmatmul.f32.gmra.mxu2 %v1105_v22  ;;  %v3695_v49 = vpop.f32.mrf.mxu3  ;;  %v1107_v22 = vld [vmem:[#allocation2 + $0x140] sm:$0xff]  ;;  %6557 = vmatpush.msra.mxu1 %v6426_v48  ;;  %v1109_v48 = vld [vmem:[#allocation2 + $0x158] sm:$0xff] }
 0x41d   :  { %13782 = vst [vmem:[#allocation16_spill] sm:$0xff] %v10219_v40  ;;  %3939 = vmatmul.f32.gmra.mxu0 %v1361_v25 }
 0x41e   :  { %v3474_v10 = vpop.f32.mrf.mxu2  ;;  %3745 = vmatmul.f32.gmra.mxu3 %v1238_v52  ;;  %v1364_v52 = vld [vmem:[#allocation2 + $0x152] sm:$0xff] }
 0x41f   :  { %v3475_v44 = vadd.f32 %v3474_v10, %v9690_v11  ;;  %v1239_v10 = vld [vmem:[#allocation2 + $0x171] sm:$0xff] }
 0x421   :  { %v3684_v54 = vadd.f32 %v3683_v7, %v3475_v44 }
 0x422   :  { %v3895_v27 = vpop.f32.mrf.mxu0 }
 0x423   :  { %v10222_v61 = vadd.f32 %v3892_v34, %v3684_v54  ;;  %3524 = vmatmul.f32.gmra.mxu2 %v1106_v32  ;;  %v3698_v25 = vpop.f32.mrf.mxu3  ;;  %v1108_v32 = vld [vmem:[#allocation2 + $0x150] sm:$0xff] }
 0x425   :  { %13783 = vst [vmem:[#allocation19_spill] sm:$0xff] %v10222_v61  ;;  %3942 = vmatmul.f32.gmra.mxu0 %v1362_v47 }
 0x426   :  { %v3477_v57 = vpop.f32.mrf.mxu2  ;;  %3748 = vmatmul.f32.gmra.mxu3 %v1239_v10  ;;  %v1365_v10 = vld [vmem:[#allocation2 + $0x15a] sm:$0xff] }
 0x427   :  { %v3478_v51 = vadd.f32 %v3477_v57, %v9704_v29 }
 0x429   :  { %v3687_v19 = vadd.f32 %v3686_v28, %v3478_v51  ;;  %v1240_v28 = vld [vmem:[#allocation2 + $0x181] sm:$0xff] }
 0x42a   :  { %v3898_v11 = vpop.f32.mrf.mxu0 }
 0x42b   :  { %v10225_v7 = vadd.f32 %v3895_v27, %v3687_v19  ;;  %3527 = vmatmul.f32.gmra.mxu2 %v1107_v22  ;;  %v3701_v47 = vpop.f32.mrf.mxu3 }
 0x42d   :  { %13784 = vst [vmem:[#allocation20_spill] sm:$0xff] %v10225_v7  ;;  %3945 = vmatmul.f32.gmra.mxu0 %v1363_v39 }
 0x42e   :  { %v3480_v34 = vpop.f32.mrf.mxu2  ;;  %3751 = vmatmul.f32.gmra.mxu3 %v1240_v28  ;;  %v1366_v28 = vld [vmem:[#allocation2 + $0x16a] sm:$0xff] }
 0x42f   :  { %v3481_v44 = vadd.f32 %v3480_v34, %v9719_v30 }
 0x431   :  { %v3690_v54 = vadd.f32 %v3689_v2, %v3481_v44  ;;  %v1241_v2 = vld [vmem:[#allocation2 + $0x189] sm:$0xff] }
 0x432   :  { %v3901_v29 = vpop.f32.mrf.mxu0  ;;  %v1110_v44 = vld [vmem:[#allocation2 + $0x168] sm:$0xff] }
 0x433   :  { %v10228_v57 = vadd.f32 %v3898_v11, %v3690_v54  ;;  %3530 = vmatmul.f32.gmra.mxu2 %v1108_v32  ;;  %v3704_v19 = vpop.f32.mrf.mxu3 }
 0x435   :  { %13785 = vst [vmem:[#allocation21_spill] sm:$0xff] %v10228_v57  ;;  %3948 = vmatmul.f32.gmra.mxu0 %v1364_v52 }
 0x436   :  { %v3483_v51 = vpop.f32.mrf.mxu2  ;;  %3754 = vmatmul.f32.gmra.mxu3 %v1241_v2  ;;  %v1367_v2 = vld [vmem:[#allocation2 + $0x172] sm:$0xff] }
 0x437   :  { %v3484_v27 = vadd.f32 %v3483_v51, %v9736_v0 }
 0x439   :  { %v3693_v22 = vadd.f32 %v3692_v14, %v3484_v27  ;;  %v1242_v14 = vld [vmem:[#allocation2 + $0x199] sm:$0xff]  ;;  %v6425_v27 = vld [vmem:[#allocation10 + $0x68] sm:$0xff] }
 0x43a   :  { %v3904_v39 = vpop.f32.mrf.mxu0  ;;  %6558 = vmatpush.msra.mxu1 %v6425_v27  ;;  %v1113_v27 = vld [vmem:[#allocation2 + $0x188] sm:$0xff] }
 0x43b   :  { %v10231_v30 = vadd.f32 %v3901_v29, %v3693_v22  ;;  %3533 = vmatmul.f32.gmra.mxu2 %v1109_v48  ;;  %v3707_v54 = vpop.f32.mrf.mxu3  ;;  %v1111_v48 = vld [vmem:[#allocation2 + $0x170] sm:$0xff] }
 0x43d   :  { %13786 = vst [vmem:[#allocation22_spill] sm:$0xff] %v10231_v30  ;;  %3951 = vmatmul.f32.gmra.mxu0 %v1365_v10 }
 0x43e   :  { %v3486_v34 = vpop.f32.mrf.mxu2  ;;  %3757 = vmatmul.f32.gmra.mxu3 %v1242_v14  ;;  %v1368_v14 = vld [vmem:[#allocation2 + $0x182] sm:$0xff] }
 0x43f   :  { %v3487_v11 = vadd.f32 %v3486_v34, %v9754_v13  ;;  %v1243_v34 = vld [vmem:[#allocation2 + $0x1a1] sm:$0xff] }
 0x441   :  { %v3696_v32 = vadd.f32 %v3695_v49, %v3487_v11 }
 0x442   :  { %v3907_v52 = vpop.f32.mrf.mxu0 }
 0x443   :  { %v10234_v0 = vadd.f32 %v3904_v39, %v3696_v32  ;;  %3536 = vmatmul.f32.gmra.mxu2 %v1110_v44  ;;  %v3710_v10 = vpop.f32.mrf.mxu3  ;;  %v1112_v44 = vld [vmem:[#allocation2 + $0x180] sm:$0xff] }
 0x445   :  { %13787 = vst [vmem:[#allocation23_spill] sm:$0xff] %v10234_v0  ;;  %3954 = vmatmul.f32.gmra.mxu0 %v1366_v28 }
 0x446   :  { %v3489_v51 = vpop.f32.mrf.mxu2  ;;  %3760 = vmatmul.f32.gmra.mxu3 %v1243_v34  ;;  %v1369_v34 = vld [vmem:[#allocation2 + $0x18a] sm:$0xff] }
 0x447   :  { %v3490_v29 = vadd.f32 %v3489_v51, %v9769_v35 }
 0x449   :  { %v3699_v22 = vadd.f32 %v3698_v25, %v3490_v29  ;;  %v1244_v25 = vld [vmem:[#allocation2 + $0x1e1] sm:$0xff] }
 0x44a   :  { %v3910_v13 = vpop.f32.mrf.mxu0 }
 0x44b   :  { %v10237_v49 = vadd.f32 %v3907_v52, %v3699_v22  ;;  %3539 = vmatmul.f32.gmra.mxu2 %v1111_v48  ;;  %v3713_v28 = vpop.f32.mrf.mxu3 }
 0x44d   :  { %13788 = vst [vmem:[#allocation24_spill] sm:$0xff] %v10237_v49  ;;  %3957 = vmatmul.f32.gmra.mxu0 %v1367_v2 }
 0x44e   :  { %v3492_v39 = vpop.f32.mrf.mxu2  ;;  %3763 = vmatmul.f32.gmra.mxu3 %v1244_v25 }
 0x44f   :  { %v3493_v11 = vadd.f32 %v3492_v39, %v9780_v5 }
 0x451   :  { %v3702_v32 = vadd.f32 %v3701_v47, %v3493_v11  ;;  %v1245_v47 = vld [vmem:[#allocation2 + $0x1e9] sm:$0xff] }
 0x452   :  { %v3913_v35 = vpop.f32.mrf.mxu0 }
 0x453   :  { %v10240_v51 = vadd.f32 %v3910_v13, %v3702_v32  ;;  %3542 = vmatmul.f32.gmra.mxu2 %v1112_v44  ;;  %v3716_v22 = vpop.f32.mrf.mxu3 }
 0x455   :  { %13789 = vst [vmem:[#allocation25_spill] sm:$0xff] %v10240_v51  ;;  %3960 = vmatmul.f32.gmra.mxu0 %v1368_v14  ;;  %v1370_v14 = vld [vmem:[#allocation2 + $0x19a] sm:$0xff] }
 0x456   :  { %v3495_v29 = vpop.f32.mrf.mxu2  ;;  %3766 = vmatmul.f32.gmra.mxu3 %v1245_v47 }
 0x457   :  { %v3496_v52 = vadd.f32 %v3495_v29, %v9791_v31  ;;  %v10248_v31 = vld [vmem:[#allocation2 + $0x1b0] sm:$0xff] }
 0x459   :  { %v3705_v48 = vadd.f32 %v3704_v19, %v3496_v52  ;;  %v1246_v19 = vld [vmem:[#allocation2 + $0x1f9] sm:$0xff] }
 0x45a   :  { %v3916_v2 = vpop.f32.mrf.mxu0  ;;  %v6424_v52 = vld [vmem:[#allocation10 + $0x60] sm:$0xff] }
 0x45b   :  { %v10243_v5 = vadd.f32 %v3913_v35, %v3705_v48  ;;  %3545 = vmatmul.f32.gmra.mxu2 %v1113_v27  ;;  %v3719_v44 = vpop.f32.mrf.mxu3  ;;  %6559 = vmatpush.msra.mxu1 %v6424_v52  ;;  %v1371_v48 = vld [vmem:[#allocation2 + $0x1a2] sm:$0xff] }
 0x45c   :  { %v1117_v52 = vld [vmem:[#allocation2 + $0x1e8] sm:$0xff] }
 0x45d   :  { %13790 = vst [vmem:[#allocation26_spill] sm:$0xff] %v10243_v5  ;;  %3963 = vmatmul.f32.gmra.mxu0 %v1369_v34 }
 0x45e   :  { %v3498_v39 = vpop.f32.mrf.mxu2  ;;  %3769 = vmatmul.f32.gmra.mxu3 %v1246_v19  ;;  %v1372_v19 = vld [vmem:[#allocation2 + $0x1e2] sm:$0xff] }
 0x45f   :  { %v3499_v13 = vadd.f32 %v3498_v39, %v9805_v4 }
 0x461   :  { %v3708_v11 = vadd.f32 %v3707_v54, %v3499_v13  ;;  %v1116_v13 = vld [vmem:[#allocation2 + $0x1e0] sm:$0xff] }
 0x462   :  { %v3919_v32 = vpop.f32.mrf.mxu0 }
 0x463   :  { %v10246_v25 = vadd.f32 %v3916_v2, %v3708_v11  ;;  %3548 = vmatmul.f32.gmra.mxu2 %v10248_v31  ;;  %v3722_v4 = vpop.f32.mrf.mxu3  ;;  %v1247_v2 = vld [vmem:[#allocation2 + $0x201] sm:$0xff] }
 0x465   :  { %13791 = vst [vmem:[#allocation27_spill] sm:$0xff] %v10246_v25  ;;  %3966 = vmatmul.f32.gmra.mxu0 %v1370_v14 }
 0x466   :  { %v3501_v35 = vpop.f32.mrf.mxu2  ;;  %3772 = vmatmul.f32.gmra.mxu3 %v1247_v2 }
 0x467   :  { %v3502_v29 = vadd.f32 %v3501_v35, %v9820_v43 }
 0x469   :  { %v3711_v27 = vadd.f32 %v3710_v10, %v3502_v29  ;;  %v1248_v10 = vld [vmem:[#allocation2 + $0x211] sm:$0xff] }
 0x46a   :  { %v3922_v54 = vpop.f32.mrf.mxu0 }
 0x46b   :  { %v10252_v34 = vadd.f32 %v3919_v32, %v3711_v27  ;;  %3551 = vmatmul.f32.gmra.mxu2 %v10248_v31  ;;  %v3725_v14 = vpop.f32.mrf.mxu3 }
 0x46d   :  { %13792 = vst [vmem:[#allocation28_spill] sm:$0xff] %v10252_v34  ;;  %3969 = vmatmul.f32.gmra.mxu0 %v1371_v48 }
 0x46e   :  { %v3504_v47 = vpop.f32.mrf.mxu2  ;;  %3775 = vmatmul.f32.gmra.mxu3 %v1248_v10  ;;  %v1374_v10 = vld [vmem:[#allocation2 + $0x1fa] sm:$0xff] }
 0x46f   :  { %v3505_v39 = vadd.f32 %v3504_v47, %v9834_v38 }
 0x471   :  { %v3714_v11 = vadd.f32 %v3713_v28, %v3505_v39  ;;  %v1249_v28 = vld [vmem:[#allocation2 + $0x219] sm:$0xff] }
 0x472   :  { %v3925_v43 = vpop.f32.mrf.mxu0  ;;  %v1118_v39 = vld [vmem:[#allocation2 + $0x1f8] sm:$0xff] }
 0x473   :  { %v10256_v35 = vadd.f32 %v3922_v54, %v3714_v11  ;;  %3554 = vmatmul.f32.gmra.mxu2 %v1116_v13  ;;  %v3728_v48 = vpop.f32.mrf.mxu3 }
 0x475   :  { %13793 = vst [vmem:[#allocation29_spill] sm:$0xff] %v10256_v35  ;;  %3972 = vmatmul.f32.gmra.mxu0 %v1372_v19 }
 0x476   :  { %v3507_v32 = vpop.f32.mrf.mxu2  ;;  %3778 = vmatmul.f32.gmra.mxu3 %v1249_v28  ;;  %v1375_v28 = vld [vmem:[#allocation2 + $0x202] sm:$0xff] }
 0x477   :  { %v3508_v29 = vadd.f32 %v3507_v32, %v9847_v26 }
 0x479   :  { %v3717_v27 = vadd.f32 %v3716_v22, %v3508_v29  ;;  %v1250_v22 = vld [vmem:[#allocation2 + $0x229] sm:$0xff]  ;;  %v6423_v29 = vld [vmem:[#allocation10 + $0x58] sm:$0xff] }
 0x47a   :  { %v3928_v2 = vpop.f32.mrf.mxu0  ;;  %6560 = vmatpush.msra.mxu1 %v6423_v29  ;;  %v1121_v29 = vld [vmem:[#allocation2 + $0x218] sm:$0xff] }
 0x47b   :  { %v10259_v38 = vadd.f32 %v3925_v43, %v3717_v27  ;;  %3557 = vmatmul.f32.gmra.mxu2 %v1117_v52  ;;  %v3731_v11 = vpop.f32.mrf.mxu3 }
 0x47d   :  { %13794 = vst [vmem:[#allocation30_spill] sm:$0xff] %v10259_v38  ;;  %3975 = vmatmul.f32.gmra.mxu0 %v1373_v60  ;;  %v1119_v60 = vld [vmem:[#allocation2 + $0x200] sm:$0xff] }
 0x47e   :  { %v3510_v47 = vpop.f32.mrf.mxu2  ;;  %3781 = vmatmul.f32.gmra.mxu3 %v1250_v22  ;;  %v1376_v22 = vld [vmem:[#allocation2 + $0x212] sm:$0xff] }
 0x47f   :  { %v3511_v54 = vadd.f32 %v3510_v47, %v9861_v8  ;;  %v1251_v47 = vld [vmem:[#allocation2 + $0x231] sm:$0xff] }
 0x481   :  { %v3720_v13 = vadd.f32 %v3719_v44, %v3511_v54 }
 0x482   :  { %v3931_v19 = vpop.f32.mrf.mxu0 }
 0x483   :  { %v10262_v26 = vadd.f32 %v3928_v2, %v3720_v13  ;;  %3560 = vmatmul.f32.gmra.mxu2 %v1118_v39  ;;  %v3734_v27 = vpop.f32.mrf.mxu3  ;;  %v1120_v39 = vld [vmem:[#allocation2 + $0x210] sm:$0xff] }
 0x485   :  { %13795 = vst [vmem:[#allocation31_spill] sm:$0xff] %v10262_v26  ;;  %3978 = vmatmul.f32.gmra.mxu0 %v1374_v10 }
 0x486   :  { %v3513_v32 = vpop.f32.mrf.mxu2  ;;  %3784 = vmatmul.f32.gmra.mxu3 %v1251_v47  ;;  %v1377_v47 = vld [vmem:[#allocation2 + $0x21a] sm:$0xff] }
 0x487   :  { %v3514_v43 = vadd.f32 %v3513_v32, %v9875_v17 }
 0x489   :  { %v3723_v52 = vadd.f32 %v3722_v4, %v3514_v43  ;;  %v1252_v4 = vld [vmem:[#allocation2 + $0x241] sm:$0xff] }
 0x48a   :  { %v3934_v8 = vpop.f32.mrf.mxu0 }
 0x48b   :  { %v10265_v44 = vadd.f32 %v3931_v19, %v3723_v52  ;;  %3563 = vmatmul.f32.gmra.mxu2 %v1119_v60  ;;  %v3737_v10 = vpop.f32.mrf.mxu3 }
 0x48d   :  { %13796 = vst [vmem:[#allocation33_spill] sm:$0xff] %v10265_v44  ;;  %3981 = vmatmul.f32.gmra.mxu0 %v1375_v28 }
 0x48e   :  { %v3516_v2 = vpop.f32.mrf.mxu2  ;;  %3787 = vmatmul.f32.gmra.mxu3 %v1252_v4  ;;  %v1378_v4 = vld [vmem:[#allocation2 + $0x22a] sm:$0xff] }
 0x48f   :  { %v3517_v54 = vadd.f32 %v3516_v2, %v9889_v24 }
 0x491   :  { %v3726_v13 = vadd.f32 %v3725_v14, %v3517_v54  ;;  %v1253_v14 = vld [vmem:[#allocation2 + $0x249] sm:$0xff] }
 0x492   :  { %v3937_v17 = vpop.f32.mrf.mxu0  ;;  %v1122_v54 = vld [vmem:[#allocation2 + $0x228] sm:$0xff] }
 0x493   :  { %v10268_v32 = vadd.f32 %v3934_v8, %v3726_v13  ;;  %3566 = vmatmul.f32.gmra.mxu2 %v1120_v39  ;;  %v3740_v52 = vpop.f32.mrf.mxu3 }
 0x495   :  { %13797 = vst [vmem:[#allocation35_spill] sm:$0xff] %v10268_v32  ;;  %3984 = vmatmul.f32.gmra.mxu0 %v1376_v22 }
 0x496   :  { %v3519_v43 = vpop.f32.mrf.mxu2  ;;  %3790 = vmatmul.f32.gmra.mxu3 %v1253_v14  ;;  %v1379_v14 = vld [vmem:[#allocation2 + $0x232] sm:$0xff] }
 0x497   :  { %v3520_v19 = vadd.f32 %v3519_v43, %v9903_v63 }
 0x499   :  { %v3729_v60 = vadd.f32 %v3728_v48, %v3520_v19  ;;  %v1254_v48 = vld [vmem:[#allocation2 + $0x259] sm:$0xff]  ;;  %v6422_v19 = vld [vmem:[#allocation10 + $0x50] sm:$0xff] }
 0x49a   :  { %v3940_v28 = vpop.f32.mrf.mxu0  ;;  %6561 = vmatpush.msra.mxu1 %v6422_v19  ;;  %v1125_v19 = vld [vmem:[#allocation2 + $0x248] sm:$0xff] }
 0x49b   :  { %v10271_v24 = vadd.f32 %v3937_v17, %v3729_v60  ;;  %3569 = vmatmul.f32.gmra.mxu2 %v1121_v29  ;;  %v3743_v13 = vpop.f32.mrf.mxu3  ;;  %v1123_v29 = vld [vmem:[#allocation2 + $0x230] sm:$0xff] }
 0x49d   :  { %13798 = vst [vmem:[#allocation37_spill] sm:$0xff] %v10271_v24  ;;  %3987 = vmatmul.f32.gmra.mxu0 %v1377_v47 }
 0x49e   :  { %v3522_v2 = vpop.f32.mrf.mxu2  ;;  %3793 = vmatmul.f32.gmra.mxu3 %v1254_v48  ;;  %v1380_v48 = vld [vmem:[#allocation2 + $0x242] sm:$0xff] }
 0x49f   :  { %v3523_v8 = vadd.f32 %v3522_v2, %v9917_v16  ;;  %v1255_v2 = vld [vmem:[#allocation2 + $0x261] sm:$0xff] }
 0x4a1   :  { %v3732_v39 = vadd.f32 %v3731_v11, %v3523_v8 }
 0x4a2   :  { %v3943_v22 = vpop.f32.mrf.mxu0 }
 0x4a3   :  { %v10274_v63 = vadd.f32 %v3940_v28, %v3732_v39  ;;  %3572 = vmatmul.f32.gmra.mxu2 %v1122_v54  ;;  %v3746_v47 = vpop.f32.mrf.mxu3  ;;  %v1124_v54 = vld [vmem:[#allocation2 + $0x240] sm:$0xff] }
 0x4a5   :  { %13799 = vst [vmem:[#allocation40_spill] sm:$0xff] %v10274_v63  ;;  %3990 = vmatmul.f32.gmra.mxu0 %v1378_v4 }
 0x4a6   :  { %v3525_v43 = vpop.f32.mrf.mxu2  ;;  %3796 = vmatmul.f32.gmra.mxu3 %v1255_v2  ;;  %v1381_v2 = vld [vmem:[#allocation2 + $0x24a] sm:$0xff] }
 0x4a7   :  { %v3526_v17 = vadd.f32 %v3525_v43, %v9931_v3 }
 0x4a9   :  { %v3735_v60 = vadd.f32 %v3734_v27, %v3526_v17  ;;  %v1256_v27 = vld [vmem:[#allocation2 + $0x271] sm:$0xff] }
 0x4aa   :  { %v3946_v16 = vpop.f32.mrf.mxu0 }
 0x4ab   :  { %v10277_v11 = vadd.f32 %v3943_v22, %v3735_v60  ;;  %3575 = vmatmul.f32.gmra.mxu2 %v1123_v29  ;;  %v3749_v4 = vpop.f32.mrf.mxu3 }
 0x4ad   :  { %13800 = vst [vmem:[#allocation43_spill] sm:$0xff] %v10277_v11  ;;  %3993 = vmatmul.f32.gmra.mxu0 %v1379_v14 }
 0x4ae   :  { %v3528_v28 = vpop.f32.mrf.mxu2  ;;  %3799 = vmatmul.f32.gmra.mxu3 %v1256_v27  ;;  %v1382_v27 = vld [vmem:[#allocation2 + $0x25a] sm:$0xff] }
 0x4af   :  { %v3529_v8 = vadd.f32 %v3528_v28, %v9945_v12 }
 0x4b1   :  { %v3738_v39 = vadd.f32 %v3737_v10, %v3529_v8  ;;  %v1257_v10 = vld [vmem:[#allocation2 + $0x279] sm:$0xff] }
 0x4b2   :  { %v3949_v3 = vpop.f32.mrf.mxu0  ;;  %v1126_v8 = vld [vmem:[#allocation2 + $0x258] sm:$0xff] }
 0x4b3   :  { %v10280_v43 = vadd.f32 %v3946_v16, %v3738_v39  ;;  %3578 = vmatmul.f32.gmra.mxu2 %v1124_v54  ;;  %v3752_v60 = vpop.f32.mrf.mxu3 }
 0x4b5   :  { %13801 = vst [vmem:[#allocation46_spill] sm:$0xff] %v10280_v43  ;;  %3996 = vmatmul.f32.gmra.mxu0 %v1380_v48 }
 0x4b6   :  { %v3531_v17 = vpop.f32.mrf.mxu2  ;;  %3802 = vmatmul.f32.gmra.mxu3 %v1257_v10  ;;  %v1383_v10 = vld [vmem:[#allocation2 + $0x262] sm:$0xff] }
 0x4b7   :  { %v3532_v22 = vadd.f32 %v3531_v17, %v9957_v59 }
 0x4b9   :  { %v3741_v29 = vadd.f32 %v3740_v52, %v3532_v22  ;;  %v1258_v52 = vld [vmem:[#allocation2 + $0x289] sm:$0xff] }
 0x4ba   :  { %v3952_v14 = vpop.f32.mrf.mxu0  ;;  %v6421_v22 = vld [vmem:[#allocation10 + $0x48] sm:$0xff] }
 0x4bb   :  { %v10283_v12 = vadd.f32 %v3949_v3, %v3741_v29  ;;  %3581 = vmatmul.f32.gmra.mxu2 %v1125_v19  ;;  %v3755_v39 = vpop.f32.mrf.mxu3  ;;  %v1127_v19 = vld [vmem:[#allocation2 + $0x260] sm:$0xff]  ;;  %6562 = vmatpush.msra.mxu1 %v6421_v22  ;;  %v1129_v22 = vld [vmem:[#allocation2 + $0x278] sm:$0xff] }
 0x4bd   :  { %13802 = vst [vmem:[#allocation49_spill] sm:$0xff] %v10283_v12  ;;  %3999 = vmatmul.f32.gmra.mxu0 %v1381_v2 }
 0x4be   :  { %v3534_v28 = vpop.f32.mrf.mxu2  ;;  %3805 = vmatmul.f32.gmra.mxu3 %v1258_v52  ;;  %v1384_v52 = vld [vmem:[#allocation2 + $0x272] sm:$0xff] }
 0x4bf   :  { %v3535_v16 = vadd.f32 %v3534_v28, %v9969_v62  ;;  %v1259_v28 = vld [vmem:[#allocation2 + $0x291] sm:$0xff] }
 0x4c1   :  { %v3744_v54 = vadd.f32 %v3743_v13, %v3535_v16 }
 0x4c2   :  { %v3955_v48 = vpop.f32.mrf.mxu0 }
 0x4c3   :  { %v10286_v59 = vadd.f32 %v3952_v14, %v3744_v54  ;;  %3584 = vmatmul.f32.gmra.mxu2 %v1126_v8  ;;  %v3758_v2 = vpop.f32.mrf.mxu3  ;;  %v1128_v8 = vld [vmem:[#allocation2 + $0x270] sm:$0xff] }
 0x4c5   :  { %13803 = vst [vmem:[#allocation52_spill] sm:$0xff] %v10286_v59  ;;  %4002 = vmatmul.f32.gmra.mxu0 %v1382_v27 }
 0x4c6   :  { %v3537_v17 = vpop.f32.mrf.mxu2  ;;  %3808 = vmatmul.f32.gmra.mxu3 %v1259_v28  ;;  %v1385_v28 = vld [vmem:[#allocation2 + $0x27a] sm:$0xff] }
 0x4c7   :  { %v3538_v3 = vadd.f32 %v3537_v17, %v9981_v23 }
 0x4c9   :  { %v3747_v29 = vadd.f32 %v3746_v47, %v3538_v3  ;;  %v1260_v47 = vld [vmem:[#allocation2 + $0x2a1] sm:$0xff] }
 0x4ca   :  { %v3958_v62 = vpop.f32.mrf.mxu0 }
 0x4cb   :  { %v10289_v13 = vadd.f32 %v3955_v48, %v3747_v29  ;;  %3587 = vmatmul.f32.gmra.mxu2 %v1127_v19  ;;  %v3761_v27 = vpop.f32.mrf.mxu3 }
 0x4cd   :  { %13804 = vst [vmem:[#allocation55_spill] sm:$0xff] %v10289_v13  ;;  %4005 = vmatmul.f32.gmra.mxu0 %v1383_v10 }
 0x4ce   :  { %v3540_v14 = vpop.f32.mrf.mxu2  ;;  %3811 = vmatmul.f32.gmra.mxu3 %v1260_v47  ;;  %v1386_v47 = vld [vmem:[#allocation2 + $0x28a] sm:$0xff] }
 0x4cf   :  { %v3541_v16 = vadd.f32 %v3540_v14, %v9992_v36 }
 0x4d1   :  { %v3750_v54 = vadd.f32 %v3749_v4, %v3541_v16  ;;  %v1261_v4 = vld [vmem:[#allocation2 + $0x2a9] sm:$0xff] }
 0x4d2   :  { %v3961_v23 = vpop.f32.mrf.mxu0  ;;  %v1130_v16 = vld [vmem:[#allocation2 + $0x288] sm:$0xff] }
 0x4d3   :  { %v10292_v17 = vadd.f32 %v3958_v62, %v3750_v54  ;;  %3590 = vmatmul.f32.gmra.mxu2 %v1128_v8  ;;  %v3764_v29 = vpop.f32.mrf.mxu3 }
 0x4d5   :  { %13805 = vst [vmem:[#allocation58_spill] sm:$0xff] %v10292_v17  ;;  %4008 = vmatmul.f32.gmra.mxu0 %v1384_v52 }
 0x4d6   :  { %v3543_v3 = vpop.f32.mrf.mxu2  ;;  %3814 = vmatmul.f32.gmra.mxu3 %v1261_v4  ;;  %v1387_v4 = vld [vmem:[#allocation2 + $0x292] sm:$0xff] }
 0x4d7   :  { %v3544_v48 = vadd.f32 %v3543_v3, %v10003_v21 }
 0x4d9   :  { %v3753_v19 = vadd.f32 %v3752_v60, %v3544_v48  ;;  %v1262_v60 = vld [vmem:[#allocation2 + $0x2b9] sm:$0xff] }
 0x4da   :  { %v3964_v10 = vpop.f32.mrf.mxu0  ;;  %v6420_v48 = vld [vmem:[#allocation10 + $0x40] sm:$0xff] }
 0x4db   :  { %v10295_v36 = vadd.f32 %v3961_v23, %v3753_v19  ;;  %3593 = vmatmul.f32.gmra.mxu2 %v1129_v22  ;;  %v3767_v54 = vpop.f32.mrf.mxu3  ;;  %v1131_v22 = vld [vmem:[#allocation2 + $0x290] sm:$0xff]  ;;  %6563 = vmatpush.msra.mxu1 %v6420_v48  ;;  %v1133_v48 = vld [vmem:[#allocation2 + $0x2a8] sm:$0xff] }
 0x4dd   :  { %13806 = vst [vmem:[#allocation61_spill] sm:$0xff] %v10295_v36  ;;  %4011 = vmatmul.f32.gmra.mxu0 %v1385_v28 }
 0x4de   :  { %v3546_v14 = vpop.f32.mrf.mxu2  ;;  %3817 = vmatmul.f32.gmra.mxu3 %v1262_v60  ;;  %v1388_v60 = vld [vmem:[#allocation2 + $0x2a2] sm:$0xff] }
 0x4df   :  { %v3547_v62 = vadd.f32 %v3546_v14, %v10014_v41  ;;  %v1263_v14 = vld [vmem:[#allocation2 + $0x2c1] sm:$0xff] }
 0x4e1   :  { %v3756_v8 = vadd.f32 %v3755_v39, %v3547_v62 }
 0x4e2   :  { %v3967_v52 = vpop.f32.mrf.mxu0 }
 0x4e3   :  { %v10298_v21 = vadd.f32 %v3964_v10, %v3756_v8  ;;  %3596 = vmatmul.f32.gmra.mxu2 %v1130_v16  ;;  %v3770_v28 = vpop.f32.mrf.mxu3  ;;  %v1132_v16 = vld [vmem:[#allocation2 + $0x2a0] sm:$0xff] }
 0x4e5   :  { %13807 = vst [vmem:[#allocation64_spill] sm:$0xff] %v10298_v21  ;;  %4014 = vmatmul.f32.gmra.mxu0 %v1386_v47 }
 0x4e6   :  { %v3549_v3 = vpop.f32.mrf.mxu2  ;;  %3820 = vmatmul.f32.gmra.mxu3 %v1263_v14  ;;  %v1389_v14 = vld [vmem:[#allocation2 + $0x2aa] sm:$0xff] }
 0x4e7   :  { %v3550_v23 = vadd.f32 %v3549_v3, %v10025_v33 }
 0x4e9   :  { %v3759_v19 = vadd.f32 %v3758_v2, %v3550_v23  ;;  %v1264_v2 = vld [vmem:[#allocation2 + $0x2d1] sm:$0xff] }
 0x4ea   :  { %v3970_v41 = vpop.f32.mrf.mxu0 }
 0x4eb   :  { %v10301_v39 = vadd.f32 %v3967_v52, %v3759_v19  ;;  %3599 = vmatmul.f32.gmra.mxu2 %v1131_v22  ;;  %v3773_v47 = vpop.f32.mrf.mxu3 }
 0x4ed   :  { %13808 = vst [vmem:[#allocation67_spill] sm:$0xff] %v10301_v39  ;;  %4017 = vmatmul.f32.gmra.mxu0 %v1387_v4 }
 0x4ee   :  { %v3552_v10 = vpop.f32.mrf.mxu2  ;;  %3823 = vmatmul.f32.gmra.mxu3 %v1264_v2  ;;  %v1390_v2 = vld [vmem:[#allocation2 + $0x2ba] sm:$0xff] }
 0x4ef   :  { %v3553_v62 = vadd.f32 %v3552_v10, %v10036_v56 }
 0x4f1   :  { %v3762_v8 = vadd.f32 %v3761_v27, %v3553_v62  ;;  %v1265_v27 = vld [vmem:[#allocation2 + $0x2d9] sm:$0xff] }
 0x4f2   :  { %v3973_v33 = vpop.f32.mrf.mxu0  ;;  %v1134_v62 = vld [vmem:[#allocation2 + $0x2b8] sm:$0xff] }
 0x4f3   :  { %v10304_v3 = vadd.f32 %v3970_v41, %v3762_v8  ;;  %3602 = vmatmul.f32.gmra.mxu2 %v1132_v16  ;;  %v3776_v19 = vpop.f32.mrf.mxu3 }
 0x4f5   :  { %13809 = vst [vmem:[#allocation70_spill] sm:$0xff] %v10304_v3  ;;  %4020 = vmatmul.f32.gmra.mxu0 %v1388_v60 }
 0x4f6   :  { %v3555_v23 = vpop.f32.mrf.mxu2  ;;  %3826 = vmatmul.f32.gmra.mxu3 %v1265_v27  ;;  %v1391_v27 = vld [vmem:[#allocation2 + $0x2c2] sm:$0xff] }
 0x4f7   :  { %v3556_v52 = vadd.f32 %v3555_v23, %v10047_v58  ;;  %v10310_v58 = vpop.f32.mrf.mxu1  ;;  %v1266_v23 = vld [vmem:[#allocation2 + $0x2e9] sm:$0xff] }
 0x4f9   :  { %v3765_v22 = vadd.f32 %v3764_v29, %v3556_v52 }
 0x4fa   :  { %v3976_v4 = vpop.f32.mrf.mxu0 }
 0x4fb   :  { %v10307_v56 = vadd.f32 %v3973_v33, %v3765_v22  ;;  %3605 = vmatmul.f32.gmra.mxu2 %v1133_v48  ;;  %v3779_v8 = vpop.f32.mrf.mxu3  ;;  %v6419_v48 = vld [vmem:[#allocation10 + $0x38] sm:$0xff]  ;;  %v1135_v22 = vld [vmem:[#allocation2 + $0x2c0] sm:$0xff] }
 0x4fc   :  { %6564 = vmatpush.msra.mxu1 %v6419_v48  ;;  %v1392_v48 = vld [vmem:[#allocation2 + $0x2d2] sm:$0xff] }
 0x4fd   :  { %13810 = vst [vmem:[#allocation72_spill] sm:$0xff] %v10307_v56  ;;  %4023 = vmatmul.f32.gmra.mxu0 %v1389_v14 }
 0x4fe   :  { %v3558_v10 = vpop.f32.mrf.mxu2  ;;  %3829 = vmatmul.f32.gmra.mxu3 %v1266_v23 }
 0x4ff   :  { %v3559_v41 = vadd.f32 %v3558_v10, %v10056_v50 }
 0x501   :  { %v3768_v16 = vadd.f32 %v3767_v54, %v3559_v41  ;;  %v1267_v41 = vld [vmem:[#allocation2 + $0x2f1] sm:$0xff] }
 0x502   :  { %v3979_v60 = vpop.f32.mrf.mxu0 }
 0x503   :  { %v10312_v29 = vadd.f32 %v3976_v4, %v3768_v16  ;;  %3608 = vmatmul.f32.gmra.mxu2 %v1134_v62  ;;  %v3782_v14 = vpop.f32.mrf.mxu3  ;;  %v10317_v4 = vpop.f32.mrf.mxu1 }
 0x505   :  { %13811 = vst [vmem:[#allocation74_spill] sm:$0xff] %v10312_v29  ;;  %4026 = vmatmul.f32.gmra.mxu0 %v1390_v2  ;;  %v1136_v2 = vld [vmem:[#allocation2 + $0x2d0] sm:$0xff] }
 0x506   :  { %v3561_v33 = vpop.f32.mrf.mxu2  ;;  %3832 = vmatmul.f32.gmra.mxu3 %v1267_v41 }
 0x507   :  { %v3562_v52 = vadd.f32 %v3561_v33, %v10066_v18 }
 0x509   :  { %v3771_v50 = vadd.f32 %v3770_v28, %v3562_v52  ;;  %v1268_v52 = vld [vmem:[#allocation2 + $0x301] sm:$0xff] }
 0x50a   :  { %v3982_v54 = vpop.f32.mrf.mxu0 }
 0x50b   :  { %v10315_v10 = vadd.f32 %v3979_v60, %v3771_v50  ;;  %3611 = vmatmul.f32.gmra.mxu2 %v1135_v22  ;;  %v3785_v23 = vpop.f32.mrf.mxu3  ;;  %v10322_v22 = vpop.f32.mrf.mxu1 }
 0x50d   :  { %13812 = vst [vmem:[#allocation76_spill] sm:$0xff] %v10315_v10  ;;  %4029 = vmatmul.f32.gmra.mxu0 %v1391_v27  ;;  %v1137_v27 = vld [vmem:[#allocation2 + $0x2d8] sm:$0xff] }
 0x50e   :  { %v3564_v62 = vpop.f32.mrf.mxu2  ;;  %3835 = vmatmul.f32.gmra.mxu3 %v1268_v52 }
 0x50f   :  { %v3565_v16 = vadd.f32 %v3564_v62, %v10076_v42 }
 0x511   :  { %v3774_v18 = vadd.f32 %v3773_v47, %v3565_v16  ;;  %v1393_v47 = vld [vmem:[#allocation2 + $0x2da] sm:$0xff] }
 0x512   :  { %v3985_v33 = vpop.f32.mrf.mxu0 }
 0x513   :  { %v10320_v28 = vadd.f32 %v3982_v54, %v3774_v18  ;;  %3614 = vmatmul.f32.gmra.mxu2 %v1136_v2  ;;  %v10325_v45 = vpop.f32.mrf.mxu3  ;;  %v1269_v54 = vld [vmem:[#allocation2 + $0x309] sm:$0xff]  ;;  %v13815_v2 = vld [vmem:[#allocation39_spill] sm:$0xff]  ;;  %v10330_v52 = vpop.f32.mrf.mxu1 }
 0x515   :  { %13813 = vst [vmem:[#allocation77_spill] sm:$0xff] %v10320_v28  ;;  %4032 = vmatmul.f32.gmra.mxu0 %v1392_v48  ;;  %v1138_v48 = vld [vmem:[#allocation2 + $0x2e8] sm:$0xff] }
 0x516   :  { %v3567_v60 = vpop.f32.mrf.mxu2  ;;  %3838 = vmatmul.f32.gmra.mxu3 %v1269_v54  ;;  %v6418_v54 = vld [vmem:[#allocation10 + $0x30] sm:$0xff] }
 0x517   :  { %v3568_v50 = vadd.f32 %v3567_v60, %v10086_v53  ;;  %v1394_v60 = vld [vmem:[#allocation2 + $0x2ea] sm:$0xff]  ;;  %6565 = vmatpush.msra.mxu1 %v6418_v54 }
 0x519   :  { %v3777_v41 = vadd.f32 %v3776_v19, %v3568_v50 }
 0x51a   :  { %v3988_v42 = vpop.f32.mrf.mxu0 }
 0x51b   :  { %v10327_v62 = vadd.f32 %v3985_v33, %v3777_v41  ;;  %3617 = vmatmul.f32.gmra.mxu2 %v1137_v27  ;;  %v10332_v53 = vpop.f32.mrf.mxu3  ;;  %v1270_v33 = vld [vmem:[#allocation2 + $0x319] sm:$0xff]  ;;  %v13817_v41 = vld [vmem:[#allocation32_spill] sm:$0xff]  ;;  %v10339_v6 = vpop.f32.mrf.mxu1 }
 0x51d   :  { %13814 = vst [vmem:[#allocation78_spill] sm:$0xff] %v10327_v62  ;;  %4035 = vmatmul.f32.gmra.mxu0 %v1393_v47 }
 0x51e   :  { %v3570_v16 = vpop.f32.mrf.mxu2  ;;  %3841 = vmatmul.f32.gmra.mxu3 %v1270_v33  ;;  %v1140_v33 = vld [vmem:[#allocation2 + $0x300] sm:$0xff] }
 0x51f   :  { %v3571_v18 = vadd.f32 %v3570_v16, %v13815_v2 }
 0x521   :  { %v3780_v15 = vadd.f32 %v3779_v8, %v3571_v18  ;;  %v1395_v18 = vld [vmem:[#allocation2 + $0x2f2] sm:$0xff] }
 0x522   :  { %v3991_v19 = vpop.f32.mrf.mxu0 }
 0x523   :  { %v10334_v50 = vadd.f32 %v3988_v42, %v3780_v15  ;;  %3620 = vmatmul.f32.gmra.mxu2 %v1138_v48  ;;  %v10337_v2 = vpop.f32.mrf.mxu3  ;;  %v1271_v15 = vld [vmem:[#allocation2 + $0x321] sm:$0xff]  ;;  %v13820_v48 = vld [vmem:[#allocation42_spill] sm:$0xff] }
 0x524   :  { %13818 = vst [vmem:[#allocation32_spill] sm:$0xff] %v10337_v2  ;;  %v1272_v2 = vld [vmem:[#allocation2 + $0x331] sm:$0xff] }
 0x525   :  { %13816 = vst [vmem:[#allocation39_spill] sm:$0xff] %v10334_v50  ;;  %4038 = vmatmul.f32.gmra.mxu0 %v1394_v60 }
 0x526   :  { %v3573_v27 = vpop.f32.mrf.mxu2  ;;  %3844 = vmatmul.f32.gmra.mxu3 %v1271_v15 }
 0x527   :  { %v3574_v47 = vadd.f32 %v3573_v27, %v13817_v41 }
 0x529   :  { %v3783_v16 = vadd.f32 %v3782_v14, %v3574_v47  ;;  %v1396_v47 = vld [vmem:[#allocation2 + $0x302] sm:$0xff] }
 0x52a   :  { %v3994_v8 = vpop.f32.mrf.mxu0 }
 0x52b   :  { %v10341_v37 = vadd.f32 %v3991_v19, %v3783_v16  ;;  %3623 = vmatmul.f32.gmra.mxu2 %v1139_v46  ;;  %v10344_v41 = vpop.f32.mrf.mxu3  ;;  %v10350_v19 = vpop.f32.mrf.mxu1  ;;  %v1141_v16 = vld [vmem:[#allocation2 + $0x308] sm:$0xff] }
 0x52c   :  { %13821 = vst [vmem:[#allocation42_spill] sm:$0xff] %v10344_v41  ;;  %v1143_v41 = vld [vmem:[#allocation2 + $0x320] sm:$0xff] }
 0x52d   :  { %13819 = vst [vmem:[#allocation79_spill] sm:$0xff] %v10341_v37  ;;  %4041 = vmatmul.f32.gmra.mxu0 %v1395_v18 }
 0x52e   :  { %v3576_v42 = vpop.f32.mrf.mxu2  ;;  %13823 = vst [vmem:[#allocation81_spill] sm:$0xff] %v10350_v19  ;;  %3847 = vmatmul.f32.gmra.mxu3 %v1272_v2  ;;  %v1398_v2 = vld [vmem:[#allocation2 + $0x31a] sm:$0xff]  ;;  %v1402_v19 = vld [vmem:[#allocation2 + $0x34a] sm:$0xff] }
 0x52f   :  { %v3577_v60 = vadd.f32 %v3576_v42, %v13820_v48  ;;  %v1273_v42 = vld [vmem:[#allocation2 + $0x339] sm:$0xff] }
 0x531   :  { %v3786_v27 = vadd.f32 %v3785_v23, %v3577_v60  ;;  %v1397_v23 = vld [vmem:[#allocation2 + $0x30a] sm:$0xff]  ;;  %v1142_v60 = vld [vmem:[#allocation2 + $0x318] sm:$0xff] }
 0x532   :  { %v10346_v14 = vpop.f32.mrf.mxu0 }
 0x533   :  { %v10348_v54 = vadd.f32 %v3994_v8, %v3786_v27  ;;  %3626 = vmatmul.f32.gmra.mxu2 %v1140_v33  ;;  %v10354_v18 = vpop.f32.mrf.mxu3  ;;  %v10360_v8 = vpop.f32.mrf.mxu1 }
 0x534   :  { %13824 = vst [vmem:[#allocation82_spill] sm:$0xff] %v10354_v18 }
 0x535   :  { %13822 = vst [vmem:[#allocation80_spill] sm:$0xff] %v10348_v54  ;;  %4044 = vmatmul.f32.gmra.mxu0 %v1396_v47  ;;  %v1274_v47 = vld [vmem:[#allocation2 + $0x349] sm:$0xff]  ;;  %v1400_v54 = vld [vmem:[#allocation2 + $0x332] sm:$0xff] }
 0x536   :  { %v10352_v46 = vpop.f32.mrf.mxu2  ;;  %3850 = vmatmul.f32.gmra.mxu3 %v1273_v42  ;;  %13826 = vst [vmem:[#allocation84_spill] sm:$0xff] %v10360_v8 }
 0x53a   :  { %v10356_v15 = vpop.f32.mrf.mxu0 }
 0x53b   :  { %13825 = vst [vmem:[#allocation83_spill] sm:$0xff] %v10356_v15  ;;  %3629 = vmatmul.f32.gmra.mxu2 %v1141_v16  ;;  %v10362_v33 = vpop.f32.mrf.mxu3  ;;  %v6417_v16 = vld [vmem:[#allocation10 + $0x28] sm:$0xff] }
 0x53c   :  { %13827 = vst [vmem:[#allocation85_spill] sm:$0xff] %v10362_v33  ;;  %6566 = vmatpush.msra.mxu1 %v6417_v16  ;;  %v1399_v15 = vld [vmem:[#allocation2 + $0x322] sm:$0xff]  ;;  %v1275_v33 = vld [vmem:[#allocation2 + $0x351] sm:$0xff] }
 0x53d   :  { %4047 = vmatmul.f32.gmra.mxu0 %v1397_v23  ;;  %v10368_v23 = vpop.f32.mrf.mxu1 }
 0x53e   :  { %v10358_v48 = vpop.f32.mrf.mxu2  ;;  %3853 = vmatmul.f32.gmra.mxu3 %v1274_v47  ;;  %13829 = vst [vmem:[#allocation87_spill] sm:$0xff] %v10368_v23 }
 0x542   :  { %v10364_v27 = vpop.f32.mrf.mxu0 }
 0x543   :  { %13828 = vst [vmem:[#allocation86_spill] sm:$0xff] %v10364_v27  ;;  %3632 = vmatmul.f32.gmra.mxu2 %v1142_v60  ;;  %v10370_v42 = vpop.f32.mrf.mxu3  ;;  %v1144_v60 = vld [vmem:[#allocation2 + $0x330] sm:$0xff] }
 0x544   :  { %13830 = vst [vmem:[#allocation88_spill] sm:$0xff] %v10370_v42 }
 0x545   :  { %4050 = vmatmul.f32.gmra.mxu0 %v1398_v2  ;;  %v10380_v16 = vpop.f32.mrf.mxu1 }
 0x546   :  { %v10366_v18 = vpop.f32.mrf.mxu2  ;;  %3856 = vmatmul.f32.gmra.mxu3 %v1275_v33  ;;  %13834 = vst [vmem:[#allocation92_spill] sm:$0xff] %v10380_v16 }
 0x54a   :  { %v10372_v8 = vpop.f32.mrf.mxu0 }
 0x54b   :  { %13831 = vst [vmem:[#allocation89_spill] sm:$0xff] %v10372_v8  ;;  %3635 = vmatmul.f32.gmra.mxu2 %v1143_v41  ;;  %v10376_v2 = vpop.f32.mrf.mxu3  ;;  %v1145_v8 = vld [vmem:[#allocation2 + $0x338] sm:$0xff] }
 0x54c   :  { %13832 = vst [vmem:[#allocation90_spill] sm:$0xff] %v10376_v2 }
 0x54d   :  { %4053 = vmatmul.f32.gmra.mxu0 %v1399_v15  ;;  %v1401_v15 = vld [vmem:[#allocation2 + $0x33a] sm:$0xff]  ;;  %v10388_v33 = vpop.f32.mrf.mxu1 }
 0x54e   :  { %v10374_v27 = vpop.f32.mrf.mxu2  ;;  %13838 = vst [vmem:[#allocation96_spill] sm:$0xff] %v10388_v33 }
 0x552   :  { %v10378_v47 = vpop.f32.mrf.mxu0 }
 0x553   :  { %13833 = vst [vmem:[#allocation91_spill] sm:$0xff] %v10378_v47  ;;  %3638 = vmatmul.f32.gmra.mxu2 %v1144_v60  ;;  %v10384_v23 = vpop.f32.mrf.mxu3 }
 0x554   :  { %13836 = vst [vmem:[#allocation94_spill] sm:$0xff] %v10384_v23  ;;  %v6416_v23 = vld [vmem:[#allocation10 + $0x20] sm:$0xff] }
 0x555   :  { %4056 = vmatmul.f32.gmra.mxu0 %v1400_v54  ;;  %v10399_v60 = vpop.f32.mrf.mxu1  ;;  %6567 = vmatpush.msra.mxu1 %v6416_v23  ;;  %v4139_v23 = vmul.f32 %v10207_v55, %v10207_v55 }
 0x556   :  { %v10382_v42 = vpop.f32.mrf.mxu2  ;;  %13843 = vst [vmem:[#allocation101_spill] sm:$0xff] %v10399_v60 }
 0x557   :  { %13835 = vst [vmem:[#allocation93_spill] sm:$0xff] %v10382_v42 }
 0x55a   :  { %v10386_v41 = vpop.f32.mrf.mxu0 }
 0x55b   :  { %13837 = vst [vmem:[#allocation95_spill] sm:$0xff] %v10386_v41  ;;  %3641 = vmatmul.f32.gmra.mxu2 %v1145_v8  ;;  %v10394_v16 = vpop.f32.mrf.mxu3  ;;  %v1403_v41 = vld [vmem:[#allocation2 + $0x352] sm:$0xff] }
 0x55c   :  { %13841 = vst [vmem:[#allocation99_spill] sm:$0xff] %v10394_v16 }
 0x55d   :  { %4059 = vmatmul.f32.gmra.mxu0 %v1401_v15  ;;  %v10408_v16 = vpop.f32.mrf.mxu1 }
 0x55e   :  { %v10390_v2 = vpop.f32.mrf.mxu2  ;;  %13847 = vst [vmem:[#allocation105_spill] sm:$0xff] %v10408_v16 }
 0x55f   :  { %13839 = vst [vmem:[#allocation97_spill] sm:$0xff] %v10390_v2 }
 0x562   :  { %v10392_v47 = vpop.f32.mrf.mxu0 }
 0x563   :  { %13840 = vst [vmem:[#allocation98_spill] sm:$0xff] %v10392_v47  ;;  %3644 = vmatmul.f32.gmra.mxu2 %v10248_v31  ;;  %v10404_v15 = vpop.f32.mrf.mxu3 }
 0x564   :  { %13845 = vst [vmem:[#allocation103_spill] sm:$0xff] %v10404_v15 }
 0x565   :  { %4062 = vmatmul.f32.gmra.mxu0 %v1402_v19  ;;  %v4140_v19 = vmul.f32 %v10210_v20, %v10210_v20  ;;  %v10431_v42 = vpop.f32.mrf.mxu1 }
 0x566   :  { %v10397_v54 = vpop.f32.mrf.mxu2 }
 0x567   :  { %13842 = vst [vmem:[#allocation100_spill] sm:$0xff] %v10397_v54  ;;  %v4203_v15 = vadd.f32 %v4140_v19, %v4139_v23  ;;  %v4143_v54 = vmul.f32 %v10219_v40, %v10219_v40 }
 0x56a   :  { %v10401_v8 = vpop.f32.mrf.mxu0 }
 0x56b   :  { %13844 = vst [vmem:[#allocation102_spill] sm:$0xff] %v10401_v8  ;;  %3647 = vmatmul.f32.gmra.mxu2 %v10248_v31  ;;  %v4141_v8 = vmul.f32 %v10213_v9, %v10213_v9  ;;  %v10420_v31 = vpop.f32.mrf.mxu3 }
 0x56c   :  { %13850 = vst [vmem:[#allocation108_spill] sm:$0xff] %v10420_v31 }
 0x56d   :  { %4065 = vmatmul.f32.gmra.mxu0 %v1403_v41  ;;  %v4069_v41 = vadd.f32 %v10210_v20, %v10207_v55  ;;  %v4144_v20 = vmul.f32 %v10222_v61, %v10222_v61  ;;  %v4146_v55 = vmul.f32 %v10228_v57, %v10228_v57 }
 0x56e   :  { %v10406_v47 = vpop.f32.mrf.mxu2 }
 0x56f   :  { %13846 = vst [vmem:[#allocation104_spill] sm:$0xff] %v10406_v47  ;;  %v4070_v16 = vadd.f32 %v4069_v41, %v10213_v9  ;;  %v4204_v47 = vadd.f32 %v4203_v15, %v4141_v8  ;;  %v4145_v41 = vmul.f32 %v10225_v7, %v10225_v7 }
 0x572   :  { %v10410_v33 = vpop.f32.mrf.mxu0 }
 0x573   :  { %13848 = vst [vmem:[#allocation106_spill] sm:$0xff] %v10410_v33  ;;  %v4142_v33 = vmul.f32 %v10216_v1, %v10216_v1 }
 0x575   :  { %v4205_v31 = vadd.f32 %v4204_v47, %v4142_v33  ;;  %v4147_v33 = vmul.f32 %v10231_v30, %v10231_v30 }
 0x576   :  { %v10418_v60 = vpop.f32.mrf.mxu2 }
 0x577   :  { %13849 = vst [vmem:[#allocation107_spill] sm:$0xff] %v10418_v60  ;;  %v4071_v60 = vadd.f32 %v4070_v16, %v10216_v1  ;;  %v4206_v23 = vadd.f32 %v4205_v31, %v4143_v54 }
 0x579   :  { %v4072_v19 = vadd.f32 %v4071_v60, %v10219_v40  ;;  %v4207_v9 = vadd.f32 %v4206_v23, %v4144_v20  ;;  %v10454_v20 = vpop.f32.mrf.mxu1 }
 0x57a   :  { %v10429_v2 = vpop.f32.mrf.mxu0 }
 0x57b   :  { %13851 = vst [vmem:[#allocation109_spill] sm:$0xff] %v10429_v2  ;;  %v4073_v15 = vadd.f32 %v4072_v19, %v10222_v61  ;;  %v10444_v2 = vpop.f32.mrf.mxu3  ;;  %v4208_v16 = vadd.f32 %v4207_v9, %v4145_v41  ;;  %v4148_v19 = vmul.f32 %v10234_v0, %v10234_v0 }
 0x57d   :  { %v4074_v47 = vadd.f32 %v4073_v15, %v10225_v7  ;;  %v4209_v31 = vadd.f32 %v4208_v16, %v4146_v55  ;;  %v4149_v15 = vmul.f32 %v10237_v49, %v10237_v49  ;;  %v6415_v7 = vld [vmem:[#allocation10 + $0x18] sm:$0xff]  ;;  %v4150_v55 = vmul.f32 %v10240_v51, %v10240_v51 }
 0x57e   :  { %v10439_v8 = vpop.f32.mrf.mxu2  ;;  %6568 = vmatpush.msra.mxu1 %v6415_v7  ;;  %v4153_v7 = vmul.f32 %v10252_v34, %v10252_v34 }
 0x57f   :  { %v4075_v60 = vadd.f32 %v4074_v47, %v10228_v57  ;;  %v4210_v61 = vadd.f32 %v4209_v31, %v4147_v33  ;;  %v13886_v57 = vld [vmem:[#allocation95_spill] sm:$0xff] }
 0x581   :  { %v4076_v23 = vadd.f32 %v4075_v60, %v10231_v30  ;;  %v4211_v40 = vadd.f32 %v4210_v61, %v4148_v19  ;;  %v4151_v60 = vmul.f32 %v10243_v5, %v10243_v5  ;;  %v4152_v61 = vmul.f32 %v10246_v25, %v10246_v25 }
 0x582   :  { %v10449_v54 = vpop.f32.mrf.mxu0 }
 0x583   :  { %v4077_v41 = vadd.f32 %v4076_v23, %v10234_v0  ;;  %v4212_v16 = vadd.f32 %v4211_v40, %v4149_v15  ;;  %v10469_v31 = vpop.f32.mrf.mxu3  ;;  %v10479_v15 = vpop.f32.mrf.mxu1 }
 0x585   :  { %v4078_v47 = vadd.f32 %v4077_v41, %v10237_v49  ;;  %v4213_v30 = vadd.f32 %v4212_v16, %v4150_v55 }
 0x586   :  { %v10459_v9 = vpop.f32.mrf.mxu2 }
 0x587   :  { %v4079_v1 = vadd.f32 %v4078_v47, %v10240_v51  ;;  %v4214_v23 = vadd.f32 %v4213_v30, %v4151_v60  ;;  %v4154_v47 = vmul.f32 %v10256_v35, %v10256_v35  ;;  %v4156_v51 = vmul.f32 %v10262_v26, %v10262_v26 }
 0x589   :  { %v4080_v19 = vadd.f32 %v4079_v1, %v10243_v5  ;;  %v4215_v49 = vadd.f32 %v4214_v23, %v4152_v61  ;;  %v4155_v1 = vmul.f32 %v10259_v38, %v10259_v38  ;;  %v4157_v23 = vmul.f32 %v10265_v44, %v10265_v44 }
 0x58a   :  { %v10467_v33 = vpop.f32.mrf.mxu0 }
 0x58b   :  { %v4081_v41 = vadd.f32 %v4080_v19, %v10246_v25  ;;  %v4216_v16 = vadd.f32 %v4215_v49, %v4153_v7  ;;  %v10492_v0 = vpop.f32.mrf.mxu3  ;;  %v13878_v25 = vld [vmem:[#allocation104_spill] sm:$0xff] }
 0x58d   :  { %v4082_v55 = vadd.f32 %v4081_v41, %v10252_v34  ;;  %v4217_v5 = vadd.f32 %v4216_v16, %v4154_v47  ;;  %v10502_v47 = vpop.f32.mrf.mxu1 }
 0x58e   :  { %v10477_v40 = vpop.f32.mrf.mxu2 }
 0x58f   :  { %v4083_v60 = vadd.f32 %v4082_v55, %v10256_v35  ;;  %v4218_v19 = vadd.f32 %v4217_v5, %v4155_v1  ;;  %v4158_v55 = vmul.f32 %v10268_v32, %v10268_v32 }
 0x591   :  { %v4084_v61 = vadd.f32 %v4083_v60, %v10259_v38  ;;  %v4219_v41 = vadd.f32 %v4218_v19, %v4156_v51  ;;  %v4159_v60 = vmul.f32 %v10271_v24, %v10271_v24 }
 0x592   :  { %v10487_v30 = vpop.f32.mrf.mxu0 }
 0x593   :  { %v4085_v7 = vadd.f32 %v4084_v61, %v10262_v26  ;;  %v4220_v35 = vadd.f32 %v4219_v41, %v4157_v23  ;;  %v4160_v61 = vmul.f32 %v10274_v63, %v10274_v63  ;;  %v4161_v26 = vmul.f32 %v10277_v11, %v10277_v11  ;;  %v10517_v23 = vpop.f32.mrf.mxu3 }
 0x595   :  { %v4086_v16 = vadd.f32 %v4085_v7, %v10265_v44  ;;  %v4221_v38 = vadd.f32 %v4220_v35, %v4158_v55  ;;  %v4166_v44 = vmul.f32 %v10292_v17, %v10292_v17 }
 0x596   :  { %v10497_v49 = vpop.f32.mrf.mxu2 }
 0x597   :  { %v4087_v1 = vadd.f32 %v4086_v16, %v10268_v32  ;;  %v4222_v19 = vadd.f32 %v4221_v38, %v4159_v60  ;;  %v4162_v16 = vmul.f32 %v10280_v43, %v10280_v43  ;;  %v10527_v60 = vpop.f32.mrf.mxu1 }
 0x599   :  { %v4088_v51 = vadd.f32 %v4087_v1, %v10271_v24  ;;  %v4223_v41 = vadd.f32 %v4222_v19, %v4160_v61  ;;  %v4163_v1 = vmul.f32 %v10283_v12, %v10283_v12 }
 0x59a   :  { %v10507_v5 = vpop.f32.mrf.mxu0 }
 0x59b   :  { %v4089_v7 = vadd.f32 %v4088_v51, %v10274_v63  ;;  %v4224_v55 = vadd.f32 %v4223_v41, %v4161_v26  ;;  %v4164_v51 = vmul.f32 %v10286_v59, %v10286_v59 }
 0x59d   :  { %v4090_v35 = vadd.f32 %v4089_v7, %v10277_v11  ;;  %v4225_v32 = vadd.f32 %v4224_v55, %v4162_v16  ;;  %v4165_v7 = vmul.f32 %v10289_v13, %v10289_v13  ;;  %v6414_v11 = vld [vmem:[#allocation10 + $0x10] sm:$0xff] }
 0x59e   :  { %v10515_v34 = vpop.f32.mrf.mxu2  ;;  %6569 = vmatpush.msra.mxu1 %v6414_v11  ;;  %v4169_v11 = vmul.f32 %v10301_v39, %v10301_v39 }
 0x59f   :  { %v4091_v24 = vadd.f32 %v4090_v35, %v10280_v43  ;;  %v4226_v19 = vadd.f32 %v4225_v32, %v4163_v1  ;;  %v10540_v35 = vpop.f32.mrf.mxu3  ;;  %v4167_v32 = vmul.f32 %v10295_v36, %v10295_v36 }
 0x5a1   :  { %v4092_v61 = vadd.f32 %v4091_v24, %v10283_v12  ;;  %v4227_v63 = vadd.f32 %v4226_v19, %v4164_v51  ;;  %v4168_v51 = vmul.f32 %v10298_v21, %v10298_v21 }
 0x5a2   :  { %v10525_v38 = vpop.f32.mrf.mxu0 }
 0x5a3   :  { %v4093_v41 = vadd.f32 %v4092_v61, %v10286_v59  ;;  %v4228_v55 = vadd.f32 %v4227_v63, %v4165_v7  ;;  %v10550_v61 = vpop.f32.mrf.mxu1 }
 0x5a5   :  { %v4094_v16 = vadd.f32 %v4093_v41, %v10289_v13  ;;  %v4229_v12 = vadd.f32 %v4228_v55, %v4166_v44 }
 0x5a6   :  { %v10535_v26 = vpop.f32.mrf.mxu2 }
 0x5a7   :  { %v4095_v1 = vadd.f32 %v4094_v16, %v10292_v17  ;;  %v4230_v59 = vadd.f32 %v4229_v12, %v4167_v32  ;;  %v4170_v16 = vmul.f32 %v10304_v3, %v10304_v3  ;;  %v4171_v17 = vmul.f32 %v10307_v56, %v10307_v56  ;;  %v10565_v12 = vpop.f32.mrf.mxu3 }
 0x5a9   :  { %v4096_v19 = vadd.f32 %v4095_v1, %v10295_v36  ;;  %v4231_v41 = vadd.f32 %v4230_v59, %v4168_v51  ;;  %v13852_v1 = vld [vmem:[#allocation34_spill] sm:$0xff]  ;;  %v4172_v59 = vmul.f32 %v10312_v29, %v10312_v29 }
 0x5aa   :  { %v10545_v24 = vpop.f32.mrf.mxu0  ;;  %v3371_v36 = vadd.f32 %v10310_v58, %v13852_v1 }
 0x5ab   :  { %v4097_v7 = vadd.f32 %v4096_v19, %v10298_v21  ;;  %v4232_v55 = vadd.f32 %v4231_v41, %v4169_v11 }
 0x5ac   :  { %v3580_v21 = vadd.f32 %v10352_v46, %v3371_v36  ;;  %v4175_v36 = vmul.f32 %v10327_v62, %v10327_v62 }
 0x5ad   :  { %v4098_v44 = vadd.f32 %v4097_v7, %v10301_v39  ;;  %v4233_v19 = vadd.f32 %v4232_v55, %v4170_v16  ;;  %v13853_v7 = vld [vmem:[#allocation45_spill] sm:$0xff]  ;;  %v4173_v39 = vmul.f32 %v10315_v10, %v10315_v10  ;;  %v13854_v16 = vld [vmem:[#allocation36_spill] sm:$0xff] }
 0x5ae   :  { %v10555_v63 = vpop.f32.mrf.mxu2  ;;  %v3374_v11 = vadd.f32 %v10317_v4, %v13853_v7  ;;  %v3377_v55 = vadd.f32 %v10322_v22, %v13854_v16  ;;  %v3789_v46 = vadd.f32 %v10325_v45, %v3580_v21 }
 0x5af   :  { %v4099_v32 = vadd.f32 %v4098_v44, %v10304_v3  ;;  %v4234_v41 = vadd.f32 %v4233_v19, %v4171_v17  ;;  %v10580_v44 = vpop.f32.mrf.mxu1 }
 0x5b0   :  { %v3583_v17 = vadd.f32 %v10358_v48, %v3374_v11  ;;  %v3586_v7 = vadd.f32 %v10366_v18, %v3377_v55  ;;  %v4176_v48 = vmul.f32 %v10334_v50, %v10334_v50  ;;  %v10601_v11 = vpop.f32.mrf.mxu3  ;;  %v13858_v55 = vld [vmem:[#allocation32_spill] sm:$0xff] }
 0x5b1   :  { %v4100_v51 = vadd.f32 %v4099_v32, %v10307_v56  ;;  %v4235_v1 = vadd.f32 %v4234_v41, %v4172_v59  ;;  %v4174_v32 = vmul.f32 %v10320_v28, %v10320_v28  ;;  %v13873_v56 = vld [vmem:[#allocation100_spill] sm:$0xff] }
 0x5b2   :  { %v10563_v13 = vpop.f32.mrf.mxu0 }
 0x5b3   :  { %v4101_v58 = vadd.f32 %v4100_v51, %v10312_v29  ;;  %v4236_v19 = vadd.f32 %v4235_v1, %v4173_v39  ;;  %v13855_v29 = vld [vmem:[#allocation48_spill] sm:$0xff]  ;;  %v3792_v39 = vadd.f32 %v10332_v53, %v3583_v17  ;;  %v3795_v1 = vadd.f32 %v13858_v55, %v3586_v7  ;;  %v13859_v53 = vld [vmem:[#allocation51_spill] sm:$0xff]  ;;  %v13860_v17 = vld [vmem:[#allocation81_spill] sm:$0xff] }
 0x5b4   :  { %v3380_v22 = vadd.f32 %v10330_v52, %v13855_v29  ;;  %v4177_v29 = vmul.f32 %v10341_v37, %v10341_v37  ;;  %v10610_v52 = vadd.f32 %v10346_v14, %v3789_v46  ;;  %v13864_v14 = vld [vmem:[#allocation41_spill] sm:$0xff]  ;;  %v13865_v46 = vld [vmem:[#allocation84_spill] sm:$0xff]  ;;  %v13866_v55 = vld [vmem:[#allocation42_spill] sm:$0xff] }
 0x5b5   :  { %v4102_v4 = vadd.f32 %v4101_v58, %v10315_v10  ;;  %v4237_v41 = vadd.f32 %v4236_v19, %v4174_v32  ;;  %v13856_v58 = vld [vmem:[#allocation38_spill] sm:$0xff]  ;;  %v13861_v19 = vld [vmem:[#allocation93_spill] sm:$0xff] }
 0x5b6   :  { %v10578_v43 = vpop.f32.mrf.mxu2  ;;  %v3383_v45 = vadd.f32 %v10339_v6, %v13856_v58  ;;  %v3589_v18 = vadd.f32 %v10374_v27, %v3380_v22  ;;  %13857 = vst [vmem:[#allocation34_spill] sm:$0xff] %v10610_v52  ;;  %v13862_v27 = vld [vmem:[#allocation80_spill] sm:$0xff]  ;;  %v13863_v22 = vld [vmem:[#allocation83_spill] sm:$0xff]  ;;  %v13867_v10 = vld [vmem:[#allocation97_spill] sm:$0xff] }
 0x5b7   :  { %v4103_v59 = vadd.f32 %v4102_v4, %v10320_v28  ;;  %v4238_v16 = vadd.f32 %v4237_v41, %v4175_v36  ;;  %v3386_v4 = vadd.f32 %v13860_v17, %v13859_v53  ;;  %v4178_v36 = vmul.f32 %v13862_v27, %v13862_v27  ;;  %v10626_v7 = vpop.f32.mrf.mxu1 }
 0x5b8   :  { %v3592_v6 = vadd.f32 %v13861_v19, %v3383_v45  ;;  %v10622_v41 = vadd.f32 %v13863_v22, %v3792_v39  ;;  %v3798_v28 = vadd.f32 %v13866_v55, %v3589_v18  ;;  %v13870_v19 = vld [vmem:[#allocation54_spill] sm:$0xff]  ;;  %v13871_v22 = vld [vmem:[#allocation87_spill] sm:$0xff] }
 0x5b9   :  { %v4104_v21 = vadd.f32 %v4103_v59, %v10327_v62  ;;  %v4239_v58 = vadd.f32 %v4238_v16, %v4176_v48  ;;  %v3389_v62 = vadd.f32 %v13865_v46, %v13864_v14  ;;  %v3595_v53 = vadd.f32 %v13867_v10, %v3386_v4  ;;  %v13872_v46 = vld [vmem:[#allocation82_spill] sm:$0xff] }
 0x5ba   :  { %v10593_v51 = vpop.f32.mrf.mxu0  ;;  %v4179_v48 = vmul.f32 %v10610_v52, %v10610_v52  ;;  %v3392_v14 = vadd.f32 %v13871_v22, %v13870_v19 }
 0x5bb   :  { %v4105_v59 = vadd.f32 %v4104_v21, %v10334_v50  ;;  %v4240_v17 = vadd.f32 %v4239_v58, %v4177_v29  ;;  %v13868_v21 = vld [vmem:[#allocation86_spill] sm:$0xff]  ;;  %v3801_v50 = vadd.f32 %v13872_v46, %v3592_v6  ;;  %v3598_v18 = vadd.f32 %v13873_v56, %v3389_v62  ;;  %v13875_v58 = vld [vmem:[#allocation92_spill] sm:$0xff] }
 0x5bc   :  { %v10634_v16 = vadd.f32 %v13868_v21, %v3795_v1  ;;  %v4180_v29 = vmul.f32 %v10622_v41, %v10622_v41  ;;  %v13876_v1 = vld [vmem:[#allocation89_spill] sm:$0xff]  ;;  %v3601_v19 = vadd.f32 %v13878_v25, %v3392_v14  ;;  %v6413_v14 = vld [vmem:[#allocation10 + $0x8] sm:$0xff] }
 0x5bd   :  { %v4106_v45 = vadd.f32 %v4105_v59, %v10341_v37  ;;  %v4241_v4 = vadd.f32 %v4240_v17, %v4178_v36  ;;  %v13874_v59 = vld [vmem:[#allocation44_spill] sm:$0xff]  ;;  %v10648_v21 = vadd.f32 %v13876_v1, %v3798_v28  ;;  %v13877_v37 = vld [vmem:[#allocation85_spill] sm:$0xff]  ;;  %v10657_v36 = vpop.f32.mrf.mxu3  ;;  %6570 = vmatpush.msra.mxu1 %v6413_v14  ;;  %v13889_v14 = vld [vmem:[#allocation94_spill] sm:$0xff] }
 0x5be   :  { %v10613_v32 = vpop.f32.mrf.mxu2  ;;  %13869 = vst [vmem:[#allocation45_spill] sm:$0xff] %v10634_v16  ;;  %v3395_v55 = vadd.f32 %v13875_v58, %v13874_v59  ;;  %v3804_v3 = vadd.f32 %v13877_v37, %v3595_v53  ;;  %v4181_v56 = vmul.f32 %v10634_v16, %v10634_v16  ;;  %v13880_v17 = vld [vmem:[#allocation96_spill] sm:$0xff]  ;;  %v13881_v59 = vld [vmem:[#allocation91_spill] sm:$0xff] }
 0x5bf   :  { %v4107_v10 = vadd.f32 %v4106_v45, %v13862_v27  ;;  %v4242_v22 = vadd.f32 %v4241_v4, %v4179_v48  ;;  %v13879_v45 = vld [vmem:[#allocation57_spill] sm:$0xff]  ;;  %v10662_v28 = vadd.f32 %v13881_v59, %v3801_v50  ;;  %v13882_v58 = vld [vmem:[#allocation88_spill] sm:$0xff]  ;;  %v13883_v53 = vld [vmem:[#allocation107_spill] sm:$0xff]  ;;  %v4182_v27 = vmul.f32 %v10648_v21, %v10648_v21 }
 0x5c0   :  { %v3398_v46 = vadd.f32 %v13880_v17, %v13879_v45  ;;  %v3807_v37 = vadd.f32 %v13882_v58, %v3598_v18  ;;  %v3604_v25 = vadd.f32 %v13883_v53, %v3395_v55  ;;  %v13885_v48 = vld [vmem:[#allocation101_spill] sm:$0xff]  ;;  %v10672_v45 = vadd.f32 %v13886_v57, %v3804_v3  ;;  %v13887_v50 = vld [vmem:[#allocation90_spill] sm:$0xff]  ;;  %v10679_v53 = vpop.f32.mrf.mxu1 }
 0x5c1   :  { %v4108_v6 = vadd.f32 %v4107_v10, %v10610_v52  ;;  %v13884_v10 = vld [vmem:[#allocation47_spill] sm:$0xff]  ;;  %v4243_v52 = vadd.f32 %v4242_v22, %v4180_v29  ;;  %v3810_v17 = vadd.f32 %v13887_v50, %v3601_v19  ;;  %v4183_v29 = vmul.f32 %v10662_v28, %v10662_v28  ;;  %v13890_v19 = vld [vmem:[#allocation60_spill] sm:$0xff] }
 0x5c2   :  { %v10636_v39 = vpop.f32.mrf.mxu0  ;;  %v3401_v4 = vadd.f32 %v13885_v48, %v13884_v10  ;;  %v3607_v18 = vadd.f32 %v10439_v8, %v3398_v46  ;;  %v3813_v57 = vadd.f32 %v13889_v14, %v3604_v25  ;;  %v13891_v10 = vld [vmem:[#allocation105_spill] sm:$0xff]  ;;  %v13892_v48 = vld [vmem:[#allocation102_spill] sm:$0xff]  ;;  %v13893_v50 = vld [vmem:[#allocation99_spill] sm:$0xff] }
 0x5c3   :  { %v4109_v1 = vadd.f32 %v4108_v6, %v10622_v41  ;;  %v4244_v59 = vadd.f32 %v4243_v52, %v4181_v56  ;;  %v13888_v6 = vld [vmem:[#allocation98_spill] sm:$0xff]  ;;  %v3404_v8 = vadd.f32 %v13891_v10, %v13890_v19  ;;  %v4184_v56 = vmul.f32 %v10672_v45, %v10672_v45 }
 0x5c4   :  { %v10684_v22 = vadd.f32 %v13888_v6, %v3807_v37  ;;  %v3610_v3 = vadd.f32 %v10459_v9, %v3401_v4  ;;  %v13894_v37 = vld [vmem:[#allocation50_spill] sm:$0xff] }
 0x5c5   :  { %v4110_v55 = vadd.f32 %v4109_v1, %v10634_v16  ;;  %v4245_v52 = vadd.f32 %v4244_v59, %v4182_v27  ;;  %v10694_v1 = vadd.f32 %v13892_v48, %v3810_v17  ;;  %v3816_v16 = vadd.f32 %v13893_v50, %v3607_v18  ;;  %v13896_v17 = vld [vmem:[#allocation103_spill] sm:$0xff]  ;;  %v13897_v10 = vld [vmem:[#allocation62_spill] sm:$0xff]  ;;  %v10713_v48 = vpop.f32.mrf.mxu3 }
 0x5c6   :  { %v10655_v62 = vpop.f32.mrf.mxu2  ;;  %v3407_v6 = vadd.f32 %v10431_v42, %v13894_v37  ;;  %v3613_v9 = vadd.f32 %v10477_v40, %v3404_v8  ;;  %v4185_v27 = vmul.f32 %v10684_v22, %v10684_v22  ;;  %v3819_v19 = vadd.f32 %v13896_v17, %v3610_v3  ;;  %v13898_v8 = vld [vmem:[#allocation109_spill] sm:$0xff]  ;;  %v13900_v37 = vld [vmem:[#allocation108_spill] sm:$0xff] }
 0x5c7   :  { %v4111_v46 = vadd.f32 %v4110_v55, %v10648_v21  ;;  %v4246_v14 = vadd.f32 %v4245_v52, %v4183_v29  ;;  %v13895_v55 = vld [vmem:[#allocation106_spill] sm:$0xff]  ;;  %v3410_v18 = vadd.f32 %v10454_v20, %v13897_v10  ;;  %v4186_v29 = vmul.f32 %v10694_v1, %v10694_v1  ;;  %v13902_v10 = vld [vmem:[#allocation56_spill] sm:$0xff] }
 0x5c8   :  { %v10706_v59 = vadd.f32 %v13895_v55, %v3813_v57  ;;  %v10718_v52 = vadd.f32 %v13898_v8, %v3816_v16  ;;  %v13899_v57 = vld [vmem:[#allocation53_spill] sm:$0xff]  ;;  %v3822_v20 = vadd.f32 %v13900_v37, %v3613_v9 }
 0x5c9   :  { %v4112_v25 = vadd.f32 %v4111_v46, %v10662_v28  ;;  %v3616_v46 = vadd.f32 %v10497_v49, %v3407_v6  ;;  %v4247_v40 = vadd.f32 %v4246_v14, %v4184_v56  ;;  %v3413_v50 = vadd.f32 %v10479_v15, %v13899_v57  ;;  %v13901_v16 = vld [vmem:[#allocation65_spill] sm:$0xff] }
 0x5ca   :  { %v10677_v58 = vpop.f32.mrf.mxu0  ;;  %v4187_v56 = vmul.f32 %v10706_v59, %v10706_v59  ;;  %v10730_v6 = vadd.f32 %v10449_v54, %v3819_v19  ;;  %v3416_v14 = vadd.f32 %v10502_v47, %v13901_v16  ;;  %v10743_v19 = vadd.f32 %v10467_v33, %v3822_v20  ;;  %v13903_v33 = vld [vmem:[#allocation68_spill] sm:$0xff] }
 0x5cb   :  { %v4113_v42 = vadd.f32 %v4112_v25, %v10672_v45  ;;  %v3619_v25 = vadd.f32 %v10515_v34, %v3410_v18  ;;  %v4248_v49 = vadd.f32 %v4247_v40, %v4185_v27  ;;  %v3825_v17 = vadd.f32 %v10444_v2, %v3616_v46  ;;  %v3433_v18 = vpop.f32.mrf.mxu1 }
 0x5cc   :  { %v3622_v9 = vadd.f32 %v10535_v26, %v3413_v50  ;;  %v3419_v34 = vadd.f32 %v10527_v60, %v13902_v10  ;;  %v3625_v40 = vadd.f32 %v10555_v63, %v3416_v14  ;;  %v4189_v26 = vmul.f32 %v10730_v6, %v10730_v6 }
 0x5cd   :  { %v4114_v3 = vadd.f32 %v4113_v42, %v10684_v22  ;;  %v4249_v27 = vadd.f32 %v4248_v49, %v4186_v29  ;;  %v4188_v42 = vmul.f32 %v10718_v52, %v10718_v52  ;;  %v3828_v47 = vadd.f32 %v10469_v31, %v3619_v25  ;;  %v13904_v25 = vld [vmem:[#allocation59_spill] sm:$0xff] }
 0x5ce   :  { %v10701_v4 = vpop.f32.mrf.mxu2  ;;  %v10751_v29 = vadd.f32 %v10487_v30, %v3825_v17  ;;  %v3831_v8 = vadd.f32 %v10492_v0, %v3622_v9  ;;  %v3628_v57 = vadd.f32 %v10578_v43, %v3419_v34  ;;  %v3422_v50 = vadd.f32 %v10550_v61, %v13903_v33  ;;  %v3851_v30 = vpop.f32.mrf.mxu3 }
 0x5cf   :  { %v4115_v15 = vadd.f32 %v4114_v3, %v10694_v1  ;;  %v4250_v46 = vadd.f32 %v4249_v27, %v4187_v56  ;;  %v4190_v3 = vmul.f32 %v10743_v19, %v10743_v19  ;;  %v10761_v37 = vadd.f32 %v10507_v5, %v3828_v47 }
 0x5d0   :  { %v3834_v20 = vadd.f32 %v10517_v23, %v3625_v40  ;;  %v3425_v0 = vadd.f32 %v10580_v44, %v13904_v25  ;;  %v3631_v43 = vadd.f32 %v10613_v32, %v3422_v50  ;;  %v4191_v56 = vmul.f32 %v10751_v29, %v10751_v29 }
 0x5d1   :  { %v4116_v54 = vadd.f32 %v4115_v15, %v10706_v59  ;;  %v4251_v31 = vadd.f32 %v4250_v46, %v4188_v42  ;;  %v10771_v16 = vadd.f32 %v10525_v38, %v3831_v8  ;;  %v3837_v5 = vadd.f32 %v10540_v35, %v3628_v57  ;;  %v13905_v15 = vld [vmem:[#allocation71_spill] sm:$0xff] }
 0x5d2   :  { %v10725_v55 = vpop.f32.mrf.mxu0  ;;  %v3428_v23 = vadd.f32 %v10626_v7, %v13905_v15  ;;  %v3634_v17 = vadd.f32 %v10655_v62, %v3425_v0  ;;  %v4192_v32 = vmul.f32 %v10761_v37, %v10761_v37  ;;  %v10781_v10 = vadd.f32 %v10545_v24, %v3834_v20  ;;  %v13906_v38 = vld [vmem:[#allocation63_spill] sm:$0xff]  ;;  %v13907_v24 = vld [vmem:[#allocation73_spill] sm:$0xff] }
 0x5d3   :  { %v4117_v60 = vadd.f32 %v4116_v54, %v10718_v52  ;;  %v4252_v49 = vadd.f32 %v4251_v31, %v4189_v26  ;;  %v3431_v27 = vadd.f32 %v10679_v53, %v13906_v38  ;;  %v3436_v35 = vpop.f32.mrf.mxu1  ;;  %v3840_v42 = vadd.f32 %v10565_v12, %v3631_v43 }
 0x5d4   :  { %v3637_v7 = vadd.f32 %v10701_v4, %v3428_v23  ;;  %v4193_v47 = vmul.f32 %v10771_v16, %v10771_v16  ;;  %v10791_v40 = vadd.f32 %v10563_v13, %v3837_v5  ;;  %v3434_v46 = vadd.f32 %v3433_v18, %v13907_v24 }
 0x5d5   :  { %v4118_v63 = vadd.f32 %v4117_v60, %v10730_v6  ;;  %v4253_v44 = vadd.f32 %v4252_v49, %v4190_v3  ;;  %v3843_v26 = vadd.f32 %v10601_v11, %v3634_v17  ;;  %v4194_v12 = vmul.f32 %v10781_v10, %v10781_v10 }
 0x5d6   :  { %v3639_v2 = vpop.f32.mrf.mxu2  ;;  %v10799_v4 = vadd.f32 %v10593_v51, %v3840_v42  ;;  %v3846_v57 = vadd.f32 %v10657_v36, %v3637_v7  ;;  %v4195_v18 = vmul.f32 %v10791_v40, %v10791_v40  ;;  %v3854_v11 = vpop.f32.mrf.mxu3 }
 0x5d7   :  { %v4119_v61 = vadd.f32 %v4118_v63, %v10743_v19  ;;  %v4254_v54 = vadd.f32 %v4253_v44, %v4191_v56  ;;  %v3640_v60 = vadd.f32 %v3639_v2, %v3431_v27  ;;  %v13908_v2 = vld [vmem:[#allocation66_spill] sm:$0xff]  ;;  %v10807_v63 = vadd.f32 %v10636_v39, %v3843_v26 }
 0x5d8   :  { %v3437_v31 = vadd.f32 %v3436_v35, %v13908_v2  ;;  %v4196_v0 = vmul.f32 %v10799_v4, %v10799_v4  ;;  %v10814_v49 = vadd.f32 %v10677_v58, %v3846_v57 }
 0x5d9   :  { %v4120_v9 = vadd.f32 %v4119_v61, %v10751_v29  ;;  %v4255_v53 = vadd.f32 %v4254_v54, %v4192_v32  ;;  %v3849_v3 = vadd.f32 %v10713_v48, %v3640_v60  ;;  %v4197_v48 = vmul.f32 %v10807_v63, %v10807_v63 }
 0x5da   :  { %v4060_v14 = vpop.f32.mrf.mxu0  ;;  %v4198_v58 = vmul.f32 %v10814_v49, %v10814_v49 }
 0x5db   :  { %v4121_v62 = vadd.f32 %v4120_v9, %v10761_v37  ;;  %v4256_v50 = vadd.f32 %v4255_v53, %v4193_v47  ;;  %v3439_v5 = vpop.f32.mrf.mxu1  ;;  %v10820_v15 = vadd.f32 %v10725_v55, %v3849_v3  ;;  %v6443_v55 = vld [vmem:[#allocation10 + $0xf8] sm:$0xff] }
 0x5dc   :  { %6765 = vmatpush.msrb.mxu2 %v6443_v55  ;;  %v6459_v55 = vld [vmem:[#allocation10 + $0x178] sm:$0xff] }
 0x5dd   :  { %v4122_v8 = vadd.f32 %v4121_v62, %v10771_v16  ;;  %v4257_v20 = vadd.f32 %v4256_v50, %v4194_v12  ;;  %v4199_v27 = vmul.f32 %v10820_v15, %v10820_v15  ;;  %6974 = vmatpush.msrb.mxu3 %v6459_v55 }
 0x5de   :  { %v3642_v34 = vpop.f32.mrf.mxu2  ;;  %v3857_v7 = vpop.f32.mrf.mxu3 }
 0x5df   :  { %v3643_v33 = vadd.f32 %v3642_v34, %v3434_v46  ;;  %v4123_v13 = vadd.f32 %v4122_v8, %v10781_v10  ;;  %v4258_v56 = vadd.f32 %v4257_v20, %v4195_v18 }
 0x5e1   :  { %v4124_v51 = vadd.f32 %v4123_v13, %v10791_v40  ;;  %v3852_v43 = vadd.f32 %v3851_v30, %v3643_v33  ;;  %v4259_v17 = vadd.f32 %v4258_v56, %v4196_v0  ;;  %v13909_v30 = vld [vmem:[#allocation75_spill] sm:$0xff] }
 0x5e2   :  { %v4063_v36 = vpop.f32.mrf.mxu0  ;;  %v3440_v32 = vadd.f32 %v3439_v5, %v13909_v30 }
 0x5e3   :  { %v4125_v39 = vadd.f32 %v4124_v51, %v10799_v4  ;;  %v10825_v9 = vadd.f32 %v4060_v14, %v3852_v43  ;;  %v4260_v34 = vadd.f32 %v4259_v17, %v4197_v48  ;;  %v6442_v51 = vld [vmem:[#allocation10 + $0xf0] sm:$0xff] }
 0x5e4   :  { %6766 = vmatpush.msrb.mxu2 %v6442_v51 }
 0x5e5   :  { %v4126_v44 = vadd.f32 %v4125_v39, %v10807_v63  ;;  %v4261_v54 = vadd.f32 %v4260_v34, %v4198_v58  ;;  %v4200_v14 = vmul.f32 %v10825_v9, %v10825_v9 }
 0x5e6   :  { %v3645_v25 = vpop.f32.mrf.mxu2 }
 0x5e7   :  { %v3646_v61 = vadd.f32 %v3645_v25, %v3437_v31  ;;  %v4127_v38 = vadd.f32 %v4126_v44, %v10814_v49  ;;  %v4262_v46 = vadd.f32 %v4261_v54, %v4199_v27 }
 0x5e9   :  { %v3855_v23 = vadd.f32 %v3854_v11, %v3646_v61  ;;  %v4128_v62 = vadd.f32 %v4127_v38, %v10820_v15  ;;  %v4263_v8 = vadd.f32 %v4262_v46, %v4200_v14  ;;  %v4289_v14 = vld [vmem:[%s13491_s3] sm:$0x1] }
 0x5ea   :  { %v4066_v24 = vpop.f32.mrf.mxu0 }
 0x5eb   :  { %v10831_v35 = vadd.f32 %v4063_v36, %v3855_v23  ;;  %v4129_v26 = vadd.f32 %v4128_v62, %v10825_v9 }
 0x5ed   :  { %v4201_v60 = vmul.f32 %v10831_v35, %v10831_v35  ;;  %v4130_v12 = vadd.f32 %v4129_v26, %v10831_v35 }
 0x5ee   :  { %v3648_v42 = vpop.f32.mrf.mxu2 }
 0x5ef   :  { %v3649_v47 = vadd.f32 %v3648_v42, %v3440_v32  ;;  %v4264_v33 = vadd.f32 %v4263_v8, %v4201_v60  ;;  %v4276_v42 = vld [vmem:[%s13490_s2] sm:$0x1] }
 0x5f1   :  { %v3858_v53 = vadd.f32 %v3857_v7, %v3649_v47 }
 0x5f3   :  { %v4067_v57 = vadd.f32 %v4066_v24, %v3858_v53  ;;  %v10854_v53 = vstv %s13492_s4 }
 0x5f4   :  { %13912 = vst [vmem:[#allocation38_spill] sm:$0xff] %v10854_v53 }
 0x5f5   :  { %v4131_v50 = vadd.f32 %v4130_v12, %v4067_v57  ;;  %v4202_v13 = vmul.f32 %v4067_v57, %v4067_v57  ;;  %v13913_v12 = vld [vmem:[#allocation21_spill] sm:$0xff] }
 0x5f7   :  { %v4132_v18 = vrot.slane %v4131_v50, 4  ;;  %v4265_v11 = vadd.f32 %v4264_v33, %v4202_v13 }
 0x5f9   :  { %v4133_v2 = vadd.f32 %v4132_v18, %v4131_v50  ;;  %v4266_v31 = vrot.slane %v4265_v11, 4  ;;  %v13914_v50 = vld [vmem:[#allocation22_spill] sm:$0xff]  ;;  %v13915_v18 = vld [vmem:[#allocation23_spill] sm:$0xff] }
 0x5fb   :  { %v4134_v3 = vrot.slane %v4133_v2, 2  ;;  %v4267_v20 = vadd.f32 %v4266_v31, %v4265_v11  ;;  %v13917_v31 = vld [vmem:[#allocation25_spill] sm:$0xff] }
 0x5fd   :  { %v4135_v25 = vadd.f32 %v4134_v3, %v4133_v2  ;;  %v4268_v36 = vrot.slane %v4267_v20, 2  ;;  %v13916_v2 = vld [vmem:[#allocation24_spill] sm:$0xff] }
 0x5ff   :  { %v4136_v0 = vrot.slane %v4135_v25, 1  ;;  %v4269_v43 = vadd.f32 %v4268_v36, %v4267_v20  ;;  %v13918_v20 = vld [vmem:[#allocation26_spill] sm:$0xff] }
 0x601   :  { %v4137_v61 = vadd.f32 %v4136_v0, %v4135_v25  ;;  %v4270_v56 = vrot.slane %v4269_v43, 1  ;;  %v6441_v25 = vld [vmem:[#allocation10 + $0xe8] sm:$0xff]  ;;  %v13919_v0 = vld [vmem:[#allocation27_spill] sm:$0xff] }
 0x602   :  { %6767 = vmatpush.msrb.mxu2 %v6441_v25 }
 0x603   :  { %v4138_v5 = vmul.f32 0.001953125, %v4137_v61  ;;  %v4271_v39 = vadd.f32 %v4270_v56, %v4269_v43  ;;  %v13920_v61 = vld [vmem:[#allocation28_spill] sm:$0xff] }
 0x605   :  { %v4272_v48 = vmul.f32 0.001953125, %v4271_v39  ;;  %v4273_v23 = vmul.f32 %v4138_v5, %v4138_v5 }
 0x607   :  { %v4274_v17 = vsub.f32 %v4272_v48, %v4273_v23  ;;  %v13922_v48 = vld [vmem:[#allocation30_spill] sm:$0xff] }
 0x609   :  { %v4275_v44 = vmax.f32 %v4274_v17, 0.0  ;;  %v13923_v17 = vld [vmem:[#allocation31_spill] sm:$0xff] }
 0x60b   :  { %v4277_v58 = vadd.f32 1e-05, %v4275_v44 }
 0x60d   :  { %9045 = vrsqrt.f32 %v4277_v58  ;;  %vm4284_vm1 = vweird.f32 %v4277_v58 }
 0x613   :  { %v9046_v30 = vpop.eup %9045 }
 0x614   :  { %v4279_v32 = vmul.f32 %v9046_v30, %v4277_v58  ;;  %vm4285_vm0 = vweird.f32 %v9046_v30  ;;  %v13924_v58 = vld [vmem:[#allocation33_spill] sm:$0xff] }
 0x615   :  { %vm4286_vm2 = vmor %vm4284_vm1, %vm4285_vm0 }
 0x616   :  { %v4280_v34 = vmul.f32 %v9046_v30, %v4279_v32 }
 0x618   :  { %v4281_v38 = vmul.f32 0.5, %v4280_v34  ;;  %v13925_v34 = vld [vmem:[#allocation35_spill] sm:$0xff] }
 0x61a   :  { %v4282_v27 = vsub.f32 1.5, %v4281_v38 }
 0x61c   :  { %v4283_v7 = vmul.f32 %v9046_v30, %v4282_v27  ;;  %v13926_v27 = vld [vmem:[#allocation37_spill] sm:$0xff] }
 0x61e   :  { %v4287_v54 = vsel %vm4286_vm2, %v9046_v30, %v4283_v7 }
 0x61f   :  { %v4288_v62 = vmul.f32 %v4287_v54, %v4276_v42  ;;  %v13927_v42 = vld [vmem:[#allocation40_spill] sm:$0xff]  ;;  %v13928_v54 = vld [vmem:[#allocation43_spill] sm:$0xff] }
 0x621   :  { %v4290_v47 = vmul.f32 %v4288_v62, %v4138_v5  ;;  %v10846_v24 = vperm.slane %v4288_v62, 0  ;;  %v13921_v5 = vld [vmem:[#allocation29_spill] sm:$0xff] }
 0x623   :  { %13910 = vst [vmem:[#allocation36_spill] sm:$0xff] %v10846_v24  ;;  %v4291_v46 = vsub.f32 %v4289_v14, %v4290_v47  ;;  %v4358_v26 = vmul.f32 %v10846_v24, %v4067_v57  ;;  %v4302_v33 = vmul.f32 %v10846_v24, %v13913_v12  ;;  %v4303_v13 = vmul.f32 %v10846_v24, %v13914_v50  ;;  %v13929_v14 = vld [vmem:[#allocation46_spill] sm:$0xff]  ;;  %v13931_v12 = vld [vmem:[#allocation52_spill] sm:$0xff]  ;;  %v13932_v50 = vld [vmem:[#allocation55_spill] sm:$0xff] }
 0x624   :  { %v4304_v11 = vmul.f32 %v10846_v24, %v13915_v18  ;;  %v4305_v57 = vmul.f32 %v10846_v24, %v13916_v2  ;;  %v4306_v3 = vmul.f32 %v10846_v24, %v13917_v31  ;;  %v4307_v51 = vmul.f32 %v10846_v24, %v13918_v20  ;;  %v13933_v2 = vld [vmem:[#allocation58_spill] sm:$0xff]  ;;  %v13934_v20 = vld [vmem:[#allocation61_spill] sm:$0xff] }
 0x625   :  { %v10849_v60 = vperm.slane %v4291_v46, 0  ;;  %v4308_v43 = vmul.f32 %v10846_v24, %v13919_v0  ;;  %v4309_v56 = vmul.f32 %v10846_v24, %v13920_v61  ;;  %v4310_v39 = vmul.f32 %v10846_v24, %v13921_v5  ;;  %v13930_v46 = vld [vmem:[#allocation49_spill] sm:$0xff]  ;;  %v13936_v61 = vld [vmem:[#allocation67_spill] sm:$0xff] }
 0x626   :  { %v4311_v23 = vmul.f32 %v10846_v24, %v13922_v48  ;;  %v4312_v44 = vmul.f32 %v10846_v24, %v13923_v17  ;;  %v4313_v30 = vmul.f32 %v10846_v24, %v13924_v58  ;;  %v4314_v38 = vmul.f32 %v10846_v24, %v13925_v34  ;;  %v13937_v48 = vld [vmem:[#allocation70_spill] sm:$0xff]  ;;  %v13938_v58 = vld [vmem:[#allocation72_spill] sm:$0xff] }
 0x627   :  { %13911 = vst [vmem:[#allocation48_spill] sm:$0xff] %v10849_v60  ;;  %v4425_v8 = vadd.f32 %v10849_v60, %v4358_v26  ;;  %v4315_v55 = vmul.f32 %v10846_v24, %v13926_v27  ;;  %v4316_v7 = vmul.f32 %v10846_v24, %v13927_v42  ;;  %v4317_v62 = vmul.f32 %v10846_v24, %v13928_v54  ;;  %v13939_v34 = vld [vmem:[#allocation74_spill] sm:$0xff]  ;;  %v13940_v42 = vld [vmem:[#allocation76_spill] sm:$0xff]  ;;  %v13947_v60 = vld [vmem:[#allocation45_spill] sm:$0xff] }
 0x628   :  { %v4318_v47 = vmul.f32 %v10846_v24, %v13929_v14  ;;  %v4319_v26 = vmul.f32 %v10846_v24, %v13930_v46  ;;  %v4321_v18 = vmul.f32 %v10846_v24, %v13932_v50  ;;  %v4322_v31 = vmul.f32 %v10846_v24, %v13933_v2  ;;  %v13941_v14 = vld [vmem:[#allocation77_spill] sm:$0xff]  ;;  %v13943_v2 = vld [vmem:[#allocation39_spill] sm:$0xff] }
 0x629   :  { %vm4490_vm3 = vcmp.gt.f32.partialorder %v4425_v8, 0.0  ;;  %v4555_v36 = vmul.f32 %v10854_v53, %v4425_v8  ;;  %v4323_v25 = vmul.f32 %v10846_v24, %v13934_v20  ;;  %v4325_v5 = vmul.f32 %v10846_v24, %v13936_v61  ;;  %v13946_v53 = vld [vmem:[#allocation34_spill] sm:$0xff] }
 0x62a   :  { %v4326_v17 = vmul.f32 %v10846_v24, %v13937_v48  ;;  %v4328_v27 = vmul.f32 %v10846_v24, %v13939_v34  ;;  %v4329_v54 = vmul.f32 %v10846_v24, %v13940_v42  ;;  %v4330_v46 = vmul.f32 %v10846_v24, %v13941_v14  ;;  %v13945_v48 = vld [vmem:[#allocation80_spill] sm:$0xff] }
 0x62b   :  { %v4619_v32 = vsel %vm4490_vm3, %v4425_v8, %v4555_v36  ;;  %v4320_v8 = vmul.f32 %v10846_v24, %v13931_v12  ;;  %v13935_v36 = vld [vmem:[#allocation64_spill] sm:$0xff]  ;;  %v13942_v12 = vld [vmem:[#allocation78_spill] sm:$0xff]  ;;  %v4332_v20 = vmul.f32 %v10846_v24, %v13943_v2  ;;  %v4335_v34 = vmul.f32 %v10846_v24, %v13946_v53 }
 0x62c   :  { %4683 = vst [vmem:[#allocation2 + $0x339] sm:$0xff] %v4619_v32  ;;  %v4324_v0 = vmul.f32 %v10846_v24, %v13935_v36  ;;  %v4327_v32 = vmul.f32 %v10846_v24, %v13938_v58  ;;  %v4331_v50 = vmul.f32 %v10846_v24, %v13942_v12  ;;  %v13944_v36 = vld [vmem:[#allocation79_spill] sm:$0xff]  ;;  %v4334_v58 = vmul.f32 %v10846_v24, %v13945_v48 }
 0x62d   :  { %v4333_v61 = vmul.f32 %v10846_v24, %v13944_v36  ;;  %v4336_v42 = vmul.f32 %v10846_v24, %v10622_v41  ;;  %v4337_v14 = vmul.f32 %v10846_v24, %v13947_v60  ;;  %v4338_v12 = vmul.f32 %v10846_v24, %v10648_v21 }
 0x62e   :  { %v4339_v2 = vmul.f32 %v10846_v24, %v10662_v28  ;;  %v4340_v36 = vmul.f32 %v10846_v24, %v10672_v45  ;;  %v4341_v48 = vmul.f32 %v10846_v24, %v10684_v22  ;;  %v4342_v53 = vmul.f32 %v10846_v24, %v10694_v1 }
 0x62f   :  { %v4343_v41 = vmul.f32 %v10846_v24, %v10706_v59  ;;  %v4344_v60 = vmul.f32 %v10846_v24, %v10718_v52  ;;  %v4345_v21 = vmul.f32 %v10846_v24, %v10730_v6  ;;  %v4346_v28 = vmul.f32 %v10846_v24, %v10743_v19 }
 0x630   :  { %v4347_v45 = vmul.f32 %v10846_v24, %v10751_v29  ;;  %v4348_v22 = vmul.f32 %v10846_v24, %v10761_v37  ;;  %v4349_v1 = vmul.f32 %v10846_v24, %v10771_v16  ;;  %v4350_v59 = vmul.f32 %v10846_v24, %v10781_v10 }
 0x631   :  { %v4351_v52 = vmul.f32 %v10846_v24, %v10791_v40  ;;  %v4352_v6 = vmul.f32 %v10846_v24, %v10799_v4  ;;  %v4353_v19 = vmul.f32 %v10846_v24, %v10807_v63  ;;  %v4354_v29 = vmul.f32 %v10846_v24, %v10814_v49  ;;  %v13948_v40 = vld [vmem:[#allocation48_spill] sm:$0xff] }
 0x632   :  { %v4355_v37 = vmul.f32 %v10846_v24, %v10820_v15  ;;  %v4356_v16 = vmul.f32 %v10846_v24, %v10825_v9  ;;  %v4357_v10 = vmul.f32 %v10846_v24, %v10831_v35  ;;  %v10971_v4 = vadd.f32 %v13948_v40, %v4302_v33 }
 0x633   :  { %v10974_v63 = vadd.f32 %v13948_v40, %v4303_v13  ;;  %v10977_v49 = vadd.f32 %v13948_v40, %v4304_v11  ;;  %v10980_v15 = vadd.f32 %v13948_v40, %v4305_v57  ;;  %v10983_v9 = vadd.f32 %v13948_v40, %v4306_v3 }
 0x634   :  { %13949 = vst [vmem:[#allocation32_spill] sm:$0xff] %v10971_v4  ;;  %v10986_v24 = vadd.f32 %v13948_v40, %v4307_v51  ;;  %v10989_v35 = vadd.f32 %v13948_v40, %v4308_v43  ;;  %v10992_v33 = vadd.f32 %v13948_v40, %v4309_v56  ;;  %v10995_v13 = vadd.f32 %v13948_v40, %v4310_v39 }
 0x635   :  { %v10998_v11 = vadd.f32 %v13948_v40, %v4311_v23  ;;  %v11001_v57 = vadd.f32 %v13948_v40, %v4312_v44  ;;  %v11004_v3 = vadd.f32 %v13948_v40, %v4313_v30  ;;  %v11007_v51 = vadd.f32 %v13948_v40, %v4314_v38 }
 0x636   :  { %v11010_v43 = vadd.f32 %v13948_v40, %v4315_v55  ;;  %v11013_v56 = vadd.f32 %v13948_v40, %v4316_v7  ;;  %v11016_v39 = vadd.f32 %v13948_v40, %v4317_v62  ;;  %v11019_v23 = vadd.f32 %v13948_v40, %v4318_v47 }
 0x637   :  { %v11022_v44 = vadd.f32 %v13948_v40, %v4319_v26  ;;  %v11025_v30 = vadd.f32 %v13948_v40, %v4320_v8  ;;  %v11028_v38 = vadd.f32 %v13948_v40, %v4321_v18  ;;  %v11031_v55 = vadd.f32 %v13948_v40, %v4322_v31 }
 0x638   :  { %v11034_v7 = vadd.f32 %v13948_v40, %v4323_v25  ;;  %v11037_v62 = vadd.f32 %v13948_v40, %v4324_v0  ;;  %v11040_v47 = vadd.f32 %v13948_v40, %v4325_v5  ;;  %v11043_v26 = vadd.f32 %v13948_v40, %v4326_v17 }
 0x639   :  { %v11046_v8 = vadd.f32 %v13948_v40, %v4327_v32  ;;  %v11049_v18 = vadd.f32 %v13948_v40, %v4328_v27  ;;  %v11052_v31 = vadd.f32 %v13948_v40, %v4329_v54  ;;  %v11055_v25 = vadd.f32 %v13948_v40, %v4330_v46 }
 0x63a   :  { %v11058_v0 = vadd.f32 %v13948_v40, %v4331_v50  ;;  %v11061_v5 = vadd.f32 %v13948_v40, %v4332_v20  ;;  %v11064_v17 = vadd.f32 %v13948_v40, %v4333_v61  ;;  %v11067_v32 = vadd.f32 %v13948_v40, %v4334_v58 }
 0x63b   :  { %13950 = vst [vmem:[#allocation51_spill] sm:$0xff] %v11055_v25  ;;  %v11070_v27 = vadd.f32 %v13948_v40, %v4335_v34  ;;  %v11073_v54 = vadd.f32 %v13948_v40, %v4336_v42  ;;  %v11076_v46 = vadd.f32 %v13948_v40, %v4337_v14  ;;  %v11079_v50 = vadd.f32 %v13948_v40, %v4338_v12 }
 0x63c   :  { %13951 = vst [vmem:[#allocation81_spill] sm:$0xff] %v11058_v0  ;;  %v11082_v20 = vadd.f32 %v13948_v40, %v4339_v2  ;;  %v11085_v61 = vadd.f32 %v13948_v40, %v4340_v36  ;;  %v11088_v58 = vadd.f32 %v13948_v40, %v4341_v48  ;;  %v11091_v34 = vadd.f32 %v13948_v40, %v4342_v53 }
 0x63d   :  { %13952 = vst [vmem:[#allocation93_spill] sm:$0xff] %v11061_v5  ;;  %v11094_v42 = vadd.f32 %v13948_v40, %v4343_v41  ;;  %v11097_v14 = vadd.f32 %v13948_v40, %v4344_v60  ;;  %v11100_v12 = vadd.f32 %v13948_v40, %v4345_v21  ;;  %v11103_v2 = vadd.f32 %v13948_v40, %v4346_v28 }
 0x63e   :  { %13953 = vst [vmem:[#allocation83_spill] sm:$0xff] %v11064_v17  ;;  %v11106_v36 = vadd.f32 %v13948_v40, %v4347_v45  ;;  %v11109_v48 = vadd.f32 %v13948_v40, %v4348_v22  ;;  %v11112_v53 = vadd.f32 %v13948_v40, %v4349_v1  ;;  %v11115_v41 = vadd.f32 %v13948_v40, %v4350_v59 }
 0x63f   :  { %13954 = vst [vmem:[#allocation41_spill] sm:$0xff] %v11067_v32  ;;  %v11118_v60 = vadd.f32 %v13948_v40, %v4351_v52  ;;  %v11121_v21 = vadd.f32 %v13948_v40, %v4352_v6  ;;  %v11124_v28 = vadd.f32 %v13948_v40, %v4353_v19  ;;  %v11127_v45 = vadd.f32 %v13948_v40, %v4354_v29  ;;  %v13964_v52 = vld [vmem:[#allocation69_spill] sm:$0xff]  ;;  %v13967_v19 = vld [vmem:[#allocation15_spill] sm:$0xff]  ;;  %v13968_v29 = vld [vmem:[#allocation18_spill] sm:$0xff] }
 0x640   :  { %13955 = vst [vmem:[#allocation84_spill] sm:$0xff] %v11070_v27  ;;  %v11130_v22 = vadd.f32 %v13948_v40, %v4355_v37  ;;  %v11133_v1 = vadd.f32 %v13948_v40, %v4356_v16  ;;  %v11136_v59 = vadd.f32 %v13948_v40, %v4357_v10  ;;  %v13966_v6 = vld [vmem:[#allocation17_spill] sm:$0xff]  ;;  %v13969_v37 = vld [vmem:[#allocation16_spill] sm:$0xff]  ;;  %v13970_v16 = vld [vmem:[#allocation19_spill] sm:$0xff]  ;;  %vm4434_vm11 = vcmp.gt.f32.partialorder %v10971_v4, 0.0 }
 0x641   :  { %13956 = vst [vmem:[#allocation42_spill] sm:$0xff] %v11115_v41  ;;  %v13971_v10 = vld [vmem:[#allocation20_spill] sm:$0xff]  ;;  %vm4435_vm12 = vcmp.gt.f32.partialorder %v10974_v63, 0.0  ;;  %vm4436_vm13 = vcmp.gt.f32.partialorder %v10977_v49, 0.0  ;;  %vm4437_vm14 = vcmp.gt.f32.partialorder %v10980_v15, 0.0  ;;  %vm4438_vm15 = vcmp.gt.f32.partialorder %v10983_v9, 0.0 }
 0x642   :  { %13957 = vst [vmem:[#allocation97_spill] sm:$0xff] %v11118_v60  ;;  %v13965_v60 = vld [vmem:[#allocation36_spill] sm:$0xff]  ;;  %vm4472_vm2 = vcmp.gt.f32.partialorder %v11085_v61, 0.0  ;;  %vm4473_vm1 = vcmp.gt.f32.partialorder %v11088_v58, 0.0  ;;  %vm4474_vm3 = vcmp.gt.f32.partialorder %v11091_v34, 0.0  ;;  %vm4479_vm0 = vcmp.gt.f32.partialorder %v11106_v36, 0.0 }
 0x643   :  { %13958 = vst [vmem:[#allocation86_spill] sm:$0xff] %v11121_v21  ;;  %v4295_v41 = vmul.f32 %v13965_v60, %v13964_v52  ;;  %v4296_v21 = vmul.f32 %v13965_v60, %v13966_v6 }
 0x644   :  { %13959 = vst [vmem:[#allocation54_spill] sm:$0xff] %v11124_v28  ;;  %v4297_v28 = vmul.f32 %v13965_v60, %v13967_v19 }
 0x645   :  { %13960 = vst [vmem:[#allocation87_spill] sm:$0xff] %v11127_v45  ;;  %v4298_v45 = vmul.f32 %v13965_v60, %v13968_v29  ;;  %v11153_v52 = vadd.f32 %v13948_v40, %v4295_v41  ;;  %v11156_v6 = vadd.f32 %v13948_v40, %v4296_v21  ;;  %v13972_v41 = vld [vmem:[#allocation38_spill] sm:$0xff] }
 0x646   :  { %13961 = vst [vmem:[#allocation82_spill] sm:$0xff] %v11130_v22  ;;  %v4299_v22 = vmul.f32 %v13965_v60, %v13969_v37  ;;  %v11159_v19 = vadd.f32 %v13948_v40, %v4297_v28 }
 0x647   :  { %13962 = vst [vmem:[#allocation100_spill] sm:$0xff] %v11133_v1  ;;  %v4300_v1 = vmul.f32 %v13965_v60, %v13970_v16  ;;  %v11162_v29 = vadd.f32 %v13948_v40, %v4298_v45  ;;  %v11179_v21 = vmul.f32 %v13972_v41, %v11156_v6  ;;  %vm4427_vm4 = vcmp.gt.f32.partialorder %v11153_v52, 0.0 }
 0x648   :  { %13963 = vst [vmem:[#allocation44_spill] sm:$0xff] %v11136_v59  ;;  %v4301_v59 = vmul.f32 %v13965_v60, %v13971_v10  ;;  %v11165_v37 = vadd.f32 %v13948_v40, %v4299_v22  ;;  %v11175_v10 = vmul.f32 %v13972_v41, %v11153_v52  ;;  %v11183_v28 = vmul.f32 %v13972_v41, %v11159_v19 }
 0x649   :  { %v11168_v16 = vadd.f32 %v13948_v40, %v4300_v1  ;;  %v11187_v45 = vmul.f32 %v13972_v41, %v11162_v29  ;;  %vm4428_vm5 = vcmp.gt.f32.partialorder %v11156_v6, 0.0  ;;  %vm4429_vm6 = vcmp.gt.f32.partialorder %v11159_v19, 0.0 }
 0x64a   :  { %v11171_v60 = vadd.f32 %v13948_v40, %v4301_v59  ;;  %13973 = vst [vmem:[#allocation92_spill] sm:$0xff] %v11183_v28  ;;  %v11191_v40 = vmul.f32 %v13972_v41, %v11165_v37  ;;  %v11203_v59 = vmul.f32 %v13972_v41, %v10971_v4  ;;  %v11207_v28 = vmul.f32 %v13972_v41, %v10974_v63  ;;  %v6439_v4 = vld [vmem:[#allocation10 + $0xd8] sm:$0xff] }
 0x64b   :  { %13974 = vst [vmem:[#allocation89_spill] sm:$0xff] %v11187_v45  ;;  %v11195_v22 = vmul.f32 %v13972_v41, %v11168_v16  ;;  %v11211_v45 = vmul.f32 %v13972_v41, %v10977_v49  ;;  %vm4430_vm7 = vcmp.gt.f32.partialorder %v11162_v29, 0.0  ;;  %vm4431_vm8 = vcmp.gt.f32.partialorder %v11165_v37, 0.0 }
 0x64c   :  { %13975 = vst [vmem:[#allocation85_spill] sm:$0xff] %v11191_v40  ;;  %v11199_v1 = vmul.f32 %v13972_v41, %v11171_v60  ;;  %v11215_v40 = vmul.f32 %v13972_v41, %v10980_v15  ;;  %vm4432_vm9 = vcmp.gt.f32.partialorder %v11168_v16, 0.0  ;;  %vm4433_vm10 = vcmp.gt.f32.partialorder %v11171_v60, 0.0 }
 0x64d   :  { %13976 = vst [vmem:[#allocation104_spill] sm:$0xff] %v11195_v22  ;;  %v11219_v22 = vmul.f32 %v13972_v41, %v10983_v9 }
 0x64e   :  { %13977 = vst [vmem:[#allocation57_spill] sm:$0xff] %v11199_v1  ;;  %v11223_v1 = vmul.f32 %v13972_v41, %v10986_v24 }
 0x64f   :  { %13978 = vst [vmem:[#allocation96_spill] sm:$0xff] %v11203_v59  ;;  %v11227_v59 = vmul.f32 %v13972_v41, %v10989_v35 }
 0x650   :  { %13979 = vst [vmem:[#allocation91_spill] sm:$0xff] %v11207_v28  ;;  %v11231_v28 = vmul.f32 %v13972_v41, %v10992_v33 }
 0x651   :  { %13980 = vst [vmem:[#allocation88_spill] sm:$0xff] %v11211_v45  ;;  %v11235_v45 = vmul.f32 %v13972_v41, %v10995_v13 }
 0x652   :  { %13981 = vst [vmem:[#allocation107_spill] sm:$0xff] %v11215_v40  ;;  %v6458_v40 = vld [vmem:[#allocation10 + $0x170] sm:$0xff] }
 0x653   :  { %13982 = vst [vmem:[#allocation47_spill] sm:$0xff] %v11219_v22  ;;  %v11240_v22 = vmul.f32 %v13972_v41, %v10998_v11  ;;  %6975 = vmatpush.msrb.mxu3 %v6458_v40  ;;  %v11292_v40 = vmul.f32 %v13972_v41, %v11031_v55 }
 0x654   :  { %13983 = vst [vmem:[#allocation101_spill] sm:$0xff] %v11223_v1  ;;  %v11244_v1 = vmul.f32 %v13972_v41, %v11001_v57 }
 0x655   :  { %13984 = vst [vmem:[#allocation95_spill] sm:$0xff] %v11227_v59  ;;  %v11248_v59 = vmul.f32 %v13972_v41, %v11004_v3 }
 0x656   :  { %13985 = vst [vmem:[#allocation90_spill] sm:$0xff] %v11231_v28  ;;  %v11252_v28 = vmul.f32 %v13972_v41, %v11007_v51 }
 0x657   :  { %13986 = vst [vmem:[#allocation98_spill] sm:$0xff] %v11235_v45  ;;  %v6440_v45 = vld [vmem:[#allocation10 + $0xe0] sm:$0xff] }
 0x658   :  { %13987 = vst [vmem:[#allocation94_spill] sm:$0xff] %v11240_v22  ;;  %v11272_v22 = vmul.f32 %v13972_v41, %v11019_v23  ;;  %6768 = vmatpush.msrb.mxu2 %v6440_v45  ;;  %v11308_v45 = vmul.f32 %v13972_v41, %v11040_v47 }
 0x659   :  { %13988 = vst [vmem:[#allocation60_spill] sm:$0xff] %v11244_v1  ;;  %v11260_v1 = vmul.f32 %v13972_v41, %v11010_v43 }
 0x65a   :  { %13989 = vst [vmem:[#allocation105_spill] sm:$0xff] %v11248_v59  ;;  %v11264_v59 = vmul.f32 %v13972_v41, %v11013_v56  ;;  %6769 = vmatpush.msrb.mxu2 %v6439_v4  ;;  %v11348_v4 = vmul.f32 %v13972_v41, %v11064_v17  ;;  %v14040_v17 = vld [vmem:[#allocation44_spill] sm:$0xff] }
 0x65b   :  { %13990 = vst [vmem:[#allocation102_spill] sm:$0xff] %v11252_v28  ;;  %v11268_v28 = vmul.f32 %v13972_v41, %v11016_v39 }
 0x65c   :  { %13991 = vst [vmem:[#allocation99_spill] sm:$0xff] %v11260_v1  ;;  %v6457_v1 = vld [vmem:[#allocation10 + $0x168] sm:$0xff] }
 0x65d   :  { %13992 = vst [vmem:[#allocation50_spill] sm:$0xff] %v11264_v59  ;;  %v11280_v59 = vmul.f32 %v13972_v41, %v11022_v44  ;;  %6976 = vmatpush.msrb.mxu3 %v6457_v1  ;;  %v11332_v1 = vmul.f32 %v13972_v41, %v11055_v25  ;;  %v14032_v25 = vld [vmem:[#allocation54_spill] sm:$0xff] }
 0x65e   :  { %13993 = vst [vmem:[#allocation106_spill] sm:$0xff] %v11268_v28  ;;  %v11284_v28 = vmul.f32 %v13972_v41, %v11025_v30 }
 0x65f   :  { %13994 = vst [vmem:[#allocation103_spill] sm:$0xff] %v11272_v22  ;;  %v11288_v22 = vmul.f32 %v13972_v41, %v11028_v38 }
 0x660   :  { %13995 = vst [vmem:[#allocation62_spill] sm:$0xff] %v11280_v59  ;;  %v6438_v59 = vld [vmem:[#allocation10 + $0xd0] sm:$0xff] }
 0x661   :  { %13996 = vst [vmem:[#allocation109_spill] sm:$0xff] %v11284_v28  ;;  %v11300_v28 = vmul.f32 %v13972_v41, %v11034_v7  ;;  %6770 = vmatpush.msrb.mxu2 %v6438_v59  ;;  %v11388_v59 = vmul.f32 %v13972_v41, %v11088_v58 }
 0x662   :  { %13997 = vst [vmem:[#allocation53_spill] sm:$0xff] %v11288_v22  ;;  %v11304_v22 = vmul.f32 %v13972_v41, %v11037_v62 }
 0x663   :  { %13998 = vst [vmem:[#allocation108_spill] sm:$0xff] %v11292_v40  ;;  %v11312_v40 = vmul.f32 %v13972_v41, %v11043_v26 }
 0x664   :  { %13999 = vst [vmem:[#allocation65_spill] sm:$0xff] %v11300_v28  ;;  %v6456_v28 = vld [vmem:[#allocation10 + $0x160] sm:$0xff] }
 0x665   :  { %14000 = vst [vmem:[#allocation56_spill] sm:$0xff] %v11304_v22  ;;  %v11320_v22 = vmul.f32 %v13972_v41, %v11046_v8  ;;  %6977 = vmatpush.msrb.mxu3 %v6456_v28  ;;  %v11372_v28 = vmul.f32 %v13972_v41, %v11079_v50 }
 0x666   :  { %14001 = vst [vmem:[#allocation68_spill] sm:$0xff] %v11308_v45  ;;  %v11324_v45 = vmul.f32 %v13972_v41, %v11049_v18 }
 0x667   :  { %14002 = vst [vmem:[#allocation59_spill] sm:$0xff] %v11312_v40  ;;  %v11328_v40 = vmul.f32 %v13972_v41, %v11052_v31 }
 0x668   :  { %14003 = vst [vmem:[#allocation71_spill] sm:$0xff] %v11320_v22  ;;  %v6437_v22 = vld [vmem:[#allocation10 + $0xc8] sm:$0xff] }
 0x669   :  { %14004 = vst [vmem:[#allocation63_spill] sm:$0xff] %v11324_v45  ;;  %v11340_v45 = vmul.f32 %v13972_v41, %v11058_v0  ;;  %6771 = vmatpush.msrb.mxu2 %v6437_v22  ;;  %v11428_v22 = vmul.f32 %v13972_v41, %v11112_v53  ;;  %v14030_v0 = vld [vmem:[#allocation86_spill] sm:$0xff] }
 0x66a   :  { %14005 = vst [vmem:[#allocation73_spill] sm:$0xff] %v11328_v40  ;;  %v11344_v40 = vmul.f32 %v13972_v41, %v11061_v5 }
 0x66b   :  { %14006 = vst [vmem:[#allocation66_spill] sm:$0xff] %v11332_v1  ;;  %v11352_v1 = vmul.f32 %v13972_v41, %v11067_v32  ;;  %v6453_v32 = vld [vmem:[#allocation10 + $0x148] sm:$0xff] }
 0x66c   :  { %14007 = vst [vmem:[#allocation75_spill] sm:$0xff] %v11340_v45  ;;  %v6455_v45 = vld [vmem:[#allocation10 + $0x158] sm:$0xff] }
 0x66d   :  { %14008 = vst [vmem:[#allocation21_spill] sm:$0xff] %v11344_v40  ;;  %v11360_v40 = vmul.f32 %v13972_v41, %v11070_v27  ;;  %6978 = vmatpush.msrb.mxu3 %v6455_v45  ;;  %v11412_v45 = vmul.f32 %v13972_v41, %v11103_v2  ;;  %v14038_v27 = vld [vmem:[#allocation100_spill] sm:$0xff] }
 0x66e   :  { %14009 = vst [vmem:[#allocation22_spill] sm:$0xff] %v11348_v4  ;;  %v11364_v4 = vmul.f32 %v13972_v41, %v11073_v54 }
 0x66f   :  { %14010 = vst [vmem:[#allocation23_spill] sm:$0xff] %v11352_v1  ;;  %v11368_v1 = vmul.f32 %v13972_v41, %v11076_v46 }
 0x670   :  { %14011 = vst [vmem:[#allocation24_spill] sm:$0xff] %v11360_v40  ;;  %v6436_v40 = vld [vmem:[#allocation10 + $0xc0] sm:$0xff] }
 0x671   :  { %14012 = vst [vmem:[#allocation25_spill] sm:$0xff] %v11364_v4  ;;  %v11380_v4 = vmul.f32 %v13972_v41, %v11082_v20  ;;  %6772 = vmatpush.msrb.mxu2 %v6436_v40  ;;  %v11468_v40 = vmul.f32 %v13972_v41, %v14040_v17 }
 0x672   :  { %14013 = vst [vmem:[#allocation26_spill] sm:$0xff] %v11368_v1  ;;  %v11384_v1 = vmul.f32 %v13972_v41, %v11085_v61 }
 0x673   :  { %14014 = vst [vmem:[#allocation27_spill] sm:$0xff] %v11372_v28  ;;  %v11392_v28 = vmul.f32 %v13972_v41, %v11091_v34 }
 0x674   :  { %14015 = vst [vmem:[#allocation28_spill] sm:$0xff] %v11380_v4  ;;  %v6454_v4 = vld [vmem:[#allocation10 + $0x150] sm:$0xff] }
 0x675   :  { %14016 = vst [vmem:[#allocation29_spill] sm:$0xff] %v11384_v1  ;;  %v11400_v1 = vmul.f32 %v13972_v41, %v11094_v42  ;;  %6979 = vmatpush.msrb.mxu3 %v6454_v4  ;;  %v14034_v4 = vld [vmem:[#allocation87_spill] sm:$0xff] }
 0x676   :  { %14017 = vst [vmem:[#allocation30_spill] sm:$0xff] %v11388_v59  ;;  %v11404_v59 = vmul.f32 %v13972_v41, %v11097_v14  ;;  %v11452_v5 = vmul.f32 %v13972_v41, %v14034_v4 }
 0x677   :  { %14018 = vst [vmem:[#allocation31_spill] sm:$0xff] %v11392_v28  ;;  %v11408_v28 = vmul.f32 %v13972_v41, %v11100_v12  ;;  %6980 = vmatpush.msrb.mxu3 %v6453_v32  ;;  %v14044_v32 = vld [vmem:[#allocation89_spill] sm:$0xff] }
 0x678   :  { %14019 = vst [vmem:[#allocation33_spill] sm:$0xff] %v11400_v1 }
 0x679   :  { %14020 = vst [vmem:[#allocation35_spill] sm:$0xff] %v11404_v59  ;;  %v11420_v59 = vmul.f32 %v13972_v41, %v11106_v36 }
 0x67a   :  { %14021 = vst [vmem:[#allocation37_spill] sm:$0xff] %v11408_v28  ;;  %v11424_v28 = vmul.f32 %v13972_v41, %v11109_v48 }
 0x67b   :  { %14022 = vst [vmem:[#allocation40_spill] sm:$0xff] %v11412_v45  ;;  %v14026_v45 = vld [vmem:[#allocation42_spill] sm:$0xff] }
 0x67c   :  { %14023 = vst [vmem:[#allocation43_spill] sm:$0xff] %v11420_v59  ;;  %v11432_v1 = vmul.f32 %v13972_v41, %v14026_v45  ;;  %v14028_v59 = vld [vmem:[#allocation97_spill] sm:$0xff] }
 0x67d   :  { %14024 = vst [vmem:[#allocation46_spill] sm:$0xff] %v11424_v28  ;;  %v11440_v28 = vmul.f32 %v13972_v41, %v14028_v59 }
 0x67e   :  { %14025 = vst [vmem:[#allocation49_spill] sm:$0xff] %v11428_v22  ;;  %v11444_v22 = vmul.f32 %v13972_v41, %v14030_v0 }
 0x67f   :  { %14027 = vst [vmem:[#allocation52_spill] sm:$0xff] %v11432_v1  ;;  %v11448_v1 = vmul.f32 %v13972_v41, %v14032_v25 }
 0x680   :  { %14029 = vst [vmem:[#allocation55_spill] sm:$0xff] %v11440_v28  ;;  %v14036_v28 = vld [vmem:[#allocation82_spill] sm:$0xff] }
 0x681   :  { %14031 = vst [vmem:[#allocation58_spill] sm:$0xff] %v11444_v22  ;;  %v11460_v22 = vmul.f32 %v13972_v41, %v14036_v28 }
 0x682   :  { %14033 = vst [vmem:[#allocation61_spill] sm:$0xff] %v11448_v1  ;;  %v11464_v1 = vmul.f32 %v13972_v41, %v14038_v27  ;;  %v11484_v41 = vsel %vm4428_vm5, %v11156_v6, %v11179_v21  ;;  %vm4477_vm5 = vcmp.gt.f32.partialorder %v11100_v12, 0.0  ;;  %v14048_v6 = vld [vmem:[#allocation104_spill] sm:$0xff] }
 0x683   :  { %14035 = vst [vmem:[#allocation64_spill] sm:$0xff] %v11452_v5  ;;  %v11474_v5 = vsel %vm4427_vm4, %v11153_v52, %v11175_v10  ;;  %v11496_v10 = vsel %vm4430_vm7, %v11162_v29, %v14044_v32  ;;  %vm4476_vm4 = vcmp.gt.f32.partialorder %v11097_v14, 0.0  ;;  %v14050_v29 = vld [vmem:[#allocation57_spill] sm:$0xff]  ;;  %v14052_v21 = vld [vmem:[#allocation96_spill] sm:$0xff]  ;;  %v14055_v32 = vld [vmem:[#allocation91_spill] sm:$0xff]  ;;  %vm4480_vm7 = vcmp.gt.f32.partialorder %v11109_v48, 0.0 }
 0x684   :  { %14037 = vst [vmem:[#allocation67_spill] sm:$0xff] %v11460_v22 }
 0x685   :  { %14039 = vst [vmem:[#allocation70_spill] sm:$0xff] %v11464_v1  ;;  %v14046_v1 = vld [vmem:[#allocation85_spill] sm:$0xff] }
 0x686   :  { %14041 = vst [vmem:[#allocation72_spill] sm:$0xff] %v11468_v40  ;;  %v14043_v40 = vld [vmem:[#allocation92_spill] sm:$0xff]  ;;  %v11502_v22 = vsel %vm4431_vm8, %v11165_v37, %v14046_v1  ;;  %v11519_v37 = vsel %vm4433_vm10, %v11171_v60, %v14050_v29  ;;  %vm4481_vm8 = vcmp.gt.f32.partialorder %v11112_v53, 0.0  ;;  %v14060_v29 = vld [vmem:[#allocation47_spill] sm:$0xff]  ;;  %vm14073_vm10 = vcmp.gt.f32.partialorder %v10998_v11, 0.0 }
 0x687   :  { %14042 = vst [vmem:[#allocation74_spill] sm:$0xff] %v11474_v5  ;;  %v11490_v52 = vsel %vm4429_vm6, %v11159_v19, %v14043_v40  ;;  %vm4478_vm6 = vcmp.gt.f32.partialorder %v11103_v2, 0.0  ;;  %v11513_v19 = vsel %vm4432_vm9, %v11168_v16, %v14048_v6  ;;  %v14053_v1 = vld [vmem:[#allocation32_spill] sm:$0xff]  ;;  %vm4482_vm9 = vcmp.gt.f32.partialorder %v14026_v45, 0.0  ;;  %v14058_v6 = vld [vmem:[#allocation107_spill] sm:$0xff] }
 0x688   :  { %14045 = vst [vmem:[#allocation76_spill] sm:$0xff] %v11496_v10  ;;  %v11525_v40 = vsel %vm4434_vm11, %v14053_v1, %v14052_v21  ;;  %v14057_v16 = vld [vmem:[#allocation88_spill] sm:$0xff]  ;;  %v11554_v21 = vsel %vm4438_vm15, %v10983_v9, %v14060_v29  ;;  %v14062_v1 = vld [vmem:[#allocation101_spill] sm:$0xff]  ;;  %vm14063_vm11 = vcmp.gt.f32.partialorder %v10986_v24, 0.0  ;;  %vm14066_vm15 = vcmp.gt.f32.partialorder %v10989_v35, 0.0  ;;  %v14068_v9 = vld [vmem:[#allocation90_spill] sm:$0xff] }
 0x689   :  { %14047 = vst [vmem:[#allocation77_spill] sm:$0xff] %v11502_v22  ;;  %v11542_v60 = vsel %vm4436_vm13, %v10977_v49, %v14057_v16  ;;  %v14065_v49 = vld [vmem:[#allocation95_spill] sm:$0xff]  ;;  %v14070_v16 = vld [vmem:[#allocation98_spill] sm:$0xff]  ;;  %vm14071_vm13 = vcmp.gt.f32.partialorder %v10995_v13, 0.0 }
 0x68a   :  { %4620 = vst [vmem:[#allocation2 + $0x19] sm:$0xff] %v11474_v5  ;;  %v11531_v5 = vsel %vm4435_vm12, %v10974_v63, %v14055_v32  ;;  %v11548_v63 = vsel %vm4437_vm14, %v10980_v15, %v14058_v6  ;;  %v11560_v32 = vsel %vm14063_vm11, %v10986_v24, %v14062_v1  ;;  %vm4484_vm12 = vcmp.gt.f32.partialorder %v14030_v0, 0.0  ;;  %v14072_v29 = vld [vmem:[#allocation94_spill] sm:$0xff] }
 0x68b   :  { %14049 = vst [vmem:[#allocation78_spill] sm:$0xff] %v11513_v19  ;;  %v11571_v15 = vsel %vm14066_vm15, %v10989_v35, %v14065_v49  ;;  %vm14069_vm11 = vcmp.gt.f32.partialorder %v10992_v33, 0.0  ;;  %v11583_v6 = vsel %vm14071_vm13, %v10995_v13, %v14070_v16  ;;  %v11589_v1 = vsel %vm14073_vm10, %v10998_v11, %v14072_v29  ;;  %v14074_v35 = vld [vmem:[#allocation60_spill] sm:$0xff]  ;;  %v14076_v13 = vld [vmem:[#allocation105_spill] sm:$0xff]  ;;  %v14078_v11 = vld [vmem:[#allocation102_spill] sm:$0xff] }
 0x68c   :  { %14051 = vst [vmem:[#allocation39_spill] sm:$0xff] %v11519_v37  ;;  %v11577_v24 = vsel %vm14069_vm11, %v10992_v33, %v14068_v9  ;;  %vm4488_vm15 = vcmp.gt.f32.partialorder %v14038_v27, 0.0  ;;  %vm14075_vm11 = vcmp.gt.f32.partialorder %v11001_v57, 0.0  ;;  %vm14077_vm13 = vcmp.gt.f32.partialorder %v11004_v3, 0.0  ;;  %v14080_v16 = vld [vmem:[#allocation99_spill] sm:$0xff] }
 0x68d   :  { %14054 = vst [vmem:[#allocation79_spill] sm:$0xff] %v11525_v40  ;;  %v11598_v33 = vsel %vm14075_vm11, %v11001_v57, %v14074_v35  ;;  %v11604_v49 = vsel %vm14077_vm13, %v11004_v3, %v14076_v13  ;;  %vm14079_vm10 = vcmp.gt.f32.partialorder %v11007_v51, 0.0  ;;  %vm14081_vm14 = vcmp.gt.f32.partialorder %v11010_v43, 0.0  ;;  %v14082_v57 = vld [vmem:[#allocation50_spill] sm:$0xff]  ;;  %v14086_v13 = vld [vmem:[#allocation103_spill] sm:$0xff] }
 0x68e   :  { %14056 = vst [vmem:[#allocation80_spill] sm:$0xff] %v11531_v5  ;;  %v11610_v9 = vsel %vm14079_vm10, %v11007_v51, %v14078_v11  ;;  %v11616_v29 = vsel %vm14081_vm14, %v11010_v43, %v14080_v16  ;;  %vm14083_vm11 = vcmp.gt.f32.partialorder %v11013_v56, 0.0  ;;  %v14084_v35 = vld [vmem:[#allocation106_spill] sm:$0xff]  ;;  %vm14085_vm13 = vcmp.gt.f32.partialorder %v11016_v39, 0.0 }
 0x68f   :  { %4621 = vst [vmem:[#allocation2 + $0x21] sm:$0xff] %v11484_v41  ;;  %v11623_v3 = vsel %vm14083_vm11, %v11013_v56, %v14082_v57  ;;  %v11629_v51 = vsel %vm14085_vm13, %v11016_v39, %v14084_v35  ;;  %vm14087_vm10 = vcmp.gt.f32.partialorder %v11019_v23, 0.0  ;;  %v14088_v11 = vld [vmem:[#allocation62_spill] sm:$0xff]  ;;  %vm14089_vm14 = vcmp.gt.f32.partialorder %v11022_v44, 0.0  ;;  %v14090_v56 = vld [vmem:[#allocation109_spill] sm:$0xff]  ;;  %v14094_v35 = vld [vmem:[#allocation108_spill] sm:$0xff] }
 0x690   :  { %14059 = vst [vmem:[#allocation34_spill] sm:$0xff] %v11548_v63  ;;  %v11635_v43 = vsel %vm14087_vm10, %v11019_v23, %v14086_v13  ;;  %v11641_v16 = vsel %vm14089_vm14, %v11022_v44, %v14088_v11  ;;  %vm14091_vm11 = vcmp.gt.f32.partialorder %v11025_v30, 0.0  ;;  %v14092_v57 = vld [vmem:[#allocation53_spill] sm:$0xff]  ;;  %vm14093_vm13 = vcmp.gt.f32.partialorder %v11028_v38, 0.0 }
 0x691   :  { %14061 = vst [vmem:[#allocation45_spill] sm:$0xff] %v11554_v21  ;;  %v11648_v39 = vsel %vm14091_vm11, %v11025_v30, %v14090_v56  ;;  %v11654_v23 = vsel %vm14093_vm13, %v11028_v38, %v14092_v57  ;;  %vm14095_vm10 = vcmp.gt.f32.partialorder %v11031_v55, 0.0  ;;  %v14096_v13 = vld [vmem:[#allocation65_spill] sm:$0xff]  ;;  %vm14097_vm14 = vcmp.gt.f32.partialorder %v11034_v7, 0.0  ;;  %v14098_v30 = vld [vmem:[#allocation56_spill] sm:$0xff]  ;;  %v14102_v57 = vld [vmem:[#allocation59_spill] sm:$0xff] }
 0x692   :  { %14064 = vst [vmem:[#allocation48_spill] sm:$0xff] %v11560_v32  ;;  %v11660_v44 = vsel %vm14095_vm10, %v11031_v55, %v14094_v35  ;;  %v11666_v11 = vsel %vm14097_vm14, %v11034_v7, %v14096_v13  ;;  %vm14099_vm11 = vcmp.gt.f32.partialorder %v11037_v62, 0.0  ;;  %v14100_v56 = vld [vmem:[#allocation68_spill] sm:$0xff]  ;;  %vm14101_vm13 = vcmp.gt.f32.partialorder %v11040_v47, 0.0  ;;  %v14104_v35 = vld [vmem:[#allocation71_spill] sm:$0xff] }
 0x693   :  { %4622 = vst [vmem:[#allocation2 + $0x31] sm:$0xff] %v11490_v52  ;;  %v11673_v38 = vsel %vm14099_vm11, %v11037_v62, %v14098_v30  ;;  %v11679_v55 = vsel %vm14101_vm13, %v11040_v47, %v14100_v56  ;;  %vm14103_vm10 = vcmp.gt.f32.partialorder %v11043_v26, 0.0  ;;  %vm14105_vm14 = vcmp.gt.f32.partialorder %v11046_v8, 0.0  ;;  %v14106_v62 = vld [vmem:[#allocation63_spill] sm:$0xff]  ;;  %v14108_v30 = vld [vmem:[#allocation73_spill] sm:$0xff]  ;;  %v14110_v56 = vld [vmem:[#allocation66_spill] sm:$0xff] }
 0x694   :  { %14067 = vst [vmem:[#allocation69_spill] sm:$0xff] %v11571_v15  ;;  %v11685_v7 = vsel %vm14103_vm10, %v11043_v26, %v14102_v57  ;;  %v11691_v13 = vsel %vm14105_vm14, %v11046_v8, %v14104_v35  ;;  %vm14107_vm11 = vcmp.gt.f32.partialorder %v11049_v18, 0.0  ;;  %vm14109_vm13 = vcmp.gt.f32.partialorder %v11052_v31, 0.0  ;;  %v14111_v57 = vld [vmem:[#allocation51_spill] sm:$0xff] }
 0x695   :  { %4623 = vst [vmem:[#allocation2 + $0x39] sm:$0xff] %v11496_v10  ;;  %v11698_v47 = vsel %vm14107_vm11, %v11049_v18, %v14106_v62  ;;  %v11704_v26 = vsel %vm14109_vm13, %v11052_v31, %v14108_v30  ;;  %vm14112_vm10 = vcmp.gt.f32.partialorder %v14111_v57, 0.0  ;;  %v14113_v35 = vld [vmem:[#allocation75_spill] sm:$0xff]  ;;  %v14116_v18 = vld [vmem:[#allocation21_spill] sm:$0xff]  ;;  %v14119_v30 = vld [vmem:[#allocation22_spill] sm:$0xff] }
 0x696   :  { %4624 = vst [vmem:[#allocation2 + $0x49] sm:$0xff] %v11502_v22  ;;  %v11710_v8 = vsel %vm14112_vm10, %v14111_v57, %v14110_v56  ;;  %v14117_v62 = vld [vmem:[#allocation93_spill] sm:$0xff]  ;;  %v14122_v57 = vld [vmem:[#allocation23_spill] sm:$0xff] }
 0x697   :  { %4625 = vst [vmem:[#allocation2 + $0x51] sm:$0xff] %v11513_v19  ;;  %vm14118_vm11 = vcmp.gt.f32.partialorder %v14117_v62, 0.0  ;;  %v14120_v19 = vld [vmem:[#allocation83_spill] sm:$0xff]  ;;  %v14123_v22 = vld [vmem:[#allocation41_spill] sm:$0xff] }
 0x698   :  { %4626 = vst [vmem:[#allocation2 + $0x61] sm:$0xff] %v11519_v37  ;;  %v11723_v31 = vsel %vm14118_vm11, %v14117_v62, %v14116_v18  ;;  %vm14121_vm13 = vcmp.gt.f32.partialorder %v14120_v19, 0.0  ;;  %vm14124_vm10 = vcmp.gt.f32.partialorder %v14123_v22, 0.0  ;;  %v14128_v18 = vld [vmem:[#allocation25_spill] sm:$0xff]  ;;  %vm14129_vm11 = vcmp.gt.f32.partialorder %v11073_v54, 0.0  ;;  %v14130_v62 = vld [vmem:[#allocation26_spill] sm:$0xff] }
 0x699   :  { %4627 = vst [vmem:[#allocation2 + $0x69] sm:$0xff] %v11525_v40  ;;  %v14114_v40 = vld [vmem:[#allocation81_spill] sm:$0xff]  ;;  %v11729_v56 = vsel %vm14121_vm13, %v14120_v19, %v14119_v30  ;;  %v11748_v19 = vsel %vm14129_vm11, %v11073_v54, %v14128_v18  ;;  %vm14131_vm13 = vcmp.gt.f32.partialorder %v11076_v46, 0.0  ;;  %v14132_v30 = vld [vmem:[#allocation27_spill] sm:$0xff]  ;;  %v14137_v18 = vld [vmem:[#allocation30_spill] sm:$0xff]  ;;  %vm14140_vm11 = vcmp.gt.f32.partialorder %v11094_v42, 0.0 }
 0x69a   :  { %vm14115_vm14 = vcmp.gt.f32.partialorder %v14114_v40, 0.0  ;;  %4628 = vst [vmem:[#allocation2 + $0x79] sm:$0xff] %v11531_v5  ;;  %v14126_v5 = vld [vmem:[#allocation84_spill] sm:$0xff]  ;;  %v14136_v54 = vld [vmem:[#allocation29_spill] sm:$0xff] }
 0x69b   :  { %v11716_v37 = vsel %vm14115_vm14, %v14114_v40, %v14113_v35  ;;  %v11735_v40 = vsel %vm14124_vm10, %v14123_v22, %v14122_v57  ;;  %v14125_v35 = vld [vmem:[#allocation24_spill] sm:$0xff]  ;;  %vm14127_vm14 = vcmp.gt.f32.partialorder %v14126_v5, 0.0  ;;  %4629 = vst [vmem:[#allocation2 + $0x81] sm:$0xff] %v11542_v60  ;;  %v11754_v22 = vsel %vm14131_vm13, %v11076_v46, %v14130_v62  ;;  %v14138_v62 = vld [vmem:[#allocation31_spill] sm:$0xff] }
 0x69c   :  { %v11741_v10 = vsel %vm14127_vm14, %v14126_v5, %v14125_v35  ;;  %vm14133_vm10 = vcmp.gt.f32.partialorder %v11079_v50, 0.0  ;;  %v14134_v57 = vld [vmem:[#allocation28_spill] sm:$0xff]  ;;  %vm14135_vm14 = vcmp.gt.f32.partialorder %v11082_v20, 0.0  ;;  %4630 = vst [vmem:[#allocation2 + $0x91] sm:$0xff] %v11548_v63  ;;  %v11773_v46 = vsel %vm4472_vm2, %v11085_v61, %v14136_v54  ;;  %v14141_v61 = vld [vmem:[#allocation35_spill] sm:$0xff]  ;;  %v14142_v54 = vld [vmem:[#allocation37_spill] sm:$0xff] }
 0x69d   :  { %v11760_v5 = vsel %vm14133_vm10, %v11079_v50, %v14132_v30  ;;  %v11766_v35 = vsel %vm14135_vm14, %v11082_v20, %v14134_v57  ;;  %v11779_v50 = vsel %vm4473_vm1, %v11088_v58, %v14137_v18  ;;  %v11785_v20 = vsel %vm4474_vm3, %v11091_v34, %v14138_v62  ;;  %v14139_v30 = vld [vmem:[#allocation33_spill] sm:$0xff]  ;;  %4631 = vst [vmem:[#allocation2 + $0x99] sm:$0xff] %v11554_v21  ;;  %v14143_v18 = vld [vmem:[#allocation40_spill] sm:$0xff]  ;;  %v14144_v62 = vld [vmem:[#allocation43_spill] sm:$0xff] }
 0x69e   :  { %v11791_v57 = vsel %vm14140_vm11, %v11094_v42, %v14139_v30  ;;  %v11798_v58 = vsel %vm4476_vm4, %v11097_v14, %v14141_v61  ;;  %v11804_v34 = vsel %vm4477_vm5, %v11100_v12, %v14142_v54  ;;  %v11810_v42 = vsel %vm4478_vm6, %v11103_v2, %v14143_v18  ;;  %4632 = vst [vmem:[#allocation2 + $0xa9] sm:$0xff] %v11560_v32  ;;  %v6435_v14 = vld [vmem:[#allocation10 + $0xb8] sm:$0xff]  ;;  %v6452_v61 = vld [vmem:[#allocation10 + $0x140] sm:$0xff]  ;;  %v14146_v54 = vld [vmem:[#allocation49_spill] sm:$0xff] }
 0x69f   :  { %v11816_v30 = vsel %vm4479_vm0, %v11106_v36, %v14144_v62  ;;  %v14145_v21 = vld [vmem:[#allocation46_spill] sm:$0xff]  ;;  %v11829_v2 = vsel %vm4481_vm8, %v11112_v53, %v14146_v54  ;;  %v14147_v18 = vld [vmem:[#allocation52_spill] sm:$0xff]  ;;  %v14148_v62 = vld [vmem:[#allocation55_spill] sm:$0xff]  ;;  %vm14149_vm0 = vcmp.gt.f32.partialorder %v14028_v59, 0.0  ;;  %4633 = vst [vmem:[#allocation2 + $0xb1] sm:$0xff] %v11571_v15  ;;  %vm14152_vm1 = vcmp.gt.f32.partialorder %v14032_v25, 0.0  ;;  %6773 = vmatpush.msrb.mxu2 %v6435_v14  ;;  %6981 = vmatpush.msrb.mxu3 %v6452_v61 }
 0x6a0   :  { %v11823_v12 = vsel %vm4480_vm7, %v11109_v48, %v14145_v21  ;;  %v11835_v36 = vsel %vm4482_vm9, %v14026_v45, %v14147_v18  ;;  %v11841_v32 = vsel %vm14149_vm0, %v14028_v59, %v14148_v62  ;;  %v6475_v48 = vld [vmem:[#allocation10 + $0x1f8] sm:$0xff]  ;;  %v14151_v54 = vld [vmem:[#allocation61_spill] sm:$0xff]  ;;  %v14153_v18 = vld [vmem:[#allocation64_spill] sm:$0xff]  ;;  %vm14154_vm2 = vcmp.gt.f32.partialorder %v14034_v4, 0.0  ;;  %4634 = vst [vmem:[#allocation2 + $0xc1] sm:$0xff] %v11577_v24 }
 0x6a1   :  { %v14150_v21 = vld [vmem:[#allocation58_spill] sm:$0xff]  ;;  %v11854_v45 = vsel %vm14152_vm1, %v14032_v25, %v14151_v54  ;;  %v11860_v59 = vsel %vm14154_vm2, %v14034_v4, %v14153_v18  ;;  %v14155_v62 = vld [vmem:[#allocation67_spill] sm:$0xff]  ;;  %vm14156_vm3 = vcmp.gt.f32.partialorder %v14036_v28, 0.0  ;;  %v14158_v54 = vld [vmem:[#allocation72_spill] sm:$0xff]  ;;  %vm14159_vm4 = vcmp.gt.f32.partialorder %v14040_v17, 0.0  ;;  %4635 = vst [vmem:[#allocation2 + $0xc9] sm:$0xff] %v11583_v6  ;;  %7183 = vmatpush.msrb.mxu0 %v6475_v48 }
 0x6a2   :  { %v11848_v53 = vsel %vm4484_vm12, %v14030_v0, %v14150_v21  ;;  %v11866_v15 = vsel %vm14156_vm3, %v14036_v28, %v14155_v62  ;;  %v6434_v0 = vld [vmem:[#allocation10 + $0xb0] sm:$0xff]  ;;  %v6451_v21 = vld [vmem:[#allocation10 + $0x138] sm:$0xff]  ;;  %v11879_v4 = vsel %vm14159_vm4, %v14040_v17, %v14158_v54  ;;  %4636 = vst [vmem:[#allocation2 + $0xd9] sm:$0xff] %v11589_v1  ;;  %v6433_v18 = vld [vmem:[#allocation10 + $0xa8] sm:$0xff] }
 0x6a3   :  { %v14157_v63 = vld [vmem:[#allocation70_spill] sm:$0xff]  ;;  %v6474_v28 = vld [vmem:[#allocation10 + $0x1f0] sm:$0xff]  ;;  %4637 = vst [vmem:[#allocation2 + $0xe1] sm:$0xff] %v11598_v33  ;;  %6774 = vmatpush.msrb.mxu2 %v6434_v0  ;;  %6982 = vmatpush.msrb.mxu3 %v6451_v21  ;;  %v6449_v17 = vld [vmem:[#allocation10 + $0x128] sm:$0xff] }
 0x6a4   :  { %v11873_v25 = vsel %vm4488_vm15, %v14038_v27, %v14157_v63  ;;  %v6450_v62 = vld [vmem:[#allocation10 + $0x130] sm:$0xff]  ;;  %v6473_v27 = vld [vmem:[#allocation10 + $0x1e8] sm:$0xff]  ;;  %4638 = vst [vmem:[#allocation2 + $0xf1] sm:$0xff] %v11604_v49  ;;  %v6432_v63 = vld [vmem:[#allocation10 + $0xa0] sm:$0xff]  ;;  %7184 = vmatpush.msrb.mxu0 %v6474_v28 }
 0x6a5   :  { %4639 = vst [vmem:[#allocation2 + $0xf9] sm:$0xff] %v11610_v9  ;;  %6775 = vmatpush.msrb.mxu2 %v6433_v18  ;;  %6983 = vmatpush.msrb.mxu3 %v6450_v62  ;;  %v6472_v14 = vld [vmem:[#allocation10 + $0x1e0] sm:$0xff]  ;;  %v6431_v54 = vld [vmem:[#allocation10 + $0x98] sm:$0xff]  ;;  %v6430_v21 = vld [vmem:[#allocation10 + $0x90] sm:$0xff] }
 0x6a6   :  { %4640 = vst [vmem:[#allocation2 + $0x109] sm:$0xff] %v11616_v29  ;;  %v6412_v61 = vld [vmem:[#allocation10] sm:$0xff]  ;;  %7185 = vmatpush.msrb.mxu0 %v6473_v27  ;;  %v6471_v0 = vld [vmem:[#allocation10 + $0x1d8] sm:$0xff]  ;;  %v6470_v18 = vld [vmem:[#allocation10 + $0x1d0] sm:$0xff] }
 0x6a7   :  { %4641 = vst [vmem:[#allocation2 + $0x111] sm:$0xff] %v11623_v3  ;;  %6571 = vmatpush.msra.mxu1 %v6412_v61  ;;  %6776 = vmatpush.msrb.mxu2 %v6432_v63  ;;  %v6448_v48 = vld [vmem:[#allocation10 + $0x120] sm:$0xff]  ;;  %v6447_v28 = vld [vmem:[#allocation10 + $0x118] sm:$0xff]  ;;  %v11890_v62 = vld [vmem:[#allocation2 + $0x1b0] sm:$0xff] }
 0x6a8   :  { %4642 = vst [vmem:[#allocation2 + $0x121] sm:$0xff] %v11629_v51  ;;  %6984 = vmatpush.msrb.mxu3 %v6449_v17  ;;  %7186 = vmatpush.msrb.mxu0 %v6472_v14  ;;  %v6429_v27 = vld [vmem:[#allocation10 + $0x88] sm:$0xff]  ;;  %v6446_v63 = vld [vmem:[#allocation10 + $0x110] sm:$0xff]  ;;  %v6428_v14 = vld [vmem:[#allocation10 + $0x80] sm:$0xff] }
 0x6a9   :  { %4643 = vst [vmem:[#allocation2 + $0x129] sm:$0xff] %v11635_v43  ;;  %6777 = vmatpush.msrb.mxu2 %v6431_v54  ;;  %6572 = vmatmul.f32.vlgmr.msra.gmra.mxu1 %v11890_v62  ;;  %v6469_v17 = vld [vmem:[#allocation10 + $0x1c8] sm:$0xff] }
 0x6aa   :  { %4644 = vst [vmem:[#allocation2 + $0x139] sm:$0xff] %v11641_v16  ;;  %6985 = vmatpush.msrb.mxu3 %v6448_v48  ;;  %7187 = vmatpush.msrb.mxu0 %v6471_v0  ;;  %v6445_v61 = vld [vmem:[#allocation10 + $0x108] sm:$0xff]  ;;  %v6468_v48 = vld [vmem:[#allocation10 + $0x1c0] sm:$0xff] }
 0x6ab   :  { %4645 = vst [vmem:[#allocation2 + $0x141] sm:$0xff] %v11648_v39  ;;  %6778 = vmatpush.msrb.mxu2 %v6430_v21  ;;  %v4812_v54 = vld [vmem:[#allocation2 + $0x1] sm:$0xff] }
 0x6ac   :  { %4646 = vst [vmem:[#allocation2 + $0x151] sm:$0xff] %v11654_v23  ;;  %6986 = vmatpush.msrb.mxu3 %v6447_v28  ;;  %7188 = vmatpush.msrb.mxu0 %v6470_v18  ;;  %v6444_v0 = vld [vmem:[#allocation10 + $0x100] sm:$0xff]  ;;  %v6491_v28 = vld [vmem:[#allocation10 + $0x278] sm:$0xff] }
 0x6ad   :  { %4647 = vst [vmem:[#allocation2 + $0x159] sm:$0xff] %v11660_v44  ;;  %6779 = vmatpush.msrb.mxu2 %v6429_v27  ;;  %v4940_v21 = vld [vmem:[#allocation2 + $0x2] sm:$0xff]  ;;  %v6467_v18 = vld [vmem:[#allocation10 + $0x1b8] sm:$0xff]  ;;  %7392 = vmatpush.msrb.mxu1 %v6491_v28  ;;  %v6466_v27 = vld [vmem:[#allocation10 + $0x1b0] sm:$0xff] }
 0x6ae   :  { %4648 = vst [vmem:[#allocation2 + $0x169] sm:$0xff] %v11666_v11  ;;  %6987 = vmatpush.msrb.mxu3 %v6446_v63  ;;  %7189 = vmatpush.msrb.mxu0 %v6469_v17  ;;  %v6465_v63 = vld [vmem:[#allocation10 + $0x1a8] sm:$0xff]  ;;  %v4686_v17 = vld [vmem:[#allocation2 + $0x18] sm:$0xff]  ;;  %v14168_v28 = vld [vmem:[#allocation45_spill] sm:$0xff] }
 0x6af   :  { %4649 = vst [vmem:[#allocation2 + $0x171] sm:$0xff] %v11673_v38  ;;  %6780 = vmatpush.msrb.mxu2 %v6428_v14  ;;  %v6463_v14 = vld [vmem:[#allocation10 + $0x198] sm:$0xff] }
 0x6b0   :  { %4650 = vst [vmem:[#allocation2 + $0x181] sm:$0xff] %v11679_v55  ;;  %6988 = vmatpush.msrb.mxu3 %v6445_v61  ;;  %6781 = vmatmul.f32.vlgmr.msrb.gmra.mxu2 %v4812_v54  ;;  %v6490_v55 = vld [vmem:[#allocation10 + $0x270] sm:$0xff]  ;;  %v4951_v61 = vld [vmem:[#allocation2 + $0x82] sm:$0xff]  ;;  %v14167_v54 = vld [vmem:[#allocation34_spill] sm:$0xff] }
 0x6b1   :  { %4651 = vst [vmem:[#allocation2 + $0x189] sm:$0xff] %v11685_v7  ;;  %7190 = vmatpush.msrb.mxu0 %v6468_v48  ;;  %6575 = vmatmul.f32.gmra.mxu1 %v11890_v62  ;;  %v4813_v7 = vld [vmem:[#allocation2 + $0x9] sm:$0xff]  ;;  %v4697_v48 = vld [vmem:[#allocation2 + $0x98] sm:$0xff] }
 0x6b2   :  { %4652 = vst [vmem:[#allocation2 + $0x1c9] sm:$0xff] %v11691_v13  ;;  %6989 = vmatpush.msrb.mxu3 %v6444_v0  ;;  %7393 = vmatpush.msrb.mxu1 %v6490_v55  ;;  %v6464_v13 = vld [vmem:[#allocation10 + $0x1a0] sm:$0xff]  ;;  %v4952_v0 = vld [vmem:[#allocation2 + $0x92] sm:$0xff] }
 0x6b3   :  { %4653 = vst [vmem:[#allocation2 + $0x1d1] sm:$0xff] %v11698_v47  ;;  %6990 = vmatmul.f32.vlgmr.msrb.gmra.mxu3 %v4940_v21  ;;  %7191 = vmatpush.msrb.mxu0 %v6467_v18  ;;  %v4941_v47 = vld [vmem:[#allocation2 + $0xa] sm:$0xff]  ;;  %v6487_v21 = vld [vmem:[#allocation10 + $0x258] sm:$0xff] }
 0x6b4   :  { %4654 = vst [vmem:[#allocation2 + $0x1e1] sm:$0xff] %v11704_v26  ;;  %v6462_v26 = vld [vmem:[#allocation10 + $0x190] sm:$0xff]  ;;  %v4698_v18 = vld [vmem:[#allocation2 + $0xa8] sm:$0xff] }
 0x6b5   :  { %4655 = vst [vmem:[#allocation2 + $0x1e9] sm:$0xff] %v11710_v8  ;;  %7192 = vmatpush.msrb.mxu0 %v6466_v27  ;;  %v6460_v8 = vld [vmem:[#allocation10 + $0x180] sm:$0xff]  ;;  %v4699_v55 = vld [vmem:[#allocation2 + $0xb0] sm:$0xff] }
 0x6b6   :  { %4656 = vst [vmem:[#allocation2 + $0x1f9] sm:$0xff] %v11716_v37  ;;  %v6461_v37 = vld [vmem:[#allocation10 + $0x188] sm:$0xff]  ;;  %v4953_v27 = vld [vmem:[#allocation2 + $0x9a] sm:$0xff] }
 0x6b7   :  { %4657 = vst [vmem:[#allocation2 + $0x201] sm:$0xff] %v11723_v31  ;;  %7193 = vmatpush.msrb.mxu0 %v6465_v63  ;;  %v4942_v31 = vld [vmem:[#allocation2 + $0x1a] sm:$0xff]  ;;  %v4954_v63 = vld [vmem:[#allocation2 + $0xaa] sm:$0xff] }
 0x6b8   :  { %4658 = vst [vmem:[#allocation2 + $0x211] sm:$0xff] %v11729_v56  ;;  %6784 = vmatmul.f32.gmra.mxu2 %v4813_v7  ;;  %v4687_v56 = vld [vmem:[#allocation2 + $0x20] sm:$0xff] }
 0x6b9   :  { %4659 = vst [vmem:[#allocation2 + $0x219] sm:$0xff] %v11735_v40  ;;  %7194 = vmatpush.msrb.mxu0 %v6464_v13  ;;  %6578 = vmatmul.f32.gmra.mxu1 %v4686_v17  ;;  %v4688_v40 = vld [vmem:[#allocation2 + $0x30] sm:$0xff] }
 0x6ba   :  { %4660 = vst [vmem:[#allocation2 + $0x229] sm:$0xff] %v11741_v10  ;;  %v14160_v10 = vld [vmem:[#allocation74_spill] sm:$0xff]  ;;  %v14170_v13 = vld [vmem:[#allocation69_spill] sm:$0xff] }
 0x6bb   :  { %4661 = vst [vmem:[#allocation2 + $0x231] sm:$0xff] %v11748_v19  ;;  %6993 = vmatmul.f32.gmra.mxu3 %v4941_v47  ;;  %7195 = vmatpush.msrb.mxu0 %v6463_v14  ;;  %v4943_v19 = vld [vmem:[#allocation2 + $0x22] sm:$0xff]  ;;  %v4955_v47 = vld [vmem:[#allocation2 + $0xb2] sm:$0xff] }
 0x6bc   :  { %4662 = vst [vmem:[#allocation2 + $0x241] sm:$0xff] %v11754_v22  ;;  %v6489_v22 = vld [vmem:[#allocation10 + $0x268] sm:$0xff] }
 0x6bd   :  { %4663 = vst [vmem:[#allocation2 + $0x249] sm:$0xff] %v11760_v5  ;;  %7196 = vmatpush.msrb.mxu0 %v6462_v26  ;;  %7394 = vmatpush.msrb.mxu1 %v6489_v22  ;;  %v14161_v5 = vld [vmem:[#allocation76_spill] sm:$0xff] }
 0x6be   :  { %4664 = vst [vmem:[#allocation2 + $0x259] sm:$0xff] %v11766_v35  ;;  %v4690_v35 = vld [vmem:[#allocation2 + $0x48] sm:$0xff] }
 0x6bf   :  { %4665 = vst [vmem:[#allocation2 + $0x261] sm:$0xff] %v11773_v46  ;;  %7197 = vmatpush.msrb.mxu0 %v6461_v37  ;;  %v4945_v46 = vld [vmem:[#allocation2 + $0x3a] sm:$0xff]  ;;  %v4701_v26 = vld [vmem:[#allocation2 + $0xc8] sm:$0xff] }
 0x6c0   :  { %4666 = vst [vmem:[#allocation2 + $0x271] sm:$0xff] %v11779_v50  ;;  %6787 = vmatmul.f32.gmra.mxu2 %v14160_v10  ;;  %v4691_v50 = vld [vmem:[#allocation2 + $0x50] sm:$0xff]  ;;  %v4956_v37 = vld [vmem:[#allocation2 + $0xc2] sm:$0xff] }
 0x6c1   :  { %4667 = vst [vmem:[#allocation2 + $0x279] sm:$0xff] %v11785_v20  ;;  %7198 = vmatpush.msrb.mxu0 %v6460_v8  ;;  %6581 = vmatmul.f32.gmra.mxu1 %v4687_v56  ;;  %v4946_v20 = vld [vmem:[#allocation2 + $0x4a] sm:$0xff] }
 0x6c2   :  { %4668 = vst [vmem:[#allocation2 + $0x289] sm:$0xff] %v11791_v57  ;;  %7199 = vmatmul.f32.vlgmr.msrb.gmra.mxu0 %v4686_v17  ;;  %v4692_v57 = vld [vmem:[#allocation2 + $0x60] sm:$0xff]  ;;  %v6486_v10 = vld [vmem:[#allocation10 + $0x250] sm:$0xff] }
 0x6c3   :  { %4669 = vst [vmem:[#allocation2 + $0x291] sm:$0xff] %v11798_v58  ;;  %6996 = vmatmul.f32.gmra.mxu3 %v4942_v31  ;;  %v4947_v58 = vld [vmem:[#allocation2 + $0x52] sm:$0xff]  ;;  %v4700_v17 = vld [vmem:[#allocation2 + $0xc0] sm:$0xff] }
 0x6c4   :  { %4670 = vst [vmem:[#allocation2 + $0x2a1] sm:$0xff] %v11804_v34  ;;  %v14164_v34 = vld [vmem:[#allocation39_spill] sm:$0xff] }
 0x6c5   :  { %4671 = vst [vmem:[#allocation2 + $0x2a9] sm:$0xff] %v11810_v42  ;;  %v4693_v42 = vld [vmem:[#allocation2 + $0x68] sm:$0xff] }
 0x6c6   :  { %4672 = vst [vmem:[#allocation2 + $0x2b9] sm:$0xff] %v11816_v30  ;;  %v4948_v30 = vld [vmem:[#allocation2 + $0x62] sm:$0xff] }
 0x6c7   :  { %4673 = vst [vmem:[#allocation2 + $0x2c1] sm:$0xff] %v11823_v12  ;;  %v6488_v12 = vld [vmem:[#allocation10 + $0x260] sm:$0xff] }
 0x6c8   :  { %4674 = vst [vmem:[#allocation2 + $0x2d1] sm:$0xff] %v11829_v2  ;;  %6790 = vmatmul.f32.gmra.mxu2 %v11484_v41  ;;  %v4689_v41 = vld [vmem:[#allocation2 + $0x38] sm:$0xff]  ;;  %7395 = vmatpush.msrb.mxu1 %v6488_v12  ;;  %v14165_v2 = vld [vmem:[#allocation79_spill] sm:$0xff] }
 0x6c9   :  { %4675 = vst [vmem:[#allocation2 + $0x2d9] sm:$0xff] %v11835_v36  ;;  %6584 = vmatmul.f32.gmra.mxu1 %v4688_v40  ;;  %v4694_v36 = vld [vmem:[#allocation2 + $0x78] sm:$0xff]  ;;  %v4959_v12 = vld [vmem:[#allocation2 + $0xe2] sm:$0xff] }
 0x6ca   :  { %4676 = vst [vmem:[#allocation2 + $0x2e9] sm:$0xff] %v11841_v32  ;;  %7202 = vmatmul.f32.gmra.mxu0 %v4687_v56  ;;  %v4944_v32 = vld [vmem:[#allocation2 + $0x32] sm:$0xff]  ;;  %7396 = vmatpush.msrb.mxu1 %v6487_v21 }
 0x6cb   :  { %4677 = vst [vmem:[#allocation2 + $0x2f1] sm:$0xff] %v11848_v53  ;;  %6999 = vmatmul.f32.gmra.mxu3 %v4943_v19  ;;  %v4949_v53 = vld [vmem:[#allocation2 + $0x6a] sm:$0xff] }
 0x6cc   :  { %4678 = vst [vmem:[#allocation2 + $0x301] sm:$0xff] %v11854_v45  ;;  %v14166_v45 = vld [vmem:[#allocation80_spill] sm:$0xff]  ;;  %7397 = vmatpush.msrb.mxu1 %v6486_v10 }
 0x6cd   :  { %4679 = vst [vmem:[#allocation2 + $0x309] sm:$0xff] %v11860_v59  ;;  %v4695_v59 = vld [vmem:[#allocation2 + $0x80] sm:$0xff] }
 0x6ce   :  { %4680 = vst [vmem:[#allocation2 + $0x319] sm:$0xff] %v11866_v15  ;;  %v14162_v15 = vld [vmem:[#allocation77_spill] sm:$0xff] }
 0x6cf   :  { %4681 = vst [vmem:[#allocation2 + $0x321] sm:$0xff] %v11873_v25  ;;  %v4950_v25 = vld [vmem:[#allocation2 + $0x7a] sm:$0xff] }
 0x6d0   :  { %4682 = vst [vmem:[#allocation2 + $0x331] sm:$0xff] %v11879_v4  ;;  %6793 = vmatmul.f32.gmra.mxu2 %v11490_v52  ;;  %v14163_v52 = vld [vmem:[#allocation78_spill] sm:$0xff]  ;;  %v4696_v4 = vld [vmem:[#allocation2 + $0x90] sm:$0xff] }
 0x6d1   :  { %6587 = vmatmul.f32.gmra.mxu1 %v4689_v41 }
 0x6d2   :  { %7205 = vmatmul.f32.gmra.mxu0 %v4688_v40 }
 0x6d3   :  { %7002 = vmatmul.f32.gmra.mxu3 %v4944_v32  ;;  %v4957_v32 = vld [vmem:[#allocation2 + $0xca] sm:$0xff] }
 0x6d8   :  { %6796 = vmatmul.f32.gmra.mxu2 %v14161_v5 }
 0x6d9   :  { %6590 = vmatmul.f32.gmra.mxu1 %v4690_v35 }
 0x6da   :  { %7208 = vmatmul.f32.gmra.mxu0 %v4689_v41  ;;  %v4702_v41 = vld [vmem:[#allocation2 + $0xd8] sm:$0xff] }
 0x6db   :  { %7005 = vmatmul.f32.gmra.mxu3 %v4945_v46 }
 0x6e0   :  { %6799 = vmatmul.f32.gmra.mxu2 %v14162_v15 }
 0x6e1   :  { %6593 = vmatmul.f32.gmra.mxu1 %v4691_v50 }
 0x6e2   :  { %7211 = vmatmul.f32.gmra.mxu0 %v4690_v35 }
 0x6e3   :  { %7008 = vmatmul.f32.gmra.mxu3 %v4946_v20  ;;  %v4958_v20 = vld [vmem:[#allocation2 + $0xda] sm:$0xff] }
 0x6e8   :  { %6802 = vmatmul.f32.gmra.mxu2 %v14163_v52 }
 0x6e9   :  { %6596 = vmatmul.f32.gmra.mxu1 %v4692_v57 }
 0x6ea   :  { %7214 = vmatmul.f32.gmra.mxu0 %v4691_v50  ;;  %v4703_v50 = vld [vmem:[#allocation2 + $0xe0] sm:$0xff] }
 0x6eb   :  { %7011 = vmatmul.f32.gmra.mxu3 %v4947_v58 }
 0x6f0   :  { %6805 = vmatmul.f32.gmra.mxu2 %v14164_v34 }
 0x6f1   :  { %6599 = vmatmul.f32.gmra.mxu1 %v4693_v42 }
 0x6f2   :  { %7217 = vmatmul.f32.gmra.mxu0 %v4692_v57 }
 0x6f3   :  { %7014 = vmatmul.f32.gmra.mxu3 %v4948_v30  ;;  %v4704_v30 = vld [vmem:[#allocation2 + $0xf0] sm:$0xff] }
 0x6f8   :  { %6808 = vmatmul.f32.gmra.mxu2 %v14165_v2 }
 0x6f9   :  { %6602 = vmatmul.f32.gmra.mxu1 %v4694_v36 }
 0x6fa   :  { %7220 = vmatmul.f32.gmra.mxu0 %v4693_v42 }
 0x6fb   :  { %7017 = vmatmul.f32.gmra.mxu3 %v4949_v53 }
 0x700   :  { %6811 = vmatmul.f32.gmra.mxu2 %v14166_v45 }
 0x701   :  { %6605 = vmatmul.f32.gmra.mxu1 %v4695_v59 }
 0x702   :  { %7223 = vmatmul.f32.gmra.mxu0 %v4694_v36 }
 0x703   :  { %7020 = vmatmul.f32.gmra.mxu3 %v4950_v25  ;;  %v4705_v25 = vld [vmem:[#allocation2 + $0xf8] sm:$0xff] }
 0x708   :  { %6814 = vmatmul.f32.gmra.mxu2 %v11542_v60  ;;  %v14169_v60 = vld [vmem:[#allocation48_spill] sm:$0xff] }
 0x709   :  { %6608 = vmatmul.f32.gmra.mxu1 %v4696_v4 }
 0x70a   :  { %7226 = vmatmul.f32.gmra.mxu0 %v4695_v59 }
 0x70b   :  { %7023 = vmatmul.f32.gmra.mxu3 %v4951_v61  ;;  %v6485_v61 = vld [vmem:[#allocation10 + $0x248] sm:$0xff] }
 0x70c   :  { %7398 = vmatpush.msrb.mxu1 %v6485_v61 }
 0x710   :  { %6817 = vmatmul.f32.gmra.mxu2 %v14167_v54 }
 0x711   :  { %6611 = vmatmul.f32.gmra.mxu1 %v4697_v48 }
 0x712   :  { %7229 = vmatmul.f32.gmra.mxu0 %v4696_v4  ;;  %v4960_v4 = vld [vmem:[#allocation2 + $0xf2] sm:$0xff] }
 0x713   :  { %7026 = vmatmul.f32.gmra.mxu3 %v4952_v0 }
 0x718   :  { %6820 = vmatmul.f32.gmra.mxu2 %v14168_v28 }
 0x719   :  { %6614 = vmatmul.f32.gmra.mxu1 %v4698_v18 }
 0x71a   :  { %7232 = vmatmul.f32.gmra.mxu0 %v4697_v48 }
 0x71b   :  { %7029 = vmatmul.f32.gmra.mxu3 %v4953_v27  ;;  %v4961_v27 = vld [vmem:[#allocation2 + $0xfa] sm:$0xff] }
 0x720   :  { %6823 = vmatmul.f32.gmra.mxu2 %v14169_v60 }
 0x721   :  { %6617 = vmatmul.f32.gmra.mxu1 %v4699_v55 }
 0x722   :  { %7235 = vmatmul.f32.gmra.mxu0 %v4698_v18  ;;  %v4706_v18 = vld [vmem:[#allocation2 + $0x108] sm:$0xff] }
 0x723   :  { %7032 = vmatmul.f32.gmra.mxu3 %v4954_v63 }
 0x726   :  { %v6573_v7 = vpop.f32.mrf.mxu1 }
 0x728   :  { %6826 = vmatmul.f32.gmra.mxu2 %v14170_v13 }
 0x729   :  { %6620 = vmatmul.f32.gmra.mxu1 %v4700_v17 }
 0x72a   :  { %7238 = vmatmul.f32.gmra.mxu0 %v4699_v55 }
 0x72b   :  { %7035 = vmatmul.f32.gmra.mxu3 %v4955_v47  ;;  %v4962_v47 = vld [vmem:[#allocation2 + $0x10a] sm:$0xff] }
 0x72e   :  { %v6576_v14 = vpop.f32.mrf.mxu1 }
 0x730   :  { %6829 = vmatmul.f32.gmra.mxu2 %v11577_v24 }
 0x731   :  { %6623 = vmatmul.f32.gmra.mxu1 %v4701_v26 }
 0x732   :  { %7241 = vmatmul.f32.gmra.mxu0 %v4700_v17  ;;  %v4707_v17 = vld [vmem:[#allocation2 + $0x110] sm:$0xff] }
 0x733   :  { %v6782_v8 = vpop.f32.mrf.mxu2  ;;  %7038 = vmatmul.f32.gmra.mxu3 %v4956_v37 }
 0x734   :  { %v6783_v31 = vadd.f32 %v6782_v8, %v6573_v7 }
 0x736   :  { %v6991_v56 = vpop.f32.mrf.mxu3  ;;  %v6579_v19 = vpop.f32.mrf.mxu1 }
 0x737   :  { %v11948_v40 = vadd.f32 %v6991_v56, %v6783_v31  ;;  %v4708_v31 = vld [vmem:[#allocation2 + $0x120] sm:$0xff]  ;;  %v4963_v56 = vld [vmem:[#allocation2 + $0x112] sm:$0xff] }
 0x738   :  { %6832 = vmatmul.f32.gmra.mxu2 %v11583_v6 }
 0x739   :  { %6626 = vmatmul.f32.gmra.mxu1 %v4702_v41 }
 0x73a   :  { %7244 = vmatmul.f32.gmra.mxu0 %v4701_v26 }
 0x73b   :  { %v6785_v24 = vpop.f32.mrf.mxu2  ;;  %7041 = vmatmul.f32.gmra.mxu3 %v4957_v32 }
 0x73c   :  { %v6786_v22 = vadd.f32 %v6785_v24, %v6576_v14 }
 0x73e   :  { %v6994_v5 = vpop.f32.mrf.mxu3  ;;  %v6582_v15 = vpop.f32.mrf.mxu1 }
 0x73f   :  { %v11951_v35 = vadd.f32 %v6994_v5, %v6786_v22  ;;  %v11953_v46 = vpop.f32.mrf.mxu0  ;;  %v4709_v5 = vld [vmem:[#allocation2 + $0x128] sm:$0xff] }
 0x740   :  { %6835 = vmatmul.f32.gmra.mxu2 %v11589_v1 }
 0x741   :  { %6629 = vmatmul.f32.gmra.mxu1 %v4703_v50 }
 0x742   :  { %7247 = vmatmul.f32.gmra.mxu0 %v4702_v41 }
 0x743   :  { %7044 = vmatmul.f32.gmra.mxu3 %v4958_v20  ;;  %v6788_v6 = vpop.f32.mrf.mxu2 }
 0x744   :  { %v6789_v52 = vadd.f32 %v6788_v6, %v6579_v19 }
 0x746   :  { %v6997_v57 = vpop.f32.mrf.mxu3  ;;  %v6585_v42 = vpop.f32.mrf.mxu1 }
 0x747   :  { %v11956_v58 = vadd.f32 %v6997_v57, %v6789_v52  ;;  %v11958_v34 = vpop.f32.mrf.mxu0 }
 0x748   :  { %6838 = vmatmul.f32.gmra.mxu2 %v11598_v33 }
 0x749   :  { %6632 = vmatmul.f32.gmra.mxu1 %v4704_v30 }
 0x74a   :  { %7250 = vmatmul.f32.gmra.mxu0 %v4703_v50  ;;  %v6484_v50 = vld [vmem:[#allocation10 + $0x240] sm:$0xff] }
 0x74b   :  { %7047 = vmatmul.f32.gmra.mxu3 %v4959_v12  ;;  %v6791_v1 = vpop.f32.mrf.mxu2  ;;  %7399 = vmatpush.msrb.mxu1 %v6484_v50  ;;  %v4965_v12 = vld [vmem:[#allocation2 + $0x12a] sm:$0xff] }
 0x74c   :  { %v6792_v2 = vadd.f32 %v6791_v1, %v6582_v15  ;;  %v4964_v15 = vld [vmem:[#allocation2 + $0x122] sm:$0xff] }
 0x74e   :  { %v7000_v36 = vpop.f32.mrf.mxu3  ;;  %v6588_v59 = vpop.f32.mrf.mxu1 }
 0x74f   :  { %v11961_v53 = vadd.f32 %v7000_v36, %v6792_v2  ;;  %v11963_v45 = vpop.f32.mrf.mxu0 }
 0x750   :  { %6841 = vmatmul.f32.gmra.mxu2 %v11604_v49 }
 0x751   :  { %6635 = vmatmul.f32.gmra.mxu1 %v4705_v25 }
 0x752   :  { %7253 = vmatmul.f32.gmra.mxu0 %v4704_v30  ;;  %v4710_v30 = vld [vmem:[#allocation2 + $0x138] sm:$0xff] }
 0x753   :  { %7050 = vmatmul.f32.gmra.mxu3 %v4960_v4  ;;  %v6794_v33 = vpop.f32.mrf.mxu2  ;;  %v4711_v4 = vld [vmem:[#allocation2 + $0x140] sm:$0xff] }
 0x754   :  { %v6795_v54 = vadd.f32 %v6794_v33, %v6585_v42  ;;  %v4966_v33 = vld [vmem:[#allocation2 + $0x13a] sm:$0xff] }
 0x756   :  { %v7003_v48 = vpop.f32.mrf.mxu3  ;;  %v6591_v28 = vpop.f32.mrf.mxu1 }
 0x757   :  { %v11966_v0 = vadd.f32 %v7003_v48, %v6795_v54  ;;  %v11968_v21 = vpop.f32.mrf.mxu0 }
 0x758   :  { %6844 = vmatmul.f32.gmra.mxu2 %v11610_v9 }
 0x759   :  { %6638 = vmatmul.f32.gmra.mxu1 %v4706_v18 }
 0x75a   :  { %7256 = vmatmul.f32.gmra.mxu0 %v4705_v25 }
 0x75b   :  { %7053 = vmatmul.f32.gmra.mxu3 %v4961_v27  ;;  %v6797_v49 = vpop.f32.mrf.mxu2  ;;  %v4712_v27 = vld [vmem:[#allocation2 + $0x150] sm:$0xff] }
 0x75c   :  { %v6798_v60 = vadd.f32 %v6797_v49, %v6588_v59  ;;  %v4967_v49 = vld [vmem:[#allocation2 + $0x142] sm:$0xff] }
 0x75e   :  { %v7006_v55 = vpop.f32.mrf.mxu3  ;;  %v6594_v13 = vpop.f32.mrf.mxu1 }
 0x75f   :  { %v11971_v63 = vadd.f32 %v7006_v55, %v6798_v60  ;;  %v11973_v7 = vpop.f32.mrf.mxu0 }
 0x760   :  { %6847 = vmatmul.f32.gmra.mxu2 %v11616_v29 }
 0x761   :  { %6641 = vmatmul.f32.gmra.mxu1 %v4707_v17 }
 0x762   :  { %7259 = vmatmul.f32.gmra.mxu0 %v4706_v18 }
 0x763   :  { %7056 = vmatmul.f32.gmra.mxu3 %v4962_v47  ;;  %v6800_v9 = vpop.f32.mrf.mxu2 }
 0x764   :  { %v6801_v14 = vadd.f32 %v6800_v9, %v6591_v28  ;;  %v4713_v9 = vld [vmem:[#allocation2 + $0x158] sm:$0xff] }
 0x766   :  { %v7009_v26 = vpop.f32.mrf.mxu3  ;;  %v6597_v10 = vpop.f32.mrf.mxu1 }
 0x767   :  { %v11976_v37 = vadd.f32 %v7009_v26, %v6801_v14  ;;  %v11978_v8 = vpop.f32.mrf.mxu0  ;;  %v4968_v14 = vld [vmem:[#allocation2 + $0x152] sm:$0xff] }
 0x768   :  { %6850 = vmatmul.f32.gmra.mxu2 %v11623_v3  ;;  %v6483_v26 = vld [vmem:[#allocation10 + $0x238] sm:$0xff] }
 0x769   :  { %6644 = vmatmul.f32.gmra.mxu1 %v4708_v31 }
 0x76a   :  { %7262 = vmatmul.f32.gmra.mxu0 %v4707_v17  ;;  %7400 = vmatpush.msrb.mxu1 %v6483_v26  ;;  %v4973_v26 = vld [vmem:[#allocation2 + $0x1ba] sm:$0xff] }
 0x76b   :  { %7059 = vmatmul.f32.gmra.mxu3 %v4963_v56  ;;  %v6803_v29 = vpop.f32.mrf.mxu2 }
 0x76c   :  { %v6804_v19 = vadd.f32 %v6803_v29, %v6594_v13 }
 0x76e   :  { %v7012_v41 = vpop.f32.mrf.mxu3  ;;  %v6600_v22 = vpop.f32.mrf.mxu1 }
 0x76f   :  { %v11981_v32 = vadd.f32 %v7012_v41, %v6804_v19  ;;  %v11983_v24 = vpop.f32.mrf.mxu0  ;;  %v4714_v41 = vld [vmem:[#allocation2 + $0x168] sm:$0xff] }
 0x770   :  { %6853 = vmatmul.f32.gmra.mxu2 %v11629_v51 }
 0x771   :  { %6647 = vmatmul.f32.gmra.mxu1 %v4709_v5 }
 0x772   :  { %7265 = vmatmul.f32.gmra.mxu0 %v4708_v31 }
 0x773   :  { %7062 = vmatmul.f32.gmra.mxu3 %v4964_v15  ;;  %v6806_v3 = vpop.f32.mrf.mxu2 }
 0x774   :  { %v6807_v20 = vadd.f32 %v6806_v3, %v6597_v10 }
 0x776   :  { %v7015_v6 = vpop.f32.mrf.mxu3  ;;  %v6603_v42 = vpop.f32.mrf.mxu1 }
 0x777   :  { %v11986_v52 = vadd.f32 %v7015_v6, %v6807_v20  ;;  %v11988_v57 = vpop.f32.mrf.mxu0  ;;  %v4715_v6 = vld [vmem:[#allocation2 + $0x170] sm:$0xff] }
 0x778   :  { %6856 = vmatmul.f32.gmra.mxu2 %v11635_v43 }
 0x779   :  { %6650 = vmatmul.f32.gmra.mxu1 %v4710_v30 }
 0x77a   :  { %7268 = vmatmul.f32.gmra.mxu0 %v4709_v5 }
 0x77b   :  { %7065 = vmatmul.f32.gmra.mxu3 %v4965_v12  ;;  %v6809_v51 = vpop.f32.mrf.mxu2 }
 0x77c   :  { %v6810_v1 = vadd.f32 %v6809_v51, %v6600_v22  ;;  %v4969_v22 = vld [vmem:[#allocation2 + $0x15a] sm:$0xff] }
 0x77e   :  { %v7018_v2 = vpop.f32.mrf.mxu3  ;;  %v6606_v25 = vpop.f32.mrf.mxu1 }
 0x77f   :  { %v11991_v36 = vadd.f32 %v7018_v2, %v6810_v1  ;;  %v11993_v59 = vpop.f32.mrf.mxu0 }
 0x780   :  { %6859 = vmatmul.f32.gmra.mxu2 %v11641_v16 }
 0x781   :  { %6653 = vmatmul.f32.gmra.mxu1 %v4711_v4 }
 0x782   :  { %7271 = vmatmul.f32.gmra.mxu0 %v4710_v30 }
 0x783   :  { %7068 = vmatmul.f32.gmra.mxu3 %v4966_v33  ;;  %v6812_v43 = vpop.f32.mrf.mxu2  ;;  %v4844_v33 = vld [vmem:[#allocation2 + $0x1b1] sm:$0xff] }
 0x784   :  { %v6813_v61 = vadd.f32 %v6812_v43, %v6603_v42  ;;  %v4970_v42 = vld [vmem:[#allocation2 + $0x16a] sm:$0xff] }
 0x786   :  { %v7021_v54 = vpop.f32.mrf.mxu3  ;;  %v6609_v18 = vpop.f32.mrf.mxu1 }
 0x787   :  { %v11996_v48 = vadd.f32 %v7021_v54, %v6813_v61  ;;  %v11998_v28 = vpop.f32.mrf.mxu0 }
 0x788   :  { %6862 = vmatmul.f32.gmra.mxu2 %v11648_v39 }
 0x789   :  { %6656 = vmatmul.f32.gmra.mxu1 %v4712_v27 }
 0x78a   :  { %7274 = vmatmul.f32.gmra.mxu0 %v4711_v4 }
 0x78b   :  { %7071 = vmatmul.f32.gmra.mxu3 %v4967_v49  ;;  %v6815_v16 = vpop.f32.mrf.mxu2  ;;  %v5098_v49 = vld [vmem:[#allocation2 + $0x180] sm:$0xff] }
 0x78c   :  { %v6816_v60 = vadd.f32 %v6815_v16, %v6606_v25  ;;  %v4971_v25 = vld [vmem:[#allocation2 + $0x172] sm:$0xff] }
 0x78d   :  { %v6482_v16 = vld [vmem:[#allocation10 + $0x230] sm:$0xff] }
 0x78e   :  { %v7024_v55 = vpop.f32.mrf.mxu3  ;;  %v6612_v47 = vpop.f32.mrf.mxu1  ;;  %7401 = vmatpush.msrb.mxu1 %v6482_v16  ;;  %v4848_v16 = vld [vmem:[#allocation2 + $0x1e1] sm:$0xff] }
 0x78f   :  { %v12001_v13 = vadd.f32 %v7024_v55, %v6816_v60  ;;  %v12003_v17 = vpop.f32.mrf.mxu0  ;;  %v4845_v55 = vld [vmem:[#allocation2 + $0x1b9] sm:$0xff] }
 0x790   :  { %6865 = vmatmul.f32.gmra.mxu2 %v11654_v23 }
 0x791   :  { %6659 = vmatmul.f32.gmra.mxu1 %v4713_v9 }
 0x792   :  { %7277 = vmatmul.f32.gmra.mxu0 %v4712_v27  ;;  %v4972_v27 = vld [vmem:[#allocation2 + $0x1b2] sm:$0xff] }
 0x793   :  { %7074 = vmatmul.f32.gmra.mxu3 %v4968_v14  ;;  %v6818_v39 = vpop.f32.mrf.mxu2 }
 0x794   :  { %v6819_v10 = vadd.f32 %v6818_v39, %v6609_v18 }
 0x796   :  { %v7027_v31 = vpop.f32.mrf.mxu3  ;;  %v6615_v19 = vpop.f32.mrf.mxu1 }
 0x797   :  { %v12006_v56 = vadd.f32 %v7027_v31, %v6819_v10  ;;  %v12008_v29 = vpop.f32.mrf.mxu0  ;;  %v5099_v10 = vld [vmem:[#allocation2 + $0x188] sm:$0xff] }
 0x798   :  { %6868 = vmatmul.f32.gmra.mxu2 %v11660_v44  ;;  %v4718_v31 = vld [vmem:[#allocation2 + $0x1c8] sm:$0xff] }
 0x799   :  { %6662 = vmatmul.f32.gmra.mxu1 %v4714_v41 }
 0x79a   :  { %7280 = vmatmul.f32.gmra.mxu0 %v4713_v9 }
 0x79b   :  { %7077 = vmatmul.f32.gmra.mxu3 %v4969_v22  ;;  %v6821_v23 = vpop.f32.mrf.mxu2 }
 0x79c   :  { %v6822_v5 = vadd.f32 %v6821_v23, %v6612_v47 }
 0x79e   :  { %v7030_v15 = vpop.f32.mrf.mxu3  ;;  %v6618_v20 = vpop.f32.mrf.mxu1 }
 0x79f   :  { %v12011_v3 = vadd.f32 %v7030_v15, %v6822_v5  ;;  %v12013_v50 = vpop.f32.mrf.mxu0  ;;  %v4846_v5 = vld [vmem:[#allocation2 + $0x1c9] sm:$0xff] }
 0x7a0   :  { %6871 = vmatmul.f32.gmra.mxu2 %v11666_v11 }
 0x7a1   :  { %6665 = vmatmul.f32.gmra.mxu1 %v4715_v6 }
 0x7a2   :  { %7283 = vmatmul.f32.gmra.mxu0 %v4714_v41 }
 0x7a3   :  { %7080 = vmatmul.f32.gmra.mxu3 %v4970_v42  ;;  %v6824_v44 = vpop.f32.mrf.mxu2 }
 0x7a4   :  { %v6825_v30 = vadd.f32 %v6824_v44, %v6615_v19 }
 0x7a6   :  { %v7033_v12 = vpop.f32.mrf.mxu3  ;;  %v6621_v2 = vpop.f32.mrf.mxu1 }
 0x7a7   :  { %v12016_v51 = vadd.f32 %v7033_v12, %v6825_v30  ;;  %v12018_v1 = vpop.f32.mrf.mxu0 }
 0x7a8   :  { %6874 = vmatmul.f32.gmra.mxu2 %v11673_v38 }
 0x7a9   :  { %6668 = vmatmul.f32.gmra.mxu1 %v11890_v62 }
 0x7aa   :  { %7286 = vmatmul.f32.gmra.mxu0 %v4715_v6  ;;  %v4974_v6 = vld [vmem:[#allocation2 + $0x1ca] sm:$0xff] }
 0x7ab   :  { %7083 = vmatmul.f32.gmra.mxu3 %v4971_v25  ;;  %v6827_v11 = vpop.f32.mrf.mxu2  ;;  %v4847_v25 = vld [vmem:[#allocation2 + $0x1d1] sm:$0xff] }
 0x7ac   :  { %v6828_v4 = vadd.f32 %v6827_v11, %v6618_v20  ;;  %v4719_v20 = vld [vmem:[#allocation2 + $0x1d0] sm:$0xff] }
 0x7ae   :  { %v7036_v43 = vpop.f32.mrf.mxu3  ;;  %v6624_v18 = vpop.f32.mrf.mxu1 }
 0x7af   :  { %v12022_v61 = vadd.f32 %v7036_v43, %v6828_v4  ;;  %v12024_v54 = vpop.f32.mrf.mxu0  ;;  %v4720_v4 = vld [vmem:[#allocation2 + $0x1e0] sm:$0xff] }
 0x7b0   :  { %6877 = vmatmul.f32.gmra.mxu2 %v4844_v33  ;;  %v4975_v33 = vld [vmem:[#allocation2 + $0x1d2] sm:$0xff] }
 0x7b1   :  { %6671 = vmatmul.f32.gmra.mxu1 %v11890_v62 }
 0x7b2   :  { %7289 = vmatmul.f32.gmra.mxu0 %v5098_v49 }
 0x7b3   :  { %7086 = vmatmul.f32.gmra.mxu3 %v4972_v27  ;;  %v6830_v38 = vpop.f32.mrf.mxu2 }
 0x7b4   :  { %v6831_v60 = vadd.f32 %v6830_v38, %v6621_v2 }
 0x7b6   :  { %v7039_v47 = vpop.f32.mrf.mxu3  ;;  %v6627_v39 = vpop.f32.mrf.mxu1 }
 0x7b7   :  { %v12027_v9 = vadd.f32 %v7039_v47, %v6831_v60  ;;  %v12029_v14 = vpop.f32.mrf.mxu0  ;;  %v4976_v47 = vld [vmem:[#allocation2 + $0x1e2] sm:$0xff] }
 0x7b8   :  { %6880 = vmatmul.f32.gmra.mxu2 %v4845_v55  ;;  %v4721_v55 = vld [vmem:[#allocation2 + $0x1e8] sm:$0xff] }
 0x7b9   :  { %6674 = vmatmul.f32.gmra.mxu1 %v4718_v31 }
 0x7ba   :  { %7292 = vmatmul.f32.gmra.mxu0 %v5099_v10 }
 0x7bb   :  { %7089 = vmatmul.f32.gmra.mxu3 %v4973_v26  ;;  %v6833_v62 = vpop.f32.mrf.mxu2  ;;  %v6481_v26 = vld [vmem:[#allocation10 + $0x228] sm:$0xff] }
 0x7bc   :  { %v6834_v19 = vadd.f32 %v6833_v62, %v6624_v18  ;;  %7402 = vmatpush.msrb.mxu1 %v6481_v26  ;;  %v4724_v26 = vld [vmem:[#allocation2 + $0x210] sm:$0xff] }
 0x7be   :  { %v7042_v41 = vpop.f32.mrf.mxu3  ;;  %v6630_v15 = vpop.f32.mrf.mxu1 }
 0x7bf   :  { %v12031_v22 = vadd.f32 %v7042_v41, %v6834_v19  ;;  %v12033_v23 = vpop.f32.mrf.mxu0  ;;  %v4849_v41 = vld [vmem:[#allocation2 + $0x1e9] sm:$0xff] }
 0x7c0   :  { %6883 = vmatmul.f32.gmra.mxu2 %v4846_v5 }
 0x7c1   :  { %6677 = vmatmul.f32.gmra.mxu1 %v4719_v20 }
 0x7c2   :  { %7295 = vmatmul.f32.gmra.mxu0 %v4718_v31 }
 0x7c3   :  { %7092 = vmatmul.f32.gmra.mxu3 %v4974_v6  ;;  %v6836_v42 = vpop.f32.mrf.mxu2 }
 0x7c4   :  { %v6837_v44 = vadd.f32 %v6836_v42, %v6627_v39 }
 0x7c6   :  { %v7045_v30 = vpop.f32.mrf.mxu3  ;;  %v6633_v11 = vpop.f32.mrf.mxu1 }
 0x7c7   :  { %v12035_v12 = vadd.f32 %v7045_v30, %v6837_v44  ;;  %v12037_v2 = vpop.f32.mrf.mxu0 }
 0x7c8   :  { %6886 = vmatmul.f32.gmra.mxu2 %v4847_v25 }
 0x7c9   :  { %6680 = vmatmul.f32.gmra.mxu1 %v4720_v4 }
 0x7ca   :  { %7298 = vmatmul.f32.gmra.mxu0 %v4719_v20  ;;  %v4977_v20 = vld [vmem:[#allocation2 + $0x1ea] sm:$0xff] }
 0x7cb   :  { %7095 = vmatmul.f32.gmra.mxu3 %v4975_v33  ;;  %v6839_v43 = vpop.f32.mrf.mxu2  ;;  %v4723_v33 = vld [vmem:[#allocation2 + $0x200] sm:$0xff] }
 0x7cc   :  { %v6840_v18 = vadd.f32 %v6839_v43, %v6630_v15  ;;  %v4722_v15 = vld [vmem:[#allocation2 + $0x1f8] sm:$0xff] }
 0x7cd   :  { %v4978_v43 = vld [vmem:[#allocation2 + $0x1fa] sm:$0xff] }
 0x7ce   :  { %v7048_v27 = vpop.f32.mrf.mxu3  ;;  %v6636_v60 = vpop.f32.mrf.mxu1 }
 0x7cf   :  { %v12039_v49 = vadd.f32 %v7048_v27, %v6840_v18  ;;  %v12041_v38 = vpop.f32.mrf.mxu0 }
 0x7d0   :  { %6889 = vmatmul.f32.gmra.mxu2 %v4848_v16 }
 0x7d1   :  { %6683 = vmatmul.f32.gmra.mxu1 %v4721_v55 }
 0x7d2   :  { %7301 = vmatmul.f32.gmra.mxu0 %v4720_v4 }
 0x7d3   :  { %7098 = vmatmul.f32.gmra.mxu3 %v4976_v47  ;;  %v6842_v39 = vpop.f32.mrf.mxu2 }
 0x7d4   :  { %v6843_v10 = vadd.f32 %v6842_v39, %v6633_v11  ;;  %v4850_v11 = vld [vmem:[#allocation2 + $0x1f9] sm:$0xff] }
 0x7d6   :  { %v7051_v31 = vpop.f32.mrf.mxu3  ;;  %v6639_v5 = vpop.f32.mrf.mxu1 }
 0x7d7   :  { %v12043_v62 = vadd.f32 %v7051_v31, %v6843_v10  ;;  %v12045_v19 = vpop.f32.mrf.mxu0  ;;  %v4979_v10 = vld [vmem:[#allocation2 + $0x202] sm:$0xff] }
 0x7d8   :  { %6892 = vmatmul.f32.gmra.mxu2 %v4849_v41 }
 0x7d9   :  { %6686 = vmatmul.f32.gmra.mxu1 %v4722_v15 }
 0x7da   :  { %7304 = vmatmul.f32.gmra.mxu0 %v4721_v55 }
 0x7db   :  { %7101 = vmatmul.f32.gmra.mxu3 %v4977_v20  ;;  %v6845_v6 = vpop.f32.mrf.mxu2 }
 0x7dc   :  { %v6846_v42 = vadd.f32 %v6845_v6, %v6636_v60  ;;  %v4851_v60 = vld [vmem:[#allocation2 + $0x201] sm:$0xff] }
 0x7de   :  { %v7054_v44 = vpop.f32.mrf.mxu3  ;;  %v6642_v4 = vpop.f32.mrf.mxu1 }
 0x7df   :  { %v12047_v30 = vadd.f32 %v7054_v44, %v6846_v42  ;;  %v12049_v25 = vpop.f32.mrf.mxu0  ;;  %v4725_v44 = vld [vmem:[#allocation2 + $0x218] sm:$0xff] }
 0x7e0   :  { %6895 = vmatmul.f32.gmra.mxu2 %v4850_v11  ;;  %v4980_v11 = vld [vmem:[#allocation2 + $0x212] sm:$0xff] }
 0x7e1   :  { %6689 = vmatmul.f32.gmra.mxu1 %v4723_v33 }
 0x7e2   :  { %7307 = vmatmul.f32.gmra.mxu0 %v4722_v15 }
 0x7e3   :  { %7104 = vmatmul.f32.gmra.mxu3 %v4978_v43  ;;  %v6848_v18 = vpop.f32.mrf.mxu2 }
 0x7e4   :  { %v6849_v27 = vadd.f32 %v6848_v18, %v6639_v5  ;;  %v4852_v5 = vld [vmem:[#allocation2 + $0x211] sm:$0xff]  ;;  %v6480_v18 = vld [vmem:[#allocation10 + $0x220] sm:$0xff] }
 0x7e5   :  { %7403 = vmatpush.msrb.mxu1 %v6480_v18 }
 0x7e6   :  { %v7057_v16 = vpop.f32.mrf.mxu3  ;;  %v6645_v39 = vpop.f32.mrf.mxu1 }
 0x7e7   :  { %v12051_v55 = vadd.f32 %v7057_v16, %v6849_v27  ;;  %v12053_v47 = vpop.f32.mrf.mxu0 }
 0x7e8   :  { %6898 = vmatmul.f32.gmra.mxu2 %v4851_v60  ;;  %v4853_v60 = vld [vmem:[#allocation2 + $0x219] sm:$0xff] }
 0x7e9   :  { %14171 = vst [vmem:[#allocation36_spill] sm:$0xff] %v12051_v55  ;;  %6692 = vmatmul.f32.gmra.mxu1 %v4724_v26  ;;  %v6494_v55 = vld [vmem:[#allocation10 + $0x290] sm:$0xff] }
 0x7ea   :  { %7310 = vmatmul.f32.gmra.mxu0 %v4723_v33 }
 0x7eb   :  { %7107 = vmatmul.f32.gmra.mxu3 %v4979_v10  ;;  %v6851_v31 = vpop.f32.mrf.mxu2 }
 0x7ec   :  { %v6852_v41 = vadd.f32 %v6851_v31, %v6642_v4  ;;  %v4726_v31 = vld [vmem:[#allocation2 + $0x228] sm:$0xff] }
 0x7ee   :  { %v7060_v15 = vpop.f32.mrf.mxu3  ;;  %v6648_v42 = vpop.f32.mrf.mxu1 }
 0x7ef   :  { %v12055_v20 = vadd.f32 %v7060_v15, %v6852_v41  ;;  %v12057_v6 = vpop.f32.mrf.mxu0  ;;  %v4981_v41 = vld [vmem:[#allocation2 + $0x21a] sm:$0xff] }
 0x7f0   :  { %14173 = vst [vmem:[#allocation15_spill] sm:$0xff] %v12057_v6  ;;  %6901 = vmatmul.f32.gmra.mxu2 %v4852_v5  ;;  %v4997_v6 = vld [vmem:[#allocation2 + $0x2da] sm:$0xff] }
 0x7f1   :  { %14172 = vst [vmem:[#allocation17_spill] sm:$0xff] %v12055_v20  ;;  %6695 = vmatmul.f32.gmra.mxu1 %v4725_v44  ;;  %v6521_v20 = vld [vmem:[#allocation10 + $0x368] sm:$0xff] }
 0x7f2   :  { %7313 = vmatmul.f32.gmra.mxu0 %v4724_v26 }
 0x7f3   :  { %7110 = vmatmul.f32.gmra.mxu3 %v4980_v11  ;;  %v6854_v43 = vpop.f32.mrf.mxu2 }
 0x7f4   :  { %v6855_v33 = vadd.f32 %v6854_v43, %v6645_v39  ;;  %v4854_v43 = vld [vmem:[#allocation2 + $0x229] sm:$0xff] }
 0x7f6   :  { %v7063_v27 = vpop.f32.mrf.mxu3  ;;  %v6651_v10 = vpop.f32.mrf.mxu1 }
 0x7f7   :  { %v12059_v16 = vadd.f32 %v7063_v27, %v6855_v33  ;;  %v12061_v4 = vpop.f32.mrf.mxu0  ;;  %v4727_v33 = vld [vmem:[#allocation2 + $0x230] sm:$0xff] }
 0x7f8   :  { %14175 = vst [vmem:[#allocation16_spill] sm:$0xff] %v12061_v4  ;;  %6904 = vmatmul.f32.gmra.mxu2 %v4853_v60  ;;  %v4982_v27 = vld [vmem:[#allocation2 + $0x22a] sm:$0xff] }
 0x7f9   :  { %14174 = vst [vmem:[#allocation18_spill] sm:$0xff] %v12059_v16  ;;  %6698 = vmatmul.f32.gmra.mxu1 %v4726_v31 }
 0x7fa   :  { %7316 = vmatmul.f32.gmra.mxu0 %v4725_v44 }
 0x7fb   :  { %7113 = vmatmul.f32.gmra.mxu3 %v4981_v41  ;;  %v6857_v26 = vpop.f32.mrf.mxu2 }
 0x7fc   :  { %v6858_v15 = vadd.f32 %v6857_v26, %v6648_v42  ;;  %v4855_v42 = vld [vmem:[#allocation2 + $0x231] sm:$0xff] }
 0x7fe   :  { %v7066_v5 = vpop.f32.mrf.mxu3  ;;  %v6654_v18 = vpop.f32.mrf.mxu1 }
 0x7ff   :  { %v12063_v11 = vadd.f32 %v7066_v5, %v6858_v15  ;;  %v12065_v39 = vpop.f32.mrf.mxu0  ;;  %v4728_v15 = vld [vmem:[#allocation2 + $0x240] sm:$0xff]  ;;  %v4983_v5 = vld [vmem:[#allocation2 + $0x232] sm:$0xff] }
 0x800   :  { %14177 = vst [vmem:[#allocation20_spill] sm:$0xff] %v12065_v39  ;;  %6907 = vmatmul.f32.gmra.mxu2 %v4854_v43 }
 0x801   :  { %14176 = vst [vmem:[#allocation19_spill] sm:$0xff] %v12063_v11  ;;  %6701 = vmatmul.f32.gmra.mxu1 %v4727_v33 }
 0x802   :  { %7319 = vmatmul.f32.gmra.mxu0 %v4726_v31 }
 0x803   :  { %7116 = vmatmul.f32.gmra.mxu3 %v4982_v27  ;;  %v6860_v60 = vpop.f32.mrf.mxu2 }
 0x804   :  { %v6861_v16 = vadd.f32 %v6860_v60, %v6651_v10  ;;  %v4856_v10 = vld [vmem:[#allocation2 + $0x241] sm:$0xff] }
 0x805   :  { %v4729_v60 = vld [vmem:[#allocation2 + $0x248] sm:$0xff] }
 0x806   :  { %v7069_v44 = vpop.f32.mrf.mxu3  ;;  %v6657_v26 = vpop.f32.mrf.mxu1 }
 0x807   :  { %v12067_v4 = vadd.f32 %v7069_v44, %v6861_v16  ;;  %v12069_v41 = vpop.f32.mrf.mxu0  ;;  %v4984_v44 = vld [vmem:[#allocation2 + $0x242] sm:$0xff] }
 0x808   :  { %14179 = vst [vmem:[#allocation42_spill] sm:$0xff] %v12069_v41  ;;  %6910 = vmatmul.f32.gmra.mxu2 %v4855_v42 }
 0x809   :  { %14178 = vst [vmem:[#allocation38_spill] sm:$0xff] %v12067_v4  ;;  %6704 = vmatmul.f32.gmra.mxu1 %v4728_v15  ;;  %v6479_v4 = vld [vmem:[#allocation10 + $0x218] sm:$0xff] }
 0x80a   :  { %7322 = vmatmul.f32.gmra.mxu0 %v4727_v33  ;;  %7404 = vmatpush.msrb.mxu1 %v6479_v4  ;;  %v4858_v4 = vld [vmem:[#allocation2 + $0x259] sm:$0xff] }
 0x80b   :  { %7119 = vmatmul.f32.gmra.mxu3 %v4983_v5  ;;  %v6863_v43 = vpop.f32.mrf.mxu2 }
 0x80c   :  { %v6864_v11 = vadd.f32 %v6863_v43, %v6654_v18 }
 0x80e   :  { %v7072_v31 = vpop.f32.mrf.mxu3  ;;  %v6660_v16 = vpop.f32.mrf.mxu1 }
 0x80f   :  { %v12071_v39 = vadd.f32 %v7072_v31, %v6864_v11  ;;  %v12073_v27 = vpop.f32.mrf.mxu0  ;;  %v4857_v11 = vld [vmem:[#allocation2 + $0x249] sm:$0xff]  ;;  %v4730_v31 = vld [vmem:[#allocation2 + $0x258] sm:$0xff] }
 0x810   :  { %14181 = vst [vmem:[#allocation86_spill] sm:$0xff] %v12073_v27  ;;  %6913 = vmatmul.f32.gmra.mxu2 %v4856_v10 }
 0x811   :  { %14180 = vst [vmem:[#allocation97_spill] sm:$0xff] %v12071_v39  ;;  %6707 = vmatmul.f32.gmra.mxu1 %v4729_v60  ;;  %v4985_v39 = vld [vmem:[#allocation2 + $0x24a] sm:$0xff] }
 0x812   :  { %7325 = vmatmul.f32.gmra.mxu0 %v4728_v15 }
 0x813   :  { %7122 = vmatmul.f32.gmra.mxu3 %v4984_v44  ;;  %v6866_v42 = vpop.f32.mrf.mxu2 }
 0x814   :  { %v6867_v33 = vadd.f32 %v6866_v42, %v6657_v26 }
 0x816   :  { %v7075_v5 = vpop.f32.mrf.mxu3  ;;  %v6663_v43 = vpop.f32.mrf.mxu1 }
 0x817   :  { %v12075_v41 = vadd.f32 %v7075_v5, %v6867_v33  ;;  %v12077_v18 = vpop.f32.mrf.mxu0  ;;  %v4731_v33 = vld [vmem:[#allocation2 + $0x260] sm:$0xff] }
 0x818   :  { %14183 = vst [vmem:[#allocation87_spill] sm:$0xff] %v12077_v18  ;;  %6916 = vmatmul.f32.gmra.mxu2 %v4857_v11  ;;  %v4986_v5 = vld [vmem:[#allocation2 + $0x25a] sm:$0xff] }
 0x819   :  { %14182 = vst [vmem:[#allocation54_spill] sm:$0xff] %v12075_v41  ;;  %6710 = vmatmul.f32.gmra.mxu1 %v4730_v31 }
 0x81a   :  { %7328 = vmatmul.f32.gmra.mxu0 %v4729_v60 }
 0x81b   :  { %7125 = vmatmul.f32.gmra.mxu3 %v4985_v39  ;;  %v6869_v15 = vpop.f32.mrf.mxu2 }
 0x81c   :  { %v6870_v10 = vadd.f32 %v6869_v15, %v6660_v16  ;;  %v4859_v16 = vld [vmem:[#allocation2 + $0x261] sm:$0xff] }
 0x81e   :  { %v7078_v44 = vpop.f32.mrf.mxu3  ;;  %v6666_v42 = vpop.f32.mrf.mxu1 }
 0x81f   :  { %v12079_v27 = vadd.f32 %v7078_v44, %v6870_v10  ;;  %v12081_v26 = vpop.f32.mrf.mxu0  ;;  %v4732_v10 = vld [vmem:[#allocation2 + $0x270] sm:$0xff]  ;;  %v4987_v44 = vld [vmem:[#allocation2 + $0x262] sm:$0xff] }
 0x820   :  { %14185 = vst [vmem:[#allocation100_spill] sm:$0xff] %v12081_v26  ;;  %6919 = vmatmul.f32.gmra.mxu2 %v4858_v4 }
 0x821   :  { %14184 = vst [vmem:[#allocation82_spill] sm:$0xff] %v12079_v27  ;;  %6713 = vmatmul.f32.gmra.mxu1 %v4731_v33 }
 0x822   :  { %7331 = vmatmul.f32.gmra.mxu0 %v4730_v31 }
 0x823   :  { %7128 = vmatmul.f32.gmra.mxu3 %v4986_v5  ;;  %v6872_v11 = vpop.f32.mrf.mxu2 }
 0x824   :  { %v6873_v41 = vadd.f32 %v6872_v11, %v6663_v43  ;;  %v4860_v43 = vld [vmem:[#allocation2 + $0x271] sm:$0xff] }
 0x825   :  { %v4733_v11 = vld [vmem:[#allocation2 + $0x278] sm:$0xff] }
 0x826   :  { %v7081_v60 = vpop.f32.mrf.mxu3  ;;  %v6669_v15 = vpop.f32.mrf.mxu1 }
 0x827   :  { %v12083_v18 = vadd.f32 %v7081_v60, %v6873_v41  ;;  %v12085_v39 = vpop.f32.mrf.mxu0  ;;  %v4988_v60 = vld [vmem:[#allocation2 + $0x272] sm:$0xff] }
 0x828   :  { %14187 = vst [vmem:[#allocation92_spill] sm:$0xff] %v12085_v39  ;;  %6922 = vmatmul.f32.gmra.mxu2 %v4859_v16 }
 0x829   :  { %14186 = vst [vmem:[#allocation44_spill] sm:$0xff] %v12083_v18  ;;  %6716 = vmatmul.f32.gmra.mxu1 %v4732_v10  ;;  %v6478_v18 = vld [vmem:[#allocation10 + $0x210] sm:$0xff] }
 0x82a   :  { %7334 = vmatmul.f32.gmra.mxu0 %v4731_v33  ;;  %7405 = vmatpush.msrb.mxu1 %v6478_v18  ;;  %v4862_v18 = vld [vmem:[#allocation2 + $0x289] sm:$0xff] }
 0x82b   :  { %7131 = vmatmul.f32.gmra.mxu3 %v4987_v44  ;;  %v6875_v4 = vpop.f32.mrf.mxu2 }
 0x82c   :  { %v6876_v27 = vadd.f32 %v6875_v4, %v6666_v42 }
 0x82e   :  { %v7084_v31 = vpop.f32.mrf.mxu3  ;;  %v6672_v41 = vpop.f32.mrf.mxu1 }
 0x82f   :  { %v12087_v26 = vadd.f32 %v7084_v31, %v6876_v27  ;;  %v12089_v5 = vpop.f32.mrf.mxu0  ;;  %v4861_v27 = vld [vmem:[#allocation2 + $0x279] sm:$0xff]  ;;  %v4734_v31 = vld [vmem:[#allocation2 + $0x288] sm:$0xff] }
 0x830   :  { %14189 = vst [vmem:[#allocation85_spill] sm:$0xff] %v12089_v5  ;;  %6925 = vmatmul.f32.gmra.mxu2 %v4860_v43 }
 0x831   :  { %14188 = vst [vmem:[#allocation89_spill] sm:$0xff] %v12087_v26  ;;  %6719 = vmatmul.f32.gmra.mxu1 %v4733_v11  ;;  %v4989_v26 = vld [vmem:[#allocation2 + $0x27a] sm:$0xff] }
 0x832   :  { %7337 = vmatmul.f32.gmra.mxu0 %v4732_v10 }
 0x833   :  { %7134 = vmatmul.f32.gmra.mxu3 %v4988_v60  ;;  %v6878_v16 = vpop.f32.mrf.mxu2 }
 0x834   :  { %v6879_v33 = vadd.f32 %v6878_v16, %v6669_v15 }
 0x836   :  { %v7087_v44 = vpop.f32.mrf.mxu3  ;;  %v6675_v4 = vpop.f32.mrf.mxu1 }
 0x837   :  { %v12091_v39 = vadd.f32 %v7087_v44, %v6879_v33  ;;  %v12093_v42 = vpop.f32.mrf.mxu0  ;;  %v4735_v33 = vld [vmem:[#allocation2 + $0x290] sm:$0xff] }
 0x838   :  { %14191 = vst [vmem:[#allocation57_spill] sm:$0xff] %v12093_v42  ;;  %6928 = vmatmul.f32.gmra.mxu2 %v4861_v27  ;;  %v4990_v44 = vld [vmem:[#allocation2 + $0x28a] sm:$0xff] }
 0x839   :  { %14190 = vst [vmem:[#allocation104_spill] sm:$0xff] %v12091_v39  ;;  %6722 = vmatmul.f32.gmra.mxu1 %v4734_v31 }
 0x83a   :  { %7340 = vmatmul.f32.gmra.mxu0 %v4733_v11 }
 0x83b   :  { %7137 = vmatmul.f32.gmra.mxu3 %v4989_v26  ;;  %v6881_v10 = vpop.f32.mrf.mxu2 }
 0x83c   :  { %v6882_v43 = vadd.f32 %v6881_v10, %v6672_v41  ;;  %v4863_v41 = vld [vmem:[#allocation2 + $0x291] sm:$0xff] }
 0x83e   :  { %v7090_v60 = vpop.f32.mrf.mxu3  ;;  %v6678_v16 = vpop.f32.mrf.mxu1 }
 0x83f   :  { %v12095_v5 = vadd.f32 %v7090_v60, %v6882_v43  ;;  %v12097_v15 = vpop.f32.mrf.mxu0  ;;  %v4736_v43 = vld [vmem:[#allocation2 + $0x2a0] sm:$0xff]  ;;  %v4991_v60 = vld [vmem:[#allocation2 + $0x292] sm:$0xff] }
 0x840   :  { %14193 = vst [vmem:[#allocation32_spill] sm:$0xff] %v12097_v15  ;;  %6931 = vmatmul.f32.gmra.mxu2 %v4862_v18 }
 0x841   :  { %14192 = vst [vmem:[#allocation96_spill] sm:$0xff] %v12095_v5  ;;  %6725 = vmatmul.f32.gmra.mxu1 %v4735_v33 }
 0x842   :  { %7343 = vmatmul.f32.gmra.mxu0 %v4734_v31 }
 0x843   :  { %7140 = vmatmul.f32.gmra.mxu3 %v4990_v44  ;;  %v6884_v27 = vpop.f32.mrf.mxu2 }
 0x844   :  { %v6885_v39 = vadd.f32 %v6884_v27, %v6675_v4  ;;  %v4864_v4 = vld [vmem:[#allocation2 + $0x2a1] sm:$0xff] }
 0x845   :  { %v4737_v27 = vld [vmem:[#allocation2 + $0x2a8] sm:$0xff] }
 0x846   :  { %v7093_v11 = vpop.f32.mrf.mxu3  ;;  %v6681_v10 = vpop.f32.mrf.mxu1 }
 0x847   :  { %v12099_v42 = vadd.f32 %v7093_v11, %v6885_v39  ;;  %v12101_v26 = vpop.f32.mrf.mxu0  ;;  %v4992_v11 = vld [vmem:[#allocation2 + $0x2a2] sm:$0xff] }
 0x848   :  { %14195 = vst [vmem:[#allocation88_spill] sm:$0xff] %v12101_v26  ;;  %6934 = vmatmul.f32.gmra.mxu2 %v4863_v41 }
 0x849   :  { %14194 = vst [vmem:[#allocation91_spill] sm:$0xff] %v12099_v42  ;;  %6728 = vmatmul.f32.gmra.mxu1 %v4736_v43  ;;  %v6477_v42 = vld [vmem:[#allocation10 + $0x208] sm:$0xff] }
 0x84a   :  { %7346 = vmatmul.f32.gmra.mxu0 %v4735_v33  ;;  %7406 = vmatpush.msrb.mxu1 %v6477_v42  ;;  %v4866_v42 = vld [vmem:[#allocation2 + $0x2b9] sm:$0xff] }
 0x84b   :  { %7143 = vmatmul.f32.gmra.mxu3 %v4991_v60  ;;  %v6887_v18 = vpop.f32.mrf.mxu2 }
 0x84c   :  { %v6888_v5 = vadd.f32 %v6887_v18, %v6678_v16 }
 0x84e   :  { %v7096_v31 = vpop.f32.mrf.mxu3  ;;  %v6684_v39 = vpop.f32.mrf.mxu1 }
 0x84f   :  { %v12103_v15 = vadd.f32 %v7096_v31, %v6888_v5  ;;  %v12105_v44 = vpop.f32.mrf.mxu0  ;;  %v4865_v5 = vld [vmem:[#allocation2 + $0x2a9] sm:$0xff]  ;;  %v4738_v31 = vld [vmem:[#allocation2 + $0x2b8] sm:$0xff] }
 0x850   :  { %14197 = vst [vmem:[#allocation47_spill] sm:$0xff] %v12105_v44  ;;  %6937 = vmatmul.f32.gmra.mxu2 %v4864_v4 }
 0x851   :  { %14196 = vst [vmem:[#allocation107_spill] sm:$0xff] %v12103_v15  ;;  %6731 = vmatmul.f32.gmra.mxu1 %v4737_v27  ;;  %v4993_v15 = vld [vmem:[#allocation2 + $0x2aa] sm:$0xff] }
 0x852   :  { %7349 = vmatmul.f32.gmra.mxu0 %v4736_v43 }
 0x853   :  { %7146 = vmatmul.f32.gmra.mxu3 %v4992_v11  ;;  %v6890_v41 = vpop.f32.mrf.mxu2 }
 0x854   :  { %v6891_v33 = vadd.f32 %v6890_v41, %v6681_v10 }
 0x856   :  { %v7099_v60 = vpop.f32.mrf.mxu3  ;;  %v6687_v18 = vpop.f32.mrf.mxu1 }
 0x857   :  { %v12107_v26 = vadd.f32 %v7099_v60, %v6891_v33  ;;  %v12109_v16 = vpop.f32.mrf.mxu0  ;;  %v4739_v33 = vld [vmem:[#allocation2 + $0x2c0] sm:$0xff] }
 0x858   :  { %14199 = vst [vmem:[#allocation95_spill] sm:$0xff] %v12109_v16  ;;  %6940 = vmatmul.f32.gmra.mxu2 %v4865_v5  ;;  %v4994_v60 = vld [vmem:[#allocation2 + $0x2ba] sm:$0xff] }
 0x859   :  { %14198 = vst [vmem:[#allocation101_spill] sm:$0xff] %v12107_v26  ;;  %6734 = vmatmul.f32.gmra.mxu1 %v4738_v31 }
 0x85a   :  { %7352 = vmatmul.f32.gmra.mxu0 %v4737_v27 }
 0x85b   :  { %7149 = vmatmul.f32.gmra.mxu3 %v4993_v15  ;;  %v6893_v43 = vpop.f32.mrf.mxu2 }
 0x85c   :  { %v6894_v4 = vadd.f32 %v6893_v43, %v6684_v39  ;;  %v4867_v39 = vld [vmem:[#allocation2 + $0x2c1] sm:$0xff] }
 0x85e   :  { %v7102_v11 = vpop.f32.mrf.mxu3  ;;  %v6690_v41 = vpop.f32.mrf.mxu1 }
 0x85f   :  { %v12111_v44 = vadd.f32 %v7102_v11, %v6894_v4  ;;  %v12113_v10 = vpop.f32.mrf.mxu0  ;;  %v4740_v4 = vld [vmem:[#allocation2 + $0x2d0] sm:$0xff]  ;;  %v4995_v11 = vld [vmem:[#allocation2 + $0x2c2] sm:$0xff] }
 0x860   :  { %14201 = vst [vmem:[#allocation98_spill] sm:$0xff] %v12113_v10  ;;  %6943 = vmatmul.f32.gmra.mxu2 %v4866_v42 }
 0x861   :  { %14200 = vst [vmem:[#allocation90_spill] sm:$0xff] %v12111_v44  ;;  %6737 = vmatmul.f32.gmra.mxu1 %v4739_v33 }
 0x862   :  { %7355 = vmatmul.f32.gmra.mxu0 %v4738_v31 }
 0x863   :  { %7152 = vmatmul.f32.gmra.mxu3 %v4994_v60  ;;  %v6896_v5 = vpop.f32.mrf.mxu2 }
 0x864   :  { %v6897_v26 = vadd.f32 %v6896_v5, %v6687_v18  ;;  %v4868_v18 = vld [vmem:[#allocation2 + $0x2d1] sm:$0xff] }
 0x865   :  { %v4741_v5 = vld [vmem:[#allocation2 + $0x2d8] sm:$0xff] }
 0x866   :  { %v7105_v27 = vpop.f32.mrf.mxu3  ;;  %v6693_v43 = vpop.f32.mrf.mxu1 }
 0x867   :  { %v12115_v16 = vadd.f32 %v7105_v27, %v6897_v26  ;;  %v12117_v15 = vpop.f32.mrf.mxu0  ;;  %v4996_v27 = vld [vmem:[#allocation2 + $0x2d2] sm:$0xff] }
 0x868   :  { %14203 = vst [vmem:[#allocation60_spill] sm:$0xff] %v12117_v15  ;;  %6946 = vmatmul.f32.gmra.mxu2 %v4867_v39  ;;  %v6523_v15 = vld [vmem:[#allocation10 + $0x378] sm:$0xff] }
 0x869   :  { %14202 = vst [vmem:[#allocation94_spill] sm:$0xff] %v12115_v16  ;;  %6740 = vmatmul.f32.gmra.mxu1 %v4740_v4  ;;  %v6476_v16 = vld [vmem:[#allocation10 + $0x200] sm:$0xff]  ;;  %7810 = vmatpush.msra.mxu3 %v6523_v15 }
 0x86a   :  { %7358 = vmatmul.f32.gmra.mxu0 %v4739_v33  ;;  %v6507_v33 = vld [vmem:[#allocation10 + $0x2f8] sm:$0xff]  ;;  %7407 = vmatpush.msrb.mxu1 %v6476_v16  ;;  %v6504_v16 = vld [vmem:[#allocation10 + $0x2e0] sm:$0xff] }
 0x86b   :  { %7155 = vmatmul.f32.gmra.mxu3 %v4995_v11  ;;  %v6899_v42 = vpop.f32.mrf.mxu2  ;;  %7601 = vmatpush.msra.mxu2 %v6507_v33  ;;  %v6503_v33 = vld [vmem:[#allocation10 + $0x2d8] sm:$0xff] }
 0x86c   :  { %v6900_v44 = vadd.f32 %v6899_v42, %v6690_v41 }
 0x86e   :  { %v7108_v31 = vpop.f32.mrf.mxu3  ;;  %v6696_v26 = vpop.f32.mrf.mxu1 }
 0x86f   :  { %v12119_v10 = vadd.f32 %v7108_v31, %v6900_v44  ;;  %v12121_v60 = vpop.f32.mrf.mxu0  ;;  %v4869_v31 = vld [vmem:[#allocation2 + $0x2d9] sm:$0xff] }
 0x870   :  { %14205 = vst [vmem:[#allocation102_spill] sm:$0xff] %v12121_v60  ;;  %6949 = vmatmul.f32.gmra.mxu2 %v4868_v18  ;;  %v6522_v60 = vld [vmem:[#allocation10 + $0x370] sm:$0xff] }
 0x871   :  { %14204 = vst [vmem:[#allocation105_spill] sm:$0xff] %v12119_v10  ;;  %6743 = vmatmul.f32.gmra.mxu1 %v4741_v5  ;;  %v6506_v10 = vld [vmem:[#allocation10 + $0x2f0] sm:$0xff]  ;;  %7811 = vmatpush.msra.mxu3 %v6522_v60 }
 0x872   :  { %7361 = vmatmul.f32.gmra.mxu0 %v4740_v4  ;;  %v6505_v4 = vld [vmem:[#allocation10 + $0x2e8] sm:$0xff]  ;;  %7602 = vmatpush.msra.mxu2 %v6506_v10 }
 0x873   :  { %7158 = vmatmul.f32.gmra.mxu3 %v4996_v27  ;;  %v6902_v39 = vpop.f32.mrf.mxu2  ;;  %v4742_v27 = vld [vmem:[#allocation2 + $0x2e8] sm:$0xff] }
 0x874   :  { %v6903_v11 = vadd.f32 %v6902_v39, %v6693_v43  ;;  %7603 = vmatpush.msra.mxu2 %v6505_v4  ;;  %v6520_v43 = vld [vmem:[#allocation10 + $0x360] sm:$0xff]  ;;  %7812 = vmatpush.msra.mxu3 %v6521_v20  ;;  %v4870_v10 = vld [vmem:[#allocation2 + $0x2e9] sm:$0xff] }
 0x875   :  { %v4743_v4 = vld [vmem:[#allocation2 + $0x2f0] sm:$0xff] }
 0x876   :  { %v7111_v44 = vpop.f32.mrf.mxu3  ;;  %v6699_v18 = vpop.f32.mrf.mxu1  ;;  %7604 = vmatpush.msra.mxu2 %v6504_v16  ;;  %7813 = vmatpush.msra.mxu3 %v6520_v43  ;;  %v4998_v20 = vld [vmem:[#allocation2 + $0x2ea] sm:$0xff]  ;;  %v6500_v16 = vld [vmem:[#allocation10 + $0x2c0] sm:$0xff] }
 0x877   :  { %v12123_v41 = vadd.f32 %v7111_v44, %v6903_v11  ;;  %v12125_v42 = vpop.f32.mrf.mxu0  ;;  %v6519_v11 = vld [vmem:[#allocation10 + $0x358] sm:$0xff]  ;;  %v6517_v43 = vld [vmem:[#allocation10 + $0x348] sm:$0xff] }
 0x878   :  { %14207 = vst [vmem:[#allocation50_spill] sm:$0xff] %v12125_v42  ;;  %6952 = vmatmul.f32.gmra.mxu2 %v4869_v31  ;;  %7814 = vmatpush.msra.mxu3 %v6519_v11  ;;  %v6538_v42 = vld [vmem:[#allocation10 + $0x3f0] sm:$0xff] }
 0x879   :  { %14206 = vst [vmem:[#allocation99_spill] sm:$0xff] %v12123_v41  ;;  %6746 = vmatmul.f32.gmra.mxu1 %v4742_v27  ;;  %7605 = vmatpush.msra.mxu2 %v6503_v33  ;;  %v6516_v33 = vld [vmem:[#allocation10 + $0x340] sm:$0xff] }
 0x87a   :  { %7364 = vmatmul.f32.gmra.mxu0 %v4741_v5  ;;  %v6502_v5 = vld [vmem:[#allocation10 + $0x2d0] sm:$0xff] }
 0x87b   :  { %7161 = vmatmul.f32.gmra.mxu3 %v4997_v6  ;;  %v6905_v15 = vpop.f32.mrf.mxu2  ;;  %v6501_v6 = vld [vmem:[#allocation10 + $0x2c8] sm:$0xff]  ;;  %7606 = vmatpush.msra.mxu2 %v6502_v5 }
 0x87c   :  { %v6906_v39 = vadd.f32 %v6905_v15, %v6696_v26  ;;  %v6518_v26 = vld [vmem:[#allocation10 + $0x350] sm:$0xff] }
 0x87d   :  { %7607 = vmatpush.msra.mxu2 %v6501_v6  ;;  %7815 = vmatpush.msra.mxu3 %v6518_v26  ;;  %v6497_v6 = vld [vmem:[#allocation10 + $0x2a8] sm:$0xff]  ;;  %v6515_v26 = vld [vmem:[#allocation10 + $0x338] sm:$0xff] }
 0x87e   :  { %v7114_v44 = vpop.f32.mrf.mxu3  ;;  %v6702_v41 = vpop.f32.mrf.mxu1 }
 0x87f   :  { %v12127_v60 = vadd.f32 %v7114_v44, %v6906_v39  ;;  %v12129_v31 = vpop.f32.mrf.mxu0  ;;  %v6539_v39 = vld [vmem:[#allocation10 + $0x3f8] sm:$0xff]  ;;  %7608 = vmatpush.msra.mxu2 %v6500_v16  ;;  %7816 = vmatpush.msra.mxu3 %v6517_v43  ;;  %v6537_v16 = vld [vmem:[#allocation10 + $0x3e8] sm:$0xff]  ;;  %v6496_v43 = vld [vmem:[#allocation10 + $0x2a0] sm:$0xff] }
 0x880   :  { %14209 = vst [vmem:[#allocation103_spill] sm:$0xff] %v12129_v31  ;;  %6955 = vmatmul.f32.gmra.mxu2 %v4870_v10  ;;  %8019 = vmatpush.msra.mxu0 %v6539_v39 }
 0x881   :  { %14208 = vst [vmem:[#allocation106_spill] sm:$0xff] %v12127_v60  ;;  %6749 = vmatmul.f32.gmra.mxu1 %v4743_v4  ;;  %v6499_v60 = vld [vmem:[#allocation10 + $0x2b8] sm:$0xff]  ;;  %7817 = vmatpush.msra.mxu3 %v6516_v33  ;;  %v6513_v33 = vld [vmem:[#allocation10 + $0x328] sm:$0xff] }
 0x882   :  { %7367 = vmatmul.f32.gmra.mxu0 %v4742_v27  ;;  %v4871_v27 = vld [vmem:[#allocation2 + $0x2f1] sm:$0xff]  ;;  %7609 = vmatpush.msra.mxu2 %v6499_v60 }
 0x883   :  { %7164 = vmatmul.f32.gmra.mxu3 %v4998_v20  ;;  %v6908_v15 = vpop.f32.mrf.mxu2  ;;  %v6498_v20 = vld [vmem:[#allocation10 + $0x2b0] sm:$0xff]  ;;  %8020 = vmatpush.msra.mxu0 %v6538_v42  ;;  %v6535_v42 = vld [vmem:[#allocation10 + $0x3d8] sm:$0xff] }
 0x884   :  { %v6909_v44 = vadd.f32 %v6908_v15, %v6699_v18  ;;  %v4744_v18 = vld [vmem:[#allocation2 + $0x300] sm:$0xff]  ;;  %7610 = vmatpush.msra.mxu2 %v6498_v20  ;;  %v4999_v15 = vld [vmem:[#allocation2 + $0x2f2] sm:$0xff]  ;;  %7818 = vmatpush.msra.mxu3 %v6515_v26 }
 0x885   :  { %8021 = vmatpush.msra.mxu0 %v6537_v16  ;;  %v6512_v26 = vld [vmem:[#allocation10 + $0x320] sm:$0xff]  ;;  %v6493_v16 = vld [vmem:[#allocation10 + $0x288] sm:$0xff] }
 0x886   :  { %v7117_v11 = vpop.f32.mrf.mxu3  ;;  %v6705_v31 = vpop.f32.mrf.mxu1  ;;  %7611 = vmatpush.msra.mxu2 %v6497_v6  ;;  %v4745_v6 = vld [vmem:[#allocation2 + $0x308] sm:$0xff] }
 0x887   :  { %v12131_v10 = vadd.f32 %v7117_v11, %v6909_v44  ;;  %v12133_v5 = vpop.f32.mrf.mxu0  ;;  %v6514_v44 = vld [vmem:[#allocation10 + $0x330] sm:$0xff]  ;;  %v6536_v11 = vld [vmem:[#allocation10 + $0x3e0] sm:$0xff] }
 0x888   :  { %14211 = vst [vmem:[#allocation109_spill] sm:$0xff] %v12133_v5  ;;  %6958 = vmatmul.f32.gmra.mxu2 %v4871_v27  ;;  %v6495_v27 = vld [vmem:[#allocation10 + $0x298] sm:$0xff]  ;;  %7819 = vmatpush.msra.mxu3 %v6514_v44  ;;  %v4872_v5 = vld [vmem:[#allocation2 + $0x301] sm:$0xff] }
 0x889   :  { %14210 = vst [vmem:[#allocation62_spill] sm:$0xff] %v12131_v10  ;;  %6752 = vmatmul.f32.gmra.mxu1 %v4744_v18  ;;  %7612 = vmatpush.msra.mxu2 %v6496_v43  ;;  %v5000_v43 = vld [vmem:[#allocation2 + $0x302] sm:$0xff]  ;;  %v6511_v44 = vld [vmem:[#allocation10 + $0x318] sm:$0xff] }
 0x88a   :  { %7370 = vmatmul.f32.gmra.mxu0 %v4743_v4  ;;  %7820 = vmatpush.msra.mxu3 %v6513_v33  ;;  %v6510_v33 = vld [vmem:[#allocation10 + $0x310] sm:$0xff] }
 0x88b   :  { %7167 = vmatmul.f32.gmra.mxu3 %v4999_v15  ;;  %v6911_v39 = vpop.f32.mrf.mxu2  ;;  %8022 = vmatpush.msra.mxu0 %v6536_v11  ;;  %v6492_v11 = vld [vmem:[#allocation10 + $0x280] sm:$0xff] }
 0x88c   :  { %v6912_v60 = vadd.f32 %v6911_v39, %v6702_v41  ;;  %7613 = vmatpush.msra.mxu2 %v6495_v27  ;;  %v6534_v41 = vld [vmem:[#allocation10 + $0x3d0] sm:$0xff]  ;;  %v6533_v39 = vld [vmem:[#allocation10 + $0x3c8] sm:$0xff]  ;;  %7821 = vmatpush.msra.mxu3 %v6512_v26 }
 0x88d   :  { %8023 = vmatpush.msra.mxu0 %v6535_v42  ;;  %v6509_v26 = vld [vmem:[#allocation10 + $0x308] sm:$0xff] }
 0x88e   :  { %v7120_v10 = vpop.f32.mrf.mxu3  ;;  %v6708_v15 = vpop.f32.mrf.mxu1  ;;  %7614 = vmatpush.msra.mxu2 %v6494_v55  ;;  %7822 = vmatpush.msra.mxu3 %v6511_v44  ;;  %v6531_v55 = vld [vmem:[#allocation10 + $0x3b8] sm:$0xff]  ;;  %v6508_v44 = vld [vmem:[#allocation10 + $0x300] sm:$0xff] }
 0x88f   :  { %v12135_v20 = vadd.f32 %v7120_v10, %v6912_v60  ;;  %v12137_v4 = vpop.f32.mrf.mxu0  ;;  %8024 = vmatpush.msra.mxu0 %v6534_v41  ;;  %v6555_v60 = vld [vmem:[#allocation10 + $0x478] sm:$0xff] }
 0x890   :  { %14213 = vst [vmem:[#allocation108_spill] sm:$0xff] %v12137_v4  ;;  %6961 = vmatmul.f32.gmra.mxu2 %v4872_v5  ;;  %v6532_v5 = vld [vmem:[#allocation10 + $0x3c0] sm:$0xff]  ;;  %8228 = vmatpush.msra.mxu1 %v6555_v60  ;;  %v4746_v41 = vld [vmem:[#allocation2 + $0x318] sm:$0xff] }
 0x891   :  { %14212 = vst [vmem:[#allocation53_spill] sm:$0xff] %v12135_v20  ;;  %6755 = vmatmul.f32.gmra.mxu1 %v4745_v6  ;;  %7615 = vmatpush.msra.mxu2 %v6493_v16  ;;  %v5001_v16 = vld [vmem:[#allocation2 + $0x30a] sm:$0xff]  ;;  %v6528_v60 = vld [vmem:[#allocation10 + $0x3a0] sm:$0xff] }
 0x892   :  { %7373 = vmatmul.f32.gmra.mxu0 %v4744_v18  ;;  %7823 = vmatpush.msra.mxu3 %v6510_v33 }
 0x893   :  { %7170 = vmatmul.f32.gmra.mxu3 %v5000_v43  ;;  %v6914_v10 = vpop.f32.mrf.mxu2  ;;  %8025 = vmatpush.msra.mxu0 %v6533_v39  ;;  %v4873_v43 = vld [vmem:[#allocation2 + $0x309] sm:$0xff] }
 0x894   :  { %v6915_v27 = vadd.f32 %v6914_v10, %v6705_v31  ;;  %7616 = vmatpush.msra.mxu2 %v6492_v11  ;;  %v6530_v31 = vld [vmem:[#allocation10 + $0x3b0] sm:$0xff]  ;;  %v6529_v39 = vld [vmem:[#allocation10 + $0x3a8] sm:$0xff]  ;;  %7824 = vmatpush.msra.mxu3 %v6509_v26 }
 0x895   :  { %8026 = vmatpush.msra.mxu0 %v6532_v5  ;;  %v6527_v5 = vld [vmem:[#allocation10 + $0x398] sm:$0xff] }
 0x896   :  { %v7123_v42 = vpop.f32.mrf.mxu3  ;;  %v6711_v4 = vpop.f32.mrf.mxu1  ;;  %7825 = vmatpush.msra.mxu3 %v6508_v44 }
 0x897   :  { %v12139_v18 = vadd.f32 %v7123_v42, %v6915_v27  ;;  %v12141_v20 = vpop.f32.mrf.mxu0  ;;  %8027 = vmatpush.msra.mxu0 %v6531_v55  ;;  %v4874_v55 = vld [vmem:[#allocation2 + $0x319] sm:$0xff] }
 0x898   :  { %6964 = vmatmul.f32.gmra.mxu2 %v4873_v43 }
 0x899   :  { %14214 = vst [vmem:[#allocation65_spill] sm:$0xff] %v12139_v18  ;;  %6758 = vmatmul.f32.gmra.mxu1 %v4746_v41  ;;  %8028 = vmatpush.msra.mxu0 %v6530_v31  ;;  %v5002_v18 = vld [vmem:[#allocation2 + $0x31a] sm:$0xff] }
 0x89a   :  { %7376 = vmatmul.f32.gmra.mxu0 %v4745_v6  ;;  %v6526_v6 = vld [vmem:[#allocation10 + $0x390] sm:$0xff] }
 0x89b   :  { %7173 = vmatmul.f32.gmra.mxu3 %v5001_v16  ;;  %v6917_v10 = vpop.f32.mrf.mxu2  ;;  %8029 = vmatpush.msra.mxu0 %v6529_v39  ;;  %v4747_v16 = vld [vmem:[#allocation2 + $0x320] sm:$0xff] }
 0x89c   :  { %v6918_v11 = vadd.f32 %v6917_v10, %v6708_v15  ;;  %v6525_v15 = vld [vmem:[#allocation10 + $0x388] sm:$0xff]  ;;  %v6524_v39 = vld [vmem:[#allocation10 + $0x380] sm:$0xff] }
 0x89d   :  { %8030 = vmatpush.msra.mxu0 %v6528_v60  ;;  %v4875_v60 = vld [vmem:[#allocation2 + $0x321] sm:$0xff] }
 0x89e   :  { %v7126_v27 = vpop.f32.mrf.mxu3  ;;  %v6714_v43 = vpop.f32.mrf.mxu1 }
 0x89f   :  { %v12143_v33 = vadd.f32 %v7126_v27, %v6918_v11  ;;  %v12145_v42 = vpop.f32.mrf.mxu0  ;;  %8031 = vmatpush.msra.mxu0 %v6527_v5  ;;  %v5196_v5 = vld [vmem:[#allocation2 + $0x19] sm:$0xff] }
 0x8a0   :  { %6967 = vmatmul.f32.gmra.mxu2 %v4874_v55  ;;  %v5003_v55 = vld [vmem:[#allocation2 + $0x322] sm:$0xff] }
 0x8a1   :  { %6761 = vmatmul.f32.gmra.mxu1 %v4747_v16  ;;  %8032 = vmatpush.msra.mxu0 %v6526_v6 }
 0x8a2   :  { %7379 = vmatmul.f32.gmra.mxu0 %v4746_v41 }
 0x8a3   :  { %7176 = vmatmul.f32.gmra.mxu3 %v5002_v18  ;;  %v6920_v31 = vpop.f32.mrf.mxu2  ;;  %8033 = vmatpush.msra.mxu0 %v6525_v15 }
 0x8a4   :  { %v6921_v26 = vadd.f32 %v6920_v31, %v6711_v4  ;;  %v5324_v31 = vld [vmem:[#allocation2 + $0x1a] sm:$0xff] }
 0x8a5   :  { %8034 = vmatpush.msra.mxu0 %v6524_v39  ;;  %v5452_v39 = vld [vmem:[#allocation2 + $0x30] sm:$0xff] }
 0x8a6   :  { %v7129_v10 = vpop.f32.mrf.mxu3  ;;  %v6717_v27 = vpop.f32.mrf.mxu1 }
 0x8a7   :  { %v12147_v44 = vadd.f32 %v7129_v10, %v6921_v26  ;;  %v12149_v11 = vpop.f32.mrf.mxu0  ;;  %v5130_v10 = vld [vmem:[#allocation2 + $0x330] sm:$0xff] }
 0x8a8   :  { %14216 = vst [vmem:[#allocation68_spill] sm:$0xff] %v12149_v11  ;;  %6970 = vmatmul.f32.gmra.mxu2 %v4875_v60 }
 0x8a9   :  { %14215 = vst [vmem:[#allocation56_spill] sm:$0xff] %v12147_v44  ;;  %7408 = vmatmul.f32.vlgmr.msrb.gmra.mxu1 %v5196_v5  ;;  %v5197_v44 = vld [vmem:[#allocation2 + $0x21] sm:$0xff] }
 0x8aa   :  { %7382 = vmatmul.f32.gmra.mxu0 %v4747_v16  ;;  %v6554_v16 = vld [vmem:[#allocation10 + $0x470] sm:$0xff] }
 0x8ab   :  { %7179 = vmatmul.f32.gmra.mxu3 %v5003_v55  ;;  %v6923_v18 = vpop.f32.mrf.mxu2  ;;  %8229 = vmatpush.msra.mxu1 %v6554_v16 }
 0x8ac   :  { %v6924_v41 = vadd.f32 %v6923_v18, %v6714_v43 }
 0x8ae   :  { %v7132_v6 = vpop.f32.mrf.mxu3  ;;  %v6720_v26 = vpop.f32.mrf.mxu1 }
 0x8af   :  { %v12151_v4 = vadd.f32 %v7132_v6, %v6924_v41  ;;  %v12153_v15 = vpop.f32.mrf.mxu0  ;;  %v5325_v41 = vld [vmem:[#allocation2 + $0x22] sm:$0xff] }
 0x8b0   :  { %14218 = vst [vmem:[#allocation71_spill] sm:$0xff] %v12153_v15  ;;  %7617 = vmatmul.f32.vlgmr.msra.gmra.mxu2 %v5324_v31  ;;  %v5198_v31 = vld [vmem:[#allocation2 + $0x31] sm:$0xff] }
 0x8b1   :  { %14217 = vst [vmem:[#allocation59_spill] sm:$0xff] %v12151_v4  ;;  %7411 = vmatmul.f32.gmra.mxu1 %v5197_v44  ;;  %v5131_v4 = vld [vmem:[#allocation2 + $0x338] sm:$0xff] }
 0x8b2   :  { %7385 = vmatmul.f32.gmra.mxu0 %v5130_v10  ;;  %v5453_v15 = vld [vmem:[#allocation2 + $0x38] sm:$0xff] }
 0x8b3   :  { %7826 = vmatmul.f32.vlgmr.msra.gmra.mxu3 %v5452_v39  ;;  %v6926_v60 = vpop.f32.mrf.mxu2 }
 0x8b4   :  { %v6927_v5 = vadd.f32 %v6926_v60, %v6717_v27  ;;  %v5326_v60 = vld [vmem:[#allocation2 + $0x32] sm:$0xff] }
 0x8b6   :  { %v7135_v55 = vpop.f32.mrf.mxu3  ;;  %v6723_v6 = vpop.f32.mrf.mxu1 }
 0x8b7   :  { %v12155_v43 = vadd.f32 %v7135_v55, %v6927_v5  ;;  %v12157_v18 = vpop.f32.mrf.mxu0  ;;  %v5199_v5 = vld [vmem:[#allocation2 + $0x39] sm:$0xff]  ;;  %v5454_v55 = vld [vmem:[#allocation2 + $0x48] sm:$0xff] }
 0x8b8   :  { %14220 = vst [vmem:[#allocation73_spill] sm:$0xff] %v12157_v18  ;;  %7620 = vmatmul.f32.gmra.mxu2 %v5325_v41 }
 0x8b9   :  { %14219 = vst [vmem:[#allocation63_spill] sm:$0xff] %v12155_v43  ;;  %7414 = vmatmul.f32.gmra.mxu1 %v5198_v31 }
 0x8ba   :  { %7388 = vmatmul.f32.gmra.mxu0 %v5131_v4 }
 0x8bb   :  { %7829 = vmatmul.f32.gmra.mxu3 %v5453_v15  ;;  %v6929_v44 = vpop.f32.mrf.mxu2 }
 0x8bc   :  { %v6930_v10 = vadd.f32 %v6929_v44, %v6720_v26  ;;  %v5327_v26 = vld [vmem:[#allocation2 + $0x3a] sm:$0xff] }
 0x8be   :  { %v7138_v39 = vpop.f32.mrf.mxu3  ;;  %v6726_v16 = vpop.f32.mrf.mxu1 }
 0x8bf   :  { %v12159_v11 = vadd.f32 %v7138_v39, %v6930_v10  ;;  %v12161_v27 = vpop.f32.mrf.mxu0  ;;  %v5200_v10 = vld [vmem:[#allocation2 + $0x49] sm:$0xff] }
 0x8c0   :  { %14222 = vst [vmem:[#allocation51_spill] sm:$0xff] %v12161_v27  ;;  %7623 = vmatmul.f32.gmra.mxu2 %v5326_v60  ;;  %v5455_v39 = vld [vmem:[#allocation2 + $0x50] sm:$0xff] }
 0x8c1   :  { %14221 = vst [vmem:[#allocation66_spill] sm:$0xff] %v12159_v11  ;;  %7417 = vmatmul.f32.gmra.mxu1 %v5199_v5 }
 0x8c2   :  { %8035 = vmatmul.f32.vlgmr.msra.gmra.mxu0 %v5198_v31 }
 0x8c3   :  { %7832 = vmatmul.f32.gmra.mxu3 %v5454_v55  ;;  %v6932_v41 = vpop.f32.mrf.mxu2 }
 0x8c4   :  { %v6933_v4 = vadd.f32 %v6932_v41, %v6723_v6  ;;  %v5328_v6 = vld [vmem:[#allocation2 + $0x4a] sm:$0xff] }
 0x8c5   :  { %v5201_v41 = vld [vmem:[#allocation2 + $0x51] sm:$0xff] }
 0x8c6   :  { %v7141_v43 = vpop.f32.mrf.mxu3  ;;  %v6729_v44 = vpop.f32.mrf.mxu1 }
 0x8c7   :  { %v12163_v18 = vadd.f32 %v7141_v43, %v6933_v4  ;;  %v12165_v15 = vpop.f32.mrf.mxu0  ;;  %v5456_v4 = vld [vmem:[#allocation2 + $0x60] sm:$0xff] }
 0x8c8   :  { %14224 = vst [vmem:[#allocation81_spill] sm:$0xff] %v12165_v15  ;;  %7626 = vmatmul.f32.gmra.mxu2 %v5327_v26 }
 0x8c9   :  { %14223 = vst [vmem:[#allocation75_spill] sm:$0xff] %v12163_v18  ;;  %7420 = vmatmul.f32.gmra.mxu1 %v5200_v10  ;;  %v6553_v18 = vld [vmem:[#allocation10 + $0x468] sm:$0xff] }
 0x8ca   :  { %8038 = vmatmul.f32.gmra.mxu0 %v5199_v5  ;;  %8230 = vmatpush.msra.mxu1 %v6553_v18  ;;  %v5330_v18 = vld [vmem:[#allocation2 + $0x62] sm:$0xff] }
 0x8cb   :  { %7835 = vmatmul.f32.gmra.mxu3 %v5455_v39  ;;  %v6935_v60 = vpop.f32.mrf.mxu2 }
 0x8cc   :  { %v6936_v11 = vadd.f32 %v6935_v60, %v6726_v16 }
 0x8ce   :  { %v7144_v31 = vpop.f32.mrf.mxu3  ;;  %v6732_v43 = vpop.f32.mrf.mxu1 }
 0x8cf   :  { %v12167_v27 = vadd.f32 %v7144_v31, %v6936_v11  ;;  %v12169_v55 = vpop.f32.mrf.mxu0  ;;  %v5329_v11 = vld [vmem:[#allocation2 + $0x52] sm:$0xff]  ;;  %v5202_v31 = vld [vmem:[#allocation2 + $0x61] sm:$0xff] }
 0x8d0   :  { %14226 = vst [vmem:[#allocation93_spill] sm:$0xff] %v12169_v55  ;;  %7629 = vmatmul.f32.gmra.mxu2 %v5328_v6 }
 0x8d1   :  { %14225 = vst [vmem:[#allocation21_spill] sm:$0xff] %v12167_v27  ;;  %7423 = vmatmul.f32.gmra.mxu1 %v5201_v41  ;;  %v5457_v27 = vld [vmem:[#allocation2 + $0x68] sm:$0xff] }
 0x8d2   :  { %8041 = vmatmul.f32.gmra.mxu0 %v5200_v10 }
 0x8d3   :  { %7838 = vmatmul.f32.gmra.mxu3 %v5456_v4  ;;  %v6938_v26 = vpop.f32.mrf.mxu2 }
 0x8d4   :  { %v6939_v5 = vadd.f32 %v6938_v26, %v6729_v44 }
 0x8d6   :  { %v7147_v39 = vpop.f32.mrf.mxu3  ;;  %v6735_v60 = vpop.f32.mrf.mxu1 }
 0x8d7   :  { %v12171_v15 = vadd.f32 %v7147_v39, %v6939_v5  ;;  %v12173_v16 = vpop.f32.mrf.mxu0  ;;  %v5203_v5 = vld [vmem:[#allocation2 + $0x69] sm:$0xff]  ;;  %v5458_v39 = vld [vmem:[#allocation2 + $0x78] sm:$0xff] }
 0x8d8   :  { %14228 = vst [vmem:[#allocation83_spill] sm:$0xff] %v12173_v16  ;;  %7632 = vmatmul.f32.gmra.mxu2 %v5329_v11 }
 0x8d9   :  { %14227 = vst [vmem:[#allocation22_spill] sm:$0xff] %v12171_v15  ;;  %7426 = vmatmul.f32.gmra.mxu1 %v5202_v31 }
 0x8da   :  { %8044 = vmatmul.f32.gmra.mxu0 %v5201_v41 }
 0x8db   :  { %7841 = vmatmul.f32.gmra.mxu3 %v5457_v27  ;;  %v6941_v10 = vpop.f32.mrf.mxu2 }
 0x8dc   :  { %v6942_v6 = vadd.f32 %v6941_v10, %v6732_v43  ;;  %v5331_v43 = vld [vmem:[#allocation2 + $0x6a] sm:$0xff] }
 0x8de   :  { %v7150_v4 = vpop.f32.mrf.mxu3  ;;  %v6738_v26 = vpop.f32.mrf.mxu1 }
 0x8df   :  { %v12175_v55 = vadd.f32 %v7150_v4, %v6942_v6  ;;  %v12177_v44 = vpop.f32.mrf.mxu0  ;;  %v5204_v6 = vld [vmem:[#allocation2 + $0x79] sm:$0xff] }
 0x8e0   :  { %14230 = vst [vmem:[#allocation41_spill] sm:$0xff] %v12177_v44  ;;  %7635 = vmatmul.f32.gmra.mxu2 %v5330_v18  ;;  %v5459_v4 = vld [vmem:[#allocation2 + $0x80] sm:$0xff] }
 0x8e1   :  { %14229 = vst [vmem:[#allocation23_spill] sm:$0xff] %v12175_v55  ;;  %7429 = vmatmul.f32.gmra.mxu1 %v5203_v5 }
 0x8e2   :  { %8047 = vmatmul.f32.gmra.mxu0 %v5202_v31 }
 0x8e3   :  { %7844 = vmatmul.f32.gmra.mxu3 %v5458_v39  ;;  %v6944_v11 = vpop.f32.mrf.mxu2 }
 0x8e4   :  { %v6945_v15 = vadd.f32 %v6944_v11, %v6735_v60  ;;  %v5332_v60 = vld [vmem:[#allocation2 + $0x7a] sm:$0xff] }
 0x8e5   :  { %v5205_v11 = vld [vmem:[#allocation2 + $0x81] sm:$0xff] }
 0x8e6   :  { %v7153_v41 = vpop.f32.mrf.mxu3  ;;  %v6741_v10 = vpop.f32.mrf.mxu1 }
 0x8e7   :  { %v12179_v16 = vadd.f32 %v7153_v41, %v6945_v15  ;;  %v12181_v27 = vpop.f32.mrf.mxu0  ;;  %v5460_v41 = vld [vmem:[#allocation2 + $0x90] sm:$0xff] }
 0x8e8   :  { %14232 = vst [vmem:[#allocation84_spill] sm:$0xff] %v12181_v27  ;;  %7638 = vmatmul.f32.gmra.mxu2 %v5331_v43 }
 0x8e9   :  { %14231 = vst [vmem:[#allocation24_spill] sm:$0xff] %v12179_v16  ;;  %7432 = vmatmul.f32.gmra.mxu1 %v5204_v6  ;;  %v6552_v16 = vld [vmem:[#allocation10 + $0x460] sm:$0xff] }
 0x8ea   :  { %8050 = vmatmul.f32.gmra.mxu0 %v5203_v5  ;;  %8231 = vmatpush.msra.mxu1 %v6552_v16  ;;  %v5334_v16 = vld [vmem:[#allocation2 + $0x92] sm:$0xff] }
 0x8eb   :  { %7847 = vmatmul.f32.gmra.mxu3 %v5459_v4  ;;  %v6947_v18 = vpop.f32.mrf.mxu2 }
 0x8ec   :  { %v6948_v55 = vadd.f32 %v6947_v18, %v6738_v26 }
 0x8ee   :  { %v7156_v31 = vpop.f32.mrf.mxu3  ;;  %v6744_v15 = vpop.f32.mrf.mxu1 }
 0x8ef   :  { %v12183_v44 = vadd.f32 %v7156_v31, %v6948_v55  ;;  %v12185_v39 = vpop.f32.mrf.mxu0  ;;  %v5333_v55 = vld [vmem:[#allocation2 + $0x82] sm:$0xff]  ;;  %v5206_v31 = vld [vmem:[#allocation2 + $0x91] sm:$0xff] }
 0x8f0   :  { %14234 = vst [vmem:[#allocation26_spill] sm:$0xff] %v12185_v39  ;;  %7641 = vmatmul.f32.gmra.mxu2 %v5332_v60 }
 0x8f1   :  { %14233 = vst [vmem:[#allocation25_spill] sm:$0xff] %v12183_v44  ;;  %7435 = vmatmul.f32.gmra.mxu1 %v5205_v11  ;;  %v5461_v44 = vld [vmem:[#allocation2 + $0x98] sm:$0xff] }
 0x8f2   :  { %8053 = vmatmul.f32.gmra.mxu0 %v5204_v6 }
 0x8f3   :  { %7850 = vmatmul.f32.gmra.mxu3 %v5460_v41  ;;  %v6950_v43 = vpop.f32.mrf.mxu2 }
 0x8f4   :  { %v6951_v5 = vadd.f32 %v6950_v43, %v6741_v10 }
 0x8f6   :  { %v7159_v4 = vpop.f32.mrf.mxu3  ;;  %v6747_v18 = vpop.f32.mrf.mxu1 }
 0x8f7   :  { %v12187_v27 = vadd.f32 %v7159_v4, %v6951_v5  ;;  %v12189_v26 = vpop.f32.mrf.mxu0  ;;  %v5207_v5 = vld [vmem:[#allocation2 + $0x99] sm:$0xff]  ;;  %v5462_v4 = vld [vmem:[#allocation2 + $0xa8] sm:$0xff] }
 0x8f8   :  { %14236 = vst [vmem:[#allocation28_spill] sm:$0xff] %v12189_v26  ;;  %7644 = vmatmul.f32.gmra.mxu2 %v5333_v55 }
 0x8f9   :  { %14235 = vst [vmem:[#allocation27_spill] sm:$0xff] %v12187_v27  ;;  %7438 = vmatmul.f32.gmra.mxu1 %v5206_v31 }
 0x8fa   :  { %8056 = vmatmul.f32.gmra.mxu0 %v5205_v11 }
 0x8fb   :  { %7853 = vmatmul.f32.gmra.mxu3 %v5461_v44  ;;  %v6953_v6 = vpop.f32.mrf.mxu2 }
 0x8fc   :  { %v6954_v60 = vadd.f32 %v6953_v6, %v6744_v15  ;;  %v5335_v15 = vld [vmem:[#allocation2 + $0x9a] sm:$0xff] }
 0x8fe   :  { %v7162_v41 = vpop.f32.mrf.mxu3  ;;  %v6750_v43 = vpop.f32.mrf.mxu1 }
 0x8ff   :  { %v12191_v39 = vadd.f32 %v7162_v41, %v6954_v60  ;;  %v12193_v10 = vpop.f32.mrf.mxu0  ;;  %v5208_v60 = vld [vmem:[#allocation2 + $0xa9] sm:$0xff] }
 0x900   :  { %14238 = vst [vmem:[#allocation30_spill] sm:$0xff] %v12193_v10  ;;  %7647 = vmatmul.f32.gmra.mxu2 %v5334_v16  ;;  %v5463_v41 = vld [vmem:[#allocation2 + $0xb0] sm:$0xff] }
 0x901   :  { %14237 = vst [vmem:[#allocation29_spill] sm:$0xff] %v12191_v39  ;;  %7441 = vmatmul.f32.gmra.mxu1 %v5207_v5 }
 0x902   :  { %8059 = vmatmul.f32.gmra.mxu0 %v5206_v31 }
 0x903   :  { %7856 = vmatmul.f32.gmra.mxu3 %v5462_v4  ;;  %v6956_v55 = vpop.f32.mrf.mxu2 }
 0x904   :  { %v6957_v27 = vadd.f32 %v6956_v55, %v6747_v18  ;;  %v5336_v18 = vld [vmem:[#allocation2 + $0xaa] sm:$0xff] }
 0x905   :  { %v5209_v55 = vld [vmem:[#allocation2 + $0xb1] sm:$0xff] }
 0x906   :  { %v7165_v11 = vpop.f32.mrf.mxu3  ;;  %v6753_v6 = vpop.f32.mrf.mxu1 }
 0x907   :  { %v12195_v26 = vadd.f32 %v7165_v11, %v6957_v27  ;;  %v12197_v44 = vpop.f32.mrf.mxu0  ;;  %v5464_v11 = vld [vmem:[#allocation2 + $0xc0] sm:$0xff] }
 0x908   :  { %14240 = vst [vmem:[#allocation33_spill] sm:$0xff] %v12197_v44  ;;  %7650 = vmatmul.f32.gmra.mxu2 %v5335_v15 }
 0x909   :  { %14239 = vst [vmem:[#allocation31_spill] sm:$0xff] %v12195_v26  ;;  %7444 = vmatmul.f32.gmra.mxu1 %v5208_v60  ;;  %v6551_v26 = vld [vmem:[#allocation10 + $0x458] sm:$0xff] }
 0x90a   :  { %8062 = vmatmul.f32.gmra.mxu0 %v5207_v5  ;;  %8232 = vmatpush.msra.mxu1 %v6551_v26  ;;  %v5338_v26 = vld [vmem:[#allocation2 + $0xc2] sm:$0xff] }
 0x90b   :  { %7859 = vmatmul.f32.gmra.mxu3 %v5463_v41  ;;  %v6959_v16 = vpop.f32.mrf.mxu2 }
 0x90c   :  { %v6960_v39 = vadd.f32 %v6959_v16, %v6750_v43 }
 0x90e   :  { %v7168_v31 = vpop.f32.mrf.mxu3  ;;  %v6756_v27 = vpop.f32.mrf.mxu1 }
 0x90f   :  { %v12199_v10 = vadd.f32 %v7168_v31, %v6960_v39  ;;  %v12201_v4 = vpop.f32.mrf.mxu0  ;;  %v5337_v39 = vld [vmem:[#allocation2 + $0xb2] sm:$0xff]  ;;  %v5210_v31 = vld [vmem:[#allocation2 + $0xc1] sm:$0xff] }
 0x910   :  { %14242 = vst [vmem:[#allocation37_spill] sm:$0xff] %v12201_v4  ;;  %7653 = vmatmul.f32.gmra.mxu2 %v5336_v18 }
 0x911   :  { %14241 = vst [vmem:[#allocation35_spill] sm:$0xff] %v12199_v10  ;;  %7447 = vmatmul.f32.gmra.mxu1 %v5209_v55  ;;  %v5465_v10 = vld [vmem:[#allocation2 + $0xc8] sm:$0xff] }
 0x912   :  { %8065 = vmatmul.f32.gmra.mxu0 %v5208_v60 }
 0x913   :  { %7862 = vmatmul.f32.gmra.mxu3 %v5464_v11  ;;  %v6962_v15 = vpop.f32.mrf.mxu2 }
 0x914   :  { %v6963_v5 = vadd.f32 %v6962_v15, %v6753_v6 }
 0x916   :  { %v7171_v41 = vpop.f32.mrf.mxu3  ;;  %v6759_v16 = vpop.f32.mrf.mxu1 }
 0x917   :  { %v12203_v44 = vadd.f32 %v7171_v41, %v6963_v5  ;;  %v12205_v43 = vpop.f32.mrf.mxu0  ;;  %v5211_v5 = vld [vmem:[#allocation2 + $0xc9] sm:$0xff]  ;;  %v5466_v41 = vld [vmem:[#allocation2 + $0xd8] sm:$0xff] }
 0x918   :  { %14244 = vst [vmem:[#allocation43_spill] sm:$0xff] %v12205_v43  ;;  %7656 = vmatmul.f32.gmra.mxu2 %v5337_v39 }
 0x919   :  { %14243 = vst [vmem:[#allocation40_spill] sm:$0xff] %v12203_v44  ;;  %7450 = vmatmul.f32.gmra.mxu1 %v5210_v31 }
 0x91a   :  { %8068 = vmatmul.f32.gmra.mxu0 %v5209_v55 }
 0x91b   :  { %7865 = vmatmul.f32.gmra.mxu3 %v5465_v10  ;;  %v6965_v60 = vpop.f32.mrf.mxu2 }
 0x91c   :  { %v6966_v18 = vadd.f32 %v6965_v60, %v6756_v27  ;;  %v5339_v27 = vld [vmem:[#allocation2 + $0xca] sm:$0xff] }
 0x91e   :  { %v7174_v11 = vpop.f32.mrf.mxu3  ;;  %v6762_v15 = vpop.f32.mrf.mxu1 }
 0x91f   :  { %v12207_v4 = vadd.f32 %v7174_v11, %v6966_v18  ;;  %v12209_v6 = vpop.f32.mrf.mxu0  ;;  %v5212_v18 = vld [vmem:[#allocation2 + $0xd9] sm:$0xff] }
 0x920   :  { %14246 = vst [vmem:[#allocation49_spill] sm:$0xff] %v12209_v6  ;;  %7659 = vmatmul.f32.gmra.mxu2 %v5338_v26  ;;  %v5467_v11 = vld [vmem:[#allocation2 + $0xe0] sm:$0xff] }
 0x921   :  { %14245 = vst [vmem:[#allocation46_spill] sm:$0xff] %v12207_v4  ;;  %7453 = vmatmul.f32.gmra.mxu1 %v5211_v5 }
 0x922   :  { %8071 = vmatmul.f32.gmra.mxu0 %v5210_v31  ;;  %v7201_v31 = vadd.f32 %v11953_v46, %v11948_v40  ;;  %v7204_v40 = vadd.f32 %v11958_v34, %v11951_v35 }
 0x923   :  { %7868 = vmatmul.f32.gmra.mxu3 %v5466_v41  ;;  %v6968_v39 = vpop.f32.mrf.mxu2 }
 0x924   :  { %v6969_v44 = vadd.f32 %v6968_v39, %v6759_v16  ;;  %v5340_v39 = vld [vmem:[#allocation2 + $0xda] sm:$0xff] }
 0x926   :  { %v7177_v55 = vpop.f32.mrf.mxu3  ;;  %v7409_v60 = vpop.f32.mrf.mxu1 }
 0x927   :  { %v12211_v43 = vadd.f32 %v7177_v55, %v6969_v44  ;;  %v12213_v10 = vpop.f32.mrf.mxu0 }
 0x928   :  { %14248 = vst [vmem:[#allocation55_spill] sm:$0xff] %v12213_v10  ;;  %7662 = vmatmul.f32.gmra.mxu2 %v5339_v27  ;;  %v5213_v27 = vld [vmem:[#allocation2 + $0xe1] sm:$0xff]  ;;  %v5468_v10 = vld [vmem:[#allocation2 + $0xf0] sm:$0xff] }
 0x929   :  { %14247 = vst [vmem:[#allocation52_spill] sm:$0xff] %v12211_v43  ;;  %7456 = vmatmul.f32.gmra.mxu1 %v5212_v18  ;;  %v7410_v43 = vadd.f32 %v7409_v60, %v7201_v31 }
 0x92a   :  { %8074 = vmatmul.f32.gmra.mxu0 %v5211_v5 }
 0x92b   :  { %7871 = vmatmul.f32.gmra.mxu3 %v5467_v11  ;;  %v6971_v26 = vpop.f32.mrf.mxu2  ;;  %v6550_v11 = vld [vmem:[#allocation10 + $0x450] sm:$0xff] }
 0x92c   :  { %v6972_v4 = vadd.f32 %v6971_v26, %v6762_v15  ;;  %8233 = vmatpush.msra.mxu1 %v6550_v11 }
 0x92e   :  { %v7180_v41 = vpop.f32.mrf.mxu3  ;;  %v7412_v55 = vpop.f32.mrf.mxu1 }
 0x92f   :  { %v12217_v16 = vadd.f32 %v7180_v41, %v6972_v4  ;;  %v12219_v44 = vpop.f32.mrf.mxu0  ;;  %v5341_v41 = vld [vmem:[#allocation2 + $0xe2] sm:$0xff]  ;;  %v7413_v31 = vadd.f32 %v7412_v55, %v7204_v40  ;;  %v5215_v55 = vld [vmem:[#allocation2 + $0xf9] sm:$0xff] }
 0x930   :  { %14250 = vst [vmem:[#allocation61_spill] sm:$0xff] %v12219_v44  ;;  %7665 = vmatmul.f32.gmra.mxu2 %v5340_v39  ;;  %v5214_v39 = vld [vmem:[#allocation2 + $0xf1] sm:$0xff]  ;;  %v5470_v40 = vld [vmem:[#allocation2 + $0x108] sm:$0xff] }
 0x931   :  { %14249 = vst [vmem:[#allocation58_spill] sm:$0xff] %v12217_v16  ;;  %7459 = vmatmul.f32.gmra.mxu1 %v5213_v27 }
 0x932   :  { %8077 = vmatmul.f32.gmra.mxu0 %v5212_v18  ;;  %v5469_v18 = vld [vmem:[#allocation2 + $0xf8] sm:$0xff] }
 0x933   :  { %7874 = vmatmul.f32.gmra.mxu3 %v5468_v10  ;;  %v7618_v5 = vpop.f32.mrf.mxu2 }
 0x934   :  { %v7619_v15 = vadd.f32 %v7618_v5, %v7410_v43  ;;  %v7207_v5 = vadd.f32 %v11963_v45, %v11956_v58 }
 0x936   :  { %v7827_v46 = vpop.f32.mrf.mxu3  ;;  %v7415_v60 = vpop.f32.mrf.mxu1 }
 0x937   :  { %v12223_v4 = vadd.f32 %v7827_v46, %v7619_v15  ;;  %v12225_v26 = vpop.f32.mrf.mxu0  ;;  %v5342_v15 = vld [vmem:[#allocation2 + $0xf2] sm:$0xff] }
 0x938   :  { %14251 = vst [vmem:[#allocation64_spill] sm:$0xff] %v12225_v26  ;;  %7668 = vmatmul.f32.gmra.mxu2 %v5341_v41  ;;  %v7416_v26 = vadd.f32 %v7415_v60, %v7207_v5  ;;  %v5216_v60 = vld [vmem:[#allocation2 + $0x109] sm:$0xff] }
 0x939   :  { %7462 = vmatmul.f32.gmra.mxu1 %v5214_v39  ;;  %v5471_v5 = vld [vmem:[#allocation2 + $0x110] sm:$0xff] }
 0x93a   :  { %8080 = vmatmul.f32.gmra.mxu0 %v5213_v27 }
 0x93b   :  { %7877 = vmatmul.f32.gmra.mxu3 %v5469_v18  ;;  %v7621_v10 = vpop.f32.mrf.mxu2 }
 0x93c   :  { %v7622_v43 = vadd.f32 %v7621_v10, %v7413_v31  ;;  %v7210_v31 = vadd.f32 %v11968_v21, %v11961_v53  ;;  %v5343_v10 = vld [vmem:[#allocation2 + $0xfa] sm:$0xff] }
 0x93e   :  { %v7830_v35 = vpop.f32.mrf.mxu3  ;;  %v7418_v46 = vpop.f32.mrf.mxu1 }
 0x93f   :  { %v12229_v34 = vadd.f32 %v7830_v35, %v7622_v43  ;;  %v12231_v11 = vpop.f32.mrf.mxu0  ;;  %v7419_v35 = vadd.f32 %v7418_v46, %v7210_v31  ;;  %v5217_v46 = vld [vmem:[#allocation2 + $0x111] sm:$0xff]  ;;  %v5472_v31 = vld [vmem:[#allocation2 + $0x120] sm:$0xff] }
 0x940   :  { %7671 = vmatmul.f32.gmra.mxu2 %v5342_v15 }
 0x941   :  { %7465 = vmatmul.f32.gmra.mxu1 %v5215_v55 }
 0x942   :  { %8083 = vmatmul.f32.gmra.mxu0 %v5214_v39 }
 0x943   :  { %7880 = vmatmul.f32.gmra.mxu3 %v5470_v40  ;;  %v7624_v27 = vpop.f32.mrf.mxu2 }
 0x944   :  { %v7625_v41 = vadd.f32 %v7624_v27, %v7416_v26  ;;  %v7213_v26 = vadd.f32 %v11973_v7, %v11966_v0  ;;  %v5344_v27 = vld [vmem:[#allocation2 + $0x10a] sm:$0xff]  ;;  %v7216_v0 = vadd.f32 %v11978_v8, %v11971_v63 }
 0x946   :  { %v7833_v58 = vpop.f32.mrf.mxu3  ;;  %v7421_v43 = vpop.f32.mrf.mxu1 }
 0x947   :  { %v12235_v45 = vadd.f32 %v7833_v58, %v7625_v41  ;;  %v12237_v18 = vpop.f32.mrf.mxu0  ;;  %v7422_v58 = vadd.f32 %v7421_v43, %v7213_v26 }
 0x948   :  { %7674 = vmatmul.f32.gmra.mxu2 %v5343_v10  ;;  %v6549_v10 = vld [vmem:[#allocation10 + $0x448] sm:$0xff] }
 0x949   :  { %7468 = vmatmul.f32.gmra.mxu1 %v5216_v60 }
 0x94a   :  { %8086 = vmatmul.f32.gmra.mxu0 %v5215_v55  ;;  %8234 = vmatpush.msra.mxu1 %v6549_v10  ;;  %v5346_v10 = vld [vmem:[#allocation2 + $0x122] sm:$0xff] }
 0x94b   :  { %7883 = vmatmul.f32.gmra.mxu3 %v5471_v5  ;;  %v7627_v39 = vpop.f32.mrf.mxu2 }
 0x94c   :  { %v7628_v15 = vadd.f32 %v7627_v39, %v7419_v35 }
 0x94e   :  { %v7836_v53 = vpop.f32.mrf.mxu3  ;;  %v7424_v41 = vpop.f32.mrf.mxu1 }
 0x94f   :  { %v12241_v21 = vadd.f32 %v7836_v53, %v7628_v15  ;;  %v12243_v40 = vpop.f32.mrf.mxu0  ;;  %v5345_v15 = vld [vmem:[#allocation2 + $0x112] sm:$0xff]  ;;  %v7425_v26 = vadd.f32 %v7424_v41, %v7216_v0  ;;  %v5218_v53 = vld [vmem:[#allocation2 + $0x121] sm:$0xff]  ;;  %v5219_v41 = vld [vmem:[#allocation2 + $0x129] sm:$0xff] }
 0x950   :  { %7677 = vmatmul.f32.gmra.mxu2 %v5344_v27  ;;  %v5474_v0 = vld [vmem:[#allocation2 + $0x138] sm:$0xff] }
 0x951   :  { %7471 = vmatmul.f32.gmra.mxu1 %v5217_v46 }
 0x952   :  { %8089 = vmatmul.f32.gmra.mxu0 %v5216_v60  ;;  %v5473_v60 = vld [vmem:[#allocation2 + $0x128] sm:$0xff] }
 0x953   :  { %7886 = vmatmul.f32.gmra.mxu3 %v5472_v31  ;;  %v7630_v55 = vpop.f32.mrf.mxu2  ;;  %v7219_v31 = vadd.f32 %v11983_v24, %v11976_v37 }
 0x954   :  { %v7631_v35 = vadd.f32 %v7630_v55, %v7422_v58 }
 0x956   :  { %v7839_v7 = vpop.f32.mrf.mxu3  ;;  %v7427_v43 = vpop.f32.mrf.mxu1 }
 0x957   :  { %v12247_v5 = vadd.f32 %v7839_v7, %v7631_v35  ;;  %v12249_v39 = vpop.f32.mrf.mxu0  ;;  %v7428_v7 = vadd.f32 %v7427_v43, %v7219_v31  ;;  %v5220_v43 = vld [vmem:[#allocation2 + $0x139] sm:$0xff] }
 0x958   :  { %7680 = vmatmul.f32.gmra.mxu2 %v5345_v15  ;;  %v5475_v31 = vld [vmem:[#allocation2 + $0x140] sm:$0xff] }
 0x959   :  { %7474 = vmatmul.f32.gmra.mxu1 %v5218_v53 }
 0x95a   :  { %8092 = vmatmul.f32.gmra.mxu0 %v5217_v46 }
 0x95b   :  { %7889 = vmatmul.f32.gmra.mxu3 %v5473_v60  ;;  %v7633_v27 = vpop.f32.mrf.mxu2 }
 0x95c   :  { %v7634_v58 = vadd.f32 %v7633_v27, %v7425_v26  ;;  %v7222_v26 = vadd.f32 %v11988_v57, %v11981_v32  ;;  %v5347_v27 = vld [vmem:[#allocation2 + $0x12a] sm:$0xff] }
 0x95e   :  { %v7842_v63 = vpop.f32.mrf.mxu3  ;;  %v7430_v35 = vpop.f32.mrf.mxu1 }
 0x95f   :  { %v12253_v8 = vadd.f32 %v7842_v63, %v7634_v58  ;;  %v12255_v55 = vpop.f32.mrf.mxu0  ;;  %v7431_v63 = vadd.f32 %v7430_v35, %v7222_v26  ;;  %v5221_v35 = vld [vmem:[#allocation2 + $0x141] sm:$0xff]  ;;  %v5476_v26 = vld [vmem:[#allocation2 + $0x150] sm:$0xff] }
 0x960   :  { %7683 = vmatmul.f32.gmra.mxu2 %v5346_v10 }
 0x961   :  { %7477 = vmatmul.f32.gmra.mxu1 %v5219_v41 }
 0x962   :  { %8095 = vmatmul.f32.gmra.mxu0 %v5218_v53 }
 0x963   :  { %7892 = vmatmul.f32.gmra.mxu3 %v5474_v0  ;;  %v7636_v46 = vpop.f32.mrf.mxu2 }
 0x964   :  { %v7637_v15 = vadd.f32 %v7636_v46, %v7428_v7  ;;  %v7225_v7 = vadd.f32 %v11993_v59, %v11986_v52  ;;  %v5348_v46 = vld [vmem:[#allocation2 + $0x13a] sm:$0xff]  ;;  %v7228_v52 = vadd.f32 %v11998_v28, %v11991_v36 }
 0x966   :  { %v7845_v37 = vpop.f32.mrf.mxu3  ;;  %v7433_v58 = vpop.f32.mrf.mxu1 }
 0x967   :  { %v12259_v24 = vadd.f32 %v7845_v37, %v7637_v15  ;;  %v12261_v60 = vpop.f32.mrf.mxu0  ;;  %v7434_v37 = vadd.f32 %v7433_v58, %v7225_v7 }
 0x968   :  { %7686 = vmatmul.f32.gmra.mxu2 %v5347_v27  ;;  %v6548_v27 = vld [vmem:[#allocation10 + $0x440] sm:$0xff] }
 0x969   :  { %7480 = vmatmul.f32.gmra.mxu1 %v5220_v43 }
 0x96a   :  { %8098 = vmatmul.f32.gmra.mxu0 %v5219_v41  ;;  %8235 = vmatpush.msra.mxu1 %v6548_v27  ;;  %v5350_v27 = vld [vmem:[#allocation2 + $0x152] sm:$0xff] }
 0x96b   :  { %7895 = vmatmul.f32.gmra.mxu3 %v5475_v31  ;;  %v7639_v53 = vpop.f32.mrf.mxu2 }
 0x96c   :  { %v7640_v10 = vadd.f32 %v7639_v53, %v7431_v63 }
 0x96e   :  { %v7848_v32 = vpop.f32.mrf.mxu3  ;;  %v7436_v15 = vpop.f32.mrf.mxu1 }
 0x96f   :  { %v12265_v57 = vadd.f32 %v7848_v32, %v7640_v10  ;;  %v12267_v0 = vpop.f32.mrf.mxu0  ;;  %v5349_v10 = vld [vmem:[#allocation2 + $0x142] sm:$0xff]  ;;  %v7437_v7 = vadd.f32 %v7436_v15, %v7228_v52  ;;  %v5222_v32 = vld [vmem:[#allocation2 + $0x151] sm:$0xff]  ;;  %v5223_v15 = vld [vmem:[#allocation2 + $0x159] sm:$0xff] }
 0x970   :  { %7689 = vmatmul.f32.gmra.mxu2 %v5348_v46  ;;  %v5478_v52 = vld [vmem:[#allocation2 + $0x168] sm:$0xff] }
 0x971   :  { %7483 = vmatmul.f32.gmra.mxu1 %v5221_v35 }
 0x972   :  { %8101 = vmatmul.f32.gmra.mxu0 %v5220_v43  ;;  %v5477_v43 = vld [vmem:[#allocation2 + $0x158] sm:$0xff] }
 0x973   :  { %7898 = vmatmul.f32.gmra.mxu3 %v5476_v26  ;;  %v7642_v41 = vpop.f32.mrf.mxu2  ;;  %v7231_v26 = vadd.f32 %v12003_v17, %v11996_v48 }
 0x974   :  { %v7643_v63 = vadd.f32 %v7642_v41, %v7434_v37 }
 0x976   :  { %v7851_v59 = vpop.f32.mrf.mxu3  ;;  %v7439_v58 = vpop.f32.mrf.mxu1 }
 0x977   :  { %v12271_v31 = vadd.f32 %v7851_v59, %v7643_v63  ;;  %v12273_v53 = vpop.f32.mrf.mxu0  ;;  %v7440_v59 = vadd.f32 %v7439_v58, %v7231_v26  ;;  %v5224_v58 = vld [vmem:[#allocation2 + $0x169] sm:$0xff] }
 0x978   :  { %7692 = vmatmul.f32.gmra.mxu2 %v5349_v10  ;;  %v5479_v26 = vld [vmem:[#allocation2 + $0x170] sm:$0xff] }
 0x979   :  { %7486 = vmatmul.f32.gmra.mxu1 %v5222_v32 }
 0x97a   :  { %8104 = vmatmul.f32.gmra.mxu0 %v5221_v35 }
 0x97b   :  { %7901 = vmatmul.f32.gmra.mxu3 %v5477_v43  ;;  %v7645_v46 = vpop.f32.mrf.mxu2 }
 0x97c   :  { %v7646_v37 = vadd.f32 %v7645_v46, %v7437_v7  ;;  %v7234_v7 = vadd.f32 %v12008_v29, %v12001_v13  ;;  %v5351_v46 = vld [vmem:[#allocation2 + $0x15a] sm:$0xff] }
 0x97e   :  { %v7854_v36 = vpop.f32.mrf.mxu3  ;;  %v7442_v63 = vpop.f32.mrf.mxu1 }
 0x97f   :  { %v12277_v28 = vadd.f32 %v7854_v36, %v7646_v37  ;;  %v12279_v41 = vpop.f32.mrf.mxu0  ;;  %v7443_v36 = vadd.f32 %v7442_v63, %v7234_v7  ;;  %v5225_v63 = vld [vmem:[#allocation2 + $0x171] sm:$0xff]  ;;  %v5480_v7 = vld [vmem:[#allocation2 + $0x180] sm:$0xff] }
 0x980   :  { %7695 = vmatmul.f32.gmra.mxu2 %v5350_v27 }
 0x981   :  { %7489 = vmatmul.f32.gmra.mxu1 %v5223_v15 }
 0x982   :  { %8107 = vmatmul.f32.gmra.mxu0 %v5222_v32 }
 0x983   :  { %7904 = vmatmul.f32.gmra.mxu3 %v5478_v52  ;;  %v7648_v35 = vpop.f32.mrf.mxu2 }
 0x984   :  { %v7649_v10 = vadd.f32 %v7648_v35, %v7440_v59  ;;  %v7237_v59 = vadd.f32 %v12013_v50, %v12006_v56  ;;  %v5352_v35 = vld [vmem:[#allocation2 + $0x16a] sm:$0xff]  ;;  %v7240_v56 = vadd.f32 %v12018_v1, %v12011_v3 }
 0x986   :  { %v7857_v48 = vpop.f32.mrf.mxu3  ;;  %v7445_v37 = vpop.f32.mrf.mxu1 }
 0x987   :  { %v12283_v17 = vadd.f32 %v7857_v48, %v7649_v10  ;;  %v12285_v43 = vpop.f32.mrf.mxu0  ;;  %v7446_v48 = vadd.f32 %v7445_v37, %v7237_v59 }
 0x988   :  { %7698 = vmatmul.f32.gmra.mxu2 %v5351_v46  ;;  %v6547_v46 = vld [vmem:[#allocation10 + $0x438] sm:$0xff] }
 0x989   :  { %7492 = vmatmul.f32.gmra.mxu1 %v5224_v58 }
 0x98a   :  { %8110 = vmatmul.f32.gmra.mxu0 %v5223_v15  ;;  %8236 = vmatpush.msra.mxu1 %v6547_v46  ;;  %v5354_v46 = vld [vmem:[#allocation2 + $0x182] sm:$0xff] }
 0x98b   :  { %7907 = vmatmul.f32.gmra.mxu3 %v5479_v26  ;;  %v7651_v32 = vpop.f32.mrf.mxu2 }
 0x98c   :  { %v7652_v27 = vadd.f32 %v7651_v32, %v7443_v36 }
 0x98e   :  { %v7860_v13 = vpop.f32.mrf.mxu3  ;;  %v7448_v10 = vpop.f32.mrf.mxu1 }
 0x98f   :  { %v12289_v29 = vadd.f32 %v7860_v13, %v7652_v27  ;;  %v12291_v52 = vpop.f32.mrf.mxu0  ;;  %v5353_v27 = vld [vmem:[#allocation2 + $0x172] sm:$0xff]  ;;  %v7449_v59 = vadd.f32 %v7448_v10, %v7240_v56  ;;  %v5226_v13 = vld [vmem:[#allocation2 + $0x181] sm:$0xff]  ;;  %v5227_v10 = vld [vmem:[#allocation2 + $0x189] sm:$0xff] }
 0x990   :  { %7701 = vmatmul.f32.gmra.mxu2 %v5352_v35 }
 0x991   :  { %7495 = vmatmul.f32.gmra.mxu1 %v5225_v63 }
 0x992   :  { %8113 = vmatmul.f32.gmra.mxu0 %v5224_v58  ;;  %v5481_v58 = vld [vmem:[#allocation2 + $0x188] sm:$0xff] }
 0x993   :  { %7910 = vmatmul.f32.gmra.mxu3 %v5480_v7  ;;  %v7654_v15 = vpop.f32.mrf.mxu2  ;;  %v7243_v7 = vadd.f32 %v12024_v54, %v12016_v51  ;;  %v7246_v51 = vadd.f32 %v12029_v14, %v12022_v61 }
 0x994   :  { %v7655_v36 = vadd.f32 %v7654_v15, %v7446_v48 }
 0x996   :  { %v7863_v50 = vpop.f32.mrf.mxu3  ;;  %v7451_v37 = vpop.f32.mrf.mxu1 }
 0x997   :  { %v12295_v26 = vadd.f32 %v7863_v50, %v7655_v36  ;;  %v12297_v32 = vpop.f32.mrf.mxu0  ;;  %v7452_v50 = vadd.f32 %v7451_v37, %v7243_v7 }
 0x998   :  { %7704 = vmatmul.f32.gmra.mxu2 %v5353_v27 }
 0x999   :  { %7498 = vmatmul.f32.gmra.mxu1 %v5226_v13 }
 0x99a   :  { %8116 = vmatmul.f32.gmra.mxu0 %v5225_v63  ;;  %v12305_v63 = vld [vmem:[#allocation2 + $0x1b0] sm:$0xff] }
 0x99b   :  { %7913 = vmatmul.f32.gmra.mxu3 %v5481_v58  ;;  %v7657_v35 = vpop.f32.mrf.mxu2 }
 0x99c   :  { %v7658_v48 = vadd.f32 %v7657_v35, %v7449_v59  ;;  %v5355_v35 = vld [vmem:[#allocation2 + $0x18a] sm:$0xff] }
 0x99e   :  { %v7866_v3 = vpop.f32.mrf.mxu3  ;;  %v7454_v36 = vpop.f32.mrf.mxu1 }
 0x99f   :  { %v12301_v1 = vadd.f32 %v7866_v3, %v7658_v48  ;;  %v12303_v15 = vpop.f32.mrf.mxu0  ;;  %v7455_v48 = vadd.f32 %v7454_v36, %v7246_v51  ;;  %v5229_v51 = vld [vmem:[#allocation2 + $0x1d1] sm:$0xff] }
 0x9a0   :  { %7707 = vmatmul.f32.gmra.mxu2 %v5354_v46  ;;  %v7249_v46 = vadd.f32 %v12033_v23, %v12027_v9  ;;  %v7252_v9 = vadd.f32 %v12037_v2, %v12031_v22  ;;  %v7255_v22 = vadd.f32 %v12041_v38, %v12035_v12 }
 0x9a1   :  { %7501 = vmatmul.f32.gmra.mxu1 %v5227_v10 }
 0x9a2   :  { %8119 = vmatmul.f32.gmra.mxu0 %v5226_v13  ;;  %v5228_v13 = vld [vmem:[#allocation2 + $0x1c9] sm:$0xff] }
 0x9a3   :  { %7916 = vmatmul.f32.gmra.mxu3 %v12305_v63  ;;  %v7660_v56 = vpop.f32.mrf.mxu2 }
 0x9a4   :  { %v7661_v27 = vadd.f32 %v7660_v56, %v7452_v50  ;;  %v5356_v56 = vld [vmem:[#allocation2 + $0x1ca] sm:$0xff] }
 0x9a6   :  { %v7869_v54 = vpop.f32.mrf.mxu3  ;;  %v7457_v37 = vpop.f32.mrf.mxu1 }
 0x9a7   :  { %v12310_v59 = vadd.f32 %v7869_v54, %v7661_v27  ;;  %v12312_v58 = vpop.f32.mrf.mxu0  ;;  %v5610_v27 = vld [vmem:[#allocation2 + $0x199] sm:$0xff]  ;;  %v7458_v36 = vadd.f32 %v7457_v37, %v7249_v46  ;;  %v5611_v37 = vld [vmem:[#allocation2 + $0x1a1] sm:$0xff] }
 0x9a8   :  { %7710 = vmatmul.f32.gmra.mxu2 %v5355_v35 }
 0x9a9   :  { %7504 = vmatmul.f32.gmra.mxu1 %v5228_v13 }
 0x9aa   :  { %8122 = vmatmul.f32.gmra.mxu0 %v5227_v10  ;;  %v5484_v10 = vld [vmem:[#allocation2 + $0x1e0] sm:$0xff] }
 0x9ab   :  { %7919 = vmatmul.f32.gmra.mxu3 %v12305_v63  ;;  %v7663_v7 = vpop.f32.mrf.mxu2 }
 0x9ac   :  { %v7664_v3 = vadd.f32 %v7663_v7, %v7455_v48  ;;  %v6546_v48 = vld [vmem:[#allocation10 + $0x430] sm:$0xff] }
 0x9ad   :  { %8237 = vmatpush.msra.mxu1 %v6546_v48 }
 0x9ae   :  { %v7872_v61 = vpop.f32.mrf.mxu3  ;;  %v7460_v54 = vpop.f32.mrf.mxu1 }
 0x9af   :  { %v12317_v14 = vadd.f32 %v7872_v61, %v7664_v3  ;;  %v12319_v50 = vpop.f32.mrf.mxu0  ;;  %v5357_v61 = vld [vmem:[#allocation2 + $0x1d2] sm:$0xff] }
 0x9b0   :  { %7713 = vmatmul.f32.gmra.mxu2 %v5356_v56  ;;  %v7461_v56 = vadd.f32 %v7460_v54, %v7252_v9  ;;  %v5231_v54 = vld [vmem:[#allocation2 + $0x1e9] sm:$0xff]  ;;  %v5486_v9 = vld [vmem:[#allocation2 + $0x1f8] sm:$0xff] }
 0x9b1   :  { %14252 = vst [vmem:[#allocation67_spill] sm:$0xff] %v12317_v14  ;;  %7507 = vmatmul.f32.gmra.mxu1 %v5229_v51  ;;  %v5485_v51 = vld [vmem:[#allocation2 + $0x1e8] sm:$0xff] }
 0x9b2   :  { %8125 = vmatmul.f32.gmra.mxu0 %v5610_v27  ;;  %v5230_v27 = vld [vmem:[#allocation2 + $0x1e1] sm:$0xff] }
 0x9b3   :  { %7922 = vmatmul.f32.gmra.mxu3 %v5484_v10  ;;  %v7666_v35 = vpop.f32.mrf.mxu2  ;;  %v5740_v14 = vld [vmem:[#allocation2 + $0x1e2] sm:$0xff] }
 0x9b4   :  { %v7667_v13 = vadd.f32 %v7666_v35, %v7458_v36 }
 0x9b6   :  { %v7875_v23 = vpop.f32.mrf.mxu3  ;;  %v7463_v46 = vpop.f32.mrf.mxu1 }
 0x9b7   :  { %v12323_v7 = vadd.f32 %v7875_v23, %v7667_v13  ;;  %v12325_v3 = vpop.f32.mrf.mxu0  ;;  %v5358_v13 = vld [vmem:[#allocation2 + $0x1e2] sm:$0xff]  ;;  %v7464_v16 = vadd.f32 %v7463_v46, %v7255_v22  ;;  %v5232_v46 = vld [vmem:[#allocation2 + $0x1f9] sm:$0xff] }
 0x9b8   :  { %14254 = vst [vmem:[#allocation72_spill] sm:$0xff] %v12325_v3  ;;  %7716 = vmatmul.f32.gmra.mxu2 %v5357_v61  ;;  %v5487_v22 = vld [vmem:[#allocation2 + $0x200] sm:$0xff] }
 0x9b9   :  { %14253 = vst [vmem:[#allocation70_spill] sm:$0xff] %v12323_v7  ;;  %7510 = vmatmul.f32.gmra.mxu1 %v5230_v27  ;;  %v5738_v7 = vld [vmem:[#allocation2 + $0x19a] sm:$0xff]  ;;  %v5739_v3 = vld [vmem:[#allocation2 + $0x1a2] sm:$0xff] }
 0x9ba   :  { %8128 = vmatmul.f32.gmra.mxu0 %v5611_v37 }
 0x9bb   :  { %7925 = vmatmul.f32.gmra.mxu3 %v5485_v51  ;;  %v7669_v36 = vpop.f32.mrf.mxu2 }
 0x9bc   :  { %v7670_v10 = vadd.f32 %v7669_v36, %v7461_v56  ;;  %v7258_v56 = vadd.f32 %v12045_v19, %v12039_v49  ;;  %v5359_v36 = vld [vmem:[#allocation2 + $0x1ea] sm:$0xff] }
 0x9be   :  { %v7878_v2 = vpop.f32.mrf.mxu3  ;;  %v7466_v23 = vpop.f32.mrf.mxu1 }
 0x9bf   :  { %v12329_v35 = vadd.f32 %v7878_v2, %v7670_v10  ;;  %v12331_v48 = vpop.f32.mrf.mxu0  ;;  %v7467_v2 = vadd.f32 %v7466_v23, %v7258_v56  ;;  %v5233_v23 = vld [vmem:[#allocation2 + $0x201] sm:$0xff]  ;;  %v5488_v56 = vld [vmem:[#allocation2 + $0x210] sm:$0xff] }
 0x9c0   :  { %14256 = vst [vmem:[#allocation76_spill] sm:$0xff] %v12331_v48  ;;  %7719 = vmatmul.f32.gmra.mxu2 %v5358_v13 }
 0x9c1   :  { %14255 = vst [vmem:[#allocation74_spill] sm:$0xff] %v12329_v35  ;;  %7513 = vmatmul.f32.gmra.mxu1 %v5231_v54 }
 0x9c2   :  { %8131 = vmatmul.f32.gmra.mxu0 %v5230_v27 }
 0x9c3   :  { %7928 = vmatmul.f32.gmra.mxu3 %v5486_v9  ;;  %v7672_v61 = vpop.f32.mrf.mxu2 }
 0x9c4   :  { %v7673_v37 = vadd.f32 %v7672_v61, %v7464_v16  ;;  %v7261_v16 = vadd.f32 %v12049_v25, %v12043_v62  ;;  %v5360_v61 = vld [vmem:[#allocation2 + $0x1fa] sm:$0xff]  ;;  %v7264_v62 = vadd.f32 %v12053_v47, %v12047_v30 }
 0x9c6   :  { %v7881_v12 = vpop.f32.mrf.mxu3  ;;  %v7469_v10 = vpop.f32.mrf.mxu1 }
 0x9c7   :  { %v12335_v38 = vadd.f32 %v7881_v12, %v7673_v37  ;;  %v12337_v51 = vpop.f32.mrf.mxu0  ;;  %v7470_v12 = vadd.f32 %v7469_v10, %v7261_v16 }
 0x9c8   :  { %14258 = vst [vmem:[#allocation78_spill] sm:$0xff] %v12337_v51  ;;  %7722 = vmatmul.f32.gmra.mxu2 %v5359_v36  ;;  %v6545_v36 = vld [vmem:[#allocation10 + $0x428] sm:$0xff] }
 0x9c9   :  { %14257 = vst [vmem:[#allocation77_spill] sm:$0xff] %v12335_v38  ;;  %7516 = vmatmul.f32.gmra.mxu1 %v5232_v46  ;;  %v5710_v51 = vld [vmem:[#allocation2 + $0x4a] sm:$0xff] }
 0x9ca   :  { %8134 = vmatmul.f32.gmra.mxu0 %v5231_v54  ;;  %8238 = vmatpush.msra.mxu1 %v6545_v36 }
 0x9cb   :  { %7931 = vmatmul.f32.gmra.mxu3 %v5487_v22  ;;  %v7675_v27 = vpop.f32.mrf.mxu2 }
 0x9cc   :  { %v7676_v13 = vadd.f32 %v7675_v27, %v7467_v2 }
 0x9ce   :  { %v7884_v49 = vpop.f32.mrf.mxu3  ;;  %v7472_v37 = vpop.f32.mrf.mxu1 }
 0x9cf   :  { %v12341_v19 = vadd.f32 %v7884_v49, %v7676_v13  ;;  %v12343_v9 = vpop.f32.mrf.mxu0  ;;  %v5361_v13 = vld [vmem:[#allocation2 + $0x202] sm:$0xff]  ;;  %v7473_v16 = vadd.f32 %v7472_v37, %v7264_v62  ;;  %v5234_v49 = vld [vmem:[#allocation2 + $0x211] sm:$0xff]  ;;  %v5235_v37 = vld [vmem:[#allocation2 + $0x219] sm:$0xff] }
 0x9d0   :  { %14260 = vst [vmem:[#allocation79_spill] sm:$0xff] %v12343_v9  ;;  %7725 = vmatmul.f32.gmra.mxu2 %v5360_v61  ;;  %v5490_v62 = vld [vmem:[#allocation2 + $0x228] sm:$0xff] }
 0x9d1   :  { %14259 = vst [vmem:[#allocation39_spill] sm:$0xff] %v12341_v19  ;;  %7519 = vmatmul.f32.gmra.mxu1 %v5233_v23 }
 0x9d2   :  { %8137 = vmatmul.f32.gmra.mxu0 %v5232_v46  ;;  %v5489_v46 = vld [vmem:[#allocation2 + $0x218] sm:$0xff] }
 0x9d3   :  { %7934 = vmatmul.f32.gmra.mxu3 %v5488_v56  ;;  %v7678_v54 = vpop.f32.mrf.mxu2  ;;  %v14263_v56 = vld [vmem:[#allocation36_spill] sm:$0xff] }
 0x9d4   :  { %v7679_v2 = vadd.f32 %v7678_v54, %v7470_v12  ;;  %v14264_v54 = vld [vmem:[#allocation15_spill] sm:$0xff] }
 0x9d5   :  { %v7267_v36 = vadd.f32 %v14264_v54, %v14263_v56 }
 0x9d6   :  { %v7887_v25 = vpop.f32.mrf.mxu3  ;;  %v7475_v10 = vpop.f32.mrf.mxu1 }
 0x9d7   :  { %v12347_v22 = vadd.f32 %v7887_v25, %v7679_v2  ;;  %v12349_v27 = vpop.f32.mrf.mxu0  ;;  %v5362_v25 = vld [vmem:[#allocation2 + $0x212] sm:$0xff]  ;;  %v7476_v6 = vadd.f32 %v7475_v10, %v7267_v36  ;;  %v5236_v10 = vld [vmem:[#allocation2 + $0x229] sm:$0xff] }
 0x9d8   :  { %14262 = vst [vmem:[#allocation34_spill] sm:$0xff] %v12349_v27  ;;  %7728 = vmatmul.f32.gmra.mxu2 %v5361_v13  ;;  %v5491_v36 = vld [vmem:[#allocation2 + $0x230] sm:$0xff] }
 0x9d9   :  { %14261 = vst [vmem:[#allocation80_spill] sm:$0xff] %v12347_v22  ;;  %7522 = vmatmul.f32.gmra.mxu1 %v5234_v49 }
 0x9da   :  { %8140 = vmatmul.f32.gmra.mxu0 %v5233_v23 }
 0x9db   :  { %7937 = vmatmul.f32.gmra.mxu3 %v5489_v46  ;;  %v7681_v61 = vpop.f32.mrf.mxu2  ;;  %v14268_v46 = vld [vmem:[#allocation16_spill] sm:$0xff] }
 0x9dc   :  { %v7682_v12 = vadd.f32 %v7681_v61, %v7473_v16  ;;  %v14267_v16 = vld [vmem:[#allocation17_spill] sm:$0xff] }
 0x9dd   :  { %v7270_v61 = vadd.f32 %v14268_v46, %v14267_v16 }
 0x9de   :  { %v7890_v30 = vpop.f32.mrf.mxu3  ;;  %v7478_v44 = vpop.f32.mrf.mxu1 }
 0x9df   :  { %v12353_v47 = vadd.f32 %v7890_v30, %v7682_v12  ;;  %v12355_v2 = vpop.f32.mrf.mxu0  ;;  %v5363_v30 = vld [vmem:[#allocation2 + $0x21a] sm:$0xff] }
 0x9e0   :  { %14266 = vst [vmem:[#allocation48_spill] sm:$0xff] %v12355_v2  ;;  %7731 = vmatmul.f32.gmra.mxu2 %v5362_v25  ;;  %v7479_v2 = vadd.f32 %v7478_v44, %v7270_v61  ;;  %v5237_v44 = vld [vmem:[#allocation2 + $0x231] sm:$0xff]  ;;  %v5492_v61 = vld [vmem:[#allocation2 + $0x240] sm:$0xff] }
 0x9e1   :  { %14265 = vst [vmem:[#allocation45_spill] sm:$0xff] %v12353_v47  ;;  %7525 = vmatmul.f32.gmra.mxu1 %v5235_v37 }
 0x9e2   :  { %8143 = vmatmul.f32.gmra.mxu0 %v5234_v49 }
 0x9e3   :  { %7940 = vmatmul.f32.gmra.mxu3 %v5490_v62  ;;  %v7684_v23 = vpop.f32.mrf.mxu2  ;;  %v14272_v62 = vld [vmem:[#allocation20_spill] sm:$0xff] }
 0x9e4   :  { %v7685_v13 = vadd.f32 %v7684_v23, %v7476_v6  ;;  %v14271_v6 = vld [vmem:[#allocation18_spill] sm:$0xff] }
 0x9e5   :  { %v7273_v23 = vadd.f32 %v14272_v62, %v14271_v6 }
 0x9e6   :  { %v7893_v56 = vpop.f32.mrf.mxu3  ;;  %v7481_v47 = vpop.f32.mrf.mxu1 }
 0x9e7   :  { %v12359_v54 = vadd.f32 %v7893_v56, %v7685_v13  ;;  %v12361_v12 = vpop.f32.mrf.mxu0  ;;  %v5364_v56 = vld [vmem:[#allocation2 + $0x22a] sm:$0xff] }
 0x9e8   :  { %14270 = vst [vmem:[#allocation36_spill] sm:$0xff] %v12361_v12  ;;  %7734 = vmatmul.f32.gmra.mxu2 %v5363_v30  ;;  %v7482_v12 = vadd.f32 %v7481_v47, %v7273_v23  ;;  %v6544_v30 = vld [vmem:[#allocation10 + $0x420] sm:$0xff] }
 0x9e9   :  { %14269 = vst [vmem:[#allocation69_spill] sm:$0xff] %v12359_v54  ;;  %7528 = vmatmul.f32.gmra.mxu1 %v5236_v10 }
 0x9ea   :  { %8146 = vmatmul.f32.gmra.mxu0 %v5235_v37  ;;  %8239 = vmatpush.msra.mxu1 %v6544_v30  ;;  %v14280_v30 = vld [vmem:[#allocation86_spill] sm:$0xff] }
 0x9eb   :  { %7943 = vmatmul.f32.gmra.mxu3 %v5491_v36  ;;  %v7687_v49 = vpop.f32.mrf.mxu2  ;;  %v14275_v36 = vld [vmem:[#allocation19_spill] sm:$0xff] }
 0x9ec   :  { %v7688_v25 = vadd.f32 %v7687_v49, %v7479_v2  ;;  %v14276_v49 = vld [vmem:[#allocation42_spill] sm:$0xff] }
 0x9ed   :  { %v7276_v6 = vadd.f32 %v14276_v49, %v14275_v36 }
 0x9ee   :  { %v7896_v16 = vpop.f32.mrf.mxu3  ;;  %v7484_v54 = vpop.f32.mrf.mxu1 }
 0x9ef   :  { %v12365_v46 = vadd.f32 %v7896_v16, %v7688_v25  ;;  %v12367_v13 = vpop.f32.mrf.mxu0  ;;  %v7485_v23 = vadd.f32 %v7484_v54, %v7276_v6  ;;  %v5239_v54 = vld [vmem:[#allocation2 + $0x249] sm:$0xff] }
 0x9f0   :  { %14274 = vst [vmem:[#allocation17_spill] sm:$0xff] %v12367_v13  ;;  %7737 = vmatmul.f32.gmra.mxu2 %v5364_v56  ;;  %v5238_v56 = vld [vmem:[#allocation2 + $0x241] sm:$0xff] }
 0x9f1   :  { %14273 = vst [vmem:[#allocation15_spill] sm:$0xff] %v12365_v46  ;;  %7531 = vmatmul.f32.gmra.mxu1 %v5237_v44  ;;  %v5365_v46 = vld [vmem:[#allocation2 + $0x232] sm:$0xff] }
 0x9f2   :  { %8149 = vmatmul.f32.gmra.mxu0 %v5236_v10  ;;  %v5493_v10 = vld [vmem:[#allocation2 + $0x248] sm:$0xff] }
 0x9f3   :  { %7946 = vmatmul.f32.gmra.mxu3 %v5492_v61  ;;  %v7690_v37 = vpop.f32.mrf.mxu2 }
 0x9f4   :  { %v7691_v2 = vadd.f32 %v7690_v37, %v7482_v12  ;;  %v14279_v37 = vld [vmem:[#allocation38_spill] sm:$0xff] }
 0x9f5   :  { %v7279_v13 = vadd.f32 %v14280_v30, %v14279_v37 }
 0x9f6   :  { %v7899_v25 = vpop.f32.mrf.mxu3  ;;  %v7487_v47 = vpop.f32.mrf.mxu1 }
 0x9f7   :  { %v12371_v62 = vadd.f32 %v7899_v25, %v7691_v2  ;;  %v12373_v16 = vpop.f32.mrf.mxu0  ;;  %v5366_v25 = vld [vmem:[#allocation2 + $0x242] sm:$0xff] }
 0x9f8   :  { %14278 = vst [vmem:[#allocation18_spill] sm:$0xff] %v12373_v16  ;;  %7740 = vmatmul.f32.gmra.mxu2 %v5365_v46  ;;  %v7488_v16 = vadd.f32 %v7487_v47, %v7279_v13  ;;  %v5494_v46 = vld [vmem:[#allocation2 + $0x258] sm:$0xff]  ;;  %v5495_v47 = vld [vmem:[#allocation2 + $0x260] sm:$0xff] }
 0x9f9   :  { %14277 = vst [vmem:[#allocation16_spill] sm:$0xff] %v12371_v62  ;;  %7534 = vmatmul.f32.gmra.mxu1 %v5238_v56  ;;  %v5240_v13 = vld [vmem:[#allocation2 + $0x259] sm:$0xff] }
 0x9fa   :  { %8152 = vmatmul.f32.gmra.mxu0 %v5237_v44 }
 0x9fb   :  { %7949 = vmatmul.f32.gmra.mxu3 %v5493_v10  ;;  %v7693_v61 = vpop.f32.mrf.mxu2  ;;  %v14284_v10 = vld [vmem:[#allocation87_spill] sm:$0xff] }
 0x9fc   :  { %v7694_v12 = vadd.f32 %v7693_v61, %v7485_v23  ;;  %v14283_v23 = vld [vmem:[#allocation97_spill] sm:$0xff] }
 0x9fd   :  { %v7282_v61 = vadd.f32 %v14284_v10, %v14283_v23 }
 0x9fe   :  { %v7902_v36 = vpop.f32.mrf.mxu3  ;;  %v7490_v62 = vpop.f32.mrf.mxu1 }
 0x9ff   :  { %v12377_v49 = vadd.f32 %v7902_v36, %v7694_v12  ;;  %v12379_v2 = vpop.f32.mrf.mxu0  ;;  %v5367_v36 = vld [vmem:[#allocation2 + $0x24a] sm:$0xff] }
 0xa00   :  { %14282 = vst [vmem:[#allocation19_spill] sm:$0xff] %v12379_v2  ;;  %7743 = vmatmul.f32.gmra.mxu2 %v5366_v25  ;;  %v7491_v2 = vadd.f32 %v7490_v62, %v7282_v61  ;;  %v5241_v62 = vld [vmem:[#allocation2 + $0x261] sm:$0xff]  ;;  %v5496_v61 = vld [vmem:[#allocation2 + $0x270] sm:$0xff] }
 0xa01   :  { %14281 = vst [vmem:[#allocation20_spill] sm:$0xff] %v12377_v49  ;;  %7537 = vmatmul.f32.gmra.mxu1 %v5239_v54 }
 0xa02   :  { %8155 = vmatmul.f32.gmra.mxu0 %v5238_v56 }
 0xa03   :  { %7952 = vmatmul.f32.gmra.mxu3 %v5494_v46  ;;  %v7696_v44 = vpop.f32.mrf.mxu2  ;;  %v14288_v46 = vld [vmem:[#allocation100_spill] sm:$0xff] }
 0xa04   :  { %v7697_v6 = vadd.f32 %v7696_v44, %v7488_v16  ;;  %v14287_v16 = vld [vmem:[#allocation54_spill] sm:$0xff] }
 0xa05   :  { %v7285_v44 = vadd.f32 %v14288_v46, %v14287_v16 }
 0xa06   :  { %v7905_v37 = vpop.f32.mrf.mxu3  ;;  %v7493_v49 = vpop.f32.mrf.mxu1 }
 0xa07   :  { %v12383_v30 = vadd.f32 %v7905_v37, %v7697_v6  ;;  %v12385_v12 = vpop.f32.mrf.mxu0  ;;  %v5368_v37 = vld [vmem:[#allocation2 + $0x25a] sm:$0xff] }
 0xa08   :  { %14286 = vst [vmem:[#allocation38_spill] sm:$0xff] %v12385_v12  ;;  %7746 = vmatmul.f32.gmra.mxu2 %v5367_v36  ;;  %v7494_v12 = vadd.f32 %v7493_v49, %v7285_v44  ;;  %v6543_v36 = vld [vmem:[#allocation10 + $0x418] sm:$0xff] }
 0xa09   :  { %14285 = vst [vmem:[#allocation42_spill] sm:$0xff] %v12383_v30  ;;  %7540 = vmatmul.f32.gmra.mxu1 %v5240_v13 }
 0xa0a   :  { %8158 = vmatmul.f32.gmra.mxu0 %v5239_v54  ;;  %8240 = vmatpush.msra.mxu1 %v6543_v36  ;;  %v14296_v36 = vld [vmem:[#allocation85_spill] sm:$0xff] }
 0xa0b   :  { %7955 = vmatmul.f32.gmra.mxu3 %v5495_v47  ;;  %v7699_v56 = vpop.f32.mrf.mxu2  ;;  %v14291_v47 = vld [vmem:[#allocation82_spill] sm:$0xff] }
 0xa0c   :  { %v7700_v25 = vadd.f32 %v7699_v56, %v7491_v2  ;;  %v14292_v56 = vld [vmem:[#allocation92_spill] sm:$0xff] }
 0xa0d   :  { %v7288_v16 = vadd.f32 %v14292_v56, %v14291_v47 }
 0xa0e   :  { %v7908_v23 = vpop.f32.mrf.mxu3  ;;  %v7496_v30 = vpop.f32.mrf.mxu1 }
 0xa0f   :  { %v12389_v10 = vadd.f32 %v7908_v23, %v7700_v25  ;;  %v12391_v6 = vpop.f32.mrf.mxu0  ;;  %v7497_v44 = vadd.f32 %v7496_v30, %v7288_v16  ;;  %v5243_v30 = vld [vmem:[#allocation2 + $0x279] sm:$0xff] }
 0xa10   :  { %14290 = vst [vmem:[#allocation97_spill] sm:$0xff] %v12391_v6  ;;  %7749 = vmatmul.f32.gmra.mxu2 %v5368_v37  ;;  %v5242_v37 = vld [vmem:[#allocation2 + $0x271] sm:$0xff] }
 0xa11   :  { %14289 = vst [vmem:[#allocation86_spill] sm:$0xff] %v12389_v10  ;;  %7543 = vmatmul.f32.gmra.mxu1 %v5241_v62  ;;  %v5369_v10 = vld [vmem:[#allocation2 + $0x262] sm:$0xff] }
 0xa12   :  { %8161 = vmatmul.f32.gmra.mxu0 %v5240_v13  ;;  %v5497_v13 = vld [vmem:[#allocation2 + $0x278] sm:$0xff] }
 0xa13   :  { %7958 = vmatmul.f32.gmra.mxu3 %v5496_v61  ;;  %v7702_v54 = vpop.f32.mrf.mxu2 }
 0xa14   :  { %v7703_v2 = vadd.f32 %v7702_v54, %v7494_v12  ;;  %v14295_v54 = vld [vmem:[#allocation44_spill] sm:$0xff] }
 0xa15   :  { %v7291_v6 = vadd.f32 %v14296_v36, %v14295_v54 }
 0xa16   :  { %v7911_v25 = vpop.f32.mrf.mxu3  ;;  %v7499_v49 = vpop.f32.mrf.mxu1 }
 0xa17   :  { %v12395_v46 = vadd.f32 %v7911_v25, %v7703_v2  ;;  %v12397_v23 = vpop.f32.mrf.mxu0  ;;  %v5370_v25 = vld [vmem:[#allocation2 + $0x272] sm:$0xff] }
 0xa18   :  { %14294 = vst [vmem:[#allocation54_spill] sm:$0xff] %v12397_v23  ;;  %7752 = vmatmul.f32.gmra.mxu2 %v5369_v10  ;;  %v7500_v23 = vadd.f32 %v7499_v49, %v7291_v6  ;;  %v5498_v10 = vld [vmem:[#allocation2 + $0x288] sm:$0xff]  ;;  %v5499_v49 = vld [vmem:[#allocation2 + $0x290] sm:$0xff] }
 0xa19   :  { %14293 = vst [vmem:[#allocation87_spill] sm:$0xff] %v12395_v46  ;;  %7546 = vmatmul.f32.gmra.mxu1 %v5242_v37  ;;  %v5244_v6 = vld [vmem:[#allocation2 + $0x289] sm:$0xff] }
 0xa1a   :  { %8164 = vmatmul.f32.gmra.mxu0 %v5241_v62 }
 0xa1b   :  { %7961 = vmatmul.f32.gmra.mxu3 %v5497_v13  ;;  %v7705_v61 = vpop.f32.mrf.mxu2  ;;  %v14300_v13 = vld [vmem:[#allocation57_spill] sm:$0xff] }
 0xa1c   :  { %v7706_v12 = vadd.f32 %v7705_v61, %v7497_v44  ;;  %v14299_v44 = vld [vmem:[#allocation89_spill] sm:$0xff] }
 0xa1d   :  { %v7294_v61 = vadd.f32 %v14300_v13, %v14299_v44 }
 0xa1e   :  { %v7914_v47 = vpop.f32.mrf.mxu3  ;;  %v7502_v46 = vpop.f32.mrf.mxu1 }
 0xa1f   :  { %v12401_v56 = vadd.f32 %v7914_v47, %v7706_v12  ;;  %v12403_v2 = vpop.f32.mrf.mxu0  ;;  %v5371_v47 = vld [vmem:[#allocation2 + $0x27a] sm:$0xff] }
 0xa20   :  { %14298 = vst [vmem:[#allocation82_spill] sm:$0xff] %v12403_v2  ;;  %7755 = vmatmul.f32.gmra.mxu2 %v5370_v25  ;;  %v7503_v2 = vadd.f32 %v7502_v46, %v7294_v61  ;;  %v5245_v46 = vld [vmem:[#allocation2 + $0x291] sm:$0xff]  ;;  %v5500_v61 = vld [vmem:[#allocation2 + $0x2a0] sm:$0xff] }
 0xa21   :  { %14297 = vst [vmem:[#allocation100_spill] sm:$0xff] %v12401_v56  ;;  %7549 = vmatmul.f32.gmra.mxu1 %v5243_v30 }
 0xa22   :  { %8167 = vmatmul.f32.gmra.mxu0 %v5242_v37 }
 0xa23   :  { %7964 = vmatmul.f32.gmra.mxu3 %v5498_v10  ;;  %v7708_v62 = vpop.f32.mrf.mxu2  ;;  %v14304_v10 = vld [vmem:[#allocation32_spill] sm:$0xff] }
 0xa24   :  { %v7709_v16 = vadd.f32 %v7708_v62, %v7500_v23  ;;  %v14303_v23 = vld [vmem:[#allocation104_spill] sm:$0xff] }
 0xa25   :  { %v7297_v62 = vadd.f32 %v14304_v10, %v14303_v23 }
 0xa26   :  { %v7917_v54 = vpop.f32.mrf.mxu3  ;;  %v7505_v56 = vpop.f32.mrf.mxu1 }
 0xa27   :  { %v12407_v36 = vadd.f32 %v7917_v54, %v7709_v16  ;;  %v12409_v12 = vpop.f32.mrf.mxu0  ;;  %v5372_v54 = vld [vmem:[#allocation2 + $0x28a] sm:$0xff] }
 0xa28   :  { %14302 = vst [vmem:[#allocation44_spill] sm:$0xff] %v12409_v12  ;;  %7758 = vmatmul.f32.gmra.mxu2 %v5371_v47  ;;  %v7506_v12 = vadd.f32 %v7505_v56, %v7297_v62  ;;  %v6542_v47 = vld [vmem:[#allocation10 + $0x410] sm:$0xff] }
 0xa29   :  { %14301 = vst [vmem:[#allocation92_spill] sm:$0xff] %v12407_v36  ;;  %7552 = vmatmul.f32.gmra.mxu1 %v5244_v6 }
 0xa2a   :  { %8170 = vmatmul.f32.gmra.mxu0 %v5243_v30  ;;  %8241 = vmatpush.msra.mxu1 %v6542_v47  ;;  %v14312_v47 = vld [vmem:[#allocation47_spill] sm:$0xff] }
 0xa2b   :  { %7967 = vmatmul.f32.gmra.mxu3 %v5499_v49  ;;  %v7711_v37 = vpop.f32.mrf.mxu2  ;;  %v14307_v49 = vld [vmem:[#allocation96_spill] sm:$0xff] }
 0xa2c   :  { %v7712_v25 = vadd.f32 %v7711_v37, %v7503_v2  ;;  %v14308_v37 = vld [vmem:[#allocation88_spill] sm:$0xff] }
 0xa2d   :  { %v7300_v23 = vadd.f32 %v14308_v37, %v14307_v49 }
 0xa2e   :  { %v7920_v44 = vpop.f32.mrf.mxu3  ;;  %v7508_v36 = vpop.f32.mrf.mxu1 }
 0xa2f   :  { %v12413_v13 = vadd.f32 %v7920_v44, %v7712_v25  ;;  %v12415_v16 = vpop.f32.mrf.mxu0  ;;  %v7509_v62 = vadd.f32 %v7508_v36, %v7300_v23  ;;  %v5247_v36 = vld [vmem:[#allocation2 + $0x2a9] sm:$0xff] }
 0xa30   :  { %14306 = vst [vmem:[#allocation89_spill] sm:$0xff] %v12415_v16  ;;  %7761 = vmatmul.f32.gmra.mxu2 %v5372_v54  ;;  %v5246_v54 = vld [vmem:[#allocation2 + $0x2a1] sm:$0xff] }
 0xa31   :  { %14305 = vst [vmem:[#allocation85_spill] sm:$0xff] %v12413_v13  ;;  %7555 = vmatmul.f32.gmra.mxu1 %v5245_v46  ;;  %v5373_v13 = vld [vmem:[#allocation2 + $0x292] sm:$0xff] }
 0xa32   :  { %8173 = vmatmul.f32.gmra.mxu0 %v5244_v6  ;;  %v5501_v6 = vld [vmem:[#allocation2 + $0x2a8] sm:$0xff] }
 0xa33   :  { %7970 = vmatmul.f32.gmra.mxu3 %v5500_v61  ;;  %v7714_v30 = vpop.f32.mrf.mxu2 }
 0xa34   :  { %v7715_v2 = vadd.f32 %v7714_v30, %v7506_v12  ;;  %v14311_v30 = vld [vmem:[#allocation91_spill] sm:$0xff] }
 0xa35   :  { %v7303_v16 = vadd.f32 %v14312_v47, %v14311_v30 }
 0xa36   :  { %v7923_v25 = vpop.f32.mrf.mxu3  ;;  %v7511_v56 = vpop.f32.mrf.mxu1 }
 0xa37   :  { %v12419_v10 = vadd.f32 %v7923_v25, %v7715_v2  ;;  %v12421_v44 = vpop.f32.mrf.mxu0  ;;  %v5374_v25 = vld [vmem:[#allocation2 + $0x2a2] sm:$0xff] }
 0xa38   :  { %14310 = vst [vmem:[#allocation104_spill] sm:$0xff] %v12421_v44  ;;  %7764 = vmatmul.f32.gmra.mxu2 %v5373_v13  ;;  %v7512_v44 = vadd.f32 %v7511_v56, %v7303_v16  ;;  %v5502_v13 = vld [vmem:[#allocation2 + $0x2b8] sm:$0xff]  ;;  %v5503_v56 = vld [vmem:[#allocation2 + $0x2c0] sm:$0xff] }
 0xa39   :  { %14309 = vst [vmem:[#allocation57_spill] sm:$0xff] %v12419_v10  ;;  %7558 = vmatmul.f32.gmra.mxu1 %v5246_v54  ;;  %v5248_v16 = vld [vmem:[#allocation2 + $0x2b9] sm:$0xff] }
 0xa3a   :  { %8176 = vmatmul.f32.gmra.mxu0 %v5245_v46 }
 0xa3b   :  { %7973 = vmatmul.f32.gmra.mxu3 %v5501_v6  ;;  %v7717_v61 = vpop.f32.mrf.mxu2  ;;  %v14316_v6 = vld [vmem:[#allocation95_spill] sm:$0xff] }
 0xa3c   :  { %v7718_v12 = vadd.f32 %v7717_v61, %v7509_v62  ;;  %v14315_v62 = vld [vmem:[#allocation107_spill] sm:$0xff] }
 0xa3d   :  { %v7306_v61 = vadd.f32 %v14316_v6, %v14315_v62 }
 0xa3e   :  { %v7926_v49 = vpop.f32.mrf.mxu3  ;;  %v7514_v10 = vpop.f32.mrf.mxu1 }
 0xa3f   :  { %v12425_v37 = vadd.f32 %v7926_v49, %v7718_v12  ;;  %v12427_v2 = vpop.f32.mrf.mxu0  ;;  %v5375_v49 = vld [vmem:[#allocation2 + $0x2aa] sm:$0xff] }
 0xa40   :  { %14314 = vst [vmem:[#allocation96_spill] sm:$0xff] %v12427_v2  ;;  %7767 = vmatmul.f32.gmra.mxu2 %v5374_v25  ;;  %v7515_v2 = vadd.f32 %v7514_v10, %v7306_v61  ;;  %v5249_v10 = vld [vmem:[#allocation2 + $0x2c1] sm:$0xff]  ;;  %v5504_v61 = vld [vmem:[#allocation2 + $0x2d0] sm:$0xff] }
 0xa41   :  { %14313 = vst [vmem:[#allocation32_spill] sm:$0xff] %v12425_v37  ;;  %7561 = vmatmul.f32.gmra.mxu1 %v5247_v36 }
 0xa42   :  { %8179 = vmatmul.f32.gmra.mxu0 %v5246_v54 }
 0xa43   :  { %7976 = vmatmul.f32.gmra.mxu3 %v5502_v13  ;;  %v7720_v46 = vpop.f32.mrf.mxu2  ;;  %v14320_v13 = vld [vmem:[#allocation98_spill] sm:$0xff] }
 0xa44   :  { %v7721_v23 = vadd.f32 %v7720_v46, %v7512_v44  ;;  %v14319_v44 = vld [vmem:[#allocation101_spill] sm:$0xff] }
 0xa45   :  { %v7309_v46 = vadd.f32 %v14320_v13, %v14319_v44 }
 0xa46   :  { %v7929_v30 = vpop.f32.mrf.mxu3  ;;  %v7517_v37 = vpop.f32.mrf.mxu1 }
 0xa47   :  { %v12431_v47 = vadd.f32 %v7929_v30, %v7721_v23  ;;  %v12433_v12 = vpop.f32.mrf.mxu0  ;;  %v5376_v30 = vld [vmem:[#allocation2 + $0x2ba] sm:$0xff] }
 0xa48   :  { %14318 = vst [vmem:[#allocation91_spill] sm:$0xff] %v12433_v12  ;;  %7770 = vmatmul.f32.gmra.mxu2 %v5375_v49  ;;  %v7518_v12 = vadd.f32 %v7517_v37, %v7309_v46  ;;  %v6541_v49 = vld [vmem:[#allocation10 + $0x408] sm:$0xff] }
 0xa49   :  { %14317 = vst [vmem:[#allocation88_spill] sm:$0xff] %v12431_v47  ;;  %7564 = vmatmul.f32.gmra.mxu1 %v5248_v16 }
 0xa4a   :  { %8182 = vmatmul.f32.gmra.mxu0 %v5247_v36  ;;  %8242 = vmatpush.msra.mxu1 %v6541_v49  ;;  %v14328_v49 = vld [vmem:[#allocation102_spill] sm:$0xff] }
 0xa4b   :  { %7979 = vmatmul.f32.gmra.mxu3 %v5503_v56  ;;  %v7723_v54 = vpop.f32.mrf.mxu2  ;;  %v14323_v56 = vld [vmem:[#allocation90_spill] sm:$0xff] }
 0xa4c   :  { %v7724_v25 = vadd.f32 %v7723_v54, %v7515_v2  ;;  %v14324_v54 = vld [vmem:[#allocation60_spill] sm:$0xff] }
 0xa4d   :  { %v7312_v44 = vadd.f32 %v14324_v54, %v14323_v56 }
 0xa4e   :  { %v7932_v62 = vpop.f32.mrf.mxu3  ;;  %v7520_v47 = vpop.f32.mrf.mxu1 }
 0xa4f   :  { %v12437_v6 = vadd.f32 %v7932_v62, %v7724_v25  ;;  %v12439_v23 = vpop.f32.mrf.mxu0  ;;  %v7521_v46 = vadd.f32 %v7520_v47, %v7312_v44  ;;  %v5251_v47 = vld [vmem:[#allocation2 + $0x2d9] sm:$0xff] }
 0xa50   :  { %14322 = vst [vmem:[#allocation107_spill] sm:$0xff] %v12439_v23  ;;  %7773 = vmatmul.f32.gmra.mxu2 %v5376_v30  ;;  %v5250_v30 = vld [vmem:[#allocation2 + $0x2d1] sm:$0xff] }
 0xa51   :  { %14321 = vst [vmem:[#allocation47_spill] sm:$0xff] %v12437_v6  ;;  %7567 = vmatmul.f32.gmra.mxu1 %v5249_v10  ;;  %v5377_v6 = vld [vmem:[#allocation2 + $0x2c2] sm:$0xff] }
 0xa52   :  { %8185 = vmatmul.f32.gmra.mxu0 %v5248_v16  ;;  %v5505_v16 = vld [vmem:[#allocation2 + $0x2d8] sm:$0xff] }
 0xa53   :  { %7982 = vmatmul.f32.gmra.mxu3 %v5504_v61  ;;  %v7726_v36 = vpop.f32.mrf.mxu2 }
 0xa54   :  { %v7727_v2 = vadd.f32 %v7726_v36, %v7518_v12  ;;  %v14327_v36 = vld [vmem:[#allocation94_spill] sm:$0xff] }
 0xa55   :  { %v7315_v23 = vadd.f32 %v14328_v49, %v14327_v36 }
 0xa56   :  { %v7935_v25 = vpop.f32.mrf.mxu3  ;;  %v7523_v37 = vpop.f32.mrf.mxu1 }
 0xa57   :  { %v12443_v13 = vadd.f32 %v7935_v25, %v7727_v2  ;;  %v12445_v62 = vpop.f32.mrf.mxu0  ;;  %v5378_v25 = vld [vmem:[#allocation2 + $0x2d2] sm:$0xff] }
 0xa58   :  { %14326 = vst [vmem:[#allocation101_spill] sm:$0xff] %v12445_v62  ;;  %7776 = vmatmul.f32.gmra.mxu2 %v5377_v6  ;;  %v7524_v62 = vadd.f32 %v7523_v37, %v7315_v23  ;;  %v5506_v6 = vld [vmem:[#allocation2 + $0x2e8] sm:$0xff]  ;;  %v5507_v37 = vld [vmem:[#allocation2 + $0x2f0] sm:$0xff] }
 0xa59   :  { %14325 = vst [vmem:[#allocation95_spill] sm:$0xff] %v12443_v13  ;;  %7570 = vmatmul.f32.gmra.mxu1 %v5250_v30  ;;  %v5252_v23 = vld [vmem:[#allocation2 + $0x2e9] sm:$0xff] }
 0xa5a   :  { %8188 = vmatmul.f32.gmra.mxu0 %v5249_v10 }
 0xa5b   :  { %7985 = vmatmul.f32.gmra.mxu3 %v5505_v16  ;;  %v7729_v61 = vpop.f32.mrf.mxu2  ;;  %v14332_v16 = vld [vmem:[#allocation50_spill] sm:$0xff] }
 0xa5c   :  { %v7730_v12 = vadd.f32 %v7729_v61, %v7521_v46  ;;  %v14331_v46 = vld [vmem:[#allocation105_spill] sm:$0xff] }
 0xa5d   :  { %v7318_v61 = vadd.f32 %v14332_v16, %v14331_v46 }
 0xa5e   :  { %v7938_v56 = vpop.f32.mrf.mxu3  ;;  %v7526_v13 = vpop.f32.mrf.mxu1 }
 0xa5f   :  { %v12449_v54 = vadd.f32 %v7938_v56, %v7730_v12  ;;  %v12451_v2 = vpop.f32.mrf.mxu0  ;;  %v5379_v56 = vld [vmem:[#allocation2 + $0x2da] sm:$0xff] }
 0xa60   :  { %14330 = vst [vmem:[#allocation90_spill] sm:$0xff] %v12451_v2  ;;  %7779 = vmatmul.f32.gmra.mxu2 %v5378_v25  ;;  %v7527_v2 = vadd.f32 %v7526_v13, %v7318_v61  ;;  %v5253_v13 = vld [vmem:[#allocation2 + $0x2f1] sm:$0xff]  ;;  %v5508_v61 = vld [vmem:[#allocation2 + $0x300] sm:$0xff] }
 0xa61   :  { %14329 = vst [vmem:[#allocation98_spill] sm:$0xff] %v12449_v54  ;;  %7573 = vmatmul.f32.gmra.mxu1 %v5251_v47 }
 0xa62   :  { %8191 = vmatmul.f32.gmra.mxu0 %v5250_v30 }
 0xa63   :  { %7988 = vmatmul.f32.gmra.mxu3 %v5506_v6  ;;  %v7732_v10 = vpop.f32.mrf.mxu2  ;;  %v14336_v6 = vld [vmem:[#allocation103_spill] sm:$0xff] }
 0xa64   :  { %v7733_v44 = vadd.f32 %v7732_v10, %v7524_v62  ;;  %v14335_v62 = vld [vmem:[#allocation99_spill] sm:$0xff] }
 0xa65   :  { %v7321_v10 = vadd.f32 %v14336_v6, %v14335_v62 }
 0xa66   :  { %v7941_v36 = vpop.f32.mrf.mxu3  ;;  %v7529_v54 = vpop.f32.mrf.mxu1 }
 0xa67   :  { %v12455_v49 = vadd.f32 %v7941_v36, %v7733_v44  ;;  %v12457_v12 = vpop.f32.mrf.mxu0  ;;  %v5380_v36 = vld [vmem:[#allocation2 + $0x2ea] sm:$0xff] }
 0xa68   :  { %14334 = vst [vmem:[#allocation94_spill] sm:$0xff] %v12457_v12  ;;  %7782 = vmatmul.f32.gmra.mxu2 %v5379_v56  ;;  %v7530_v12 = vadd.f32 %v7529_v54, %v7321_v10  ;;  %v6540_v56 = vld [vmem:[#allocation10 + $0x400] sm:$0xff] }
 0xa69   :  { %14333 = vst [vmem:[#allocation60_spill] sm:$0xff] %v12455_v49  ;;  %7576 = vmatmul.f32.gmra.mxu1 %v5252_v23  ;;  %v5254_v10 = vld [vmem:[#allocation2 + $0x301] sm:$0xff] }
 0xa6a   :  { %8194 = vmatmul.f32.gmra.mxu0 %v5251_v47  ;;  %8243 = vmatpush.msra.mxu1 %v6540_v56 }
 0xa6b   :  { %7991 = vmatmul.f32.gmra.mxu3 %v5507_v37  ;;  %v7735_v30 = vpop.f32.mrf.mxu2  ;;  %v14339_v37 = vld [vmem:[#allocation106_spill] sm:$0xff] }
 0xa6c   :  { %v7736_v25 = vadd.f32 %v7735_v30, %v7527_v2  ;;  %v14340_v30 = vld [vmem:[#allocation109_spill] sm:$0xff] }
 0xa6d   :  { %v7324_v62 = vadd.f32 %v14340_v30, %v14339_v37 }
 0xa6e   :  { %v7944_v46 = vpop.f32.mrf.mxu3  ;;  %v7532_v49 = vpop.f32.mrf.mxu1 }
 0xa6f   :  { %v12461_v16 = vadd.f32 %v7944_v46, %v7736_v25  ;;  %v12463_v44 = vpop.f32.mrf.mxu0  ;;  %v7533_v54 = vadd.f32 %v7532_v49, %v7324_v62  ;;  %v5255_v49 = vld [vmem:[#allocation2 + $0x309] sm:$0xff] }
 0xa70   :  { %14338 = vst [vmem:[#allocation105_spill] sm:$0xff] %v12463_v44  ;;  %7785 = vmatmul.f32.gmra.mxu2 %v5380_v36  ;;  %v5509_v36 = vld [vmem:[#allocation2 + $0x308] sm:$0xff] }
 0xa71   :  { %14337 = vst [vmem:[#allocation102_spill] sm:$0xff] %v12461_v16  ;;  %7579 = vmatmul.f32.gmra.mxu1 %v5253_v13  ;;  %v5381_v16 = vld [vmem:[#allocation2 + $0x2f2] sm:$0xff] }
 0xa72   :  { %8197 = vmatmul.f32.gmra.mxu0 %v5252_v23 }
 0xa73   :  { %7994 = vmatmul.f32.gmra.mxu3 %v5508_v61  ;;  %v7738_v47 = vpop.f32.mrf.mxu2 }
 0xa74   :  { %v7739_v2 = vadd.f32 %v7738_v47, %v7530_v12  ;;  %v14342_v12 = vld [vmem:[#allocation62_spill] sm:$0xff]  ;;  %v14343_v47 = vld [vmem:[#allocation108_spill] sm:$0xff] }
 0xa75   :  { %v7327_v56 = vadd.f32 %v14343_v47, %v14342_v12 }
 0xa76   :  { %v7947_v25 = vpop.f32.mrf.mxu3  ;;  %v7535_v44 = vpop.f32.mrf.mxu1 }
 0xa77   :  { %v7948_v6 = vadd.f32 %v7947_v25, %v7739_v2  ;;  %v12467_v46 = vpop.f32.mrf.mxu0  ;;  %v5382_v2 = vld [vmem:[#allocation2 + $0x302] sm:$0xff] }
 0xa78   :  { %14341 = vst [vmem:[#allocation50_spill] sm:$0xff] %v12467_v46  ;;  %7788 = vmatmul.f32.gmra.mxu2 %v5381_v16  ;;  %v7536_v46 = vadd.f32 %v7535_v44, %v7327_v56  ;;  %v5510_v16 = vld [vmem:[#allocation2 + $0x318] sm:$0xff]  ;;  %v5511_v56 = vld [vmem:[#allocation2 + $0x320] sm:$0xff] }
 0xa79   :  { %7582 = vmatmul.f32.gmra.mxu1 %v5254_v10 }
 0xa7a   :  { %8200 = vmatmul.f32.gmra.mxu0 %v5253_v13 }
 0xa7b   :  { %7997 = vmatmul.f32.gmra.mxu3 %v5509_v36  ;;  %v7741_v23 = vpop.f32.mrf.mxu2 }
 0xa7c   :  { %v7742_v61 = vadd.f32 %v7741_v23, %v7533_v54  ;;  %v14344_v54 = vld [vmem:[#allocation53_spill] sm:$0xff] }
 0xa7d   :  { %v7330_v36 = vadd.f32 %v12141_v20, %v14344_v54 }
 0xa7e   :  { %v7950_v22 = vpop.f32.mrf.mxu3  ;;  %v7538_v25 = vpop.f32.mrf.mxu1 }
 0xa7f   :  { %v7951_v37 = vadd.f32 %v7950_v22, %v7742_v61  ;;  %v8156_v30 = vpop.f32.mrf.mxu0  ;;  %v5383_v61 = vld [vmem:[#allocation2 + $0x30a] sm:$0xff]  ;;  %v7539_v19 = vadd.f32 %v7538_v25, %v7330_v36 }
 0xa80   :  { %v12471_v27 = vadd.f32 %v8156_v30, %v7948_v6  ;;  %7791 = vmatmul.f32.gmra.mxu2 %v5382_v2  ;;  %v5256_v6 = vld [vmem:[#allocation2 + $0x319] sm:$0xff]  ;;  %v5512_v36 = vld [vmem:[#allocation2 + $0x330] sm:$0xff] }
 0xa81   :  { %7585 = vmatmul.f32.gmra.mxu1 %v5255_v49 }
 0xa82   :  { %8203 = vmatmul.f32.gmra.mxu0 %v5254_v10 }
 0xa83   :  { %8000 = vmatmul.f32.gmra.mxu3 %v5510_v16  ;;  %v7744_v13 = vpop.f32.mrf.mxu2 }
 0xa84   :  { %v7745_v62 = vadd.f32 %v7744_v13, %v7536_v46  ;;  %v14345_v46 = vld [vmem:[#allocation65_spill] sm:$0xff] }
 0xa85   :  { %v7333_v2 = vadd.f32 %v12145_v42, %v14345_v46 }
 0xa86   :  { %v7953_v23 = vpop.f32.mrf.mxu3  ;;  %v7541_v47 = vpop.f32.mrf.mxu1 }
 0xa87   :  { %v7954_v12 = vadd.f32 %v7953_v23, %v7745_v62  ;;  %v8159_v22 = vpop.f32.mrf.mxu0  ;;  %v5384_v62 = vld [vmem:[#allocation2 + $0x31a] sm:$0xff]  ;;  %v7542_v23 = vadd.f32 %v7541_v47, %v7333_v2 }
 0xa88   :  { %v12475_v44 = vadd.f32 %v8159_v22, %v7951_v37  ;;  %7794 = vmatmul.f32.gmra.mxu2 %v5383_v61  ;;  %v5257_v37 = vld [vmem:[#allocation2 + $0x321] sm:$0xff]  ;;  %v5513_v2 = vld [vmem:[#allocation2 + $0x338] sm:$0xff] }
 0xa89   :  { %7588 = vmatmul.f32.gmra.mxu1 %v5256_v6 }
 0xa8a   :  { %8206 = vmatmul.f32.gmra.mxu0 %v5255_v49 }
 0xa8b   :  { %8003 = vmatmul.f32.gmra.mxu3 %v5511_v56  ;;  %v7747_v10 = vpop.f32.mrf.mxu2 }
 0xa8c   :  { %v7748_v30 = vadd.f32 %v7747_v10, %v7539_v19  ;;  %v14346_v19 = vld [vmem:[#allocation68_spill] sm:$0xff] }
 0xa8d   :  { %v7336_v61 = vadd.f32 %v14346_v19, %v12143_v33  ;;  %v5386_v19 = vld [vmem:[#allocation2 + $0x332] sm:$0xff] }
 0xa8e   :  { %v7956_v20 = vpop.f32.mrf.mxu3  ;;  %v7544_v54 = vpop.f32.mrf.mxu1 }
 0xa8f   :  { %v7957_v16 = vadd.f32 %v7956_v20, %v7748_v30  ;;  %v8162_v13 = vpop.f32.mrf.mxu0  ;;  %v5385_v30 = vld [vmem:[#allocation2 + $0x322] sm:$0xff]  ;;  %v7545_v20 = vadd.f32 %v7544_v54, %v7336_v61 }
 0xa90   :  { %v12479_v25 = vadd.f32 %v8162_v13, %v7954_v12  ;;  %7797 = vmatmul.f32.gmra.mxu2 %v5384_v62  ;;  %v5258_v12 = vld [vmem:[#allocation2 + $0x331] sm:$0xff]  ;;  %v14347_v62 = vld [vmem:[#allocation56_spill] sm:$0xff] }
 0xa91   :  { %7591 = vmatmul.f32.gmra.mxu1 %v5257_v37 }
 0xa92   :  { %8209 = vmatmul.f32.gmra.mxu0 %v5256_v6 }
 0xa93   :  { %8006 = vmatmul.f32.gmra.mxu3 %v5512_v36  ;;  %v7750_v49 = vpop.f32.mrf.mxu2 }
 0xa94   :  { %v7751_v22 = vadd.f32 %v7750_v49, %v7542_v23  ;;  %v14348_v23 = vld [vmem:[#allocation71_spill] sm:$0xff] }
 0xa95   :  { %v7339_v36 = vadd.f32 %v14348_v23, %v14347_v62  ;;  %v5387_v62 = vld [vmem:[#allocation2 + $0x33a] sm:$0xff] }
 0xa96   :  { %v7959_v42 = vpop.f32.mrf.mxu3  ;;  %v7547_v46 = vpop.f32.mrf.mxu1 }
 0xa97   :  { %v7960_v56 = vadd.f32 %v7959_v42, %v7751_v22  ;;  %v8165_v10 = vpop.f32.mrf.mxu0  ;;  %v7548_v9 = vadd.f32 %v7547_v46, %v7339_v36 }
 0xa98   :  { %v12483_v47 = vadd.f32 %v8165_v10, %v7957_v16  ;;  %7800 = vmatmul.f32.gmra.mxu2 %v5385_v30  ;;  %v5259_v16 = vld [vmem:[#allocation2 + $0x339] sm:$0xff]  ;;  %v14350_v30 = vld [vmem:[#allocation73_spill] sm:$0xff] }
 0xa99   :  { %7594 = vmatmul.f32.gmra.mxu1 %v5258_v12  ;;  %v14349_v10 = vld [vmem:[#allocation59_spill] sm:$0xff] }
 0xa9a   :  { %8212 = vmatmul.f32.gmra.mxu0 %v5257_v37 }
 0xa9b   :  { %8009 = vmatmul.f32.gmra.mxu3 %v5513_v2  ;;  %v7753_v6 = vpop.f32.mrf.mxu2 }
 0xa9c   :  { %v7754_v13 = vadd.f32 %v7753_v6, %v7545_v20  ;;  %v7342_v20 = vadd.f32 %v14350_v30, %v14349_v10  ;;  %v5642_v30 = vld [vmem:[#allocation2 + $0x349] sm:$0xff] }
 0xa9e   :  { %v7962_v33 = vpop.f32.mrf.mxu3  ;;  %v7550_v42 = vpop.f32.mrf.mxu1 }
 0xa9f   :  { %v7963_v49 = vadd.f32 %v7962_v33, %v7754_v13  ;;  %v8168_v22 = vpop.f32.mrf.mxu0  ;;  %v7551_v33 = vadd.f32 %v7550_v42, %v7342_v20 }
 0xaa0   :  { %v12487_v54 = vadd.f32 %v8168_v22, %v7960_v56  ;;  %7803 = vmatmul.f32.gmra.mxu2 %v5386_v19  ;;  %v5708_v56 = vld [vmem:[#allocation2 + $0x32] sm:$0xff]  ;;  %v14352_v22 = vld [vmem:[#allocation51_spill] sm:$0xff] }
 0xaa1   :  { %7597 = vmatmul.f32.gmra.mxu1 %v5259_v16 }
 0xaa2   :  { %8215 = vmatmul.f32.gmra.mxu0 %v5258_v12  ;;  %v9053_v12 = vld [vmem:[#allocation2 + $0x1b0] sm:$0xff] }
 0xaa3   :  { %8012 = vmatmul.f32.gmra.mxu3 %v12305_v63  ;;  %v7756_v37 = vpop.f32.mrf.mxu2 }
 0xaa4   :  { %v7757_v61 = vadd.f32 %v7756_v37, %v7548_v9  ;;  %v14351_v9 = vld [vmem:[#allocation63_spill] sm:$0xff] }
 0xaa5   :  { %v7345_v19 = vadd.f32 %v14352_v22, %v14351_v9  ;;  %v5643_v9 = vld [vmem:[#allocation2 + $0x351] sm:$0xff] }
 0xaa6   :  { %v7965_v2 = vpop.f32.mrf.mxu3  ;;  %v7553_v23 = vpop.f32.mrf.mxu1 }
 0xaa7   :  { %v7966_v6 = vadd.f32 %v7965_v2, %v7757_v61  ;;  %v8171_v13 = vpop.f32.mrf.mxu0  ;;  %v7554_v38 = vadd.f32 %v7553_v23, %v7345_v19  ;;  %v14355_v19 = vld [vmem:[#allocation75_spill] sm:$0xff] }
 0xaa8   :  { %v12492_v46 = vadd.f32 %v8171_v13, %v7963_v49  ;;  %7806 = vmatmul.f32.gmra.mxu2 %v5387_v62  ;;  %v5709_v49 = vld [vmem:[#allocation2 + $0x3a] sm:$0xff]  ;;  %v14354_v62 = vld [vmem:[#allocation81_spill] sm:$0xff] }
 0xaa9   :  { %8244 = vmatmul.f32.vlgmr.msra.gmra.mxu1 %v5708_v56  ;;  %v14353_v13 = vld [vmem:[#allocation66_spill] sm:$0xff] }
 0xaaa   :  { %8218 = vmatmul.f32.gmra.mxu0 %v5259_v16  ;;  %v7348_v56 = vadd.f32 %v14354_v62, %v14353_v13 }
 0xaab   :  { %8015 = vmatmul.f32.gmra.mxu3 %v9053_v12  ;;  %v7759_v63 = vpop.f32.mrf.mxu2 }
 0xaac   :  { %v7760_v36 = vadd.f32 %v7759_v63, %v7551_v33 }
 0xaae   :  { %v7968_v37 = vpop.f32.mrf.mxu3  ;;  %v7556_v2 = vpop.f32.mrf.mxu1 }
 0xaaf   :  { %v7969_v10 = vadd.f32 %v7968_v37, %v7760_v36  ;;  %v8174_v61 = vpop.f32.mrf.mxu0  ;;  %v7557_v36 = vadd.f32 %v7556_v2, %v7348_v56  ;;  %v14357_v56 = vld [vmem:[#allocation21_spill] sm:$0xff] }
 0xab0   :  { %v12496_v42 = vadd.f32 %v8174_v61, %v7966_v6  ;;  %v14356_v61 = vld [vmem:[#allocation93_spill] sm:$0xff] }
 0xab1   :  { %8247 = vmatmul.f32.gmra.mxu1 %v5709_v49 }
 0xab2   :  { %8221 = vmatmul.f32.gmra.mxu0 %v5642_v30  ;;  %v7351_v30 = vadd.f32 %v14356_v61, %v14355_v19 }
 0xab3   :  { %v7762_v16 = vpop.f32.mrf.mxu2 }
 0xab4   :  { %v7763_v20 = vadd.f32 %v7762_v16, %v7554_v38 }
 0xab6   :  { %v7971_v33 = vpop.f32.mrf.mxu3  ;;  %v7559_v22 = vpop.f32.mrf.mxu1 }
 0xab7   :  { %v7972_v12 = vadd.f32 %v7971_v33, %v7763_v20  ;;  %v8177_v63 = vpop.f32.mrf.mxu0  ;;  %v7560_v62 = vadd.f32 %v7559_v22, %v7351_v30  ;;  %v5711_v33 = vld [vmem:[#allocation2 + $0x52] sm:$0xff] }
 0xab8   :  { %v12500_v37 = vadd.f32 %v8177_v63, %v7969_v10  ;;  %v14358_v63 = vld [vmem:[#allocation83_spill] sm:$0xff]  ;;  %v14360_v30 = vld [vmem:[#allocation41_spill] sm:$0xff] }
 0xab9   :  { %8250 = vmatmul.f32.gmra.mxu1 %v5710_v51 }
 0xaba   :  { %8224 = vmatmul.f32.gmra.mxu0 %v5643_v9  ;;  %v7354_v9 = vadd.f32 %v14358_v63, %v14357_v56 }
 0xabb   :  { %v7765_v6 = vpop.f32.mrf.mxu2 }
 0xabc   :  { %v7766_v23 = vadd.f32 %v7765_v6, %v7557_v36 }
 0xabe   :  { %v7974_v38 = vpop.f32.mrf.mxu3  ;;  %v7562_v13 = vpop.f32.mrf.mxu1 }
 0xabf   :  { %v7975_v49 = vadd.f32 %v7974_v38, %v7766_v23  ;;  %v8180_v16 = vpop.f32.mrf.mxu0  ;;  %v7563_v48 = vadd.f32 %v7562_v13, %v7354_v9  ;;  %v5712_v23 = vld [vmem:[#allocation2 + $0x62] sm:$0xff] }
 0xac0   :  { %v12504_v20 = vadd.f32 %v8180_v16, %v7972_v12  ;;  %v14359_v12 = vld [vmem:[#allocation22_spill] sm:$0xff] }
 0xac1   :  { %8253 = vmatmul.f32.gmra.mxu1 %v5711_v33  ;;  %v7357_v38 = vadd.f32 %v14360_v30, %v14359_v12 }
 0xac3   :  { %v7768_v2 = vpop.f32.mrf.mxu2 }
 0xac4   :  { %v7769_v10 = vadd.f32 %v7768_v2, %v7560_v62 }
 0xac6   :  { %v7977_v51 = vpop.f32.mrf.mxu3  ;;  %v7565_v6 = vpop.f32.mrf.mxu1 }
 0xac7   :  { %v7978_v35 = vadd.f32 %v7977_v51, %v7769_v10  ;;  %v8183_v36 = vpop.f32.mrf.mxu0  ;;  %v7566_v56 = vadd.f32 %v7565_v6, %v7357_v38  ;;  %v5713_v10 = vld [vmem:[#allocation2 + $0x6a] sm:$0xff]  ;;  %v5716_v38 = vld [vmem:[#allocation2 + $0x92] sm:$0xff] }
 0xac8   :  { %v12508_v19 = vadd.f32 %v8183_v36, %v7975_v49 }
 0xac9   :  { %8256 = vmatmul.f32.gmra.mxu1 %v5712_v23 }
 0xacb   :  { %v7771_v61 = vpop.f32.mrf.mxu2 }
 0xacc   :  { %v7772_v22 = vadd.f32 %v7771_v61, %v7563_v48  ;;  %v5714_v61 = vld [vmem:[#allocation2 + $0x7a] sm:$0xff] }
 0xace   :  { %v7980_v16 = vpop.f32.mrf.mxu3  ;;  %v12512_v2 = vpop.f32.mrf.mxu1 }
 0xacf   :  { %v7981_v33 = vadd.f32 %v7980_v16, %v7772_v22  ;;  %v8186_v62 = vpop.f32.mrf.mxu0  ;;  %14361 = vst [vmem:[#allocation99_spill] sm:$0xff] %v12512_v2  ;;  %v5735_v2 = vld [vmem:[#allocation2 + $0x172] sm:$0xff] }
 0xad0   :  { %v12514_v63 = vadd.f32 %v8186_v62, %v7978_v35  ;;  %v5715_v35 = vld [vmem:[#allocation2 + $0x82] sm:$0xff]  ;;  %v5717_v62 = vld [vmem:[#allocation2 + $0x9a] sm:$0xff] }
 0xad1   :  { %8259 = vmatmul.f32.gmra.mxu1 %v5713_v10 }
 0xad2   :  { %14362 = vst [vmem:[#allocation103_spill] sm:$0xff] %v12514_v63  ;;  %v5741_v63 = vld [vmem:[#allocation2 + $0x1ea] sm:$0xff] }
 0xad3   :  { %v7774_v13 = vpop.f32.mrf.mxu2 }
 0xad4   :  { %v7775_v49 = vadd.f32 %v7774_v13, %v7566_v56  ;;  %v5719_v13 = vld [vmem:[#allocation2 + $0xb2] sm:$0xff] }
 0xad6   :  { %v7983_v9 = vpop.f32.mrf.mxu3  ;;  %v12516_v23 = vpop.f32.mrf.mxu1 }
 0xad7   :  { %v7984_v51 = vadd.f32 %v7983_v9, %v7775_v49  ;;  %v8189_v36 = vpop.f32.mrf.mxu0  ;;  %14363 = vst [vmem:[#allocation106_spill] sm:$0xff] %v12516_v23  ;;  %v5720_v9 = vld [vmem:[#allocation2 + $0xc2] sm:$0xff]  ;;  %v5734_v23 = vld [vmem:[#allocation2 + $0x16a] sm:$0xff] }
 0xad8   :  { %v12518_v48 = vadd.f32 %v8189_v36, %v7981_v33  ;;  %v5718_v33 = vld [vmem:[#allocation2 + $0xaa] sm:$0xff] }
 0xad9   :  { %8262 = vmatmul.f32.gmra.mxu1 %v5714_v61  ;;  %v5721_v36 = vld [vmem:[#allocation2 + $0xca] sm:$0xff] }
 0xada   :  { %14364 = vst [vmem:[#allocation109_spill] sm:$0xff] %v12518_v48  ;;  %v5737_v48 = vld [vmem:[#allocation2 + $0x18a] sm:$0xff] }
 0xade   :  { %v12520_v12 = vpop.f32.mrf.mxu1 }
 0xadf   :  { %v8192_v22 = vpop.f32.mrf.mxu0  ;;  %14365 = vst [vmem:[#allocation62_spill] sm:$0xff] %v12520_v12  ;;  %v5733_v12 = vld [vmem:[#allocation2 + $0x15a] sm:$0xff] }
 0xae0   :  { %v12522_v30 = vadd.f32 %v8192_v22, %v7984_v51  ;;  %v5722_v22 = vld [vmem:[#allocation2 + $0xda] sm:$0xff] }
 0xae1   :  { %8265 = vmatmul.f32.gmra.mxu1 %v5715_v35 }
 0xae2   :  { %14366 = vst [vmem:[#allocation108_spill] sm:$0xff] %v12522_v30  ;;  %v5736_v30 = vld [vmem:[#allocation2 + $0x182] sm:$0xff] }
 0xae6   :  { %v12524_v6 = vpop.f32.mrf.mxu1 }
 0xae7   :  { %14367 = vst [vmem:[#allocation53_spill] sm:$0xff] %v12524_v6  ;;  %v5732_v6 = vld [vmem:[#allocation2 + $0x152] sm:$0xff] }
 0xae9   :  { %8268 = vmatmul.f32.gmra.mxu1 %v5716_v38  ;;  %v5723_v38 = vld [vmem:[#allocation2 + $0xe2] sm:$0xff] }
 0xaee   :  { %v12526_v16 = vpop.f32.mrf.mxu1 }
 0xaef   :  { %14368 = vst [vmem:[#allocation65_spill] sm:$0xff] %v12526_v16  ;;  %v5731_v16 = vld [vmem:[#allocation2 + $0x142] sm:$0xff] }
 0xaf1   :  { %8271 = vmatmul.f32.gmra.mxu1 %v5717_v62 }
 0xaf6   :  { %v12528_v56 = vpop.f32.mrf.mxu1 }
 0xaf7   :  { %14369 = vst [vmem:[#allocation68_spill] sm:$0xff] %v12528_v56  ;;  %v5730_v56 = vld [vmem:[#allocation2 + $0x13a] sm:$0xff] }
 0xaf9   :  { %8274 = vmatmul.f32.gmra.mxu1 %v5718_v33  ;;  %v5724_v33 = vld [vmem:[#allocation2 + $0xf2] sm:$0xff] }
 0xafe   :  { %v12530_v10 = vpop.f32.mrf.mxu1 }
 0xaff   :  { %14370 = vst [vmem:[#allocation56_spill] sm:$0xff] %v12530_v10  ;;  %v5729_v10 = vld [vmem:[#allocation2 + $0x12a] sm:$0xff] }
 0xb01   :  { %8277 = vmatmul.f32.gmra.mxu1 %v5719_v13 }
 0xb06   :  { %v12532_v49 = vpop.f32.mrf.mxu1 }
 0xb07   :  { %14371 = vst [vmem:[#allocation71_spill] sm:$0xff] %v12532_v49  ;;  %v5725_v49 = vld [vmem:[#allocation2 + $0xfa] sm:$0xff] }
 0xb09   :  { %8280 = vmatmul.f32.gmra.mxu1 %v5720_v9 }
 0xb0e   :  { %v12534_v51 = vpop.f32.mrf.mxu1 }
 0xb0f   :  { %14372 = vst [vmem:[#allocation59_spill] sm:$0xff] %v12534_v51  ;;  %v5726_v51 = vld [vmem:[#allocation2 + $0x10a] sm:$0xff] }
 0xb11   :  { %8283 = vmatmul.f32.gmra.mxu1 %v5721_v36 }
 0xb16   :  { %v12536_v61 = vpop.f32.mrf.mxu1 }
 0xb17   :  { %14373 = vst [vmem:[#allocation73_spill] sm:$0xff] %v12536_v61  ;;  %v5727_v61 = vld [vmem:[#allocation2 + $0x112] sm:$0xff] }
 0xb19   :  { %8286 = vmatmul.f32.gmra.mxu1 %v5722_v22 }
 0xb1e   :  { %v12538_v35 = vpop.f32.mrf.mxu1 }
 0xb1f   :  { %14374 = vst [vmem:[#allocation63_spill] sm:$0xff] %v12538_v35  ;;  %v5728_v35 = vld [vmem:[#allocation2 + $0x122] sm:$0xff] }
 0xb21   :  { %8289 = vmatmul.f32.gmra.mxu1 %v5723_v38 }
 0xb26   :  { %v12540_v62 = vpop.f32.mrf.mxu1 }
 0xb29   :  { %8292 = vmatmul.f32.gmra.mxu1 %v5724_v33 }
 0xb2e   :  { %v12542_v13 = vpop.f32.mrf.mxu1 }
 0xb31   :  { %8295 = vmatmul.f32.gmra.mxu1 %v5725_v49 }
 0xb36   :  { %v12544_v9 = vpop.f32.mrf.mxu1 }
 0xb39   :  { %8298 = vmatmul.f32.gmra.mxu1 %v5726_v51 }
 0xb3e   :  { %v12546_v36 = vpop.f32.mrf.mxu1 }
 0xb41   :  { %8301 = vmatmul.f32.gmra.mxu1 %v5727_v61 }
 0xb46   :  { %v12548_v22 = vpop.f32.mrf.mxu1 }
 0xb49   :  { %8304 = vmatmul.f32.gmra.mxu1 %v5728_v35 }
 0xb4e   :  { %v12550_v38 = vpop.f32.mrf.mxu1 }
 0xb51   :  { %8307 = vmatmul.f32.gmra.mxu1 %v5729_v10 }
 0xb56   :  { %v12552_v33 = vpop.f32.mrf.mxu1 }
 0xb59   :  { %8310 = vmatmul.f32.gmra.mxu1 %v5730_v56 }
 0xb5e   :  { %v12554_v49 = vpop.f32.mrf.mxu1 }
 0xb61   :  { %8313 = vmatmul.f32.gmra.mxu1 %v5731_v16 }
 0xb66   :  { %v12556_v51 = vpop.f32.mrf.mxu1 }
 0xb69   :  { %8316 = vmatmul.f32.gmra.mxu1 %v5732_v6 }
 0xb6e   :  { %v12558_v61 = vpop.f32.mrf.mxu1 }
 0xb71   :  { %8319 = vmatmul.f32.gmra.mxu1 %v5733_v12 }
 0xb76   :  { %v12560_v35 = vpop.f32.mrf.mxu1 }
 0xb79   :  { %8322 = vmatmul.f32.gmra.mxu1 %v5734_v23 }
 0xb7e   :  { %v12562_v10 = vpop.f32.mrf.mxu1 }
 0xb81   :  { %8325 = vmatmul.f32.gmra.mxu1 %v5735_v2 }
 0xb86   :  { %v12564_v56 = vpop.f32.mrf.mxu1 }
 0xb89   :  { %8328 = vmatmul.f32.gmra.mxu1 %v5736_v30 }
 0xb8e   :  { %v12566_v16 = vpop.f32.mrf.mxu1 }
 0xb8f   :  { %14375 = vst [vmem:[#allocation51_spill] sm:$0xff] %v12566_v16  ;;  %v5742_v16 = vld [vmem:[#allocation2 + $0x1fa] sm:$0xff] }
 0xb91   :  { %8331 = vmatmul.f32.gmra.mxu1 %v5737_v48 }
 0xb96   :  { %v12568_v6 = vpop.f32.mrf.mxu1 }
 0xb97   :  { %14376 = vst [vmem:[#allocation66_spill] sm:$0xff] %v12568_v6  ;;  %v5743_v6 = vld [vmem:[#allocation2 + $0x202] sm:$0xff] }
 0xb99   :  { %8334 = vmatmul.f32.gmra.mxu1 %v5738_v7 }
 0xb9e   :  { %v12570_v12 = vpop.f32.mrf.mxu1 }
 0xb9f   :  { %14377 = vst [vmem:[#allocation81_spill] sm:$0xff] %v12570_v12  ;;  %v5744_v12 = vld [vmem:[#allocation2 + $0x212] sm:$0xff] }
 0xba1   :  { %8337 = vmatmul.f32.gmra.mxu1 %v5739_v3 }
 0xba6   :  { %v12572_v23 = vpop.f32.mrf.mxu1 }
 0xba7   :  { %14378 = vst [vmem:[#allocation75_spill] sm:$0xff] %v12572_v23  ;;  %v5745_v23 = vld [vmem:[#allocation2 + $0x21a] sm:$0xff] }
 0xba9   :  { %8340 = vmatmul.f32.gmra.mxu1 %v5740_v14 }
 0xbae   :  { %v12574_v2 = vpop.f32.mrf.mxu1 }
 0xbaf   :  { %14379 = vst [vmem:[#allocation93_spill] sm:$0xff] %v12574_v2  ;;  %v5746_v2 = vld [vmem:[#allocation2 + $0x22a] sm:$0xff] }
 0xbb1   :  { %8343 = vmatmul.f32.gmra.mxu1 %v5741_v63 }
 0xbb6   :  { %v12576_v30 = vpop.f32.mrf.mxu1 }
 0xbb7   :  { %14380 = vst [vmem:[#allocation21_spill] sm:$0xff] %v12576_v30  ;;  %v5747_v30 = vld [vmem:[#allocation2 + $0x232] sm:$0xff] }
 0xbb9   :  { %8346 = vmatmul.f32.gmra.mxu1 %v5742_v16 }
 0xbbe   :  { %v12578_v48 = vpop.f32.mrf.mxu1 }
 0xbbf   :  { %14381 = vst [vmem:[#allocation83_spill] sm:$0xff] %v12578_v48  ;;  %v5748_v48 = vld [vmem:[#allocation2 + $0x242] sm:$0xff] }
 0xbc1   :  { %8349 = vmatmul.f32.gmra.mxu1 %v5743_v6 }
 0xbc6   :  { %v12580_v7 = vpop.f32.mrf.mxu1 }
 0xbc7   :  { %14382 = vst [vmem:[#allocation22_spill] sm:$0xff] %v12580_v7  ;;  %v5749_v7 = vld [vmem:[#allocation2 + $0x24a] sm:$0xff] }
 0xbc9   :  { %8352 = vmatmul.f32.gmra.mxu1 %v5744_v12 }
 0xbce   :  { %v12582_v3 = vpop.f32.mrf.mxu1 }
 0xbcf   :  { %14383 = vst [vmem:[#allocation41_spill] sm:$0xff] %v12582_v3  ;;  %v5750_v3 = vld [vmem:[#allocation2 + $0x25a] sm:$0xff] }
 0xbd1   :  { %8355 = vmatmul.f32.gmra.mxu1 %v5745_v23 }
 0xbd6   :  { %v12584_v14 = vpop.f32.mrf.mxu1 }
 0xbd7   :  { %14384 = vst [vmem:[#allocation110_spill] sm:$0xff] %v12584_v14  ;;  %v5751_v14 = vld [vmem:[#allocation2 + $0x262] sm:$0xff] }
 0xbd9   :  { %8358 = vmatmul.f32.gmra.mxu1 %v5746_v2 }
 0xbde   :  { %v12586_v63 = vpop.f32.mrf.mxu1 }
 0xbdf   :  { %14385 = vst [vmem:[#allocation111_spill] sm:$0xff] %v12586_v63  ;;  %v5752_v63 = vld [vmem:[#allocation2 + $0x272] sm:$0xff] }
 0xbe1   :  { %8361 = vmatmul.f32.gmra.mxu1 %v5747_v30 }
 0xbe6   :  { %v12588_v16 = vpop.f32.mrf.mxu1 }
 0xbe7   :  { %14386 = vst [vmem:[#allocation112_spill] sm:$0xff] %v12588_v16  ;;  %v5753_v16 = vld [vmem:[#allocation2 + $0x27a] sm:$0xff] }
 0xbe9   :  { %8364 = vmatmul.f32.gmra.mxu1 %v5748_v48 }
 0xbee   :  { %v12590_v6 = vpop.f32.mrf.mxu1 }
 0xbef   :  { %14387 = vst [vmem:[#allocation113_spill] sm:$0xff] %v12590_v6  ;;  %v5754_v6 = vld [vmem:[#allocation2 + $0x28a] sm:$0xff] }
 0xbf1   :  { %8367 = vmatmul.f32.gmra.mxu1 %v5749_v7 }
 0xbf6   :  { %v12592_v12 = vpop.f32.mrf.mxu1 }
 0xbf7   :  { %14388 = vst [vmem:[#allocation114_spill] sm:$0xff] %v12592_v12  ;;  %v5755_v12 = vld [vmem:[#allocation2 + $0x292] sm:$0xff] }
 0xbf9   :  { %8370 = vmatmul.f32.gmra.mxu1 %v5750_v3 }
 0xbfe   :  { %v12594_v23 = vpop.f32.mrf.mxu1 }
 0xbff   :  { %14389 = vst [vmem:[#allocation115_spill] sm:$0xff] %v12594_v23  ;;  %v5756_v23 = vld [vmem:[#allocation2 + $0x2a2] sm:$0xff] }
 0xc01   :  { %8373 = vmatmul.f32.gmra.mxu1 %v5751_v14 }
 0xc06   :  { %v12596_v2 = vpop.f32.mrf.mxu1 }
 0xc07   :  { %14390 = vst [vmem:[#allocation116_spill] sm:$0xff] %v12596_v2  ;;  %v5757_v2 = vld [vmem:[#allocation2 + $0x2aa] sm:$0xff] }
 0xc09   :  { %8376 = vmatmul.f32.gmra.mxu1 %v5752_v63 }
 0xc0e   :  { %v12598_v30 = vpop.f32.mrf.mxu1 }
 0xc0f   :  { %14391 = vst [vmem:[#allocation117_spill] sm:$0xff] %v12598_v30  ;;  %v5758_v30 = vld [vmem:[#allocation2 + $0x2ba] sm:$0xff] }
 0xc11   :  { %8379 = vmatmul.f32.gmra.mxu1 %v5753_v16 }
 0xc16   :  { %v12600_v48 = vpop.f32.mrf.mxu1 }
 0xc17   :  { %14392 = vst [vmem:[#allocation118_spill] sm:$0xff] %v12600_v48  ;;  %v5759_v48 = vld [vmem:[#allocation2 + $0x2c2] sm:$0xff] }
 0xc19   :  { %8382 = vmatmul.f32.gmra.mxu1 %v5754_v6 }
 0xc1e   :  { %v12602_v7 = vpop.f32.mrf.mxu1 }
 0xc1f   :  { %14393 = vst [vmem:[#allocation119_spill] sm:$0xff] %v12602_v7  ;;  %v5760_v7 = vld [vmem:[#allocation2 + $0x2d2] sm:$0xff] }
 0xc21   :  { %8385 = vmatmul.f32.gmra.mxu1 %v5755_v12 }
 0xc26   :  { %v12604_v3 = vpop.f32.mrf.mxu1 }
 0xc27   :  { %14394 = vst [vmem:[#allocation120_spill] sm:$0xff] %v12604_v3  ;;  %v5761_v3 = vld [vmem:[#allocation2 + $0x2da] sm:$0xff] }
 0xc29   :  { %8388 = vmatmul.f32.gmra.mxu1 %v5756_v23 }
 0xc2e   :  { %v12606_v14 = vpop.f32.mrf.mxu1 }
 0xc2f   :  { %14395 = vst [vmem:[#allocation121_spill] sm:$0xff] %v12606_v14  ;;  %v5762_v14 = vld [vmem:[#allocation2 + $0x2ea] sm:$0xff] }
 0xc31   :  { %8391 = vmatmul.f32.gmra.mxu1 %v5757_v2 }
 0xc36   :  { %v12608_v63 = vpop.f32.mrf.mxu1 }
 0xc37   :  { %14396 = vst [vmem:[#allocation122_spill] sm:$0xff] %v12608_v63  ;;  %v5763_v63 = vld [vmem:[#allocation2 + $0x2f2] sm:$0xff] }
 0xc39   :  { %8394 = vmatmul.f32.gmra.mxu1 %v5758_v30 }
 0xc3e   :  { %v12610_v16 = vpop.f32.mrf.mxu1 }
 0xc3f   :  { %14397 = vst [vmem:[#allocation123_spill] sm:$0xff] %v12610_v16 }
 0xc41   :  { %8397 = vmatmul.f32.gmra.mxu1 %v5759_v48  ;;  %v5764_v48 = vld [vmem:[#allocation2 + $0x302] sm:$0xff] }
 0xc46   :  { %v12612_v6 = vpop.f32.mrf.mxu1 }
 0xc47   :  { %14398 = vst [vmem:[#allocation124_spill] sm:$0xff] %v12612_v6 }
 0xc49   :  { %8400 = vmatmul.f32.gmra.mxu1 %v5760_v7 }
 0xc4e   :  { %v12614_v12 = vpop.f32.mrf.mxu1 }
 0xc4f   :  { %14399 = vst [vmem:[#allocation125_spill] sm:$0xff] %v12614_v12  ;;  %v5765_v12 = vld [vmem:[#allocation2 + $0x30a] sm:$0xff] }
 0xc51   :  { %8403 = vmatmul.f32.gmra.mxu1 %v5761_v3 }
 0xc56   :  { %v12616_v23 = vpop.f32.mrf.mxu1 }
 0xc57   :  { %14400 = vst [vmem:[#allocation126_spill] sm:$0xff] %v12616_v23 }
 0xc59   :  { %8406 = vmatmul.f32.gmra.mxu1 %v5762_v14  ;;  %v5766_v14 = vld [vmem:[#allocation2 + $0x31a] sm:$0xff] }
 0xc5e   :  { %v12618_v2 = vpop.f32.mrf.mxu1 }
 0xc5f   :  { %14401 = vst [vmem:[#allocation127_spill] sm:$0xff] %v12618_v2 }
 0xc61   :  { %8409 = vmatmul.f32.gmra.mxu1 %v5763_v63 }
 0xc66   :  { %v8365_v30 = vpop.f32.mrf.mxu1 }
 0xc67   :  { %v12621_v16 = vadd.f32 %v8365_v30, %v12471_v27  ;;  %v5767_v27 = vld [vmem:[#allocation2 + $0x322] sm:$0xff] }
 0xc69   :  { %14402 = vst [vmem:[#allocation128_spill] sm:$0xff] %v12621_v16  ;;  %8412 = vmatmul.f32.gmra.mxu1 %v5764_v48 }
 0xc6e   :  { %v8368_v6 = vpop.f32.mrf.mxu1 }
 0xc6f   :  { %v12624_v7 = vadd.f32 %v8368_v6, %v12475_v44  ;;  %v5768_v44 = vld [vmem:[#allocation2 + $0x332] sm:$0xff] }
 0xc71   :  { %14403 = vst [vmem:[#allocation129_spill] sm:$0xff] %v12624_v7  ;;  %8415 = vmatmul.f32.gmra.mxu1 %v5765_v12 }
 0xc76   :  { %v8371_v3 = vpop.f32.mrf.mxu1 }
 0xc77   :  { %v12627_v23 = vadd.f32 %v8371_v3, %v12479_v25  ;;  %v5769_v25 = vld [vmem:[#allocation2 + $0x33a] sm:$0xff] }
 0xc79   :  { %14404 = vst [vmem:[#allocation130_spill] sm:$0xff] %v12627_v23  ;;  %8418 = vmatmul.f32.gmra.mxu1 %v5766_v14  ;;  %v5770_v14 = vld [vmem:[#allocation2 + $0x34a] sm:$0xff] }
 0xc7e   :  { %v8374_v2 = vpop.f32.mrf.mxu1 }
 0xc7f   :  { %v12630_v63 = vadd.f32 %v8374_v2, %v12483_v47  ;;  %v8040_v47 = vadd.f32 %v12237_v18, %v12229_v34  ;;  %v8043_v2 = vadd.f32 %v12243_v40, %v12235_v45  ;;  %v8052_v18 = vadd.f32 %v12261_v60, %v12253_v8 }
 0xc81   :  { %14405 = vst [vmem:[#allocation131_spill] sm:$0xff] %v12630_v63  ;;  %8421 = vmatmul.f32.gmra.mxu1 %v5767_v27  ;;  %v12659_v34 = vadd.f32 %v12544_v9, %v8043_v2  ;;  %v12684_v8 = vadd.f32 %v12550_v38, %v8052_v18  ;;  %v8061_v38 = vadd.f32 %v12279_v41, %v12271_v31 }
 0xc82   :  { %v8067_v41 = vadd.f32 %v12291_v52, %v12283_v17 }
 0xc83   :  { %14411 = vst [vmem:[#allocation137_spill] sm:$0xff] %v12659_v34  ;;  %v8509_v40 = vmul.f32 %v12659_v34, %v12659_v34 }
 0xc84   :  { %14414 = vst [vmem:[#allocation140_spill] sm:$0xff] %v12684_v8  ;;  %v12730_v52 = vadd.f32 %v12560_v35, %v8067_v41  ;;  %v8076_v35 = vadd.f32 %v12312_v58, %v12301_v1  ;;  %v14422_v58 = vld [vmem:[#allocation51_spill] sm:$0xff]  ;;  %v14431_v41 = vld [vmem:[#allocation81_spill] sm:$0xff] }
 0xc86   :  { %v8377_v30 = vpop.f32.mrf.mxu1  ;;  %14419 = vst [vmem:[#allocation145_spill] sm:$0xff] %v12730_v52 }
 0xc87   :  { %v12633_v48 = vadd.f32 %v8377_v30, %v12487_v54  ;;  %v8037_v54 = vadd.f32 %v12231_v11, %v12223_v4  ;;  %v5771_v30 = vld [vmem:[#allocation2 + $0x352] sm:$0xff]  ;;  %v8049_v4 = vadd.f32 %v12255_v55, %v12247_v5  ;;  %v8055_v55 = vadd.f32 %v12267_v0, %v12259_v24 }
 0xc89   :  { %14406 = vst [vmem:[#allocation132_spill] sm:$0xff] %v12633_v48  ;;  %8424 = vmatmul.f32.gmra.mxu1 %v5768_v44  ;;  %v12695_v0 = vadd.f32 %v12552_v33, %v8055_v55  ;;  %v12755_v55 = vpop.f32.mrf.mxu0 }
 0xc8b   :  { %14415 = vst [vmem:[#allocation141_spill] sm:$0xff] %v12695_v0  ;;  %v8513_v33 = vmul.f32 %v12695_v0, %v12695_v0 }
 0xc8e   :  { %v8380_v6 = vpop.f32.mrf.mxu1 }
 0xc8f   :  { %v12636_v12 = vadd.f32 %v8380_v6, %v12492_v46  ;;  %v12648_v46 = vadd.f32 %v12542_v13, %v8040_v47  ;;  %v12656_v6 = vadd.f32 %v12540_v62, %v8037_v54  ;;  %v12711_v54 = vadd.f32 %v12556_v51, %v8061_v38 }
 0xc90   :  { %v8070_v51 = vadd.f32 %v12297_v32, %v12289_v29  ;;  %v12740_v29 = vpop.f32.mrf.mxu2 }
 0xc91   :  { %14407 = vst [vmem:[#allocation133_spill] sm:$0xff] %v12636_v12  ;;  %8427 = vmatmul.f32.gmra.mxu1 %v5769_v25  ;;  %v8508_v11 = vmul.f32 %v12648_v46, %v12648_v46  ;;  %v8437_v5 = vadd.f32 %v12648_v46, %v12656_v6  ;;  %v8515_v17 = vmul.f32 %v12711_v54, %v12711_v54 }
 0xc92   :  { %14409 = vst [vmem:[#allocation135_spill] sm:$0xff] %v12648_v46  ;;  %v12738_v18 = vadd.f32 %v12562_v10, %v8070_v51  ;;  %v8079_v10 = vadd.f32 %v12319_v50, %v12310_v59  ;;  %v14427_v50 = vld [vmem:[#allocation66_spill] sm:$0xff] }
 0xc93   :  { %14410 = vst [vmem:[#allocation136_spill] sm:$0xff] %v12656_v6  ;;  %v8438_v13 = vadd.f32 %v8437_v5, %v12659_v34 }
 0xc94   :  { %14417 = vst [vmem:[#allocation143_spill] sm:$0xff] %v12711_v54  ;;  %v8518_v1 = vmul.f32 %v12738_v18, %v12738_v18 }
 0xc95   :  { %14420 = vst [vmem:[#allocation146_spill] sm:$0xff] %v12738_v18 }
 0xc96   :  { %v8383_v3 = vpop.f32.mrf.mxu1 }
 0xc97   :  { %v12639_v23 = vadd.f32 %v8383_v3, %v12496_v42  ;;  %v8046_v42 = vadd.f32 %v12249_v39, %v12241_v21  ;;  %v8507_v21 = vmul.f32 %v12656_v6, %v12656_v6  ;;  %v12675_v39 = vadd.f32 %v12548_v22, %v8049_v4 }
 0xc99   :  { %14408 = vst [vmem:[#allocation134_spill] sm:$0xff] %v12639_v23  ;;  %8430 = vmatmul.f32.gmra.mxu1 %v5770_v14  ;;  %v12666_v45 = vadd.f32 %v12546_v36, %v8046_v42  ;;  %v8058_v36 = vadd.f32 %v12273_v53, %v12265_v57  ;;  %v8511_v24 = vmul.f32 %v12675_v39, %v12675_v39 }
 0xc9a   :  { %14413 = vst [vmem:[#allocation139_spill] sm:$0xff] %v12675_v39  ;;  %v8064_v53 = vadd.f32 %v12285_v43, %v12277_v28 }
 0xc9b   :  { %14412 = vst [vmem:[#allocation138_spill] sm:$0xff] %v12666_v45  ;;  %v8510_v62 = vmul.f32 %v12666_v45, %v12666_v45  ;;  %v8439_v25 = vadd.f32 %v8438_v13, %v12666_v45  ;;  %v12703_v14 = vadd.f32 %v12554_v49, %v8058_v36  ;;  %v14424_v36 = vld [vmem:[#allocation103_spill] sm:$0xff] }
 0xc9d   :  { %14416 = vst [vmem:[#allocation142_spill] sm:$0xff] %v12703_v14  ;;  %v8440_v57 = vadd.f32 %v8439_v25, %v12675_v39  ;;  %v8514_v49 = vmul.f32 %v12703_v14, %v12703_v14 }
 0xc9e   :  { %v8386_v27 = vpop.f32.mrf.mxu1 }
 0xc9f   :  { %v12651_v44 = vadd.f32 %v8386_v27, %v12500_v37  ;;  %v8571_v37 = vadd.f32 %v8508_v11, %v8507_v21  ;;  %v8441_v31 = vadd.f32 %v8440_v57, %v12684_v8  ;;  %v12719_v27 = vadd.f32 %v12558_v61, %v8064_v53  ;;  %v12745_v21 = vpop.f32.mrf.mxu3  ;;  %v14429_v57 = vld [vmem:[#allocation70_spill] sm:$0xff]  ;;  %v14430_v53 = vld [vmem:[#allocation76_spill] sm:$0xff] }
 0xca0   :  { %v8073_v61 = vadd.f32 %v12303_v15, %v12295_v26  ;;  %v8517_v26 = vmul.f32 %v12730_v52, %v12730_v52 }
 0xca1   :  { %8433 = vmatmul.f32.gmra.mxu1 %v5771_v30  ;;  %v8572_v22 = vadd.f32 %v8571_v37, %v8509_v40  ;;  %14418 = vst [vmem:[#allocation144_spill] sm:$0xff] %v12719_v27  ;;  %v8442_v43 = vadd.f32 %v8441_v31, %v12695_v0  ;;  %v14538_v0 = vld [vmem:[#allocation27_spill] sm:$0xff] }
 0xca2   :  { %v12750_v15 = vadd.f32 %v12564_v56, %v8073_v61 }
 0xca3   :  { %v8573_v3 = vadd.f32 %v8572_v22, %v8510_v62  ;;  %v8443_v4 = vadd.f32 %v8442_v43, %v12703_v14  ;;  %v12760_v62 = vadd.f32 %v14422_v58, %v8076_v35  ;;  %v14425_v22 = vld [vmem:[#allocation67_spill] sm:$0xff]  ;;  %v14434_v43 = vld [vmem:[#allocation78_spill] sm:$0xff]  ;;  %v8553_v14 = vmul.f32 %v12639_v23, %v12639_v23 }
 0xca4   :  { %14421 = vst [vmem:[#allocation147_spill] sm:$0xff] %v12750_v15  ;;  %v8519_v59 = vmul.f32 %v12750_v15, %v12750_v15 }
 0xca5   :  { %v8574_v47 = vadd.f32 %v8573_v3, %v8511_v24  ;;  %v8444_v32 = vadd.f32 %v8443_v4, %v12711_v54  ;;  %14423 = vst [vmem:[#allocation51_spill] sm:$0xff] %v12760_v62  ;;  %v14426_v24 = vld [vmem:[#allocation72_spill] sm:$0xff]  ;;  %v12771_v3 = vadd.f32 %v14427_v50, %v8079_v10  ;;  %v8520_v31 = vmul.f32 %v12760_v62, %v12760_v62  ;;  %v14435_v4 = vld [vmem:[#allocation75_spill] sm:$0xff] }
 0xca6   :  { %v8389_v60 = vpop.f32.mrf.mxu1  ;;  %v8082_v25 = vadd.f32 %v14426_v24, %v14425_v22  ;;  %v12805_v22 = vpop.f32.mrf.mxu0 }
 0xca7   :  { %v12688_v9 = vadd.f32 %v8389_v60, %v12504_v20  ;;  %v8512_v20 = vmul.f32 %v12684_v8, %v12684_v8  ;;  %v8445_v5 = vadd.f32 %v8444_v32, %v12719_v27  ;;  %14428 = vst [vmem:[#allocation103_spill] sm:$0xff] %v12771_v3  ;;  %v12792_v32 = vpop.f32.mrf.mxu3  ;;  %v14539_v8 = vld [vmem:[#allocation30_spill] sm:$0xff] }
 0xca9   :  { %v8575_v2 = vadd.f32 %v8574_v47, %v8512_v20  ;;  %v8446_v13 = vadd.f32 %v8445_v5, %v12730_v52  ;;  %v8085_v47 = vadd.f32 %v14430_v53, %v14429_v57  ;;  %v14444_v57 = vld [vmem:[#allocation21_spill] sm:$0xff] }
 0xcab   :  { %v8576_v42 = vadd.f32 %v8575_v2, %v8513_v33  ;;  %v8447_v20 = vadd.f32 %v8446_v13, %v12738_v18  ;;  %v12779_v2 = vadd.f32 %v14431_v41, %v8082_v25  ;;  %v12787_v61 = vadd.f32 %v14435_v4, %v8085_v47  ;;  %v14441_v13 = vld [vmem:[#allocation109_spill] sm:$0xff]  ;;  %v14447_v41 = vld [vmem:[#allocation48_spill] sm:$0xff] }
 0xcac   :  { %v14451_v4 = vld [vmem:[#allocation36_spill] sm:$0xff] }
 0xcad   :  { %v8577_v11 = vadd.f32 %v8576_v42, %v8514_v49  ;;  %14432 = vst [vmem:[#allocation67_spill] sm:$0xff] %v12779_v2  ;;  %v8448_v49 = vadd.f32 %v8447_v20, %v12750_v15  ;;  %v8523_v25 = vmul.f32 %v12787_v61, %v12787_v61 }
 0xcae   :  { %v8392_v28 = vpop.f32.mrf.mxu1  ;;  %14436 = vst [vmem:[#allocation72_spill] sm:$0xff] %v12787_v61 }
 0xcaf   :  { %v12723_v30 = vadd.f32 %v8392_v28, %v12508_v19  ;;  %v8516_v19 = vmul.f32 %v12719_v27, %v12719_v27  ;;  %v8578_v40 = vadd.f32 %v8577_v11, %v8515_v17  ;;  %v14433_v28 = vld [vmem:[#allocation74_spill] sm:$0xff]  ;;  %v8521_v17 = vmul.f32 %v12771_v3, %v12771_v3  ;;  %v12789_v11 = vpop.f32.mrf.mxu2 }
 0xcb0   :  { %v8088_v51 = vadd.f32 %v14434_v43, %v14433_v28  ;;  %v14448_v43 = vld [vmem:[#allocation83_spill] sm:$0xff] }
 0xcb1   :  { %v8579_v37 = vadd.f32 %v8578_v40, %v8516_v19  ;;  %v8449_v19 = vadd.f32 %v8448_v49, %v12760_v62  ;;  %v8522_v40 = vmul.f32 %v12779_v2, %v12779_v2 }
 0xcb3   :  { %v8580_v38 = vadd.f32 %v8579_v37, %v8517_v26  ;;  %v14437_v26 = vld [vmem:[#allocation93_spill] sm:$0xff] }
 0xcb4   :  { %v12797_v5 = vadd.f32 %v14437_v26, %v8088_v51  ;;  %v14439_v37 = vld [vmem:[#allocation77_spill] sm:$0xff]  ;;  %v14452_v26 = vld [vmem:[#allocation22_spill] sm:$0xff] }
 0xcb5   :  { %v8581_v33 = vadd.f32 %v8580_v38, %v8518_v1  ;;  %v14440_v1 = vld [vmem:[#allocation79_spill] sm:$0xff] }
 0xcb6   :  { %v8395_v60 = vpop.f32.mrf.mxu1  ;;  %14438 = vst [vmem:[#allocation66_spill] sm:$0xff] %v12797_v5  ;;  %v8091_v58 = vadd.f32 %v14440_v1, %v14439_v37  ;;  %v14442_v38 = vld [vmem:[#allocation39_spill] sm:$0xff]  ;;  %v14454_v37 = vld [vmem:[#allocation69_spill] sm:$0xff] }
 0xcb7   :  { %v12764_v56 = vadd.f32 %v8395_v60, %v14424_v36  ;;  %v8582_v42 = vadd.f32 %v8581_v33, %v8519_v59  ;;  %v8450_v60 = vadd.f32 %v8449_v19, %v12771_v3  ;;  %v14443_v59 = vld [vmem:[#allocation34_spill] sm:$0xff]  ;;  %v8524_v33 = vmul.f32 %v12797_v5, %v12797_v5  ;;  %v14455_v1 = vld [vmem:[#allocation17_spill] sm:$0xff] }
 0xcb8   :  { %v8094_v50 = vadd.f32 %v14443_v59, %v14442_v38  ;;  %v12813_v53 = vadd.f32 %v14444_v57, %v8091_v58  ;;  %v8103_v58 = vadd.f32 %v14455_v1, %v14454_v37  ;;  %v14456_v59 = vld [vmem:[#allocation41_spill] sm:$0xff] }
 0xcb9   :  { %v8583_v35 = vadd.f32 %v8582_v42, %v8520_v31  ;;  %v8451_v20 = vadd.f32 %v8450_v60, %v12779_v2  ;;  %v14446_v31 = vld [vmem:[#allocation80_spill] sm:$0xff] }
 0xcba   :  { %14445 = vst [vmem:[#allocation70_spill] sm:$0xff] %v12813_v53  ;;  %v8097_v49 = vadd.f32 %v14447_v41, %v14446_v31  ;;  %v12821_v51 = vadd.f32 %v14448_v43, %v8094_v50  ;;  %v14460_v31 = vld [vmem:[#allocation18_spill] sm:$0xff] }
 0xcbb   :  { %v8584_v24 = vadd.f32 %v8583_v35, %v8521_v17  ;;  %v8452_v28 = vadd.f32 %v8451_v20, %v12787_v61  ;;  %v14450_v17 = vld [vmem:[#allocation45_spill] sm:$0xff]  ;;  %v14458_v20 = vld [vmem:[#allocation108_spill] sm:$0xff] }
 0xcbc   :  { %14449 = vst [vmem:[#allocation76_spill] sm:$0xff] %v12821_v51  ;;  %v8100_v19 = vadd.f32 %v14451_v4, %v14450_v17  ;;  %v8526_v38 = vmul.f32 %v12821_v51, %v12821_v51  ;;  %v14463_v4 = vld [vmem:[#allocation16_spill] sm:$0xff] }
 0xcbd   :  { %v8585_v47 = vadd.f32 %v8584_v24, %v8522_v40  ;;  %v8453_v35 = vadd.f32 %v8452_v28, %v12797_v5  ;;  %v8525_v40 = vmul.f32 %v12813_v53, %v12813_v53  ;;  %v12833_v24 = vpop.f32.mrf.mxu2 }
 0xcbe   :  { %v8398_v10 = vpop.f32.mrf.mxu1  ;;  %v12839_v50 = vadd.f32 %v14456_v59, %v8100_v19  ;;  %v14464_v19 = vld [vmem:[#allocation19_spill] sm:$0xff]  ;;  %v14468_v59 = vld [vmem:[#allocation38_spill] sm:$0xff] }
 0xcbf   :  { %v12803_v36 = vadd.f32 %v8398_v10, %v14441_v13  ;;  %v8586_v42 = vadd.f32 %v8585_v47, %v8523_v25  ;;  %v12829_v10 = vadd.f32 %v14452_v26, %v8097_v49  ;;  %v8454_v25 = vadd.f32 %v8453_v35, %v12813_v53  ;;  %v14459_v47 = vld [vmem:[#allocation15_spill] sm:$0xff]  ;;  %v12846_v49 = vpop.f32.mrf.mxu3  ;;  %v12856_v26 = vpop.f32.mrf.mxu0 }
 0xcc0   :  { %14457 = vst [vmem:[#allocation74_spill] sm:$0xff] %v12839_v50  ;;  %v8106_v41 = vadd.f32 %v14460_v31, %v14459_v47  ;;  %v8109_v35 = vadd.f32 %v14464_v19, %v14463_v4 }
 0xcc1   :  { %14453 = vst [vmem:[#allocation81_spill] sm:$0xff] %v12829_v10  ;;  %v8587_v60 = vadd.f32 %v8586_v42, %v8524_v33  ;;  %v8455_v28 = vadd.f32 %v8454_v25, %v12821_v51  ;;  %v8527_v43 = vmul.f32 %v12829_v10, %v12829_v10  ;;  %v14461_v42 = vld [vmem:[#allocation110_spill] sm:$0xff]  ;;  %v14467_v25 = vld [vmem:[#allocation20_spill] sm:$0xff] }
 0xcc2   :  { %v12852_v17 = vadd.f32 %v14461_v42, %v8103_v58  ;;  %v14469_v42 = vld [vmem:[#allocation112_spill] sm:$0xff] }
 0xcc3   :  { %v8588_v33 = vadd.f32 %v8587_v60, %v8525_v40  ;;  %v8456_v1 = vadd.f32 %v8455_v28, %v12829_v10  ;;  %v14465_v40 = vld [vmem:[#allocation111_spill] sm:$0xff]  ;;  %v12870_v4 = vadd.f32 %v14469_v42, %v8109_v35 }
 0xcc4   :  { %14462 = vst [vmem:[#allocation78_spill] sm:$0xff] %v12852_v17  ;;  %v12862_v60 = vadd.f32 %v14465_v40, %v8106_v41  ;;  %v8529_v31 = vmul.f32 %v12852_v17, %v12852_v17 }
 0xcc5   :  { %v8589_v37 = vadd.f32 %v8588_v33, %v8526_v38  ;;  %v8457_v58 = vadd.f32 %v8456_v1, %v12839_v50  ;;  %14470 = vst [vmem:[#allocation93_spill] sm:$0xff] %v12870_v4  ;;  %v14471_v38 = vld [vmem:[#allocation42_spill] sm:$0xff]  ;;  %v14472_v33 = vld [vmem:[#allocation97_spill] sm:$0xff] }
 0xcc6   :  { %v8401_v13 = vpop.f32.mrf.mxu1  ;;  %14466 = vst [vmem:[#allocation75_spill] sm:$0xff] %v12862_v60  ;;  %v8115_v28 = vadd.f32 %v14472_v33, %v14471_v38  ;;  %v8530_v40 = vmul.f32 %v12862_v60, %v12862_v60  ;;  %v14475_v1 = vld [vmem:[#allocation86_spill] sm:$0xff]  ;;  %v8531_v38 = vmul.f32 %v12870_v4, %v12870_v4 }
 0xcc7   :  { %v12842_v57 = vadd.f32 %v8401_v13, %v14458_v20  ;;  %v8528_v13 = vmul.f32 %v12839_v50, %v12839_v50  ;;  %v8112_v20 = vadd.f32 %v14468_v59, %v14467_v25  ;;  %v8590_v47 = vadd.f32 %v8589_v37, %v8527_v43  ;;  %v14473_v43 = vld [vmem:[#allocation113_spill] sm:$0xff]  ;;  %v14476_v25 = vld [vmem:[#allocation54_spill] sm:$0xff]  ;;  %v12884_v50 = vpop.f32.mrf.mxu2  ;;  %v12894_v51 = vpop.f32.mrf.mxu3 }
 0xcc8   :  { %v8458_v41 = vadd.f32 %v8457_v58, %v12852_v17  ;;  %v8118_v59 = vadd.f32 %v14476_v25, %v14475_v1  ;;  %v14479_v58 = vld [vmem:[#allocation87_spill] sm:$0xff]  ;;  %v14480_v33 = vld [vmem:[#allocation82_spill] sm:$0xff]  ;;  %v14484_v25 = vld [vmem:[#allocation44_spill] sm:$0xff]  ;;  %v12904_v53 = vpop.f32.mrf.mxu0 }
 0xcc9   :  { %v8591_v10 = vadd.f32 %v8590_v47, %v8528_v13  ;;  %v12880_v37 = vadd.f32 %v14473_v43, %v8112_v20  ;;  %v14477_v13 = vld [vmem:[#allocation114_spill] sm:$0xff]  ;;  %v8121_v17 = vadd.f32 %v14480_v33, %v14479_v58  ;;  %v14488_v33 = vld [vmem:[#allocation89_spill] sm:$0xff] }
 0xcca   :  { %v8459_v42 = vadd.f32 %v8458_v41, %v12862_v60  ;;  %v12890_v47 = vadd.f32 %v14477_v13, %v8115_v28  ;;  %v14483_v41 = vld [vmem:[#allocation100_spill] sm:$0xff] }
 0xccb   :  { %14474 = vst [vmem:[#allocation77_spill] sm:$0xff] %v12880_v37  ;;  %v8592_v35 = vadd.f32 %v8591_v10, %v8529_v31  ;;  %v8532_v1 = vmul.f32 %v12880_v37, %v12880_v37  ;;  %v14481_v10 = vld [vmem:[#allocation115_spill] sm:$0xff]  ;;  %v8124_v60 = vadd.f32 %v14484_v25, %v14483_v41  ;;  %v14492_v25 = vld [vmem:[#allocation104_spill] sm:$0xff] }
 0xccc   :  { %14478 = vst [vmem:[#allocation79_spill] sm:$0xff] %v12890_v47  ;;  %v8460_v43 = vadd.f32 %v8459_v42, %v12870_v4  ;;  %v12900_v31 = vadd.f32 %v14481_v10, %v8118_v59  ;;  %v8533_v58 = vmul.f32 %v12890_v47, %v12890_v47  ;;  %v14487_v42 = vld [vmem:[#allocation92_spill] sm:$0xff] }
 0xccd   :  { %v8593_v20 = vadd.f32 %v8592_v35, %v8530_v40  ;;  %v14485_v40 = vld [vmem:[#allocation116_spill] sm:$0xff]  ;;  %v8127_v4 = vadd.f32 %v14488_v33, %v14487_v42  ;;  %v14493_v42 = vld [vmem:[#allocation118_spill] sm:$0xff] }
 0xcce   :  { %v12874_v19 = vpop.f32.mrf.mxu1  ;;  %14482 = vst [vmem:[#allocation109_spill] sm:$0xff] %v12900_v31  ;;  %v8461_v13 = vadd.f32 %v8460_v43, %v12880_v37  ;;  %v12910_v35 = vadd.f32 %v14485_v40, %v8121_v17  ;;  %v8534_v41 = vmul.f32 %v12900_v31, %v12900_v31  ;;  %v14491_v43 = vld [vmem:[#allocation85_spill] sm:$0xff] }
 0xccf   :  { %v8594_v28 = vadd.f32 %v8593_v20, %v8531_v38  ;;  %v14489_v38 = vld [vmem:[#allocation117_spill] sm:$0xff]  ;;  %v8130_v37 = vadd.f32 %v14492_v25, %v14491_v43  ;;  %v12928_v33 = vadd.f32 %v14493_v42, %v8127_v4  ;;  %v14500_v43 = vld [vmem:[#allocation91_spill] sm:$0xff] }
 0xcd0   :  { %14486 = vst [vmem:[#allocation39_spill] sm:$0xff] %v12910_v35  ;;  %v8462_v10 = vadd.f32 %v8461_v13, %v12890_v47  ;;  %v12920_v20 = vadd.f32 %v14489_v38, %v8124_v60  ;;  %v8535_v40 = vmul.f32 %v12910_v35, %v12910_v35  ;;  %v12932_v47 = vpop.f32.mrf.mxu2  ;;  %v12952_v3 = vpop.f32.mrf.mxu0 }
 0xcd1   :  { %v8595_v59 = vadd.f32 %v8594_v28, %v8532_v1  ;;  %14494 = vst [vmem:[#allocation21_spill] sm:$0xff] %v12928_v33  ;;  %v14495_v1 = vld [vmem:[#allocation57_spill] sm:$0xff]  ;;  %v14496_v28 = vld [vmem:[#allocation96_spill] sm:$0xff] }
 0xcd2   :  { %14490 = vst [vmem:[#allocation34_spill] sm:$0xff] %v12920_v20  ;;  %v8463_v17 = vadd.f32 %v8462_v10, %v12900_v31  ;;  %v8133_v13 = vadd.f32 %v14496_v28, %v14495_v1  ;;  %v8536_v38 = vmul.f32 %v12920_v20, %v12920_v20  ;;  %v14499_v10 = vld [vmem:[#allocation32_spill] sm:$0xff]  ;;  %v12942_v31 = vpop.f32.mrf.mxu3  ;;  %v8537_v1 = vmul.f32 %v12928_v33, %v12928_v33  ;;  %v14504_v28 = vld [vmem:[#allocation107_spill] sm:$0xff] }
 0xcd3   :  { %v8596_v61 = vadd.f32 %v8595_v59, %v8533_v58  ;;  %v14497_v58 = vld [vmem:[#allocation119_spill] sm:$0xff]  ;;  %v8136_v25 = vadd.f32 %v14500_v43, %v14499_v10 }
 0xcd4   :  { %v8464_v60 = vadd.f32 %v8463_v17, %v12910_v35  ;;  %v12938_v59 = vadd.f32 %v14497_v58, %v8130_v37  ;;  %v14503_v17 = vld [vmem:[#allocation88_spill] sm:$0xff]  ;;  %v14507_v43 = vld [vmem:[#allocation47_spill] sm:$0xff] }
 0xcd5   :  { %v8597_v2 = vadd.f32 %v8596_v61, %v8534_v41  ;;  %v14501_v61 = vld [vmem:[#allocation120_spill] sm:$0xff]  ;;  %v8139_v35 = vadd.f32 %v14504_v28, %v14503_v17  ;;  %v14509_v28 = vld [vmem:[#allocation122_spill] sm:$0xff] }
 0xcd6   :  { %v12914_v5 = vpop.f32.mrf.mxu1  ;;  %14498 = vst [vmem:[#allocation80_spill] sm:$0xff] %v12938_v59  ;;  %v8465_v42 = vadd.f32 %v8464_v60, %v12920_v20  ;;  %v12948_v41 = vadd.f32 %v14501_v61, %v8133_v13  ;;  %v14508_v20 = vld [vmem:[#allocation101_spill] sm:$0xff] }
 0xcd7   :  { %v8598_v4 = vadd.f32 %v8597_v2, %v8535_v40  ;;  %v8538_v2 = vmul.f32 %v12938_v59, %v12938_v59  ;;  %v14505_v40 = vld [vmem:[#allocation121_spill] sm:$0xff]  ;;  %v8142_v13 = vadd.f32 %v14508_v20, %v14507_v43  ;;  %v12968_v15 = vadd.f32 %v14509_v28, %v8139_v35 }
 0xcd8   :  { %14502 = vst [vmem:[#allocation48_spill] sm:$0xff] %v12948_v41  ;;  %v8466_v10 = vadd.f32 %v8465_v42, %v12928_v33  ;;  %v12960_v60 = vadd.f32 %v14505_v40, %v8136_v25  ;;  %v8539_v17 = vmul.f32 %v12948_v41, %v12948_v41  ;;  %v14513_v40 = vld [vmem:[#allocation123_spill] sm:$0xff]  ;;  %v12980_v43 = vpop.f32.mrf.mxu2 }
 0xcd9   :  { %v8599_v58 = vadd.f32 %v8598_v4, %v8536_v38  ;;  %14510 = vst [vmem:[#allocation45_spill] sm:$0xff] %v12968_v15  ;;  %v14511_v38 = vld [vmem:[#allocation95_spill] sm:$0xff]  ;;  %v14512_v4 = vld [vmem:[#allocation90_spill] sm:$0xff]  ;;  %v12976_v20 = vadd.f32 %v14513_v40, %v8142_v13  ;;  %v8541_v28 = vmul.f32 %v12968_v15, %v12968_v15 }
 0xcda   :  { %14506 = vst [vmem:[#allocation83_spill] sm:$0xff] %v12960_v60  ;;  %v8467_v62 = vadd.f32 %v8466_v10, %v12938_v59  ;;  %v8145_v42 = vadd.f32 %v14512_v4, %v14511_v38  ;;  %v8540_v25 = vmul.f32 %v12960_v60, %v12960_v60  ;;  %v14520_v38 = vld [vmem:[#allocation105_spill] sm:$0xff] }
 0xcdb   :  { %v8600_v61 = vadd.f32 %v8599_v58, %v8537_v1  ;;  %14514 = vst [vmem:[#allocation36_spill] sm:$0xff] %v12976_v20  ;;  %v14515_v1 = vld [vmem:[#allocation98_spill] sm:$0xff] }
 0xcdc   :  { %v8468_v18 = vadd.f32 %v8467_v62, %v12948_v41  ;;  %v14516_v58 = vld [vmem:[#allocation94_spill] sm:$0xff]  ;;  %v14519_v62 = vld [vmem:[#allocation60_spill] sm:$0xff]  ;;  %v12990_v41 = vpop.f32.mrf.mxu3 }
 0xcdd   :  { %v8601_v33 = vadd.f32 %v8600_v61, %v8538_v2  ;;  %v8148_v10 = vadd.f32 %v14516_v58, %v14515_v1  ;;  %v14517_v2 = vld [vmem:[#allocation124_spill] sm:$0xff]  ;;  %v8151_v4 = vadd.f32 %v14520_v38, %v14519_v62  ;;  %v14523_v58 = vld [vmem:[#allocation102_spill] sm:$0xff] }
 0xcde   :  { %v12954_v37 = vpop.f32.mrf.mxu1  ;;  %v8469_v35 = vadd.f32 %v8468_v18, %v12960_v60  ;;  %v12986_v61 = vadd.f32 %v14517_v2, %v8145_v42  ;;  %v14521_v18 = vld [vmem:[#allocation125_spill] sm:$0xff]  ;;  %v14524_v60 = vld [vmem:[#allocation50_spill] sm:$0xff]  ;;  %v13002_v2 = vpop.f32.mrf.mxu0 }
 0xcdf   :  { %v8602_v59 = vadd.f32 %v8601_v33, %v8539_v17  ;;  %v8542_v33 = vmul.f32 %v12976_v20, %v12976_v20  ;;  %v12998_v17 = vadd.f32 %v14521_v18, %v8148_v10  ;;  %v8154_v42 = vadd.f32 %v14524_v60, %v14523_v58  ;;  %v14527_v18 = vld [vmem:[#allocation127_spill] sm:$0xff] }
 0xce0   :  { %14518 = vst [vmem:[#allocation22_spill] sm:$0xff] %v12986_v61  ;;  %v8470_v1 = vadd.f32 %v8469_v35, %v12968_v15  ;;  %v8543_v38 = vmul.f32 %v12986_v61, %v12986_v61  ;;  %v13021_v58 = vpop.f32.mrf.mxu2 }
 0xce1   :  { %v8603_v40 = vadd.f32 %v8602_v59, %v8540_v25  ;;  %14522 = vst [vmem:[#allocation69_spill] sm:$0xff] %v12998_v17  ;;  %v14525_v59 = vld [vmem:[#allocation126_spill] sm:$0xff]  ;;  %v8544_v10 = vmul.f32 %v12998_v17, %v12998_v17  ;;  %v13014_v27 = vadd.f32 %v14527_v18, %v8154_v42 }
 0xce2   :  { %v8471_v62 = vadd.f32 %v8470_v1, %v12976_v20  ;;  %v13008_v25 = vadd.f32 %v14525_v59, %v8151_v4 }
 0xce3   :  { %v8604_v52 = vadd.f32 %v8603_v40, %v8541_v28  ;;  %14528 = vst [vmem:[#allocation41_spill] sm:$0xff] %v13014_v27 }
 0xce4   :  { %14526 = vst [vmem:[#allocation17_spill] sm:$0xff] %v13008_v25  ;;  %v8472_v15 = vadd.f32 %v8471_v62, %v12986_v61  ;;  %v8545_v40 = vmul.f32 %v13008_v25, %v13008_v25  ;;  %v13026_v62 = vpop.f32.mrf.mxu3  ;;  %v14529_v61 = vld [vmem:[#allocation130_spill] sm:$0xff] }
 0xce5   :  { %v8605_v35 = vadd.f32 %v8604_v52, %v8542_v33  ;;  %v8546_v33 = vmul.f32 %v13014_v27, %v13014_v27  ;;  %v8549_v20 = vmul.f32 %v14529_v61, %v14529_v61 }
 0xce6   :  { %v12992_v13 = vpop.f32.mrf.mxu1  ;;  %v8473_v28 = vadd.f32 %v8472_v15, %v12998_v17  ;;  %v8547_v15 = vmul.f32 %v12621_v16, %v12621_v16  ;;  %v13031_v59 = vpop.f32.mrf.mxu0 }
 0xce7   :  { %v8606_v60 = vadd.f32 %v8605_v35, %v8543_v38 }
 0xce8   :  { %v8474_v52 = vadd.f32 %v8473_v28, %v13008_v25 }
 0xce9   :  { %v8607_v4 = vadd.f32 %v8606_v60, %v8544_v10  ;;  %v8548_v10 = vmul.f32 %v12624_v7, %v12624_v7 }
 0xcea   :  { %v8475_v38 = vadd.f32 %v8474_v52, %v13014_v27  ;;  %v8550_v27 = vmul.f32 %v12630_v63, %v12630_v63 }
 0xceb   :  { %v8608_v42 = vadd.f32 %v8607_v4, %v8545_v40 }
 0xcec   :  { %v8476_v18 = vadd.f32 %v8475_v38, %v12621_v16 }
 0xced   :  { %v8609_v35 = vadd.f32 %v8608_v42, %v8546_v33  ;;  %v13044_v33 = vpop.f32.mrf.mxu2 }
 0xcee   :  { %v13019_v1 = vpop.f32.mrf.mxu1  ;;  %v8477_v28 = vadd.f32 %v8476_v18, %v12624_v7  ;;  %v14530_v18 = vld [vmem:[#allocation23_spill] sm:$0xff]  ;;  %v14531_v7 = vld [vmem:[#allocation84_spill] sm:$0xff] }
 0xcef   :  { %v8610_v60 = vadd.f32 %v8609_v35, %v8547_v15  ;;  %v8551_v15 = vmul.f32 %v12633_v48, %v12633_v48  ;;  %v13049_v35 = vpop.f32.mrf.mxu3  ;;  %v7360_v16 = vadd.f32 %v14531_v7, %v14530_v18  ;;  %v14535_v7 = vld [vmem:[#allocation25_spill] sm:$0xff] }
 0xcf0   :  { %v8478_v52 = vadd.f32 %v8477_v28, %v14529_v61  ;;  %v14532_v28 = vld [vmem:[#allocation24_spill] sm:$0xff]  ;;  %v14533_v61 = vld [vmem:[#allocation26_spill] sm:$0xff] }
 0xcf1   :  { %v8611_v4 = vadd.f32 %v8610_v60, %v8548_v10  ;;  %v8552_v60 = vmul.f32 %v12636_v12, %v12636_v12  ;;  %v7363_v17 = vadd.f32 %v14533_v61, %v14532_v28  ;;  %v7369_v61 = vadd.f32 %v14539_v8, %v14538_v0 }
 0xcf2   :  { %v8479_v38 = vadd.f32 %v8478_v52, %v12630_v63  ;;  %v8555_v0 = vmul.f32 %v12688_v9, %v12688_v9 }
 0xcf3   :  { %v8612_v42 = vadd.f32 %v8611_v4, %v8549_v20  ;;  %v13058_v20 = vpop.f32.mrf.mxu0  ;;  %v14534_v4 = vld [vmem:[#allocation99_spill] sm:$0xff] }
 0xcf4   :  { %v8480_v10 = vadd.f32 %v8479_v38, %v12633_v48  ;;  %v7569_v52 = vadd.f32 %v14534_v4, %v7360_v16  ;;  %v14537_v38 = vld [vmem:[#allocation106_spill] sm:$0xff]  ;;  %v8554_v16 = vmul.f32 %v12651_v44, %v12651_v44  ;;  %v14542_v4 = vld [vmem:[#allocation31_spill] sm:$0xff] }
 0xcf5   :  { %v8613_v25 = vadd.f32 %v8612_v42, %v8550_v27  ;;  %v14536_v27 = vld [vmem:[#allocation28_spill] sm:$0xff]  ;;  %v7572_v18 = vadd.f32 %v14537_v38, %v7363_v17  ;;  %v14546_v38 = vld [vmem:[#allocation62_spill] sm:$0xff] }
 0xcf6   :  { %v13039_v40 = vpop.f32.mrf.mxu1  ;;  %v8481_v54 = vadd.f32 %v8480_v10, %v12636_v12  ;;  %v7366_v42 = vadd.f32 %v14536_v27, %v14535_v7  ;;  %v14543_v12 = vld [vmem:[#allocation37_spill] sm:$0xff]  ;;  %v14544_v7 = vld [vmem:[#allocation35_spill] sm:$0xff]  ;;  %v7778_v46 = vadd.f32 %v12740_v29, %v7569_v52  ;;  %v14552_v52 = vld [vmem:[#allocation52_spill] sm:$0xff] }
 0xcf7   :  { %v8614_v63 = vadd.f32 %v8613_v25, %v8551_v15  ;;  %v14540_v25 = vld [vmem:[#allocation29_spill] sm:$0xff]  ;;  %v7375_v45 = vadd.f32 %v14543_v12, %v14542_v4  ;;  %v14545_v27 = vld [vmem:[#allocation43_spill] sm:$0xff]  ;;  %v7781_v12 = vadd.f32 %v12789_v11, %v7572_v18  ;;  %v8010_v18 = vpop.f32.mrf.mxu3 }
 0xcf8   :  { %v8482_v39 = vadd.f32 %v8481_v54, %v12639_v23  ;;  %v14541_v15 = vld [vmem:[#allocation33_spill] sm:$0xff]  ;;  %v7378_v17 = vadd.f32 %v14545_v27, %v14544_v7  ;;  %v7575_v34 = vadd.f32 %v14546_v38, %v7366_v42  ;;  %v14547_v54 = vld [vmem:[#allocation40_spill] sm:$0xff]  ;;  %v7987_v42 = vadd.f32 %v12745_v21, %v7778_v46  ;;  %v7801_v27 = vpop.f32.mrf.mxu2 }
 0xcf9   :  { %v8615_v28 = vadd.f32 %v8614_v63, %v8552_v60  ;;  %v7372_v10 = vadd.f32 %v14541_v15, %v14540_v25  ;;  %v14548_v60 = vld [vmem:[#allocation49_spill] sm:$0xff]  ;;  %v14549_v25 = vld [vmem:[#allocation46_spill] sm:$0xff]  ;;  %v14550_v15 = vld [vmem:[#allocation55_spill] sm:$0xff] }
 0xcfa   :  { %v8483_v63 = vadd.f32 %v8482_v39, %v12651_v44  ;;  %v7381_v23 = vadd.f32 %v14548_v60, %v14547_v54  ;;  %v7384_v6 = vadd.f32 %v14550_v15, %v14549_v25  ;;  %v14551_v4 = vld [vmem:[#allocation53_spill] sm:$0xff]  ;;  %v8556_v39 = vmul.f32 %v12723_v30, %v12723_v30 }
 0xcfb   :  { %v8616_v8 = vadd.f32 %v8615_v28, %v8553_v14  ;;  %v7578_v7 = vadd.f32 %v14551_v4, %v7369_v61  ;;  %v14553_v28 = vld [vmem:[#allocation61_spill] sm:$0xff]  ;;  %v7990_v54 = vadd.f32 %v12792_v32, %v7781_v12  ;;  %v7784_v60 = vadd.f32 %v12833_v24, %v7575_v34  ;;  %v14555_v32 = vld [vmem:[#allocation68_spill] sm:$0xff]  ;;  %v8219_v34 = vpop.f32.mrf.mxu0 }
 0xcfc   :  { %v8484_v14 = vadd.f32 %v8483_v63, %v12688_v9  ;;  %v7387_v38 = vadd.f32 %v14553_v28, %v14552_v52  ;;  %v14554_v25 = vld [vmem:[#allocation65_spill] sm:$0xff]  ;;  %v8196_v61 = vadd.f32 %v12755_v55, %v7987_v42  ;;  %v7584_v12 = vadd.f32 %v14555_v32, %v7375_v45 }
 0xcfd   :  { %v8617_v29 = vadd.f32 %v8616_v8, %v8554_v16  ;;  %v7581_v11 = vadd.f32 %v14554_v25, %v7372_v10  ;;  %v8557_v16 = vmul.f32 %v12764_v56, %v12764_v56  ;;  %v7993_v8 = vadd.f32 %v12846_v49, %v7784_v60 }
 0xcfe   :  { %v13067_v48 = vpop.f32.mrf.mxu1  ;;  %v8485_v21 = vadd.f32 %v8484_v14, %v12723_v30  ;;  %v8199_v63 = vadd.f32 %v12805_v22, %v7990_v54  ;;  %v7787_v15 = vadd.f32 %v12884_v50, %v7578_v7  ;;  %v8558_v55 = vmul.f32 %v12803_v36, %v12803_v36  ;;  %v14556_v50 = vld [vmem:[#allocation56_spill] sm:$0xff] }
 0xcff   :  { %v8618_v46 = vadd.f32 %v8617_v29, %v8555_v0  ;;  %v13112_v0 = vadd.f32 %v12874_v19, %v8196_v61  ;;  %v8202_v49 = vadd.f32 %v12856_v26, %v7993_v8  ;;  %v7790_v22 = vadd.f32 %v12932_v47, %v7581_v11  ;;  %v14557_v26 = vld [vmem:[#allocation71_spill] sm:$0xff]  ;;  %v8013_v8 = vpop.f32.mrf.mxu3 }
 0xd00   :  { %v8486_v4 = vadd.f32 %v8485_v21, %v12764_v56  ;;  %v7996_v42 = vadd.f32 %v12894_v51, %v7787_v15  ;;  %v7587_v7 = vadd.f32 %v14556_v50, %v7378_v17  ;;  %v8559_v14 = vmul.f32 %v12842_v57, %v12842_v57 }
 0xd01   :  { %v8619_v10 = vadd.f32 %v8618_v46, %v8556_v39  ;;  %v13122_v39 = vadd.f32 %v12914_v5, %v8199_v63  ;;  %v7999_v19 = vadd.f32 %v12942_v31, %v7790_v22  ;;  %v7793_v51 = vadd.f32 %v12980_v43, %v7584_v12  ;;  %v7804_v43 = vpop.f32.mrf.mxu2 }
 0xd02   :  { %v8487_v29 = vadd.f32 %v8486_v4, %v12803_v36  ;;  %v8205_v52 = vadd.f32 %v12904_v53, %v7996_v42  ;;  %v7590_v28 = vadd.f32 %v14557_v26, %v7381_v23  ;;  %v8560_v54 = vmul.f32 %v13112_v0, %v13112_v0  ;;  %v14558_v53 = vld [vmem:[#allocation59_spill] sm:$0xff]  ;;  %v14560_v42 = vld [vmem:[#allocation58_spill] sm:$0xff] }
 0xd03   :  { %v8620_v45 = vadd.f32 %v8619_v10, %v8557_v16  ;;  %v13132_v60 = vadd.f32 %v12954_v37, %v8202_v49  ;;  %v8002_v5 = vadd.f32 %v12990_v41, %v7793_v51  ;;  %v8208_v25 = vadd.f32 %v12952_v3, %v7999_v19  ;;  %v14559_v16 = vld [vmem:[#allocation73_spill] sm:$0xff]  ;;  %v8222_v10 = vpop.f32.mrf.mxu0  ;;  %v14561_v49 = vld [vmem:[#allocation64_spill] sm:$0xff] }
 0xd04   :  { %v8488_v17 = vadd.f32 %v8487_v29, %v12842_v57  ;;  %v7796_v31 = vadd.f32 %v13021_v58, %v7587_v7  ;;  %v7593_v11 = vadd.f32 %v14558_v53, %v7384_v6  ;;  %v8561_v46 = vmul.f32 %v13122_v39, %v13122_v39  ;;  %v14562_v29 = vld [vmem:[#allocation63_spill] sm:$0xff] }
 0xd05   :  { %v8621_v47 = vadd.f32 %v8620_v45, %v8558_v55  ;;  %v13142_v21 = vadd.f32 %v12992_v13, %v8205_v52  ;;  %v8211_v41 = vadd.f32 %v13002_v2, %v8002_v5  ;;  %v7799_v3 = vadd.f32 %v13044_v33, %v7590_v28 }
 0xd06   :  { %v8425_v24 = vpop.f32.mrf.mxu1  ;;  %v8489_v23 = vadd.f32 %v8488_v17, %v13112_v0  ;;  %v8005_v37 = vadd.f32 %v13026_v62, %v7796_v31  ;;  %v7596_v58 = vadd.f32 %v14559_v16, %v7387_v38  ;;  %v8562_v32 = vmul.f32 %v13132_v60, %v13132_v60 }
 0xd07   :  { %v8622_v61 = vadd.f32 %v8621_v47, %v8559_v14  ;;  %v13152_v12 = vadd.f32 %v13019_v1, %v8208_v25  ;;  %v8008_v13 = vadd.f32 %v13049_v35, %v7799_v3  ;;  %v7802_v2 = vadd.f32 %v7801_v27, %v7593_v11  ;;  %v8016_v25 = vpop.f32.mrf.mxu3 }
 0xd08   :  { %v8490_v15 = vadd.f32 %v8489_v23, %v13122_v39  ;;  %v8214_v62 = vadd.f32 %v13031_v59, %v8005_v37  ;;  %v8563_v4 = vmul.f32 %v13142_v21, %v13142_v21  ;;  %v13160_v55 = vadd.f32 %v13039_v40, %v8211_v41 }
 0xd09   :  { %v8623_v63 = vadd.f32 %v8622_v61, %v8560_v54  ;;  %v7390_v22 = vadd.f32 %v14561_v49, %v14560_v42  ;;  %v8011_v1 = vadd.f32 %v8010_v18, %v7802_v2  ;;  %v8217_v50 = vadd.f32 %v13058_v20, %v8008_v13  ;;  %v7807_v47 = vpop.f32.mrf.mxu2 }
 0xd0a   :  { %v8491_v38 = vadd.f32 %v8490_v15, %v13132_v60  ;;  %v7805_v35 = vadd.f32 %v7804_v43, %v7596_v58  ;;  %v8564_v27 = vmul.f32 %v13152_v12, %v13152_v12  ;;  %v13169_v45 = vadd.f32 %v13067_v48, %v8214_v62 }
 0xd0b   :  { %v8624_v33 = vadd.f32 %v8623_v63, %v8561_v46  ;;  %v7599_v14 = vadd.f32 %v14562_v29, %v7390_v22  ;;  %v8220_v19 = vadd.f32 %v8219_v34, %v8011_v1  ;;  %v8565_v20 = vmul.f32 %v13160_v55, %v13160_v55  ;;  %v8225_v43 = vpop.f32.mrf.mxu0 }
 0xd0c   :  { %v8492_v59 = vadd.f32 %v8491_v38, %v13142_v21  ;;  %v8014_v40 = vadd.f32 %v8013_v8, %v7805_v35  ;;  %v13175_v18 = vadd.f32 %v8425_v24, %v8217_v50  ;;  %v8566_v48 = vmul.f32 %v13169_v45, %v13169_v45 }
 0xd0d   :  { %v8625_v7 = vadd.f32 %v8624_v33, %v8562_v32  ;;  %v7808_v34 = vadd.f32 %v7807_v47, %v7599_v14 }
 0xd0e   :  { %v8428_v6 = vpop.f32.mrf.mxu1  ;;  %v8493_v51 = vadd.f32 %v8492_v59, %v13152_v12  ;;  %v8223_v26 = vadd.f32 %v8222_v10, %v8014_v40  ;;  %v8567_v24 = vmul.f32 %v13175_v18, %v13175_v18 }
 0xd0f   :  { %v8626_v52 = vadd.f32 %v8625_v7, %v8563_v4  ;;  %v13180_v5 = vadd.f32 %v8428_v6, %v8220_v19  ;;  %v8017_v61 = vadd.f32 %v8016_v25, %v7808_v34  ;;  %v8657_v25 = vld [vmem:[%s13495_s7] sm:$0x1] }
 0xd10   :  { %v8494_v54 = vadd.f32 %v8493_v51, %v13160_v55 }
 0xd11   :  { %v8627_v17 = vadd.f32 %v8626_v52, %v8564_v27  ;;  %v8568_v37 = vmul.f32 %v13180_v5, %v13180_v5  ;;  %v8226_v41 = vadd.f32 %v8225_v43, %v8017_v61 }
 0xd12   :  { %v8495_v53 = vadd.f32 %v8494_v54, %v13169_v45 }
 0xd13   :  { %v8628_v31 = vadd.f32 %v8627_v17, %v8565_v20  ;;  %v8644_v17 = vld [vmem:[%s13494_s6] sm:$0x1]  ;;  %s9162_s6 = smov [#allocation11]  }
 0xd14   :  { %v8496_v46 = vadd.f32 %v8495_v53, %v13175_v18  ;;  %s8990_s7 = sshll.u32 %s9162_s6, 4  ;;  %s8991_s7 = int_to_ptr.vmem [resolvable:$true] %s8990_s7 }
 0xd15   :  { %v8629_v23 = vadd.f32 %v8628_v31, %v8566_v48 }
 0xd16   :  { %v8431_v28 = vpop.f32.mrf.mxu1  ;;  %v8497_v16 = vadd.f32 %v8496_v46, %v13180_v5 }
 0xd17   :  { %v13185_v11 = vadd.f32 %v8431_v28, %v8223_v26  ;;  %v8630_v3 = vadd.f32 %v8629_v23, %v8567_v24  ;;  %v8857_v23 = vld [vmem:[#allocation5 + $0x1f8] sm:$0xff] }
 0xd19   :  { %v8569_v58 = vmul.f32 %v13185_v11, %v13185_v11  ;;  %v8631_v6 = vadd.f32 %v8630_v3, %v8568_v37  ;;  %v8498_v63 = vadd.f32 %v8497_v16, %v13185_v11  ;;  %v14564_v16 = vld [vmem:[#allocation135_spill] sm:$0xff] }
 0xd1b   :  { %v8632_v32 = vadd.f32 %v8631_v6, %v8569_v58 }
 0xd1e   :  { %v8434_v8 = vpop.f32.mrf.mxu1 }
 0xd1f   :  { %v8435_v15 = vadd.f32 %v8434_v8, %v8226_v41  ;;  %v14563_v41 = vld [vmem:[#allocation136_spill] sm:$0xff]  ;;  %v14565_v8 = vld [vmem:[#allocation137_spill] sm:$0xff] }
 0xd21   :  { %v8499_v13 = vadd.f32 %v8498_v63, %v8435_v15  ;;  %v8570_v62 = vmul.f32 %v8435_v15, %v8435_v15  ;;  %v14566_v63 = vld [vmem:[#allocation138_spill] sm:$0xff] }
 0xd23   :  { %v8500_v2 = vrot.slane %v8499_v13, 4  ;;  %v8633_v10 = vadd.f32 %v8632_v32, %v8570_v62  ;;  %v14568_v62 = vld [vmem:[#allocation140_spill] sm:$0xff] }
 0xd25   :  { %v8501_v33 = vadd.f32 %v8500_v2, %v8499_v13  ;;  %v8634_v38 = vrot.slane %v8633_v10, 4 }
 0xd27   :  { %v8502_v4 = vrot.slane %v8501_v33, 2  ;;  %v8635_v42 = vadd.f32 %v8634_v38, %v8633_v10  ;;  %v14569_v10 = vld [vmem:[#allocation141_spill] sm:$0xff]  ;;  %v14570_v38 = vld [vmem:[#allocation142_spill] sm:$0xff] }
 0xd29   :  { %v8503_v49 = vadd.f32 %v8502_v4, %v8501_v33  ;;  %v8636_v22 = vrot.slane %v8635_v42, 2 }
 0xd2b   :  { %v8504_v1 = vrot.slane %v8503_v49, 1  ;;  %v8637_v50 = vadd.f32 %v8636_v22, %v8635_v42  ;;  %v14571_v42 = vld [vmem:[#allocation143_spill] sm:$0xff]  ;;  %v14572_v22 = vld [vmem:[#allocation144_spill] sm:$0xff] }
 0xd2d   :  { %v8505_v35 = vadd.f32 %v8504_v1, %v8503_v49  ;;  %v8638_v7 = vrot.slane %v8637_v50, 1 }
 0xd2f   :  { %v8506_v59 = vmul.f32 0.001953125, %v8505_v35  ;;  %v8639_v27 = vadd.f32 %v8638_v7, %v8637_v50  ;;  %v14573_v50 = vld [vmem:[#allocation69_spill] sm:$0xff] }
 0xd30   :  { %v14574_v7 = vld [vmem:[#allocation17_spill] sm:$0xff] }
 0xd31   :  { %v8640_v29 = vmul.f32 0.001953125, %v8639_v27  ;;  %v8641_v14 = vmul.f32 %v8506_v59, %v8506_v59  ;;  %v14575_v27 = vld [vmem:[#allocation41_spill] sm:$0xff] }
 0xd33   :  { %v8642_v40 = vsub.f32 %v8640_v29, %v8641_v14  ;;  %v14576_v14 = vld [vmem:[#allocation128_spill] sm:$0xff] }
 0xd35   :  { %v8643_v19 = vmax.f32 %v8642_v40, 0.0 }
 0xd37   :  { %v8645_v52 = vadd.f32 1e-05, %v8643_v19  ;;  %v14577_v19 = vld [vmem:[#allocation129_spill] sm:$0xff] }
 0xd39   :  { %9047 = vrsqrt.f32 %v8645_v52  ;;  %vm8652_vm6 = vweird.f32 %v8645_v52 }
 0xd3f   :  { %v9048_v51 = vpop.eup %9047 }
 0xd40   :  { %v8647_v20 = vmul.f32 %v9048_v51, %v8645_v52  ;;  %vm8653_vm5 = vweird.f32 %v9048_v51 }
 0xd41   :  { %vm8654_vm7 = vmor %vm8652_vm6, %vm8653_vm5 }
 0xd42   :  { %v8648_v26 = vmul.f32 %v9048_v51, %v8647_v20 }
 0xd44   :  { %v8649_v28 = vmul.f32 0.5, %v8648_v26  ;;  %v14579_v26 = vld [vmem:[#allocation131_spill] sm:$0xff] }
 0xd46   :  { %v8650_v47 = vsub.f32 1.5, %v8649_v28 }
 0xd48   :  { %v8651_v54 = vmul.f32 %v9048_v51, %v8650_v47  ;;  %v14580_v47 = vld [vmem:[#allocation132_spill] sm:$0xff] }
 0xd4a   :  { %v8655_v48 = vsel %vm8654_vm7, %v9048_v51, %v8651_v54  ;;  %v14578_v51 = vld [vmem:[#allocation130_spill] sm:$0xff]  ;;  %v14581_v54 = vld [vmem:[#allocation133_spill] sm:$0xff] }
 0xd4b   :  { %v8656_v34 = vmul.f32 %v8655_v48, %v8644_v17 }
 0xd4d   :  { %v8658_v31 = vmul.f32 %v8656_v34, %v8506_v59  ;;  %v13200_v53 = vperm.slane %v8656_v34, 0  ;;  %v14582_v34 = vld [vmem:[#allocation134_spill] sm:$0xff] }
 0xd4f   :  { %v8659_v24 = vsub.f32 %v8657_v25, %v8658_v31  ;;  %v8726_v43 = vmul.f32 %v13200_v53, %v8435_v15  ;;  %v8663_v3 = vmul.f32 %v13200_v53, %v14563_v41  ;;  %v8664_v58 = vmul.f32 %v13200_v53, %v14564_v16  ;;  %v14567_v15 = vld [vmem:[#allocation139_spill] sm:$0xff] }
 0xd50   :  { %v8665_v6 = vmul.f32 %v13200_v53, %v14565_v8  ;;  %v8666_v32 = vmul.f32 %v13200_v53, %v14566_v63  ;;  %v8667_v13 = vmul.f32 %v13200_v53, %v14567_v15  ;;  %v8668_v2 = vmul.f32 %v13200_v53, %v14568_v62 }
 0xd51   :  { %v13203_v61 = vperm.slane %v8659_v24, 0  ;;  %v8669_v33 = vmul.f32 %v13200_v53, %v14569_v10  ;;  %v13222_v4 = vmul.f32 %v13200_v53, %v14570_v38  ;;  %v13226_v49 = vmul.f32 %v13200_v53, %v14571_v42  ;;  %v8794_v10 = vld [vmem:[#allocation5] sm:$0xff] }
 0xd52   :  { %v13230_v1 = vmul.f32 %v13200_v53, %v14572_v22  ;;  %v8700_v35 = vmul.f32 %v13200_v53, %v14573_v50  ;;  %v8701_v59 = vmul.f32 %v13200_v53, %v14574_v7  ;;  %v8702_v29 = vmul.f32 %v13200_v53, %v14575_v27  ;;  %v8795_v50 = vld [vmem:[#allocation5 + $0x8] sm:$0xff]  ;;  %v8797_v7 = vld [vmem:[#allocation5 + $0x18] sm:$0xff] }
 0xd53   :  { %v8793_v46 = vadd.f32 %v13203_v61, %v8726_v43  ;;  %v8703_v40 = vmul.f32 %v13200_v53, %v14576_v14  ;;  %v8704_v52 = vmul.f32 %v13200_v53, %v14577_v19  ;;  %v8705_v20 = vmul.f32 %v13200_v53, %v14578_v51 }
 0xd54   :  { %v8706_v28 = vmul.f32 %v13200_v53, %v14579_v26  ;;  %v8707_v17 = vmul.f32 %v13200_v53, %v14580_v47  ;;  %v8708_v48 = vmul.f32 %v13200_v53, %v14581_v54  ;;  %v8709_v25 = vmul.f32 %v13200_v53, %v14582_v34  ;;  %v8799_v26 = vld [vmem:[#allocation5 + $0x28] sm:$0xff] }
 0xd55   :  { %v8921_v37 = vadd.f32 %v8857_v23, %v8793_v46  ;;  %v8710_v31 = vmul.f32 %v13200_v53, %v12651_v44  ;;  %v8711_v24 = vmul.f32 %v13200_v53, %v12688_v9  ;;  %v8712_v43 = vmul.f32 %v13200_v53, %v12723_v30 }
 0xd56   :  { %v8713_v23 = vmul.f32 %v13200_v53, %v12764_v56  ;;  %v8714_v46 = vmul.f32 %v13200_v53, %v12803_v36  ;;  %v8716_v41 = vmul.f32 %v13200_v53, %v13112_v0  ;;  %v8717_v44 = vmul.f32 %v13200_v53, %v13122_v39 }
 0xd57   :  { %8985 = vst [vmem:[#allocation11 + $0x1f8] sm:$0xff] %v8921_v37  ;;  %v8715_v37 = vmul.f32 %v13200_v53, %v12842_v57  ;;  %v8718_v9 = vmul.f32 %v13200_v53, %v13132_v60  ;;  %v8719_v30 = vmul.f32 %v13200_v53, %v13142_v21  ;;  %v8720_v56 = vmul.f32 %v13200_v53, %v13152_v12 }
 0xd58   :  { %v8721_v36 = vmul.f32 %v13200_v53, %v13160_v55  ;;  %v8722_v57 = vmul.f32 %v13200_v53, %v13169_v45  ;;  %v8723_v0 = vmul.f32 %v13200_v53, %v13175_v18  ;;  %v8724_v39 = vmul.f32 %v13200_v53, %v13180_v5 }
 0xd59   :  { %v8725_v60 = vmul.f32 %v13200_v53, %v13185_v11  ;;  %v8730_v21 = vadd.f32 %v13203_v61, %v8663_v3  ;;  %v8731_v16 = vadd.f32 %v13203_v61, %v8664_v58  ;;  %v8732_v12 = vadd.f32 %v13203_v61, %v8665_v6 }
 0xd5a   :  { %v8733_v55 = vadd.f32 %v13203_v61, %v8666_v32  ;;  %v8734_v8 = vadd.f32 %v13203_v61, %v8667_v13  ;;  %v8735_v45 = vadd.f32 %v13203_v61, %v8668_v2  ;;  %v8736_v18 = vadd.f32 %v13203_v61, %v8669_v33 }
 0xd5b   :  { %v13292_v63 = vadd.f32 %v13203_v61, %v8700_v35  ;;  %v13295_v5 = vadd.f32 %v13203_v61, %v8701_v59  ;;  %v13298_v11 = vadd.f32 %v13203_v61, %v8702_v29  ;;  %v13301_v3 = vadd.f32 %v13203_v61, %v8703_v40  ;;  %v8796_v35 = vld [vmem:[#allocation5 + $0x10] sm:$0xff]  ;;  %v8798_v40 = vld [vmem:[#allocation5 + $0x20] sm:$0xff] }
 0xd5c   :  { %v13304_v58 = vadd.f32 %v13203_v61, %v8704_v52  ;;  %v13307_v6 = vadd.f32 %v13203_v61, %v8705_v20  ;;  %v13310_v32 = vadd.f32 %v13203_v61, %v8706_v28  ;;  %v13313_v15 = vadd.f32 %v13203_v61, %v8707_v17 }
 0xd5d   :  { %v13316_v13 = vadd.f32 %v13203_v61, %v8708_v48  ;;  %v13319_v62 = vadd.f32 %v13203_v61, %v8709_v25  ;;  %v13322_v2 = vadd.f32 %v13203_v61, %v8710_v31  ;;  %v13325_v33 = vadd.f32 %v13203_v61, %v8711_v24  ;;  %v8800_v48 = vld [vmem:[#allocation5 + $0x30] sm:$0xff] }
 0xd5e   :  { %v13328_v38 = vadd.f32 %v13203_v61, %v8712_v43  ;;  %v13331_v42 = vadd.f32 %v13203_v61, %v8713_v23  ;;  %v13334_v22 = vadd.f32 %v13203_v61, %v8714_v46  ;;  %v13337_v59 = vadd.f32 %v13203_v61, %v8715_v37  ;;  %v8801_v43 = vld [vmem:[#allocation5 + $0x38] sm:$0xff]  ;;  %v14583_v23 = vld [vmem:[#allocation145_spill] sm:$0xff] }
 0xd5f   :  { %v13340_v27 = vadd.f32 %v13203_v61, %v8716_v41  ;;  %v13343_v29 = vadd.f32 %v13203_v61, %v8717_v44  ;;  %v13346_v14 = vadd.f32 %v13203_v61, %v8718_v9  ;;  %v13349_v19 = vadd.f32 %v13203_v61, %v8719_v30  ;;  %v8802_v44 = vld [vmem:[#allocation5 + $0x40] sm:$0xff]  ;;  %v14584_v9 = vld [vmem:[#allocation146_spill] sm:$0xff] }
 0xd60   :  { %v13352_v52 = vadd.f32 %v13203_v61, %v8720_v56  ;;  %v13355_v51 = vadd.f32 %v13203_v61, %v8721_v36  ;;  %v13358_v20 = vadd.f32 %v13203_v61, %v8722_v57  ;;  %v13361_v28 = vadd.f32 %v13203_v61, %v8723_v0  ;;  %v8803_v36 = vld [vmem:[#allocation5 + $0x48] sm:$0xff]  ;;  %v14585_v57 = vld [vmem:[#allocation147_spill] sm:$0xff] }
 0xd61   :  { %v13364_v47 = vadd.f32 %v13203_v61, %v8724_v39  ;;  %v13367_v17 = vadd.f32 %v13203_v61, %v8725_v60  ;;  %v8858_v54 = vadd.f32 %v8794_v10, %v8730_v21  ;;  %v8737_v34 = vadd.f32 %v13203_v61, %v13222_v4  ;;  %v14586_v21 = vld [vmem:[#allocation51_spill] sm:$0xff] }
 0xd62   :  { %v8859_v25 = vadd.f32 %v8795_v50, %v8731_v16  ;;  %v8860_v31 = vadd.f32 %v8796_v35, %v8732_v12  ;;  %v8861_v24 = vadd.f32 %v8797_v7, %v8733_v55  ;;  %v8673_v46 = vmul.f32 %v13200_v53, %v14583_v23  ;;  %v8806_v35 = vld [vmem:[#allocation5 + $0x60] sm:$0xff] }
 0xd63   :  { %v8738_v37 = vadd.f32 %v13203_v61, %v13226_v49  ;;  %v8862_v41 = vadd.f32 %v8798_v40, %v8734_v8  ;;  %8922 = vst [vmem:[#allocation11] sm:$0xff] %v8858_v54  ;;  %v8674_v30 = vmul.f32 %v13200_v53, %v14584_v9  ;;  %v8739_v56 = vadd.f32 %v13203_v61, %v13230_v1  ;;  %v8804_v49 = vld [vmem:[#allocation5 + $0x50] sm:$0xff]  ;;  %v8805_v8 = vld [vmem:[#allocation5 + $0x58] sm:$0xff]  ;;  %v14587_v1 = vld [vmem:[#allocation103_spill] sm:$0xff] }
 0xd64   :  { %v8863_v4 = vadd.f32 %v8799_v26, %v8735_v45  ;;  %8923 = vst [vmem:[#allocation11 + $0x8] sm:$0xff] %v8859_v25  ;;  %v8675_v0 = vmul.f32 %v13200_v53, %v14585_v57  ;;  %v8740_v39 = vadd.f32 %v13203_v61, %v8673_v46  ;;  %v8864_v60 = vadd.f32 %v8800_v48, %v8736_v18  ;;  %v14588_v7 = vld [vmem:[#allocation67_spill] sm:$0xff]  ;;  %v8807_v54 = vld [vmem:[#allocation5 + $0x68] sm:$0xff] }
 0xd65   :  { %8924 = vst [vmem:[#allocation11 + $0x10] sm:$0xff] %v8860_v31  ;;  %v8676_v16 = vmul.f32 %v13200_v53, %v14586_v21  ;;  %v8741_v12 = vadd.f32 %v13203_v61, %v8674_v30  ;;  %v8865_v55 = vadd.f32 %v8801_v43, %v8737_v34  ;;  %v8677_v45 = vmul.f32 %v13200_v53, %v14587_v1  ;;  %v14589_v48 = vld [vmem:[#allocation72_spill] sm:$0xff]  ;;  %v14590_v43 = vld [vmem:[#allocation66_spill] sm:$0xff] }
 0xd66   :  { %8925 = vst [vmem:[#allocation11 + $0x18] sm:$0xff] %v8861_v24  ;;  %v8742_v10 = vadd.f32 %v13203_v61, %v8675_v0  ;;  %v8866_v50 = vadd.f32 %v8802_v44, %v8738_v37  ;;  %v8678_v18 = vmul.f32 %v13200_v53, %v14588_v7  ;;  %v8867_v26 = vadd.f32 %v8803_v36, %v8739_v56  ;;  %v8808_v24 = vld [vmem:[#allocation5 + $0x70] sm:$0xff]  ;;  %v14591_v44 = vld [vmem:[#allocation70_spill] sm:$0xff]  ;;  %v14592_v36 = vld [vmem:[#allocation76_spill] sm:$0xff] }
 0xd67   :  { %8926 = vst [vmem:[#allocation11 + $0x20] sm:$0xff] %v8862_v41  ;;  %v8743_v40 = vadd.f32 %v13203_v61, %v8676_v16  ;;  %v8679_v34 = vmul.f32 %v13200_v53, %v14589_v48  ;;  %v8744_v25 = vadd.f32 %v13203_v61, %v8677_v45  ;;  %v8868_v31 = vadd.f32 %v8804_v49, %v8740_v39  ;;  %v8809_v41 = vld [vmem:[#allocation5 + $0x78] sm:$0xff]  ;;  %v14593_v49 = vld [vmem:[#allocation81_spill] sm:$0xff] }
 0xd68   :  { %8927 = vst [vmem:[#allocation11 + $0x28] sm:$0xff] %v8863_v4  ;;  %v8680_v23 = vmul.f32 %v13200_v53, %v14590_v43  ;;  %v8745_v46 = vadd.f32 %v13203_v61, %v8678_v18  ;;  %v8869_v37 = vadd.f32 %v8805_v8, %v8741_v12  ;;  %v8681_v9 = vmul.f32 %v13200_v53, %v14591_v44  ;;  %v8810_v4 = vld [vmem:[#allocation5 + $0x80] sm:$0xff]  ;;  %v14594_v8 = vld [vmem:[#allocation74_spill] sm:$0xff] }
 0xd69   :  { %8928 = vst [vmem:[#allocation11 + $0x30] sm:$0xff] %v8864_v60  ;;  %v8746_v30 = vadd.f32 %v13203_v61, %v8679_v34  ;;  %v8870_v56 = vadd.f32 %v8806_v35, %v8742_v10  ;;  %v8682_v57 = vmul.f32 %v13200_v53, %v14592_v36  ;;  %v8871_v39 = vadd.f32 %v8807_v54, %v8743_v40  ;;  %v8811_v60 = vld [vmem:[#allocation5 + $0x88] sm:$0xff]  ;;  %v14595_v35 = vld [vmem:[#allocation78_spill] sm:$0xff]  ;;  %v14596_v54 = vld [vmem:[#allocation75_spill] sm:$0xff] }
 0xd6a   :  { %8929 = vst [vmem:[#allocation11 + $0x38] sm:$0xff] %v8865_v55  ;;  %v8747_v0 = vadd.f32 %v13203_v61, %v8680_v23  ;;  %v8683_v21 = vmul.f32 %v13200_v53, %v14593_v49  ;;  %v8748_v16 = vadd.f32 %v13203_v61, %v8681_v9  ;;  %v8872_v12 = vadd.f32 %v8808_v24, %v8744_v25  ;;  %v8812_v55 = vld [vmem:[#allocation5 + $0x90] sm:$0xff] }
 0xd6b   :  { %8930 = vst [vmem:[#allocation11 + $0x40] sm:$0xff] %v8866_v50  ;;  %v8684_v1 = vmul.f32 %v13200_v53, %v14594_v8  ;;  %v8749_v45 = vadd.f32 %v13203_v61, %v8682_v57  ;;  %v8873_v10 = vadd.f32 %v8809_v41, %v8745_v46  ;;  %v8813_v50 = vld [vmem:[#allocation5 + $0x98] sm:$0xff]  ;;  %v8685_v7 = vmul.f32 %v13200_v53, %v14595_v35  ;;  %v14597_v24 = vld [vmem:[#allocation93_spill] sm:$0xff] }
 0xd6c   :  { %8931 = vst [vmem:[#allocation11 + $0x48] sm:$0xff] %v8867_v26  ;;  %v8750_v18 = vadd.f32 %v13203_v61, %v8683_v21  ;;  %v8874_v40 = vadd.f32 %v8810_v4, %v8746_v30  ;;  %v8814_v26 = vld [vmem:[#allocation5 + $0xa0] sm:$0xff]  ;;  %v8686_v48 = vmul.f32 %v13200_v53, %v14596_v54  ;;  %v8875_v25 = vadd.f32 %v8811_v60, %v8747_v0  ;;  %v14598_v41 = vld [vmem:[#allocation77_spill] sm:$0xff] }
 0xd6d   :  { %8932 = vst [vmem:[#allocation11 + $0x50] sm:$0xff] %v8868_v31  ;;  %v8751_v34 = vadd.f32 %v13203_v61, %v8684_v1  ;;  %v8815_v31 = vld [vmem:[#allocation5 + $0xa8] sm:$0xff]  ;;  %v8687_v43 = vmul.f32 %v13200_v53, %v14597_v24  ;;  %v8752_v23 = vadd.f32 %v13203_v61, %v8685_v7  ;;  %v8876_v46 = vadd.f32 %v8812_v55, %v8748_v16  ;;  %v14599_v4 = vld [vmem:[#allocation79_spill] sm:$0xff]  ;;  %v14600_v60 = vld [vmem:[#allocation109_spill] sm:$0xff] }
 0xd6e   :  { %8933 = vst [vmem:[#allocation11 + $0x58] sm:$0xff] %v8869_v37  ;;  %v8816_v37 = vld [vmem:[#allocation5 + $0xb0] sm:$0xff]  ;;  %v8688_v44 = vmul.f32 %v13200_v53, %v14598_v41  ;;  %v8753_v9 = vadd.f32 %v13203_v61, %v8686_v48  ;;  %v8877_v30 = vadd.f32 %v8813_v50, %v8749_v45  ;;  %v8689_v36 = vmul.f32 %v13200_v53, %v14599_v4  ;;  %v14601_v55 = vld [vmem:[#allocation39_spill] sm:$0xff]  ;;  %v14602_v50 = vld [vmem:[#allocation34_spill] sm:$0xff] }
 0xd6f   :  { %8934 = vst [vmem:[#allocation11 + $0x60] sm:$0xff] %v8870_v56  ;;  %v8817_v56 = vld [vmem:[#allocation5 + $0xb8] sm:$0xff]  ;;  %v8754_v57 = vadd.f32 %v13203_v61, %v8687_v43  ;;  %v8878_v0 = vadd.f32 %v8814_v26, %v8750_v18  ;;  %v8690_v49 = vmul.f32 %v13200_v53, %v14600_v60  ;;  %v8879_v16 = vadd.f32 %v8815_v31, %v8751_v34  ;;  %v14603_v26 = vld [vmem:[#allocation21_spill] sm:$0xff]  ;;  %v14604_v31 = vld [vmem:[#allocation80_spill] sm:$0xff] }
 0xd70   :  { %8935 = vst [vmem:[#allocation11 + $0x68] sm:$0xff] %v8871_v39  ;;  %v8818_v39 = vld [vmem:[#allocation5 + $0xc0] sm:$0xff]  ;;  %v8755_v21 = vadd.f32 %v13203_v61, %v8688_v44  ;;  %v8691_v8 = vmul.f32 %v13200_v53, %v14601_v55  ;;  %v8756_v1 = vadd.f32 %v13203_v61, %v8689_v36  ;;  %v8880_v45 = vadd.f32 %v8816_v37, %v8752_v23  ;;  %v14605_v37 = vld [vmem:[#allocation48_spill] sm:$0xff] }
 0xd71   :  { %8936 = vst [vmem:[#allocation11 + $0x70] sm:$0xff] %v8872_v12  ;;  %v8819_v12 = vld [vmem:[#allocation5 + $0xc8] sm:$0xff]  ;;  %v8692_v35 = vmul.f32 %v13200_v53, %v14602_v50  ;;  %v8757_v7 = vadd.f32 %v13203_v61, %v8690_v49  ;;  %v8881_v18 = vadd.f32 %v8817_v56, %v8753_v9  ;;  %v8693_v54 = vmul.f32 %v13200_v53, %v14603_v26  ;;  %v14606_v56 = vld [vmem:[#allocation83_spill] sm:$0xff] }
 0xd72   :  { %8937 = vst [vmem:[#allocation11 + $0x78] sm:$0xff] %v8873_v10  ;;  %v8820_v10 = vld [vmem:[#allocation5 + $0xd0] sm:$0xff]  ;;  %v8758_v48 = vadd.f32 %v13203_v61, %v8691_v8  ;;  %v8882_v34 = vadd.f32 %v8818_v39, %v8754_v57  ;;  %v8694_v24 = vmul.f32 %v13200_v53, %v14604_v31  ;;  %v8883_v23 = vadd.f32 %v8819_v12, %v8755_v21  ;;  %v14608_v12 = vld [vmem:[#allocation36_spill] sm:$0xff] }
 0xd73   :  { %8938 = vst [vmem:[#allocation11 + $0x80] sm:$0xff] %v8874_v40  ;;  %v8821_v40 = vld [vmem:[#allocation5 + $0xd8] sm:$0xff]  ;;  %v8759_v43 = vadd.f32 %v13203_v61, %v8692_v35  ;;  %v8695_v41 = vmul.f32 %v13200_v53, %v14605_v37  ;;  %v8760_v44 = vadd.f32 %v13203_v61, %v8693_v54  ;;  %v8884_v9 = vadd.f32 %v8820_v10, %v8756_v1  ;;  %v14607_v39 = vld [vmem:[#allocation45_spill] sm:$0xff] }
 0xd74   :  { %8939 = vst [vmem:[#allocation11 + $0x88] sm:$0xff] %v8875_v25  ;;  %v8822_v25 = vld [vmem:[#allocation5 + $0xe0] sm:$0xff]  ;;  %v8696_v4 = vmul.f32 %v13200_v53, %v14606_v56  ;;  %v8761_v36 = vadd.f32 %v13203_v61, %v8694_v24  ;;  %v8885_v57 = vadd.f32 %v8821_v40, %v8757_v7  ;;  %v8697_v60 = vmul.f32 %v13200_v53, %v14607_v39  ;;  %v14609_v10 = vld [vmem:[#allocation22_spill] sm:$0xff]  ;;  %v8831_v24 = vld [vmem:[#allocation5 + $0x128] sm:$0xff] }
 0xd75   :  { %8940 = vst [vmem:[#allocation11 + $0x90] sm:$0xff] %v8876_v46  ;;  %v8823_v46 = vld [vmem:[#allocation5 + $0xe8] sm:$0xff]  ;;  %v8762_v49 = vadd.f32 %v13203_v61, %v8695_v41  ;;  %v8886_v21 = vadd.f32 %v8822_v25, %v8758_v48  ;;  %v8698_v55 = vmul.f32 %v13200_v53, %v14608_v12  ;;  %v8699_v50 = vmul.f32 %v13200_v53, %v14609_v10  ;;  %v8829_v54 = vld [vmem:[#allocation5 + $0x118] sm:$0xff]  ;;  %v8830_v25 = vld [vmem:[#allocation5 + $0x120] sm:$0xff] }
 0xd76   :  { %8941 = vst [vmem:[#allocation11 + $0x98] sm:$0xff] %v8877_v30  ;;  %v8824_v30 = vld [vmem:[#allocation5 + $0xf0] sm:$0xff]  ;;  %v8763_v8 = vadd.f32 %v13203_v61, %v8696_v4  ;;  %v8887_v1 = vadd.f32 %v8823_v46, %v8759_v43  ;;  %v8764_v35 = vadd.f32 %v13203_v61, %v8697_v60  ;;  %v8833_v46 = vld [vmem:[#allocation5 + $0x138] sm:$0xff]  ;;  %v8834_v41 = vld [vmem:[#allocation5 + $0x140] sm:$0xff] }
 0xd77   :  { %8942 = vst [vmem:[#allocation11 + $0xa0] sm:$0xff] %v8878_v0  ;;  %v8825_v0 = vld [vmem:[#allocation5 + $0xf8] sm:$0xff]  ;;  %v8888_v7 = vadd.f32 %v8824_v30, %v8760_v44  ;;  %v8765_v40 = vadd.f32 %v13203_v61, %v8698_v55  ;;  %v8766_v48 = vadd.f32 %v13203_v61, %v8699_v50  ;;  %v8832_v53 = vld [vmem:[#allocation5 + $0x130] sm:$0xff]  ;;  %v8895_v44 = vadd.f32 %v8831_v24, %v13292_v63  ;;  %v8839_v39 = vld [vmem:[#allocation5 + $0x168] sm:$0xff] }
 0xd78   :  { %8943 = vst [vmem:[#allocation11 + $0xa8] sm:$0xff] %v8879_v16  ;;  %v8826_v16 = vld [vmem:[#allocation5 + $0x100] sm:$0xff]  ;;  %v8889_v26 = vadd.f32 %v8825_v0, %v8761_v36  ;;  %v8896_v61 = vadd.f32 %v8832_v53, %v13295_v5  ;;  %v8836_v30 = vld [vmem:[#allocation5 + $0x150] sm:$0xff]  ;;  %v8897_v56 = vadd.f32 %v8833_v46, %v13298_v11  ;;  %v8837_v4 = vld [vmem:[#allocation5 + $0x158] sm:$0xff]  ;;  %v8898_v36 = vadd.f32 %v8834_v41, %v13301_v3 }
 0xd79   :  { %8944 = vst [vmem:[#allocation11 + $0xb0] sm:$0xff] %v8880_v45  ;;  %v8827_v45 = vld [vmem:[#allocation5 + $0x108] sm:$0xff]  ;;  %v8894_v37 = vadd.f32 %v8830_v25, %v8766_v48  ;;  %v8900_v63 = vadd.f32 %v8836_v30, %v13307_v6  ;;  %v8840_v60 = vld [vmem:[#allocation5 + $0x170] sm:$0xff]  ;;  %v8901_v5 = vadd.f32 %v8837_v4, %v13310_v32  ;;  %v8903_v3 = vadd.f32 %v8839_v39, %v13316_v13  ;;  %v8845_v55 = vld [vmem:[#allocation5 + $0x198] sm:$0xff] }
 0xd7a   :  { %8945 = vst [vmem:[#allocation11 + $0xb8] sm:$0xff] %v8881_v18  ;;  %v8828_v18 = vld [vmem:[#allocation5 + $0x110] sm:$0xff]  ;;  %v8891_v31 = vadd.f32 %v8827_v45, %v8763_v8  ;;  %v8846_v8 = vld [vmem:[#allocation5 + $0x1a0] sm:$0xff]  ;;  %v8849_v10 = vld [vmem:[#allocation5 + $0x1b8] sm:$0xff] }
 0xd7b   :  { %8946 = vst [vmem:[#allocation11 + $0xc0] sm:$0xff] %v8882_v34  ;;  %v8890_v34 = vadd.f32 %v8826_v16, %v8762_v49  ;;  %v8892_v43 = vadd.f32 %v8828_v18, %v8764_v35  ;;  %v8841_v49 = vld [vmem:[#allocation5 + $0x178] sm:$0xff]  ;;  %v8843_v16 = vld [vmem:[#allocation5 + $0x188] sm:$0xff]  ;;  %v8844_v12 = vld [vmem:[#allocation5 + $0x190] sm:$0xff] }
 0xd7c   :  { %8947 = vst [vmem:[#allocation11 + $0xc8] sm:$0xff] %v8883_v23  ;;  %v8893_v23 = vadd.f32 %v8829_v54, %v8765_v40  ;;  %v8905_v6 = vadd.f32 %v8841_v49, %v13322_v2  ;;  %v8908_v13 = vadd.f32 %v8844_v12, %v13331_v42  ;;  %v8848_v45 = vld [vmem:[#allocation5 + $0x1b0] sm:$0xff]  ;;  %v8910_v2 = vadd.f32 %v8846_v8, %v13337_v59  ;;  %v8850_v50 = vld [vmem:[#allocation5 + $0x1c0] sm:$0xff]  ;;  %v8851_v35 = vld [vmem:[#allocation5 + $0x1c8] sm:$0xff] }
 0xd7d   :  { %8948 = vst [vmem:[#allocation11 + $0xd0] sm:$0xff] %v8884_v9  ;;  %v8835_v9 = vld [vmem:[#allocation5 + $0x148] sm:$0xff]  ;;  %v8913_v42 = vadd.f32 %v8849_v10, %v13346_v14  ;;  %v8853_v18 = vld [vmem:[#allocation5 + $0x1d8] sm:$0xff]  ;;  %v8854_v40 = vld [vmem:[#allocation5 + $0x1e0] sm:$0xff]  ;;  %v8915_v59 = vadd.f32 %v8851_v35, %v13352_v52 }
 0xd7e   :  { %8949 = vst [vmem:[#allocation11 + $0xd8] sm:$0xff] %v8885_v57  ;;  %v8838_v57 = vld [vmem:[#allocation5 + $0x160] sm:$0xff]  ;;  %v8899_v0 = vadd.f32 %v8835_v9, %v13304_v58  ;;  %v8904_v58 = vadd.f32 %v8840_v60, %v13319_v62  ;;  %v8909_v62 = vadd.f32 %v8845_v55, %v13334_v22  ;;  %v8914_v22 = vadd.f32 %v8850_v50, %v13349_v19  ;;  %v8856_v54 = vld [vmem:[#allocation5 + $0x1f0] sm:$0xff] }
 0xd7f   :  { %8950 = vst [vmem:[#allocation11 + $0xe0] sm:$0xff] %v8886_v21  ;;  %v8902_v11 = vadd.f32 %v8838_v57, %v13313_v15  ;;  %v8842_v21 = vld [vmem:[#allocation5 + $0x180] sm:$0xff]  ;;  %v8907_v15 = vadd.f32 %v8843_v16, %v13328_v38  ;;  %v8912_v38 = vadd.f32 %v8848_v45, %v13343_v29  ;;  %v8917_v29 = vadd.f32 %v8853_v18, %v13358_v20 }
 0xd80   :  { %8951 = vst [vmem:[#allocation11 + $0xe8] sm:$0xff] %v8887_v1  ;;  %v8906_v32 = vadd.f32 %v8842_v21, %v13325_v33  ;;  %v8847_v1 = vld [vmem:[#allocation5 + $0x1a8] sm:$0xff]  ;;  %v8918_v48 = vadd.f32 %v8854_v40, %v13361_v28  ;;  %v8920_v19 = vadd.f32 %v8856_v54, %v13367_v17 }
 0xd81   :  { %8952 = vst [vmem:[#allocation11 + $0xf0] sm:$0xff] %v8888_v7  ;;  %v8911_v33 = vadd.f32 %v8847_v1, %v13340_v27  ;;  %v8852_v7 = vld [vmem:[#allocation5 + $0x1d0] sm:$0xff] }
 0xd82   :  { %8953 = vst [vmem:[#allocation11 + $0xf8] sm:$0xff] %v8889_v26  ;;  %v8855_v26 = vld [vmem:[#allocation5 + $0x1e8] sm:$0xff]  ;;  %v8916_v27 = vadd.f32 %v8852_v7, %v13355_v51 }
 0xd83   :  { %8954 = vst [vmem:[#allocation11 + $0x100] sm:$0xff] %v8890_v34  ;;  %v8919_v14 = vadd.f32 %v8855_v26, %v13364_v47 }
 0xd84   :  { %8955 = vst [vmem:[#allocation11 + $0x108] sm:$0xff] %v8891_v31 }
 0xd85   :  { %8956 = vst [vmem:[#allocation11 + $0x110] sm:$0xff] %v8892_v43 }
 0xd86   :  { %8957 = vst [vmem:[#allocation11 + $0x118] sm:$0xff] %v8893_v23 }
 0xd87   :  { %8958 = vst [vmem:[#allocation11 + $0x120] sm:$0xff] %v8894_v37 }
 0xd88   :  { %8959 = vst [vmem:[#allocation11 + $0x128] sm:$0xff] %v8895_v44 }
 0xd89   :  { %8960 = vst [vmem:[#allocation11 + $0x130] sm:$0xff] %v8896_v61 }
 0xd8a   :  { %8961 = vst [vmem:[#allocation11 + $0x138] sm:$0xff] %v8897_v56 }
 0xd8b   :  { %8962 = vst [vmem:[#allocation11 + $0x140] sm:$0xff] %v8898_v36 }
 0xd8c   :  { %8963 = vst [vmem:[#allocation11 + $0x148] sm:$0xff] %v8899_v0 }
 0xd8d   :  { %8964 = vst [vmem:[#allocation11 + $0x150] sm:$0xff] %v8900_v63 }
 0xd8e   :  { %8965 = vst [vmem:[#allocation11 + $0x158] sm:$0xff] %v8901_v5 }
 0xd8f   :  { %8966 = vst [vmem:[#allocation11 + $0x160] sm:$0xff] %v8902_v11 }
 0xd90   :  { %8967 = vst [vmem:[#allocation11 + $0x168] sm:$0xff] %v8903_v3 }
 0xd91   :  { %8968 = vst [vmem:[#allocation11 + $0x170] sm:$0xff] %v8904_v58 }
 0xd92   :  { %8969 = vst [vmem:[#allocation11 + $0x178] sm:$0xff] %v8905_v6 }
 0xd93   :  { %8970 = vst [vmem:[#allocation11 + $0x180] sm:$0xff] %v8906_v32 }
 0xd94   :  { %8971 = vst [vmem:[#allocation11 + $0x188] sm:$0xff] %v8907_v15 }
 0xd95   :  { %8972 = vst [vmem:[#allocation11 + $0x190] sm:$0xff] %v8908_v13 }
 0xd96   :  { %8973 = vst [vmem:[#allocation11 + $0x198] sm:$0xff] %v8909_v62 }
 0xd97   :  { %8974 = vst [vmem:[#allocation11 + $0x1a0] sm:$0xff] %v8910_v2 }
 0xd98   :  { %8975 = vst [vmem:[#allocation11 + $0x1a8] sm:$0xff] %v8911_v33 }
 0xd99   :  { %8976 = vst [vmem:[#allocation11 + $0x1b0] sm:$0xff] %v8912_v38 }
 0xd9a   :  { %8977 = vst [vmem:[#allocation11 + $0x1b8] sm:$0xff] %v8913_v42 }
 0xd9b   :  { %8978 = vst [vmem:[#allocation11 + $0x1c0] sm:$0xff] %v8914_v22 }
 0xd9c   :  { %8979 = vst [vmem:[#allocation11 + $0x1c8] sm:$0xff] %v8915_v59 }
 0xd9d   :  { %8980 = vst [vmem:[#allocation11 + $0x1d0] sm:$0xff] %v8916_v27 }
 0xd9e   :  { %8981 = vst [vmem:[#allocation11 + $0x1d8] sm:$0xff] %v8917_v29 }
 0xd9f   :  { %8982 = vst [vmem:[#allocation11 + $0x1e0] sm:$0xff] %v8918_v48 }
 0xda0   :  { %8983 = vst [vmem:[#allocation11 + $0x1e8] sm:$0xff] %v8919_v14 }
 0xda1   :  { %8984 = vst [vmem:[#allocation11 + $0x1f0] sm:$0xff] %v8920_v19 }
 0xda2   :  { %8998 = dma.vmem_to_hbm [thread:$0]  %s8991_s7, 8192, %s8993_s28, [#allocation7], %s9157_s13, %s9157_s13, %s9158_s14  }
 0xda3   :  { %9154 = dma.done.wait [#allocation7], 8192  }
 0xda4   :  { %9155 = vsyncadd [#allocation7], 4294959104 }
 0xda5   :  { %9003 = vsyncpa [#allocation6], 1 }
 0xda6   :  { %9004 = vsyncpa [#allocation9], 1 }
 0xda7   :  { %9005 = vsyncpa [#allocation7], 1 }

</bundles_post_ra>
